<compile_context>
chip_gen: v7x
topology: tpu7x:2x2x1
jax: 0.10.0
libtpu: 0.0.40
codegen_flags: <defaults>
</compile_context>

<pallas_src>
import numpy as np
import jax
import jax.numpy as jnp
from jax.experimental import pallas as pl
from jax.experimental.pallas import tpu as pltpu

FEATURES = 4   # channel dim of the fused feature maps
HIDDEN = 64    # inner channel dim of ResidualConvUnit (hard-coded 64 in the module)


# ---------------------------------------------------------------------------
# host-side constants
# ---------------------------------------------------------------------------
def _interp_matrix(n_out, n_in):
    """Bilinear interpolation matrix, align_corners=True (PyTorch semantics)."""
    if n_out == 1:
        m = np.zeros((1, n_in), np.float32)
        m[0, 0] = 1.0
        return m
    src = np.arange(n_out, dtype=np.float64) * (n_in - 1) / (n_out - 1)
    i0 = np.clip(np.floor(src).astype(np.int64), 0, n_in - 1)
    i1 = np.clip(i0 + 1, 0, n_in - 1)
    w1 = (src - i0).astype(np.float32)
    w0 = 1.0 - w1
    m = np.zeros((n_out, n_in), np.float32)
    np.add.at(m, (np.arange(n_out), i0), w0)
    np.add.at(m, (np.arange(n_out), i1), w1)
    return m


def _border_masks(H, W, B):
    """(4, B*H*W) f32 border masks, tiled per image over the folded batch-lane axis.

    row 0: source-column mask for dx=+1 taps  (valid where col >= 1)
    row 1: source-column mask for dx=-1 taps  (valid where col <= W-2)
    row 2: dest-row    mask for dy=-1 taps    (valid where row >= 1)
    row 3: dest-row    mask for dy=+1 taps    (valid where row <= H-2)
    Together they zero every tap that the circular roll wraps across a row, image or
    batch boundary, which is what makes the roll-based 3x3 conv equal to zero padding.
    """
    lin = np.arange(H * W)
    col = lin % W
    row = lin // W
    m = np.stack([col >= 1, col <= W - 2, row >= 1, row <= H - 2]).astype(np.float32)
    return jnp.asarray(np.tile(m, (1, B)))                     # (4, B*H*W)


def _pack_params(params):
    """PyTorch-shaped conv params -> a few packed, sublane-aligned kernel operands."""
    hd = HIDDEN
    r1, r2 = params["rcu1"], params["rcu2"]

    def pad8(a):                               # pad rows up to a multiple of 8
        pad = (-a.shape[0]) % 8
        return jnp.pad(a, ((0, pad), (0, 0)))

    def w2_taps(w2):                           # (Hd,Hd,3,3) -> (9*Hd, Hd), tap-major rows
        return jnp.transpose(w2, (2, 3, 0, 1)).reshape(9 * hd, hd)

    wsm = params["smooth_w"][:, :, 0, 0]                                   # (C, C)
    w1p = jnp.concatenate([r1["w1"][:, :, 0, 0], r2["w1"][:, :, 0, 0]], 0)  # (2*Hd, C)
    w3p = jnp.concatenate([pad8(r1["w3"][:, :, 0, 0]),
                           pad8(r2["w3"][:, :, 0, 0])], 0)                  # (16, Hd)
    w2p = jnp.concatenate([w2_taps(r1["w2"]), w2_taps(r2["w2"])], 0)        # (18*Hd, Hd)
    biasp = jnp.concatenate([
        r1["b1"][:, None], r1["b2"][:, None],            # rows [0:64), [64:128)
        r2["b1"][:, None], r2["b2"][:, None],            # rows [128:192), [192:256)
        pad8(r1["b3"][:, None]),                         # rows [256:260)
        pad8(r2["b3"][:, None]),                         # rows [264:268)
        pad8(params["smooth_b"][:, None]),               # rows [272:276)
    ], 0)                                                                   # (280, 1)
    return wsm, w1p, w3p, w2p, biasp


# ---------------------------------------------------------------------------
# fused Pallas kernel (single grid-free invocation, channels-major, batch on lanes)
# ---------------------------------------------------------------------------
def _make_fusion_kernel(H, W, B, C):
    HW = H * W
    N = B * HW
    Hd = HIDDEN

    def kernel(x0_ref, x1_ref, ut_ref, masks_ref, wsm_ref, w1p_ref, w3p_ref,
               w2p_ref, bias_ref, o_ref):
        # hoisted sublane broadcasts of the 4 border masks (reused by both RCUs)
        m_col_ge1 = jnp.broadcast_to(masks_ref[0:1, :], (Hd, N))   # dx=+1 source mask
        m_col_le = jnp.broadcast_to(masks_ref[1:2, :], (Hd, N))    # dx=-1 source mask
        m_row_ge1 = jnp.broadcast_to(masks_ref[2:3, :], (Hd, N))   # dy=-1 dest mask
        m_row_le = jnp.broadcast_to(masks_ref[3:4, :], (Hd, N))    # dy=+1 dest mask

        def rcu(x, w1, w3, w2_base, b1, b2, b3):
            # ResidualConvUnit (bn=False, ReLU).  x: (C, N) channels-major.
            a = jnp.maximum(x, 0.0)
            h = jnp.maximum(
                jnp.dot(w1, a, preferred_element_type=jnp.float32) + b1, 0.0)  # (Hd, N)
            # column-pre-masked (source-side) copies of h; wrapped taps are zeroed.
            h_dx = {-1: h * m_col_le, 0: h, 1: h * m_col_ge1}
            acc = None
            for dy in (-1, 0, 1):
                part = None
                for dx in (-1, 0, 1):
                    k = (dy + 1) * 3 + (dx + 1)
                    shift = (-(dy * W + dx)) % N           # np.roll convention
                    src = h_dx[dx]
                    rolled = src if shift == 0 else pltpu.roll(src, shift, axis=1)
                    w2k = w2p_ref[w2_base + k * Hd:w2_base + (k + 1) * Hd, :]
                    c = jnp.dot(w2k, rolled, preferred_element_type=jnp.float32)
                    part = c if part is None else part + c
                if dy == -1:
                    part = part * m_row_ge1
                elif dy == 1:
                    part = part * m_row_le
                acc = part if acc is None else acc + part
            h2 = jnp.maximum(acc + b2, 0.0)                                    # (Hd, N)
            out = jnp.dot(w3, h2, preferred_element_type=jnp.float32) + b3     # (C, N)
            return out + x

        # static, sublane-aligned views into the packed parameter arrays
        w1a = w1p_ref[0:Hd, :]
        w1b = w1p_ref[Hd:2 * Hd, :]
        w3a = w3p_ref[0:C, :]
        w3b = w3p_ref[8:8 + C, :]
        b1a = bias_ref[0:Hd, :]
        b2a = bias_ref[Hd:2 * Hd, :]
        b1b = bias_ref[2 * Hd:3 * Hd, :]
        b2b = bias_ref[3 * Hd:4 * Hd, :]
        b3a = bias_ref[4 * Hd:4 * Hd + C, :]
        b3b = bias_ref[4 * Hd + 8:4 * Hd + 8 + C, :]
        bsm = bias_ref[4 * Hd + 16:4 * Hd + 16 + C, :]

        # xs[0] path: 1x1 smoothing conv BEFORE the (linear) bilinear upsample (exact),
        # then one lane-dense matmul against the batch-block-diagonal kron operator.
        sm_pre = jnp.dot(wsm_ref[...], x0_ref[...],
                         preferred_element_type=jnp.float32)        # (C, B*HinWin)
        up = jnp.dot(sm_pre, ut_ref[...],
                     preferred_element_type=jnp.float32) + bsm      # (C, N)

        # res = resConfUnit1(xs[1]); fused = smoothing(up(xs[0])) + res
        res = rcu(x1_ref[...], w1a, w3a, 0, b1a, b2a, b3a)
        fused = up + res
        # output = resConfUnit2(fused)  -- one wide lane-dense store
        o_ref[...] = rcu(fused, w1b, w3b, 9 * Hd, b1b, b2b, b3b)

    return kernel


# ---------------------------------------------------------------------------
# FeatureFusionBlock forward (len(xs) == 2 path), NCHW in / NCHW out
# ---------------------------------------------------------------------------
def feature_fusion_block(xs, up_size, params):
    x0, x1 = xs                                  # NCHW, like the PyTorch module
    B, C, Hin, Win = x0.shape
    Hout, Wout = up_size
    Bx1, C1, H, W = x1.shape
    assert (B, C) == (Bx1, C1) and (H, W) == (Hout, Wout)
    HW = H * W
    N = B * HW
    Nin = B * Hin * Win

    # host-side constants
    A = _interp_matrix(Hout, Hin)                           # (Hout, Hin)
    Bw = _interp_matrix(Wout, Win)                          # (Wout, Win)
    ut_img = np.kron(A, Bw).T.astype(np.float32)            # (HinWin, HoutWout)
    # block-diagonal over batch so the whole folded batch upsamples in one matmul
    ut = jnp.asarray(np.kron(np.eye(B, dtype=np.float32), ut_img))   # (Nin, N)
    masks = _border_masks(H, W, B)                          # (4, N)
    wsm, w1p, w3p, w2p, biasp = _pack_params(params)

    # channels-major with batch folded into lanes (layout plumbing done by XLA outside
    # the kernel): (B, C, HW) -> (C, B*HW)
    x0f = jnp.transpose(x0.reshape(B, C, Hin * Win), (1, 0, 2)).reshape(C, Nin)
    x1f = jnp.transpose(x1.reshape(B, C, HW), (1, 0, 2)).reshape(C, N)

    kernel = _make_fusion_kernel(H, W, B, C)
    out_flat = pl.pallas_call(
        kernel,
        out_shape=jax.ShapeDtypeStruct((C, N), jnp.float32),
        in_specs=[pl.BlockSpec(memory_space=pltpu.MemorySpace.VMEM) for _ in range(9)],
        out_specs=pl.BlockSpec(memory_space=pltpu.MemorySpace.VMEM),
    )(x0f, x1f, ut, masks, wsm, w1p, w3p, w2p, biasp)

    return jnp.transpose(out_flat.reshape(C, B, H, W), (1, 0, 2, 3))


# ---------------------------------------------------------------------------
# deterministic parameter init (synthetic, PyTorch-shaped: (O, I, kh, kw) / (O,))
# ---------------------------------------------------------------------------
def init_params(key, features=FEATURES, hidden=HIDDEN):
    def nrm(k, shape, scale=0.1):
        return scale * jax.random.normal(k, shape, jnp.float32)

    def rcu(k):
        ks = jax.random.split(k, 6)
        return dict(
            w1=nrm(ks[0], (hidden, features, 1, 1)), b1=nrm(ks[1], (hidden,)),
            w2=nrm(ks[2], (hidden, hidden, 3, 3)), b2=nrm(ks[3], (hidden,)),
            w3=nrm(ks[4], (features, hidden, 1, 1)), b3=nrm(ks[5], (features,)),
        )

    ks = jax.random.split(key, 4)
    return dict(
        smooth_w=nrm(ks[0], (features, features, 1, 1)),
        smooth_b=nrm(ks[1], (features,)),
        rcu1=rcu(ks[2]),
        rcu2=rcu(ks[3]),
    )


# ---------------------------------------------------------------------------
# pure-JAX reference (for numerical check), NCHW
# ---------------------------------------------------------------------------
def _rcu_ref(x, p):
    relu = lambda v: jnp.maximum(v, 0.0)
    hid = p["w2"].shape[0]
    B, _, H, W = x.shape
    a = relu(x)
    h = relu(jnp.einsum('oi,bihw->bohw', p["w1"][:, :, 0, 0], a)
             + p["b1"][None, :, None, None])
    hp = jnp.pad(h, ((0, 0), (0, 0), (1, 1), (1, 1)))
    acc = jnp.zeros((B, hid, H, W), jnp.float32) + p["b2"][None, :, None, None]
    for ky in range(3):
        for kx in range(3):
            acc = acc + jnp.einsum('oi,bihw->bohw', p["w2"][:, :, ky, kx],
                                   hp[:, :, ky:ky + H, kx:kx + W])
    h2 = relu(acc)
    out = jnp.einsum('oi,bihw->bohw', p["w3"][:, :, 0, 0], h2) + p["b3"][None, :, None, None]
    return out + x


def feature_fusion_ref(xs, up_size, params):
    x0, x1 = xs
    _, _, Hin, Win = x0.shape
    Hout, Wout = up_size
    A = jnp.asarray(_interp_matrix(Hout, Hin))
    Bm = jnp.asarray(_interp_matrix(Wout, Win))
    up = jnp.einsum('oh,bchw,pw->bcop', A, x0, Bm)
    sm = jnp.einsum('oi,bihw->bohw', params["smooth_w"][:, :, 0, 0], up) \
        + params["smooth_b"][None, :, None, None]
    fused = sm + _rcu_ref(x1, params["rcu1"])
    return _rcu_ref(fused, params["rcu2"])


if __name__ == "__main__":
    key = jax.random.PRNGKey(0)
    k0, k1, kp = jax.random.split(key, 3)
    B = 2
    # xs[0]: coarser feature from the previous fusion step; xs[1]: next-scale feature
    x0 = jax.random.normal(k0, (B, FEATURES, 8, 8), jnp.float32)
    x1 = jax.random.normal(k1, (B, FEATURES, 16, 16), jnp.float32)
    up_size = (16, 16)
    params = init_params(kp)

    out = feature_fusion_block((x0, x1), up_size, params)
    out = jax.block_until_ready(out)

    ref = feature_fusion_ref((x0, x1), up_size, params)
    assert out.shape == (B, FEATURES, 16, 16)
    np.testing.assert_allclose(np.asarray(out), np.asarray(ref), rtol=1e-3, atol=1e-3)
    print("KERNEL_OK")
</pallas_src>

<mosaic_0001>
module attributes {stable_mosaic.version = 11 : i64} {
  func.func @kernel(%arg0: memref<4x128xf32, #tpu.memory_space<vmem>>, %arg1: memref<4x512xf32, #tpu.memory_space<vmem>>, %arg2: memref<128x512xf32, #tpu.memory_space<vmem>>, %arg3: memref<4x512xf32, #tpu.memory_space<vmem>>, %arg4: memref<4x4xf32, #tpu.memory_space<vmem>>, %arg5: memref<128x4xf32, #tpu.memory_space<vmem>>, %arg6: memref<16x64xf32, #tpu.memory_space<vmem>>, %arg7: memref<1152x64xf32, #tpu.memory_space<vmem>>, %arg8: memref<280x1xf32, #tpu.memory_space<vmem>>, %arg9: memref<4x512xf32, #tpu.memory_space<vmem>>) attributes {dimension_semantics = [], scalar_prefetch = 0 : i64, scratch_operands = 0 : i64, tpu.core_type = #tpu.core_type<tc>} {
    %c0 = arith.constant 0 : index
    %c0_0 = arith.constant 0 : index
    %0 = vector.load %arg3[%c0, %c0_0] : memref<4x512xf32, #tpu.memory_space<vmem>>, vector<1x512xf32>
    %1 = vector.shape_cast %0 : vector<1x512xf32> to vector<1x512xf32>
    %2 = vector.broadcast %1 : vector<1x512xf32> to vector<64x512xf32>
    %c1 = arith.constant 1 : index
    %c0_1 = arith.constant 0 : index
    %3 = vector.load %arg3[%c1, %c0_1] : memref<4x512xf32, #tpu.memory_space<vmem>>, vector<1x512xf32>
    %4 = vector.shape_cast %3 : vector<1x512xf32> to vector<1x512xf32>
    %5 = vector.broadcast %4 : vector<1x512xf32> to vector<64x512xf32>
    %c2 = arith.constant 2 : index
    %c0_2 = arith.constant 0 : index
    %6 = vector.load %arg3[%c2, %c0_2] : memref<4x512xf32, #tpu.memory_space<vmem>>, vector<1x512xf32>
    %7 = vector.shape_cast %6 : vector<1x512xf32> to vector<1x512xf32>
    %8 = vector.broadcast %7 : vector<1x512xf32> to vector<64x512xf32>
    %c3 = arith.constant 3 : index
    %c0_3 = arith.constant 0 : index
    %9 = vector.load %arg3[%c3, %c0_3] : memref<4x512xf32, #tpu.memory_space<vmem>>, vector<1x512xf32>
    %10 = vector.shape_cast %9 : vector<1x512xf32> to vector<1x512xf32>
    %11 = vector.broadcast %10 : vector<1x512xf32> to vector<64x512xf32>
    %c0_4 = arith.constant 0 : index
    %c0_5 = arith.constant 0 : index
    %12 = vector.load %arg5[%c0_4, %c0_5] : memref<128x4xf32, #tpu.memory_space<vmem>>, vector<64x4xf32>
    %c64 = arith.constant 64 : index
    %c0_6 = arith.constant 0 : index
    %13 = vector.load %arg5[%c64, %c0_6] : memref<128x4xf32, #tpu.memory_space<vmem>>, vector<64x4xf32>
    %c0_7 = arith.constant 0 : index
    %c0_8 = arith.constant 0 : index
    %14 = vector.load %arg6[%c0_7, %c0_8] : memref<16x64xf32, #tpu.memory_space<vmem>>, vector<4x64xf32>
    %c8 = arith.constant 8 : index
    %c0_9 = arith.constant 0 : index
    %15 = vector.load %arg6[%c8, %c0_9] : memref<16x64xf32, #tpu.memory_space<vmem>>, vector<4x64xf32>
    %c0_10 = arith.constant 0 : index
    %c0_11 = arith.constant 0 : index
    %16 = vector.load %arg8[%c0_10, %c0_11] : memref<280x1xf32, #tpu.memory_space<vmem>>, vector<64x1xf32>
    %c64_12 = arith.constant 64 : index
    %c0_13 = arith.constant 0 : index
    %17 = vector.load %arg8[%c64_12, %c0_13] : memref<280x1xf32, #tpu.memory_space<vmem>>, vector<64x1xf32>
    %c128 = arith.constant 128 : index
    %c0_14 = arith.constant 0 : index
    %18 = vector.load %arg8[%c128, %c0_14] : memref<280x1xf32, #tpu.memory_space<vmem>>, vector<64x1xf32>
    %c192 = arith.constant 192 : index
    %c0_15 = arith.constant 0 : index
    %19 = vector.load %arg8[%c192, %c0_15] : memref<280x1xf32, #tpu.memory_space<vmem>>, vector<64x1xf32>
    %c256 = arith.constant 256 : index
    %c0_16 = arith.constant 0 : index
    %20 = vector.load %arg8[%c256, %c0_16] : memref<280x1xf32, #tpu.memory_space<vmem>>, vector<4x1xf32>
    %c264 = arith.constant 264 : index
    %c0_17 = arith.constant 0 : index
    %21 = vector.load %arg8[%c264, %c0_17] : memref<280x1xf32, #tpu.memory_space<vmem>>, vector<4x1xf32>
    %c272 = arith.constant 272 : index
    %c0_18 = arith.constant 0 : index
    %22 = vector.load %arg8[%c272, %c0_18] : memref<280x1xf32, #tpu.memory_space<vmem>>, vector<4x1xf32>
    %c0_19 = arith.constant 0 : index
    %c0_20 = arith.constant 0 : index
    %23 = vector.load %arg4[%c0_19, %c0_20] : memref<4x4xf32, #tpu.memory_space<vmem>>, vector<4x4xf32>
    %c0_21 = arith.constant 0 : index
    %c0_22 = arith.constant 0 : index
    %24 = vector.load %arg0[%c0_21, %c0_22] : memref<4x128xf32, #tpu.memory_space<vmem>>, vector<4x128xf32>
    %cst = arith.constant dense<0.000000e+00> : vector<4x128xf32>
    %25 = tpu.matmul %23, %24, %cst {dimension_numbers = #tpu.dot_dimension_numbers<[1], [0], [0], [1], [0, 0, 1, 1], [], []>} : vector<4x4xf32>, vector<4x128xf32>, vector<4x128xf32> -> vector<4x128xf32>
    %c0_23 = arith.constant 0 : index
    %c0_24 = arith.constant 0 : index
    %26 = vector.load %arg2[%c0_23, %c0_24] : memref<128x512xf32, #tpu.memory_space<vmem>>, vector<128x512xf32>
    %cst_25 = arith.constant dense<0.000000e+00> : vector<4x512xf32>
    %27 = tpu.matmul %25, %26, %cst_25 {dimension_numbers = #tpu.dot_dimension_numbers<[1], [0], [0], [1], [0, 0, 1, 1], [], []>} : vector<4x128xf32>, vector<128x512xf32>, vector<4x512xf32> -> vector<4x512xf32>
    %28 = vector.broadcast %22 : vector<4x1xf32> to vector<4x512xf32>
    %29 = arith.addf %27, %28 : vector<4x512xf32>
    %c0_26 = arith.constant 0 : index
    %c0_27 = arith.constant 0 : index
    %30 = vector.load %arg1[%c0_26, %c0_27] : memref<4x512xf32, #tpu.memory_space<vmem>>, vector<4x512xf32>
    %cst_28 = arith.constant 0.000000e+00 : f32
    %31 = vector.broadcast %cst_28 : f32 to vector<4x512xf32>
    %32 = arith.maximumf %30, %31 : vector<4x512xf32>
    %cst_29 = arith.constant dense<0.000000e+00> : vector<64x512xf32>
    %33 = tpu.matmul %12, %32, %cst_29 {dimension_numbers = #tpu.dot_dimension_numbers<[1], [0], [0], [1], [0, 0, 1, 1], [], []>} : vector<64x4xf32>, vector<4x512xf32>, vector<64x512xf32> -> vector<64x512xf32>
    %34 = vector.broadcast %16 : vector<64x1xf32> to vector<64x512xf32>
    %35 = arith.addf %33, %34 : vector<64x512xf32>
    %cst_30 = arith.constant 0.000000e+00 : f32
    %36 = vector.broadcast %cst_30 : f32 to vector<64x512xf32>
    %37 = arith.maximumf %35, %36 : vector<64x512xf32>
    %38 = arith.mulf %37, %5 : vector<64x512xf32>
    %39 = arith.mulf %37, %2 : vector<64x512xf32>
    %c17_i32 = arith.constant 17 : i32
    %40 = tpu.dynamic_rotate %38 by %c17_i32 dim 1 : vector<64x512xf32>, i32 -> vector<64x512xf32>
    %c0_31 = arith.constant 0 : index
    %c0_32 = arith.constant 0 : index
    %41 = vector.load %arg7[%c0_31, %c0_32] : memref<1152x64xf32, #tpu.memory_space<vmem>>, vector<64x64xf32>
    %cst_33 = arith.constant dense<0.000000e+00> : vector<64x512xf32>
    %42 = tpu.matmul %41, %40, %cst_33 {dimension_numbers = #tpu.dot_dimension_numbers<[1], [0], [0], [1], [0, 0, 1, 1], [], []>} : vector<64x64xf32>, vector<64x512xf32>, vector<64x512xf32> -> vector<64x512xf32>
    %c16_i32 = arith.constant 16 : i32
    %43 = tpu.dynamic_rotate %37 by %c16_i32 dim 1 : vector<64x512xf32>, i32 -> vector<64x512xf32>
    %c64_34 = arith.constant 64 : index
    %c0_35 = arith.constant 0 : index
    %44 = vector.load %arg7[%c64_34, %c0_35] : memref<1152x64xf32, #tpu.memory_space<vmem>>, vector<64x64xf32>
    %cst_36 = arith.constant dense<0.000000e+00> : vector<64x512xf32>
    %45 = tpu.matmul %44, %43, %cst_36 {dimension_numbers = #tpu.dot_dimension_numbers<[1], [0], [0], [1], [0, 0, 1, 1], [], []>} : vector<64x64xf32>, vector<64x512xf32>, vector<64x512xf32> -> vector<64x512xf32>
    %46 = arith.addf %42, %45 : vector<64x512xf32>
    %c15_i32 = arith.constant 15 : i32
    %47 = tpu.dynamic_rotate %39 by %c15_i32 dim 1 : vector<64x512xf32>, i32 -> vector<64x512xf32>
    %c128_37 = arith.constant 128 : index
    %c0_38 = arith.constant 0 : index
    %48 = vector.load %arg7[%c128_37, %c0_38] : memref<1152x64xf32, #tpu.memory_space<vmem>>, vector<64x64xf32>
    %cst_39 = arith.constant dense<0.000000e+00> : vector<64x512xf32>
    %49 = tpu.matmul %48, %47, %cst_39 {dimension_numbers = #tpu.dot_dimension_numbers<[1], [0], [0], [1], [0, 0, 1, 1], [], []>} : vector<64x64xf32>, vector<64x512xf32>, vector<64x512xf32> -> vector<64x512xf32>
    %50 = arith.addf %46, %49 : vector<64x512xf32>
    %51 = arith.mulf %50, %8 : vector<64x512xf32>
    %c1_i32 = arith.constant 1 : i32
    %52 = tpu.dynamic_rotate %38 by %c1_i32 dim 1 : vector<64x512xf32>, i32 -> vector<64x512xf32>
    %c192_40 = arith.constant 192 : index
    %c0_41 = arith.constant 0 : index
    %53 = vector.load %arg7[%c192_40, %c0_41] : memref<1152x64xf32, #tpu.memory_space<vmem>>, vector<64x64xf32>
    %cst_42 = arith.constant dense<0.000000e+00> : vector<64x512xf32>
    %54 = tpu.matmul %53, %52, %cst_42 {dimension_numbers = #tpu.dot_dimension_numbers<[1], [0], [0], [1], [0, 0, 1, 1], [], []>} : vector<64x64xf32>, vector<64x512xf32>, vector<64x512xf32> -> vector<64x512xf32>
    %c256_43 = arith.constant 256 : index
    %c0_44 = arith.constant 0 : index
    %55 = vector.load %arg7[%c256_43, %c0_44] : memref<1152x64xf32, #tpu.memory_space<vmem>>, vector<64x64xf32>
    %cst_45 = arith.constant dense<0.000000e+00> : vector<64x512xf32>
    %56 = tpu.matmul %55, %37, %cst_45 {dimension_numbers = #tpu.dot_dimension_numbers<[1], [0], [0], [1], [0, 0, 1, 1], [], []>} : vector<64x64xf32>, vector<64x512xf32>, vector<64x512xf32> -> vector<64x512xf32>
    %57 = arith.addf %54, %56 : vector<64x512xf32>
    %c511_i32 = arith.constant 511 : i32
    %58 = tpu.dynamic_rotate %39 by %c511_i32 dim 1 : vector<64x512xf32>, i32 -> vector<64x512xf32>
    %c320 = arith.constant 320 : index
    %c0_46 = arith.constant 0 : index
    %59 = vector.load %arg7[%c320, %c0_46] : memref<1152x64xf32, #tpu.memory_space<vmem>>, vector<64x64xf32>
    %cst_47 = arith.constant dense<0.000000e+00> : vector<64x512xf32>
    %60 = tpu.matmul %59, %58, %cst_47 {dimension_numbers = #tpu.dot_dimension_numbers<[1], [0], [0], [1], [0, 0, 1, 1], [], []>} : vector<64x64xf32>, vector<64x512xf32>, vector<64x512xf32> -> vector<64x512xf32>
    %61 = arith.addf %57, %60 : vector<64x512xf32>
    %62 = arith.addf %51, %61 : vector<64x512xf32>
    %c497_i32 = arith.constant 497 : i32
    %63 = tpu.dynamic_rotate %38 by %c497_i32 dim 1 : vector<64x512xf32>, i32 -> vector<64x512xf32>
    %c384 = arith.constant 384 : index
    %c0_48 = arith.constant 0 : index
    %64 = vector.load %arg7[%c384, %c0_48] : memref<1152x64xf32, #tpu.memory_space<vmem>>, vector<64x64xf32>
    %cst_49 = arith.constant dense<0.000000e+00> : vector<64x512xf32>
    %65 = tpu.matmul %64, %63, %cst_49 {dimension_numbers = #tpu.dot_dimension_numbers<[1], [0], [0], [1], [0, 0, 1, 1], [], []>} : vector<64x64xf32>, vector<64x512xf32>, vector<64x512xf32> -> vector<64x512xf32>
    %c496_i32 = arith.constant 496 : i32
    %66 = tpu.dynamic_rotate %37 by %c496_i32 dim 1 : vector<64x512xf32>, i32 -> vector<64x512xf32>
    %c448 = arith.constant 448 : index
    %c0_50 = arith.constant 0 : index
    %67 = vector.load %arg7[%c448, %c0_50] : memref<1152x64xf32, #tpu.memory_space<vmem>>, vector<64x64xf32>
    %cst_51 = arith.constant dense<0.000000e+00> : vector<64x512xf32>
    %68 = tpu.matmul %67, %66, %cst_51 {dimension_numbers = #tpu.dot_dimension_numbers<[1], [0], [0], [1], [0, 0, 1, 1], [], []>} : vector<64x64xf32>, vector<64x512xf32>, vector<64x512xf32> -> vector<64x512xf32>
    %69 = arith.addf %65, %68 : vector<64x512xf32>
    %c495_i32 = arith.constant 495 : i32
    %70 = tpu.dynamic_rotate %39 by %c495_i32 dim 1 : vector<64x512xf32>, i32 -> vector<64x512xf32>
    %c512 = arith.constant 512 : index
    %c0_52 = arith.constant 0 : index
    %71 = vector.load %arg7[%c512, %c0_52] : memref<1152x64xf32, #tpu.memory_space<vmem>>, vector<64x64xf32>
    %cst_53 = arith.constant dense<0.000000e+00> : vector<64x512xf32>
    %72 = tpu.matmul %71, %70, %cst_53 {dimension_numbers = #tpu.dot_dimension_numbers<[1], [0], [0], [1], [0, 0, 1, 1], [], []>} : vector<64x64xf32>, vector<64x512xf32>, vector<64x512xf32> -> vector<64x512xf32>
    %73 = arith.addf %69, %72 : vector<64x512xf32>
    %74 = arith.mulf %73, %11 : vector<64x512xf32>
    %75 = arith.addf %62, %74 : vector<64x512xf32>
    %76 = vector.broadcast %17 : vector<64x1xf32> to vector<64x512xf32>
    %77 = arith.addf %75, %76 : vector<64x512xf32>
    %cst_54 = arith.constant 0.000000e+00 : f32
    %78 = vector.broadcast %cst_54 : f32 to vector<64x512xf32>
    %79 = arith.maximumf %77, %78 : vector<64x512xf32>
    %cst_55 = arith.constant dense<0.000000e+00> : vector<4x512xf32>
    %80 = tpu.matmul %14, %79, %cst_55 {dimension_numbers = #tpu.dot_dimension_numbers<[1], [0], [0], [1], [0, 0, 1, 1], [], []>} : vector<4x64xf32>, vector<64x512xf32>, vector<4x512xf32> -> vector<4x512xf32>
    %81 = vector.broadcast %20 : vector<4x1xf32> to vector<4x512xf32>
    %82 = arith.addf %80, %81 : vector<4x512xf32>
    %83 = arith.addf %82, %30 : vector<4x512xf32>
    %84 = arith.addf %29, %83 : vector<4x512xf32>
    %cst_56 = arith.constant 0.000000e+00 : f32
    %85 = vector.broadcast %cst_56 : f32 to vector<4x512xf32>
    %86 = arith.maximumf %84, %85 : vector<4x512xf32>
    %cst_57 = arith.constant dense<0.000000e+00> : vector<64x512xf32>
    %87 = tpu.matmul %13, %86, %cst_57 {dimension_numbers = #tpu.dot_dimension_numbers<[1], [0], [0], [1], [0, 0, 1, 1], [], []>} : vector<64x4xf32>, vector<4x512xf32>, vector<64x512xf32> -> vector<64x512xf32>
    %88 = vector.broadcast %18 : vector<64x1xf32> to vector<64x512xf32>
    %89 = arith.addf %87, %88 : vector<64x512xf32>
    %cst_58 = arith.constant 0.000000e+00 : f32
    %90 = vector.broadcast %cst_58 : f32 to vector<64x512xf32>
    %91 = arith.maximumf %89, %90 : vector<64x512xf32>
    %92 = arith.mulf %91, %5 : vector<64x512xf32>
    %93 = arith.mulf %91, %2 : vector<64x512xf32>
    %c17_i32_59 = arith.constant 17 : i32
    %94 = tpu.dynamic_rotate %92 by %c17_i32_59 dim 1 : vector<64x512xf32>, i32 -> vector<64x512xf32>
    %c576 = arith.constant 576 : index
    %c0_60 = arith.constant 0 : index
    %95 = vector.load %arg7[%c576, %c0_60] : memref<1152x64xf32, #tpu.memory_space<vmem>>, vector<64x64xf32>
    %cst_61 = arith.constant dense<0.000000e+00> : vector<64x512xf32>
    %96 = tpu.matmul %95, %94, %cst_61 {dimension_numbers = #tpu.dot_dimension_numbers<[1], [0], [0], [1], [0, 0, 1, 1], [], []>} : vector<64x64xf32>, vector<64x512xf32>, vector<64x512xf32> -> vector<64x512xf32>
    %c16_i32_62 = arith.constant 16 : i32
    %97 = tpu.dynamic_rotate %91 by %c16_i32_62 dim 1 : vector<64x512xf32>, i32 -> vector<64x512xf32>
    %c640 = arith.constant 640 : index
    %c0_63 = arith.constant 0 : index
    %98 = vector.load %arg7[%c640, %c0_63] : memref<1152x64xf32, #tpu.memory_space<vmem>>, vector<64x64xf32>
    %cst_64 = arith.constant dense<0.000000e+00> : vector<64x512xf32>
    %99 = tpu.matmul %98, %97, %cst_64 {dimension_numbers = #tpu.dot_dimension_numbers<[1], [0], [0], [1], [0, 0, 1, 1], [], []>} : vector<64x64xf32>, vector<64x512xf32>, vector<64x512xf32> -> vector<64x512xf32>
    %100 = arith.addf %96, %99 : vector<64x512xf32>
    %c15_i32_65 = arith.constant 15 : i32
    %101 = tpu.dynamic_rotate %93 by %c15_i32_65 dim 1 : vector<64x512xf32>, i32 -> vector<64x512xf32>
    %c704 = arith.constant 704 : index
    %c0_66 = arith.constant 0 : index
    %102 = vector.load %arg7[%c704, %c0_66] : memref<1152x64xf32, #tpu.memory_space<vmem>>, vector<64x64xf32>
    %cst_67 = arith.constant dense<0.000000e+00> : vector<64x512xf32>
    %103 = tpu.matmul %102, %101, %cst_67 {dimension_numbers = #tpu.dot_dimension_numbers<[1], [0], [0], [1], [0, 0, 1, 1], [], []>} : vector<64x64xf32>, vector<64x512xf32>, vector<64x512xf32> -> vector<64x512xf32>
    %104 = arith.addf %100, %103 : vector<64x512xf32>
    %105 = arith.mulf %104, %8 : vector<64x512xf32>
    %c1_i32_68 = arith.constant 1 : i32
    %106 = tpu.dynamic_rotate %92 by %c1_i32_68 dim 1 : vector<64x512xf32>, i32 -> vector<64x512xf32>
    %c768 = arith.constant 768 : index
    %c0_69 = arith.constant 0 : index
    %107 = vector.load %arg7[%c768, %c0_69] : memref<1152x64xf32, #tpu.memory_space<vmem>>, vector<64x64xf32>
    %cst_70 = arith.constant dense<0.000000e+00> : vector<64x512xf32>
    %108 = tpu.matmul %107, %106, %cst_70 {dimension_numbers = #tpu.dot_dimension_numbers<[1], [0], [0], [1], [0, 0, 1, 1], [], []>} : vector<64x64xf32>, vector<64x512xf32>, vector<64x512xf32> -> vector<64x512xf32>
    %c832 = arith.constant 832 : index
    %c0_71 = arith.constant 0 : index
    %109 = vector.load %arg7[%c832, %c0_71] : memref<1152x64xf32, #tpu.memory_space<vmem>>, vector<64x64xf32>
    %cst_72 = arith.constant dense<0.000000e+00> : vector<64x512xf32>
    %110 = tpu.matmul %109, %91, %cst_72 {dimension_numbers = #tpu.dot_dimension_numbers<[1], [0], [0], [1], [0, 0, 1, 1], [], []>} : vector<64x64xf32>, vector<64x512xf32>, vector<64x512xf32> -> vector<64x512xf32>
    %111 = arith.addf %108, %110 : vector<64x512xf32>
    %c511_i32_73 = arith.constant 511 : i32
    %112 = tpu.dynamic_rotate %93 by %c511_i32_73 dim 1 : vector<64x512xf32>, i32 -> vector<64x512xf32>
    %c896 = arith.constant 896 : index
    %c0_74 = arith.constant 0 : index
    %113 = vector.load %arg7[%c896, %c0_74] : memref<1152x64xf32, #tpu.memory_space<vmem>>, vector<64x64xf32>
    %cst_75 = arith.constant dense<0.000000e+00> : vector<64x512xf32>
    %114 = tpu.matmul %113, %112, %cst_75 {dimension_numbers = #tpu.dot_dimension_numbers<[1], [0], [0], [1], [0, 0, 1, 1], [], []>} : vector<64x64xf32>, vector<64x512xf32>, vector<64x512xf32> -> vector<64x512xf32>
    %115 = arith.addf %111, %114 : vector<64x512xf32>
    %116 = arith.addf %105, %115 : vector<64x512xf32>
    %c497_i32_76 = arith.constant 497 : i32
    %117 = tpu.dynamic_rotate %92 by %c497_i32_76 dim 1 : vector<64x512xf32>, i32 -> vector<64x512xf32>
    %c960 = arith.constant 960 : index
    %c0_77 = arith.constant 0 : index
    %118 = vector.load %arg7[%c960, %c0_77] : memref<1152x64xf32, #tpu.memory_space<vmem>>, vector<64x64xf32>
    %cst_78 = arith.constant dense<0.000000e+00> : vector<64x512xf32>
    %119 = tpu.matmul %118, %117, %cst_78 {dimension_numbers = #tpu.dot_dimension_numbers<[1], [0], [0], [1], [0, 0, 1, 1], [], []>} : vector<64x64xf32>, vector<64x512xf32>, vector<64x512xf32> -> vector<64x512xf32>
    %c496_i32_79 = arith.constant 496 : i32
    %120 = tpu.dynamic_rotate %91 by %c496_i32_79 dim 1 : vector<64x512xf32>, i32 -> vector<64x512xf32>
    %c1024 = arith.constant 1024 : index
    %c0_80 = arith.constant 0 : index
    %121 = vector.load %arg7[%c1024, %c0_80] : memref<1152x64xf32, #tpu.memory_space<vmem>>, vector<64x64xf32>
    %cst_81 = arith.constant dense<0.000000e+00> : vector<64x512xf32>
    %122 = tpu.matmul %121, %120, %cst_81 {dimension_numbers = #tpu.dot_dimension_numbers<[1], [0], [0], [1], [0, 0, 1, 1], [], []>} : vector<64x64xf32>, vector<64x512xf32>, vector<64x512xf32> -> vector<64x512xf32>
    %123 = arith.addf %119, %122 : vector<64x512xf32>
    %c495_i32_82 = arith.constant 495 : i32
    %124 = tpu.dynamic_rotate %93 by %c495_i32_82 dim 1 : vector<64x512xf32>, i32 -> vector<64x512xf32>
    %c1088 = arith.constant 1088 : index
    %c0_83 = arith.constant 0 : index
    %125 = vector.load %arg7[%c1088, %c0_83] : memref<1152x64xf32, #tpu.memory_space<vmem>>, vector<64x64xf32>
    %cst_84 = arith.constant dense<0.000000e+00> : vector<64x512xf32>
    %126 = tpu.matmul %125, %124, %cst_84 {dimension_numbers = #tpu.dot_dimension_numbers<[1], [0], [0], [1], [0, 0, 1, 1], [], []>} : vector<64x64xf32>, vector<64x512xf32>, vector<64x512xf32> -> vector<64x512xf32>
    %127 = arith.addf %123, %126 : vector<64x512xf32>
    %128 = arith.mulf %127, %11 : vector<64x512xf32>
    %129 = arith.addf %116, %128 : vector<64x512xf32>
    %130 = vector.broadcast %19 : vector<64x1xf32> to vector<64x512xf32>
    %131 = arith.addf %129, %130 : vector<64x512xf32>
    %cst_85 = arith.constant 0.000000e+00 : f32
    %132 = vector.broadcast %cst_85 : f32 to vector<64x512xf32>
    %133 = arith.maximumf %131, %132 : vector<64x512xf32>
    %cst_86 = arith.constant dense<0.000000e+00> : vector<4x512xf32>
    %134 = tpu.matmul %15, %133, %cst_86 {dimension_numbers = #tpu.dot_dimension_numbers<[1], [0], [0], [1], [0, 0, 1, 1], [], []>} : vector<4x64xf32>, vector<64x512xf32>, vector<4x512xf32> -> vector<4x512xf32>
    %135 = vector.broadcast %21 : vector<4x1xf32> to vector<4x512xf32>
    %136 = arith.addf %134, %135 : vector<4x512xf32>
    %137 = arith.addf %136, %84 : vector<4x512xf32>
    %c0_87 = arith.constant 0 : index
    %c0_88 = arith.constant 0 : index
    %138 = vector.load %arg9[%c0_87, %c0_88] : memref<4x512xf32, #tpu.memory_space<vmem>>, vector<4x512xf32>
    tpu.vector_store %arg9[%c0_87, %c0_88], %137 {strides = array<i32>} : memref<4x512xf32, #tpu.memory_space<vmem>>, vector<4x512xf32>,
    return
  }
}

</mosaic_0001>

<bundles_post_ra>
// kernel: tpu_custom_call.1
= control target key start
LH: loop header
LB: loop body
LE: loop exit
PB: predicated region body
PF: predicated region fallthrough
CT: control target
= control target key end

     0   :  { %vm183_vm0 = vcmask 1043456   ;;  %vm179_vm1 = vcmask 31744   ;;  %v16666_v1 = vmov 0.0   ;;  %vm11232_vm2 = vmmov 0   ;;  %s16656_s0 = inlined_call_operand.vmem [shape: f32[4,128], index: 0, kind: input, shape index: {}]   ;;  %s16657_s1 = inlined_call_operand.vmem [shape: f32[4,512], index: 1, kind: input, shape index: {}]   ;;  %s16658_s2 = inlined_call_operand.vmem [shape: f32[128,512], index: 2, kind: input, shape index: {}]   ;;  %s16659_s3 = inlined_call_operand.vmem [shape: f32[4,512], index: 3, kind: input, shape index: {}]   ;;  %s16660_s4 = inlined_call_operand.vmem [shape: f32[4,4], index: 4, kind: input, shape index: {}]   ;;  %s16661_s5 = inlined_call_operand.vmem [shape: f32[128,4], index: 5, kind: input, shape index: {}]   ;;  %s16662_s6 = inlined_call_operand.vmem [shape: f32[16,64], index: 6, kind: input, shape index: {}]   ;;  %s16663_s7 = inlined_call_operand.vmem [shape: f32[1152,64], index: 7, kind: input, shape index: {}]   ;;  %s16664_s8 = inlined_call_operand.vmem [shape: f32[280,1], index: 8, kind: input, shape index: {}]   ;;  %s16665_s9 = inlined_call_operand.hbm [shape: f32[4,512], index: 9, kind: output, shape index: {}]  }
   0x1   :  { %v178_v0 = vld [vmem:[%s16656_s0] sm:$0xf]  ;;  %8800 = vmatprep.subr.mxu0 %v16666_v1  ;;  %8802 = vmatprep.mubr.msk.f32.mxu0 %vm11232_vm2, %v16666_v1  ;;  %v258_v3 = vld [vmem:[%s16658_s2 + $0x8] sm:$0xff]  ;;  %v260_v6 = vld [vmem:[%s16658_s2 + $0x18] sm:$0xff] }
   0x2   :  { %v177_v2 = vld [vmem:[%s16660_s4] sm:$0xf]  ;;  %v262_v4 = vld [vmem:[%s16658_s2 + $0x28] sm:$0xff]  ;;  %8801 = vmatpush3.msk.msra.mxu0 %vm183_vm0, %v178_v0  ;;  %v264_v7 = vld [vmem:[%s16658_s2 + $0x38] sm:$0xff]  ;;  %390 = vmatprep.mubr.f32.mxu1 %v16666_v1 }
   0x3   :  { %v8805_v5 = vpack.c.bf16 %v262_v4, %v258_v3  ;;  %v257_v8 = vld [vmem:[%s16658_s2] sm:$0xff]  ;;  %8803 = vmatmul.mubr.msk.f32.vlgmr.msra.gmra.mrb[0].mxu0 %vm179_vm1, %v177_v2  ;;  %v8837_v9 = vpack.c.bf16 %v264_v7, %v260_v6  ;;  %v259_v11 = vld [vmem:[%s16658_s2 + $0x10] sm:$0xff]  ;;  %v266_v15 = vld [vmem:[%s16658_s2 + $0x48] sm:$0xff] }
   0x4   :  { %v261_v10 = vld [vmem:[%s16658_s2 + $0x20] sm:$0xff]  ;;  %v263_v12 = vld [vmem:[%s16658_s2 + $0x30] sm:$0xff]  ;;  %v270_v16 = vld [vmem:[%s16658_s2 + $0x68] sm:$0xff]  ;;  %461 = vmatprep.mubr.f32.mxu0 %v16666_v1 }
   0x5   :  { %8806 = vmatprep.subr.bf16.mxu1 %v8805_v5  ;;  %v8807_v13 = vpack.c.bf16 %v261_v10, %v257_v8  ;;  %v8839_v14 = vpack.c.bf16 %v263_v12, %v259_v11  ;;  %v268_v17 = vld [vmem:[%s16658_s2 + $0x58] sm:$0xff]  ;;  %8838 = vmatprep.subr.bf16.mxu0 %v8837_v9  ;;  %v8809_v18 = vpack.c.bf16 %v270_v16, %v266_v15  ;;  %v265_v20 = vld [vmem:[%s16658_s2 + $0x40] sm:$0xff]  ;;  %v267_v24 = vld [vmem:[%s16658_s2 + $0x50] sm:$0xff] }
   0x6   :  { %v272_v19 = vld [vmem:[%s16658_s2 + $0x78] sm:$0xff]  ;;  %v269_v21 = vld [vmem:[%s16658_s2 + $0x60] sm:$0xff]  ;;  %v271_v25 = vld [vmem:[%s16658_s2 + $0x70] sm:$0xff] }
   0x7   :  { %8808 = vmatpush1.bf16.msra.mxu1 %v8807_v13  ;;  %8840 = vmatpush1.bf16.msra.mxu0 %v8839_v14  ;;  %v8841_v22 = vpack.c.bf16 %v272_v19, %v268_v17  ;;  %v8811_v23 = vpack.c.bf16 %v269_v21, %v265_v20  ;;  %v274_v26 = vld [vmem:[%s16658_s2 + $0x88] sm:$0xff]  ;;  %v8843_v27 = vpack.c.bf16 %v271_v25, %v267_v24  ;;  %v276_v29 = vld [vmem:[%s16658_s2 + $0x98] sm:$0xff]  ;;  %v273_v33 = vld [vmem:[%s16658_s2 + $0x80] sm:$0xff] }
   0x8   :  { %8810 = vmatprep.subr.bf16.mxu1 %v8809_v18  ;;  %v278_v28 = vld [vmem:[%s16658_s2 + $0xa8] sm:$0xff]  ;;  %v280_v30 = vld [vmem:[%s16658_s2 + $0xb8] sm:$0xff]  ;;  %v277_v34 = vld [vmem:[%s16658_s2 + $0xa0] sm:$0xff] }
   0x9   :  { %8842 = vmatprep.subr.bf16.mxu0 %v8841_v22  ;;  %v8813_v31 = vpack.c.bf16 %v278_v28, %v274_v26  ;;  %v8845_v32 = vpack.c.bf16 %v280_v30, %v276_v29  ;;  %v275_v35 = vld [vmem:[%s16658_s2 + $0x90] sm:$0xff]  ;;  %v282_v37 = vld [vmem:[%s16658_s2 + $0xc8] sm:$0xff]  ;;  %v8815_v39 = vpack.c.bf16 %v277_v34, %v273_v33  ;;  %v284_v41 = vld [vmem:[%s16658_s2 + $0xd8] sm:$0xff] }
   0xa   :  { %v279_v36 = vld [vmem:[%s16658_s2 + $0xb0] sm:$0xff]  ;;  %v286_v38 = vld [vmem:[%s16658_s2 + $0xe8] sm:$0xff]  ;;  %v288_v42 = vld [vmem:[%s16658_s2 + $0xf8] sm:$0xff] }
   0xb   :  { %8812 = vmatpush1.bf16.msra.mxu1 %v8811_v23  ;;  %8844 = vmatpush1.bf16.msra.mxu0 %v8843_v27  ;;  %v8847_v40 = vpack.c.bf16 %v279_v36, %v275_v35  ;;  %v281_v43 = vld [vmem:[%s16658_s2 + $0xc0] sm:$0xff]  ;;  %v8817_v44 = vpack.c.bf16 %v286_v38, %v282_v37  ;;  %v8849_v45 = vpack.c.bf16 %v288_v42, %v284_v41  ;;  %v283_v47 = vld [vmem:[%s16658_s2 + $0xd0] sm:$0xff]  ;;  %v290_v49 = vld [vmem:[%s16658_s2 + $0x108] sm:$0xff] }
   0xc   :  { %8814 = vmatprep.subr.bf16.mxu1 %v8813_v31  ;;  %8846 = vmatprep.subr.bf16.mxu0 %v8845_v32  ;;  %v285_v46 = vld [vmem:[%s16658_s2 + $0xe0] sm:$0xff]  ;;  %v287_v48 = vld [vmem:[%s16658_s2 + $0xf0] sm:$0xff]  ;;  %v294_v50 = vld [vmem:[%s16658_s2 + $0x128] sm:$0xff] }
   0xd   :  { %v292_v51 = vld [vmem:[%s16658_s2 + $0x118] sm:$0xff]  ;;  %v8819_v53 = vpack.c.bf16 %v285_v46, %v281_v43  ;;  %v8851_v54 = vpack.c.bf16 %v287_v48, %v283_v47  ;;  %v289_v55 = vld [vmem:[%s16658_s2 + $0x100] sm:$0xff]  ;;  %v8821_v57 = vpack.c.bf16 %v294_v50, %v290_v49  ;;  %v291_v59 = vld [vmem:[%s16658_s2 + $0x110] sm:$0xff] }
   0xe   :  { %v296_v52 = vld [vmem:[%s16658_s2 + $0x138] sm:$0xff]  ;;  %v293_v56 = vld [vmem:[%s16658_s2 + $0x120] sm:$0xff]  ;;  %v295_v60 = vld [vmem:[%s16658_s2 + $0x130] sm:$0xff] }
   0xf   :  { %8816 = vmatpush1.bf16.msra.mxu1 %v8815_v39  ;;  %8848 = vmatpush1.bf16.msra.mxu0 %v8847_v40  ;;  %v8853_v58 = vpack.c.bf16 %v296_v52, %v292_v51  ;;  %v298_v61 = vld [vmem:[%s16658_s2 + $0x148] sm:$0xff]  ;;  %v300_v63 = vld [vmem:[%s16658_s2 + $0x158] sm:$0xff]  ;;  %v8823_v2 = vpack.c.bf16 %v293_v56, %v289_v55  ;;  %v8855_v3 = vpack.c.bf16 %v295_v60, %v291_v59  ;;  %v297_v4 = vld [vmem:[%s16658_s2 + $0x140] sm:$0xff] }
  0x10   :  { %8818 = vmatprep.subr.bf16.mxu1 %v8817_v44  ;;  %8850 = vmatprep.subr.bf16.mxu0 %v8849_v45  ;;  %v302_v62 = vld [vmem:[%s16658_s2 + $0x168] sm:$0xff]  ;;  %v304_v0 = vld [vmem:[%s16658_s2 + $0x178] sm:$0xff]  ;;  %v301_v5 = vld [vmem:[%s16658_s2 + $0x160] sm:$0xff] }
  0x11   :  { %v8825_v6 = vpack.c.bf16 %v302_v62, %v298_v61  ;;  %v8857_v7 = vpack.c.bf16 %v304_v0, %v300_v63  ;;  %v299_v8 = vld [vmem:[%s16658_s2 + $0x150] sm:$0xff]  ;;  %v306_v10 = vld [vmem:[%s16658_s2 + $0x188] sm:$0xff]  ;;  %v308_v12 = vld [vmem:[%s16658_s2 + $0x198] sm:$0xff]  ;;  %v8827_v14 = vpack.c.bf16 %v301_v5, %v297_v4 }
  0x12   :  { %v303_v9 = vld [vmem:[%s16658_s2 + $0x170] sm:$0xff]  ;;  %v310_v11 = vld [vmem:[%s16658_s2 + $0x1a8] sm:$0xff]  ;;  %v312_v13 = vld [vmem:[%s16658_s2 + $0x1b8] sm:$0xff] }
  0x13   :  { %8820 = vmatpush1.bf16.msra.mxu1 %v8819_v53  ;;  %8852 = vmatpush1.bf16.msra.mxu0 %v8851_v54  ;;  %v8859_v15 = vpack.c.bf16 %v303_v9, %v299_v8  ;;  %v305_v16 = vld [vmem:[%s16658_s2 + $0x180] sm:$0xff] }
  0x14   :  { %8822 = vmatprep.subr.bf16.mxu1 %v8821_v57  ;;  %8854 = vmatprep.subr.bf16.mxu0 %v8853_v58  ;;  %v309_v17 = vld [vmem:[%s16658_s2 + $0x1a0] sm:$0xff] }
  0x17   :  { %8824 = vmatpush1.bf16.msra.mxu1 %v8823_v2  ;;  %8856 = vmatpush1.bf16.msra.mxu0 %v8855_v3 }
  0x18   :  { %14 = vsyncpa [#allocation3], 0  ;;  %8826 = vmatprep.subr.bf16.mxu1 %v8825_v6  ;;  %8858 = vmatprep.subr.bf16.mxu0 %v8857_v7  ;;  %v8829_v18 = vpack.c.bf16 %v310_v11, %v306_v10  ;;  %v8861_v19 = vpack.c.bf16 %v312_v13, %v308_v12  ;;  %v307_v20 = vld [vmem:[%s16658_s2 + $0x190] sm:$0xff]  ;;  %v314_v22 = vld [vmem:[%s16658_s2 + $0x1c8] sm:$0xff]  ;;  %v8831_v26 = vpack.c.bf16 %v309_v17, %v305_v16  ;;  %v11233_v44 = vmov 0   ;;  %s11234_s17 = smov 16  }
  0x19   :  { %v311_v21 = vld [vmem:[%s16658_s2 + $0x1b0] sm:$0xff]  ;;  %v318_v23 = vld [vmem:[%s16658_s2 + $0x1e8] sm:$0xff]  ;;  %v316_v24 = vld [vmem:[%s16658_s2 + $0x1d8] sm:$0xff]  ;;  %9921 = vset.pattern.permute.xlu0 %v11233_v44  ;;  %9922 = vset.pattern.permute.xlu1 %v11233_v44  ;;  %v16668_v61 = vlaneseq  ;;  %s11235_s18 = smov 17   ;;  %s11236_s19 = smov 15   ;;  %vm1082_vm5 = vcmask 523264  }
  0x1a   :  { %v320_v25 = vld [vmem:[%s16658_s2 + $0x1f8] sm:$0xff]  ;;  %v8863_v27 = vpack.c.bf16 %v311_v21, %v307_v20  ;;  %v313_v28 = vld [vmem:[%s16658_s2 + $0x1c0] sm:$0xff]  ;;  %v8833_v29 = vpack.c.bf16 %v318_v23, %v314_v22  ;;  %v315_v32 = vld [vmem:[%s16658_s2 + $0x1d0] sm:$0xff]  ;;  %s11237_s4 = smov 1   ;;  %s11238_s20 = smov 127  }
  0x1b   :  { %8828 = vmatpush1.bf16.msra.mxu1 %v8827_v14  ;;  %8860 = vmatpush1.bf16.msra.mxu0 %v8859_v15  ;;  %v8865_v30 = vpack.c.bf16 %v320_v25, %v316_v24  ;;  %v317_v31 = vld [vmem:[%s16658_s2 + $0x1e0] sm:$0xff]  ;;  %v319_v33 = vld [vmem:[%s16658_s2 + $0x1f0] sm:$0xff]  ;;  %v469_v37 = vld [vmem:[%s16657_s1 + $0x8] sm:$0xff]  ;;  %v36_v62 = vshrl.u32 %v16668_v61, 7  ;;  %s11239_s27 = smov 112   ;;  %s11240_s25 = smov 113  }
  0x1c   :  { %8830 = vmatprep.subr.bf16.mxu1 %v8829_v18  ;;  %8862 = vmatprep.subr.bf16.mxu0 %v8861_v19  ;;  %v8835_v34 = vpack.c.bf16 %v317_v31, %v313_v28  ;;  %v8867_v35 = vpack.c.bf16 %v319_v33, %v315_v32  ;;  %v468_v36 = vld [vmem:[%s16657_s1] sm:$0xff]  ;;  %v471_v39 = vmax.f32 %v469_v37, 0.0  ;;  %v144_v43 = vld [vmem:[%s16664_s8 + $0x10] sm:$0xff]  ;;  %v143_v45 = vld [vmem:[%s16664_s8 + $0x8] sm:$0xff]  ;;  %s11241_s24 = smov 111  }
  0x1d   :  { %v470_v38 = vmax.f32 %v468_v36, 0.0  ;;  %v142_v42 = vld [vmem:[%s16664_s8] sm:$0xff]  ;;  %484 = vperm.xlu1 %9922, %v144_v43   ;;  %v145_v46 = vld [vmem:[%s16664_s8 + $0x18] sm:$0xff]  ;;  %v147_v48 = vld [vmem:[%s16664_s8 + $0x28] sm:$0xff]  ;;  %v11590_v0 = vsub.s32 0, %v36_v62  ;;  %v11592_v2 = vsub.s32 2, %v36_v62 }
  0x1e   :  { %v515_v41 = vcombine.high %v471_v39, %v471_v39  ;;  %474 = vperm.xlu0 %9921, %v142_v42   ;;  %v146_v47 = vld [vmem:[%s16664_s8 + $0x20] sm:$0xff]  ;;  %v148_v49 = vld [vmem:[%s16664_s8 + $0x30] sm:$0xff]  ;;  %v149_v50 = vld [vmem:[%s16664_s8 + $0x38] sm:$0xff]  ;;  %v11597_v4 = vsub.s32 1, %v36_v62  ;;  %v11599_v5 = vsub.s32 3, %v36_v62 }
  0x1f   :  { %8832 = vmatpush1.bf16.msra.mxu1 %v8831_v26  ;;  %8864 = vmatpush1.bf16.msra.mxu0 %v8863_v27  ;;  %v514_v40 = vcombine.high %v470_v38, %v470_v38  ;;  %v124_v53 = vld [vmem:[%s16661_s5] sm:$0xff]  ;;  %v125_v54 = vld [vmem:[%s16661_s5 + $0x8] sm:$0xff]  ;;  %v126_v55 = vld [vmem:[%s16661_s5 + $0x10] sm:$0xff]  ;;  %16827 = vst [vmem:[#allocation5_spill] sm:$0xff] %v11590_v0 }
  0x20   :  { %8834 = vmatprep.subr.bf16.mxu1 %v8833_v29  ;;  %8866 = vmatprep.subr.bf16.mxu0 %v8865_v30  ;;  %v127_v56 = vld [vmem:[%s16661_s5 + $0x18] sm:$0xff]  ;;  %v128_v57 = vld [vmem:[%s16661_s5 + $0x20] sm:$0xff]  ;;  %v129_v58 = vld [vmem:[%s16661_s5 + $0x28] sm:$0xff]  ;;  %16828 = vst [vmem:[#allocation6_spill] sm:$0xff] %v11592_v2 }
  0x21   :  { %489 = vperm.xlu1 %9922, %v145_v46   ;;  %v130_v59 = vld [vmem:[%s16661_s5 + $0x30] sm:$0xff]  ;;  %v131_v60 = vld [vmem:[%s16661_s5 + $0x38] sm:$0xff]  ;;  %v8461_v3 = vld [vmem:[%s16659_s3 + $0x1] ss:$4 sm:$0xf]  ;;  %16829 = vst [vmem:[#allocation7_spill] sm:$0xff] %v11597_v4 }
  0x22   :  { %479 = vperm.xlu0 %9921, %v143_v45   ;;  %16830 = vst [vmem:[#allocation8_spill] sm:$0xff] %v11599_v5  ;;  %v33_v8 = vld [vmem:[%s16659_s3] ss:$4 sm:$0xf]  ;;  %v11605_v13 = vrot.slane %v8461_v3, %v11590_v0  ;;  %v11608_v14 = vrot.slane %v8461_v3, %v11592_v2  ;;  %v11611_v17 = vrot.slane %v8461_v3, %v11597_v4 }
  0x23   :  { %8836 = vmatpush1.bf16.msra.mxu1 %v8835_v34  ;;  %8868 = vmatpush1.bf16.msra.mxu0 %v8867_v35  ;;  %v11614_v18 = vrot.slane %v8461_v3, %v11599_v5  ;;  %v11621_v23 = vrot.slane %v33_v8, %v11590_v0  ;;  %v11624_v24 = vrot.slane %v33_v8, %v11597_v4 }
  0x24   :  { %8466 = vmatprep.subr.msk.mxu1 %vm183_vm0, %v514_v40  ;;  %8476 = vmatprep.subr.msk.mxu0 %vm183_vm0, %v515_v41  ;;  %16831 = vst [vmem:[#allocation9_spill] sm:$0xff] %v11605_v13  ;;  %16832 = vst [vmem:[#allocation10_spill] sm:$0xff] %v11608_v14  ;;  %v11631_v29 = vrot.slane %v33_v8, %v11592_v2  ;;  %v11634_v30 = vrot.slane %v33_v8, %v11599_v5 }
  0x25   :  { %499 = vperm.xlu1 %9922, %v147_v48   ;;  %16833 = vst [vmem:[#allocation11_spill] sm:$0xff] %v11611_v17  ;;  %16834 = vst [vmem:[#allocation12_spill] sm:$0xff] %v11614_v18 }
  0x26   :  { %494 = vperm.xlu0 %9921, %v146_v47   ;;  %16837 = vst [vmem:[#allocation15_spill] sm:$0xff] %v11621_v23  ;;  %16838 = vst [vmem:[#allocation16_spill] sm:$0xff] %v11624_v24 }
  0x27   :  { %16841 = vst [vmem:[#allocation19_spill] sm:$0xff] %v11631_v29  ;;  %16842 = vst [vmem:[#allocation20_spill] sm:$0xff] %v11634_v30 }
  0x29   :  { %509 = vperm.xlu1 %9922, %v149_v50  }
  0x2a   :  { %504 = vperm.xlu0 %9921, %v148_v49  }
  0x9c   :  { %v485_v20 = vpop.permute.xlu1 %484 }
  0x9d   :  { %v475_v63 = vpop.permute.xlu0 %474 }
  0xa0   :  { %v490_v62 = vpop.permute.xlu1 %489 }
  0xa1   :  { %v480_v19 = vpop.permute.xlu0 %479 }
  0xd6   :  { %v253_v51 = vpop.f32.mrb[0].mxu0 }
  0xd7   :  { %v8804_v52 = vpop.f32.mrb[1].mxu0  ;;  %391 = vmatmul.mubr.f32.vlgmr.msra.gmra.mrb[0].mxu1 %v253_v51  ;;  %462 = vmatmul.mubr.f32.vlgmr.msra.gmra.mrb[2].mxu0 %v253_v51 }
  0xd8   :  { %8467 = vmatpush1.msk.msra.mxu1 %vm183_vm0, %v470_v38  ;;  %612 = vmatprep.mubr.f32.mxu1 %v16666_v1 }
  0xd9   :  { %8477 = vmatpush1.msk.msra.mxu0 %vm183_vm0, %v471_v39  ;;  %725 = vmatprep.mubr.f32.mxu0 %v16666_v1 }
  0xdb   :  { %8468 = vmatmul.mubr.msk.f32.vlgmr.msra.gmra.mrb[2].mxu1 %vm179_vm1, %v124_v53  ;;  %8478 = vmatmul.mubr.msk.f32.vlgmr.msra.gmra.mrb[4].mxu0 %vm179_vm1, %v124_v53 }
  0xdc   :  { %618 = vmatprep.mubr.f32.mxu1 %v16666_v1  ;;  %731 = vmatprep.mubr.f32.mxu0 %v16666_v1 }
  0xdf   :  { %8469 = vmatmul.mubr.msk.f32.gmra.mrb[4].mxu1 %vm179_vm1, %v125_v54  ;;  %8479 = vmatmul.mubr.msk.f32.gmra.mrb[6].mxu0 %vm179_vm1, %v125_v54 }
  0xe0   :  { %624 = vmatprep.mubr.f32.mxu1 %v16666_v1  ;;  %737 = vmatprep.mubr.f32.mxu0 %v16666_v1 }
  0xe3   :  { %8470 = vmatmul.mubr.msk.f32.gmra.mrb[6].mxu1 %vm179_vm1, %v126_v55  ;;  %8480 = vmatmul.mubr.msk.f32.gmra.mrb[8].mxu0 %vm179_vm1, %v126_v55 }
  0xe4   :  { %630 = vmatprep.mubr.f32.mxu1 %v16666_v1  ;;  %743 = vmatprep.mubr.f32.mxu0 %v16666_v1 }
  0xe7   :  { %8471 = vmatmul.mubr.msk.f32.gmra.mrb[8].mxu1 %vm179_vm1, %v127_v56  ;;  %8481 = vmatmul.mubr.msk.f32.gmra.mrb[10].mxu0 %vm179_vm1, %v127_v56 }
  0xe8   :  { %636 = vmatprep.mubr.f32.mxu1 %v16666_v1  ;;  %749 = vmatprep.mubr.f32.mxu0 %v16666_v1 }
  0xeb   :  { %8472 = vmatmul.mubr.msk.f32.gmra.mrb[10].mxu1 %vm179_vm1, %v128_v57  ;;  %8482 = vmatmul.mubr.msk.f32.gmra.mrb[12].mxu0 %vm179_vm1, %v128_v57 }
  0xec   :  { %642 = vmatprep.mubr.f32.mxu1 %v16666_v1  ;;  %755 = vmatprep.mubr.f32.mxu0 %v16666_v1 }
  0xef   :  { %8473 = vmatmul.mubr.msk.f32.gmra.mrb[12].mxu1 %vm179_vm1, %v129_v58  ;;  %8483 = vmatmul.mubr.msk.f32.gmra.mrb[14].mxu0 %vm179_vm1, %v129_v58 }
  0xf0   :  { %648 = vmatprep.mubr.f32.mxu1 %v16666_v1  ;;  %761 = vmatprep.mubr.f32.mxu0 %v16666_v1 }
  0xf3   :  { %8474 = vmatmul.mubr.msk.f32.gmra.mrb[14].mxu1 %vm179_vm1, %v130_v59  ;;  %8484 = vmatmul.mubr.msk.f32.gmra.mrb[16].mxu0 %vm179_vm1, %v130_v59 }
  0xf4   :  { %654 = vmatprep.mubr.f32.mxu1 %v16666_v1  ;;  %767 = vmatprep.mubr.f32.mxu0 %v16666_v1 }
  0xf7   :  { %8475 = vmatmul.mubr.msk.f32.gmra.mrb[16].mxu1 %vm179_vm1, %v131_v60  ;;  %8485 = vmatmul.mubr.msk.f32.gmra.mrb[18].mxu0 %vm179_vm1, %v131_v60 }
  0xf8   :  { %1171 = vmatprep.mubr.f32.mxu1 %v16666_v1  ;;  %1284 = vmatprep.mubr.f32.mxu0 %v16666_v1 }
 0x1ae   :  { %v614_v6 = vpop.f32.mrb[2].mxu1  ;;  %v727_v7 = vpop.f32.mrb[4].mxu0 }
 0x1af   :  { %v615_v9 = vadd.f32 %v614_v6, %v475_v63  ;;  %v728_v10 = vadd.f32 %v727_v7, %v475_v63  ;;  %v616_v11 = vpop.f32.mrb[3].mxu1  ;;  %v729_v12 = vpop.f32.mrb[5].mxu0 }
 0x1b0   :  { %v617_v15 = vadd.f32 %v616_v11, %v475_v63  ;;  %v730_v16 = vadd.f32 %v729_v12, %v475_v63 }
 0x1b1   :  { %v11616_v21 = vmax.f32 %v615_v9, 0.0  ;;  %v11618_v22 = vmax.f32 %v728_v10, 0.0 }
 0x1b2   :  { %v11626_v25 = vmax.f32 %v617_v15, 0.0  ;;  %v11628_v26 = vmax.f32 %v730_v16, 0.0  ;;  %v620_v27 = vpop.f32.mrb[4].mxu1  ;;  %v733_v28 = vpop.f32.mrb[6].mxu0 }
 0x1b3   :  { %16835 = vst [vmem:[#allocation13_spill] sm:$0xff] %v11616_v21  ;;  %16836 = vst [vmem:[#allocation14_spill] sm:$0xff] %v11618_v22  ;;  %v621_v31 = vadd.f32 %v620_v27, %v480_v19  ;;  %v734_v32 = vadd.f32 %v733_v28, %v480_v19  ;;  %v622_v33 = vpop.f32.mrb[5].mxu1  ;;  %v735_v34 = vpop.f32.mrb[7].mxu0  ;;  %v806_v35 = vmul.f32 %v11616_v21, %v11605_v13 }
 0x1b4   :  { %16839 = vst [vmem:[#allocation17_spill] sm:$0xff] %v11626_v25  ;;  %16840 = vst [vmem:[#allocation18_spill] sm:$0xff] %v11628_v26  ;;  %v808_v36 = vmul.f32 %v11618_v22, %v11608_v14  ;;  %v623_v37 = vadd.f32 %v622_v33, %v480_v19  ;;  %v736_v38 = vadd.f32 %v735_v34, %v480_v19 }
 0x1b5   :  { %v807_v39 = vmul.f32 %v11626_v25, %v11611_v17  ;;  %v809_v40 = vmul.f32 %v11628_v26, %v11614_v18  ;;  %v11644_v41 = vmax.f32 %v621_v31, 0.0  ;;  %v11646_v42 = vmax.f32 %v734_v32, 0.0 }
 0x1b6   :  { %v11650_v43 = vmul.f32 %v11616_v21, %v11621_v23  ;;  %v11654_v44 = vmul.f32 %v11626_v25, %v11624_v24  ;;  %v11656_v45 = vmax.f32 %v623_v37, 0.0  ;;  %v11658_v46 = vmax.f32 %v736_v38, 0.0  ;;  %v626_v47 = vpop.f32.mrb[6].mxu1  ;;  %v739_v48 = vpop.f32.mrb[8].mxu0 }
 0x1b7   :  { %v11662_v49 = vmul.f32 %v11618_v22, %v11631_v29  ;;  %v11666_v50 = vmul.f32 %v11628_v26, %v11634_v30  ;;  %v627_v51 = vadd.f32 %v626_v47, %v485_v20  ;;  %v740_v52 = vadd.f32 %v739_v48, %v485_v20  ;;  %v628_v53 = vpop.f32.mrb[7].mxu1  ;;  %v741_v54 = vpop.f32.mrb[9].mxu0 }
 0x1b8   :  { %v11670_v55 = vpack.i.bf16 %v11644_v41, %v11616_v21  ;;  %v11674_v56 = vpack.i.bf16 %v11646_v42, %v11618_v22  ;;  %v629_v57 = vadd.f32 %v628_v53, %v485_v20  ;;  %v742_v58 = vadd.f32 %v741_v54, %v485_v20  ;;  %v495_v38 = vpop.permute.xlu0 %494 }
 0x1b9   :  { %v11678_v59 = vpack.i.bf16 %v11656_v45, %v11626_v25  ;;  %v11682_v60 = vpack.i.bf16 %v11658_v46, %v11628_v26  ;;  %v11684_v63 = vmax.f32 %v627_v51, 0.0  ;;  %v11686_v3 = vmax.f32 %v740_v52, 0.0 }
 0x1ba   :  { %16843 = vst [vmem:[#allocation21_spill] sm:$0xff] %v11670_v55  ;;  %16844 = vst [vmem:[#allocation22_spill] sm:$0xff] %v11674_v56  ;;  %9924 = vrot.lane.b32.xlu0 %v11670_v55, %s11234_s17  ;;  %v810_v6 = vmul.f32 %v11644_v41, %v11605_v13  ;;  %v811_v7 = vmul.f32 %v11656_v45, %v11611_v17  ;;  %v11694_v8 = vmax.f32 %v629_v57, 0.0  ;;  %v11696_v9 = vmax.f32 %v742_v58, 0.0  ;;  %v632_v10 = vpop.f32.mrb[8].mxu1  ;;  %v745_v11 = vpop.f32.mrb[10].mxu0 }
 0x1bb   :  { %16845 = vst [vmem:[#allocation23_spill] sm:$0xff] %v11678_v59  ;;  %16846 = vst [vmem:[#allocation24_spill] sm:$0xff] %v11682_v60  ;;  %9934 = vrot.lane.b32.xlu1 %v11678_v59, %s11234_s17  ;;  %v812_v12 = vmul.f32 %v11646_v42, %v11608_v14  ;;  %v813_v15 = vmul.f32 %v11658_v46, %v11614_v18  ;;  %v633_v16 = vadd.f32 %v632_v10, %v490_v62  ;;  %v634_v20 = vpop.f32.mrb[9].mxu1  ;;  %v747_v27 = vpop.f32.mrb[11].mxu0 }
 0x1bc   :  { %16847 = vst [vmem:[#allocation25_spill] sm:$0xff] %v11684_v63  ;;  %16848 = vst [vmem:[#allocation26_spill] sm:$0xff] %v11686_v3  ;;  %v746_v19 = vadd.f32 %v745_v11, %v490_v62  ;;  %v11704_v28 = vpack.i.bf16 %v810_v6, %v806_v35  ;;  %v11706_v31 = vpack.i.bf16 %v811_v7, %v807_v39 }
 0x1bd   :  { %16849 = vst [vmem:[#allocation27_spill] sm:$0xff] %v11694_v8  ;;  %v635_v32 = vadd.f32 %v634_v20, %v490_v62  ;;  %v748_v33 = vadd.f32 %v747_v27, %v490_v62  ;;  %v11708_v34 = vpack.i.bf16 %v812_v12, %v808_v36  ;;  %v11710_v37 = vpack.i.bf16 %v813_v15, %v809_v40 }
 0x1be   :  { %16850 = vst [vmem:[#allocation28_spill] sm:$0xff] %v11704_v28  ;;  %16851 = vst [vmem:[#allocation29_spill] sm:$0xff] %v11706_v31  ;;  %v11712_v47 = vmax.f32 %v633_v16, 0.0  ;;  %v11714_v48 = vmax.f32 %v746_v19, 0.0  ;;  %9929 = vrot.lane.b32.xlu0 %v11674_v56, %s11234_s17  ;;  %v814_v35 = vmul.f32 %v11684_v63, %v11605_v13  ;;  %v815_v39 = vmul.f32 %v11694_v8, %v11611_v17  ;;  %v638_v40 = vpop.f32.mrb[10].mxu1  ;;  %v751_v52 = vpop.f32.mrb[12].mxu0 }
 0x1bf   :  { %16852 = vst [vmem:[#allocation30_spill] sm:$0xff] %v11710_v37  ;;  %v11722_v51 = vmax.f32 %v635_v32, 0.0  ;;  %v11724_v36 = vmax.f32 %v748_v33, 0.0  ;;  %9939 = vrot.lane.b32.xlu1 %v11682_v60, %s11234_s17  ;;  %v816_v53 = vmul.f32 %v11686_v3, %v11608_v14  ;;  %v817_v54 = vmul.f32 %v11696_v9, %v11614_v18  ;;  %v640_v62 = vpop.f32.mrb[11].mxu1  ;;  %v753_v6 = vpop.f32.mrb[13].mxu0 }
 0x1c0   :  { %16853 = vst [vmem:[#allocation31_spill] sm:$0xff] %v11714_v48  ;;  %v639_v57 = vadd.f32 %v638_v40, %v495_v38  ;;  %v752_v58 = vadd.f32 %v751_v52, %v495_v38  ;;  %v11734_v7 = vpack.i.bf16 %v11712_v47, %v11684_v63  ;;  %v11738_v10 = vpack.i.bf16 %v11714_v48, %v11686_v3  ;;  %v500_v19 = vpop.permute.xlu1 %499 }
 0x1c1   :  { %v641_v11 = vadd.f32 %v640_v62, %v495_v38  ;;  %v754_v12 = vadd.f32 %v753_v6, %v495_v38  ;;  %v11742_v15 = vpack.i.bf16 %v11722_v51, %v11694_v8  ;;  %v11746_v16 = vpack.i.bf16 %v11724_v36, %v11696_v9 }
 0x1c2   :  { %16854 = vst [vmem:[#allocation32_spill] sm:$0xff] %v11734_v7  ;;  %16855 = vst [vmem:[#allocation33_spill] sm:$0xff] %v11738_v10  ;;  %v11748_v20 = vmax.f32 %v639_v57, 0.0  ;;  %v11750_v27 = vmax.f32 %v752_v58, 0.0  ;;  %9944 = vrot.lane.b32.xlu0 %v11734_v7, %s11234_s17  ;;  %v818_v32 = vmul.f32 %v11712_v47, %v11605_v13  ;;  %v819_v33 = vmul.f32 %v11722_v51, %v11611_v17  ;;  %v644_v52 = vpop.f32.mrb[12].mxu1  ;;  %v757_v62 = vpop.f32.mrb[14].mxu0 }
 0x1c3   :  { %16856 = vst [vmem:[#allocation34_spill] sm:$0xff] %v11742_v15  ;;  %16857 = vst [vmem:[#allocation35_spill] sm:$0xff] %v11746_v16  ;;  %v11758_v38 = vmax.f32 %v641_v11, 0.0  ;;  %v11760_v40 = vmax.f32 %v754_v12, 0.0  ;;  %9954 = vrot.lane.b32.xlu1 %v11742_v15, %s11234_s17  ;;  %v820_v57 = vmul.f32 %v11714_v48, %v11608_v14  ;;  %v821_v58 = vmul.f32 %v11724_v36, %v11614_v18  ;;  %v646_v61 = vpop.f32.mrb[13].mxu1  ;;  %v759_v5 = vpop.f32.mrb[15].mxu0 }
 0x1c4   :  { %16858 = vst [vmem:[#allocation36_spill] sm:$0xff] %v11748_v20  ;;  %16859 = vst [vmem:[#allocation37_spill] sm:$0xff] %v11750_v27  ;;  %v645_v6 = vadd.f32 %v644_v52, %v500_v19  ;;  %v758_v1 = vadd.f32 %v757_v62, %v500_v19  ;;  %v11768_v2 = vpack.i.bf16 %v818_v32, %v814_v35  ;;  %v505_v15 = vpop.permute.xlu0 %504 }
 0x1c5   :  { %16860 = vst [vmem:[#allocation38_spill] sm:$0xff] %v11758_v38  ;;  %16861 = vst [vmem:[#allocation39_spill] sm:$0xff] %v11760_v40  ;;  %v11770_v11 = vpack.i.bf16 %v819_v33, %v815_v39  ;;  %v647_v12 = vadd.f32 %v646_v61, %v500_v19  ;;  %v760_v4 = vadd.f32 %v759_v5, %v500_v19 }
 0x1c6   :  { %16862 = vst [vmem:[#allocation40_spill] sm:$0xff] %v11768_v2  ;;  %v11772_v0 = vpack.i.bf16 %v820_v57, %v816_v53  ;;  %v11774_v7 = vpack.i.bf16 %v821_v58, %v817_v54  ;;  %v11776_v60 = vmax.f32 %v645_v6, 0.0  ;;  %v11778_v56 = vmax.f32 %v758_v1, 0.0  ;;  %9949 = vrot.lane.b32.xlu0 %v11738_v10, %s11234_s17  ;;  %v650_v53 = vpop.f32.mrb[14].mxu1  ;;  %v763_v54 = vpop.f32.mrb[16].mxu0 }
 0x1c7   :  { %16863 = vst [vmem:[#allocation41_spill] sm:$0xff] %v11770_v11  ;;  %v822_v35 = vmul.f32 %v11748_v20, %v11605_v13  ;;  %v823_v39 = vmul.f32 %v11758_v38, %v11611_v17  ;;  %v11786_v61 = vmax.f32 %v647_v12, 0.0  ;;  %v11788_v5 = vmax.f32 %v760_v4, 0.0  ;;  %9959 = vrot.lane.b32.xlu1 %v11746_v16, %s11234_s17  ;;  %v652_v52 = vpop.f32.mrb[15].mxu1  ;;  %v765_v62 = vpop.f32.mrb[17].mxu0 }
 0x1c8   :  { %16864 = vst [vmem:[#allocation42_spill] sm:$0xff] %v11772_v0  ;;  %16865 = vst [vmem:[#allocation43_spill] sm:$0xff] %v11774_v7  ;;  %v824_v1 = vmul.f32 %v11750_v27, %v11608_v14  ;;  %v825_v19 = vmul.f32 %v11760_v40, %v11614_v18  ;;  %v651_v32 = vadd.f32 %v650_v53, %v505_v15 }
 0x1c9   :  { %16866 = vst [vmem:[#allocation44_spill] sm:$0xff] %v11776_v60  ;;  %16867 = vst [vmem:[#allocation45_spill] sm:$0xff] %v11778_v56  ;;  %v764_v33 = vadd.f32 %v763_v54, %v505_v15  ;;  %v11798_v57 = vpack.i.bf16 %v11776_v60, %v11748_v20  ;;  %v11802_v4 = vpack.i.bf16 %v11778_v56, %v11750_v27  ;;  %v510_v54 = vpop.permute.xlu1 %509 }
 0x1ca   :  { %16868 = vst [vmem:[#allocation46_spill] sm:$0xff] %v11786_v61  ;;  %16869 = vst [vmem:[#allocation47_spill] sm:$0xff] %v11788_v5  ;;  %v653_v58 = vadd.f32 %v652_v52, %v505_v15  ;;  %v766_v6 = vadd.f32 %v765_v62, %v505_v15  ;;  %v11806_v12 = vpack.i.bf16 %v11786_v61, %v11758_v38  ;;  %v11812_v16 = vmax.f32 %v651_v32, 0.0  ;;  %v656_v55 = vpop.f32.mrb[16].mxu1  ;;  %v769_v22 = vpop.f32.mrb[18].mxu0 }
 0x1cb   :  { %16870 = vst [vmem:[#allocation48_spill] sm:$0xff] %v11798_v57  ;;  %16871 = vst [vmem:[#allocation49_spill] sm:$0xff] %v11802_v4  ;;  %v11810_v53 = vpack.i.bf16 %v11788_v5, %v11760_v40  ;;  %v11814_v10 = vmax.f32 %v764_v33, 0.0  ;;  %9964 = vrot.lane.b32.xlu0 %v11798_v57, %s11234_s17  ;;  %v826_v52 = vmul.f32 %v11776_v60, %v11605_v13  ;;  %v658_v26 = vpop.f32.mrb[17].mxu1  ;;  %v771_v25 = vpop.f32.mrb[19].mxu0 }
 0x1cc   :  { %16872 = vst [vmem:[#allocation50_spill] sm:$0xff] %v11806_v12  ;;  %16874 = vst [vmem:[#allocation52_spill] sm:$0xff] %v11812_v16  ;;  %v827_v15 = vmul.f32 %v11786_v61, %v11611_v17  ;;  %v11822_v62 = vmax.f32 %v653_v58, 0.0  ;;  %v11824_v59 = vmax.f32 %v766_v6, 0.0  ;;  %9974 = vrot.lane.b32.xlu1 %v11806_v12, %s11234_s17  ;;  %v828_v32 = vmul.f32 %v11778_v56, %v11608_v14 }
 0x1cd   :  { %16873 = vst [vmem:[#allocation51_spill] sm:$0xff] %v11810_v53  ;;  %16875 = vst [vmem:[#allocation53_spill] sm:$0xff] %v11814_v10  ;;  %v829_v33 = vmul.f32 %v11788_v5, %v11614_v18  ;;  %v657_v57 = vadd.f32 %v656_v55, %v510_v54  ;;  %v770_v21 = vadd.f32 %v769_v22, %v510_v54 }
 0x1ce   :  { %16876 = vst [vmem:[#allocation54_spill] sm:$0xff] %v11822_v62  ;;  %16877 = vst [vmem:[#allocation55_spill] sm:$0xff] %v11824_v59  ;;  %v11832_v7 = vpack.i.bf16 %v826_v52, %v822_v35  ;;  %v11834_v58 = vpack.i.bf16 %v827_v15, %v823_v39  ;;  %v659_v6 = vadd.f32 %v658_v26, %v510_v54 }
 0x1cf   :  { %v772_v0 = vadd.f32 %v771_v25, %v510_v54  ;;  %v11836_v11 = vpack.i.bf16 %v828_v32, %v824_v1  ;;  %v11838_v2 = vpack.i.bf16 %v829_v33, %v825_v19  ;;  %v11840_v12 = vmax.f32 %v657_v57, 0.0  ;;  %9969 = vrot.lane.b32.xlu0 %v11802_v4, %s11234_s17 }
 0x1d0   :  { %16878 = vst [vmem:[#allocation56_spill] sm:$0xff] %v11832_v7  ;;  %v11842_v37 = vmax.f32 %v770_v21, 0.0  ;;  %v830_v22 = vmul.f32 %v11812_v16, %v11605_v13  ;;  %v831_v55 = vmul.f32 %v11822_v62, %v11611_v17  ;;  %v11850_v35 = vmax.f32 %v659_v6, 0.0  ;;  %9979 = vrot.lane.b32.xlu1 %v11810_v53, %s11234_s17 }
 0x1d1   :  { %16879 = vst [vmem:[#allocation57_spill] sm:$0xff] %v11840_v12  ;;  %v11852_v25 = vmax.f32 %v772_v0, 0.0  ;;  %v832_v21 = vmul.f32 %v11814_v10, %v11608_v14  ;;  %v833_v26 = vmul.f32 %v11824_v59, %v11614_v18  ;;  %v11862_v39 = vpack.i.bf16 %v11840_v12, %v11812_v16 }
 0x1d2   :  { %16880 = vst [vmem:[#allocation58_spill] sm:$0xff] %v11842_v37  ;;  %16881 = vst [vmem:[#allocation59_spill] sm:$0xff] %v11850_v35  ;;  %v11866_v1 = vpack.i.bf16 %v11842_v37, %v11814_v10  ;;  %v834_v0 = vmul.f32 %v11840_v12, %v11605_v13  ;;  %v836_v19 = vmul.f32 %v11842_v37, %v11608_v14 }
 0x1d3   :  { %16882 = vst [vmem:[#allocation60_spill] sm:$0xff] %v11852_v25  ;;  %16883 = vst [vmem:[#allocation61_spill] sm:$0xff] %v11862_v39  ;;  %v11874_v57 = vpack.i.bf16 %v11850_v35, %v11822_v62  ;;  %v11878_v54 = vpack.i.bf16 %v11852_v25, %v11824_v59  ;;  %v835_v52 = vmul.f32 %v11850_v35, %v11611_v17  ;;  %9984 = vrot.lane.b32.xlu0 %v11862_v39, %s11234_s17 }
 0x1d4   :  { %16884 = vst [vmem:[#allocation62_spill] sm:$0xff] %v11866_v1  ;;  %v837_v15 = vmul.f32 %v11852_v25, %v11614_v18  ;;  %v11886_v32 = vpack.i.bf16 %v834_v0, %v830_v22  ;;  %v11888_v33 = vpack.i.bf16 %v836_v19, %v832_v21  ;;  %v842_v6 = vmul.f32 %v11644_v41, %v11621_v23 }
 0x1d5   :  { %16885 = vst [vmem:[#allocation63_spill] sm:$0xff] %v11874_v57  ;;  %16886 = vst [vmem:[#allocation64_spill] sm:$0xff] %v11878_v54  ;;  %v843_v14 = vmul.f32 %v11656_v45, %v11624_v24  ;;  %9999 = vrot.lane.b32.xlu1 %v11874_v57, %s11234_s17  ;;  %v11896_v17 = vpack.i.bf16 %v835_v52, %v831_v55  ;;  %v844_v18 = vmul.f32 %v11646_v42, %v11631_v29 }
 0x1d6   :  { %v11898_v13 = vpack.i.bf16 %v837_v15, %v833_v26  ;;  %v845_v22 = vmul.f32 %v11658_v46, %v11634_v30  ;;  %v11905_v21 = vpack.i.bf16 %v842_v6, %v11650_v43  ;;  %v846_v19 = vmul.f32 %v11684_v63, %v11621_v23 }
 0x1d7   :  { %v11908_v0 = vpack.i.bf16 %v843_v14, %v11654_v44  ;;  %v850_v55 = vmul.f32 %v11712_v47, %v11621_v23  ;;  %v11915_v26 = vpack.i.bf16 %v844_v18, %v11662_v49  ;;  %v847_v15 = vmul.f32 %v11694_v8, %v11624_v24  ;;  %9989 = vrot.lane.b32.xlu0 %v11866_v1, %s11234_s17 }
 0x1d8   :  { %v11918_v52 = vpack.i.bf16 %v845_v22, %v11666_v50  ;;  %v851_v43 = vmul.f32 %v11722_v51, %v11624_v24  ;;  %v848_v44 = vmul.f32 %v11686_v3, %v11631_v29  ;;  %v852_v18 = vmul.f32 %v11714_v48, %v11631_v29 }
 0x1d9   :  { %v11926_v14 = vpack.i.bf16 %v850_v55, %v846_v19  ;;  %v849_v49 = vmul.f32 %v11696_v9, %v11634_v30  ;;  %10004 = vrot.lane.b32.xlu1 %v11878_v54, %s11234_s17  ;;  %v853_v6 = vmul.f32 %v11724_v36, %v11634_v30  ;;  %v854_v22 = vmul.f32 %v11748_v20, %v11621_v23 }
 0x1da   :  { %v11936_v50 = vpack.i.bf16 %v851_v43, %v847_v15  ;;  %v858_v19 = vmul.f32 %v11776_v60, %v11621_v23  ;;  %v11944_v55 = vpack.i.bf16 %v852_v18, %v848_v44  ;;  %v855_v1 = vmul.f32 %v11758_v38, %v11624_v24 }
 0x1db   :  { %v859_v57 = vmul.f32 %v11786_v61, %v11624_v24  ;;  %v856_v15 = vmul.f32 %v11750_v27, %v11631_v29  ;;  %v11952_v43 = vpack.i.bf16 %v853_v6, %v849_v49  ;;  %v860_v39 = vmul.f32 %v11778_v56, %v11631_v29  ;;  %9994 = vrot.lane.b32.xlu0 %v11704_v28, %s11235_s18 }
 0x1dc   :  { %v11954_v54 = vpack.i.bf16 %v858_v19, %v854_v22  ;;  %v857_v44 = vmul.f32 %v11760_v40, %v11634_v30  ;;  %v861_v53 = vmul.f32 %v11788_v5, %v11634_v30  ;;  %v862_v49 = vmul.f32 %v11812_v16, %v11621_v23 }
 0x1dd   :  { %v11962_v18 = vpack.i.bf16 %v859_v57, %v855_v1  ;;  %v866_v6 = vmul.f32 %v11840_v12, %v11621_v23  ;;  %10009 = vrot.lane.b32.xlu1 %v11706_v31, %s11235_s18  ;;  %v11972_v22 = vpack.i.bf16 %v860_v39, %v856_v15  ;;  %v863_v19 = vmul.f32 %v11822_v62, %v11624_v24 }
 0x1de   :  { %v867_v1 = vmul.f32 %v11850_v35, %v11624_v24  ;;  %v864_v57 = vmul.f32 %v11814_v10, %v11631_v29  ;;  %v11980_v4 = vpack.i.bf16 %v861_v53, %v857_v44  ;;  %v868_v23 = vmul.f32 %v11842_v37, %v11631_v29  ;;  %v16888_v53 = vld [vmem:[#allocation30_spill] sm:$0xff]  ;;  %v16899_v29 = vld [vmem:[#allocation29_spill] sm:$0xff] }
 0x1df   :  { %v11982_v28 = vpack.i.bf16 %v866_v6, %v862_v49  ;;  %v865_v39 = vmul.f32 %v11824_v59, %v11634_v30  ;;  %v869_v31 = vmul.f32 %v11852_v25, %v11634_v30  ;;  %10014 = vrot.lane.b32.xlu0 %v11708_v34, %s11235_s18  ;;  %v16890_v49 = vld [vmem:[#allocation40_spill] sm:$0xff]  ;;  %v16891_v6 = vld [vmem:[#allocation41_spill] sm:$0xff] }
 0x1e0   :  { %v11988_v15 = vpack.i.bf16 %v867_v1, %v863_v19  ;;  %v11994_v24 = vpack.i.bf16 %v868_v23, %v864_v57  ;;  %v16892_v19 = vld [vmem:[#allocation42_spill] sm:$0xff]  ;;  %v16893_v1 = vld [vmem:[#allocation43_spill] sm:$0xff]  ;;  %v16894_v23 = vld [vmem:[#allocation17_spill] sm:$0xff] }
 0x1e1   :  { %10019 = vrot.lane.b32.xlu1 %v16888_v53, %s11235_s18  ;;  %v11998_v44 = vpack.i.bf16 %v869_v31, %v865_v39  ;;  %v16896_v30 = vld [vmem:[#allocation13_spill] sm:$0xff]  ;;  %v16900_v57 = vld [vmem:[#allocation42_spill] sm:$0xff]  ;;  %v16901_v8 = vmov %v16893_v1  ;;  %v16902_v31 = vlaneseq  ;;  %v16904_v39 = vld [vmem:[#allocation56_spill] sm:$0xff] }
 0x1e2   :  { %16887 = vst [vmem:[#allocation65_spill] sm:$0xff] %v11994_v24 }
 0x1e3   :  { %16889 = vst [vmem:[#allocation30_spill] sm:$0xff] %v11998_v44  ;;  %10024 = vrot.lane.b32.xlu0 %v16890_v49, %s11235_s18 }
 0x1e5   :  { %10029 = vrot.lane.b32.xlu1 %v16891_v6, %s11235_s18 }
 0x1e7   :  { %10034 = vrot.lane.b32.xlu0 %v16892_v19, %s11235_s18  ;;  %v16897_v19 = vld [vmem:[#allocation14_spill] sm:$0xff] }
 0x1e9   :  { %10039 = vrot.lane.b32.xlu1 %v16893_v1, %s11235_s18  ;;  %v12105_v1 = vand.u32 127, %v16902_v31 }
 0x1eb   :  { %10044 = vrot.lane.b32.xlu0 %v11832_v7, %s11235_s18  ;;  %v16898_v7 = vld [vmem:[#allocation28_spill] sm:$0xff]  ;;  %16903 = vst [vmem:[#allocation40_spill] sm:$0xff] %v12105_v1  ;;  %vm1041_vm3 = vcmp.lt.s32.totalorder %v12105_v1, 16  ;;  %vm936_vm4 = vcmp.lt.s32.totalorder %v12105_v1, 17  ;;  %vm1647_vm6 = vcmp.lt.s32.totalorder %v12105_v1, 15  ;;  %vm2066_vm7 = vcmp.lt.s32.totalorder %v12105_v1, 1 }
 0x1ec   :  { %vm2679_vm8 = vcmp.lt.s32.totalorder %v12105_v1, 127  ;;  %vm3203_vm9 = vcmp.lt.s32.totalorder %v12105_v1, 112  ;;  %vm3098_vm10 = vcmp.lt.s32.totalorder %v12105_v1, 113  ;;  %vm3808_vm11 = vcmp.lt.s32.totalorder %v12105_v1, 111 }
 0x1ed   :  { %10049 = vrot.lane.b32.xlu1 %v11834_v58, %s11235_s18 }
 0x1ef   :  { %10054 = vrot.lane.b32.xlu0 %v11836_v11, %s11235_s18 }
 0x1f1   :  { %10059 = vrot.lane.b32.xlu1 %v11838_v2, %s11235_s18 }
 0x1f3   :  { %10064 = vrot.lane.b32.xlu0 %v11886_v32, %s11235_s18 }
 0x1f5   :  { %10079 = vrot.lane.b32.xlu1 %v11896_v17, %s11235_s18 }
 0x1f7   :  { %10069 = vrot.lane.b32.xlu0 %v11888_v33, %s11235_s18 }
 0x1f9   :  { %10084 = vrot.lane.b32.xlu1 %v11898_v13, %s11235_s18 }
 0x1fb   :  { %10074 = vrot.lane.b32.xlu0 %v11905_v21, %s11236_s19 }
 0x1fd   :  { %10089 = vrot.lane.b32.xlu1 %v11908_v0, %s11236_s19 }
 0x1ff   :  { %10094 = vrot.lane.b32.xlu0 %v11915_v26, %s11236_s19 }
 0x201   :  { %10099 = vrot.lane.b32.xlu1 %v11918_v52, %s11236_s19 }
 0x203   :  { %10104 = vrot.lane.b32.xlu0 %v11926_v14, %s11236_s19 }
 0x205   :  { %10109 = vrot.lane.b32.xlu1 %v11936_v50, %s11236_s19 }
 0x207   :  { %10114 = vrot.lane.b32.xlu0 %v11944_v55, %s11236_s19 }
 0x209   :  { %10119 = vrot.lane.b32.xlu1 %v11952_v43, %s11236_s19 }
 0x20b   :  { %10124 = vrot.lane.b32.xlu0 %v11954_v54, %s11236_s19 }
 0x20d   :  { %10129 = vrot.lane.b32.xlu1 %v11962_v18, %s11236_s19 }
 0x20f   :  { %10134 = vrot.lane.b32.xlu0 %v11972_v22, %s11236_s19 }
 0x211   :  { %10139 = vrot.lane.b32.xlu1 %v11980_v4, %s11236_s19 }
 0x213   :  { %10144 = vrot.lane.b32.xlu0 %v11982_v28, %s11236_s19 }
 0x215   :  { %10154 = vrot.lane.b32.xlu1 %v11988_v15, %s11236_s19 }
 0x217   :  { %10149 = vrot.lane.b32.xlu0 %v11994_v24, %s11236_s19 }
 0x219   :  { %10159 = vrot.lane.b32.xlu1 %v11998_v44, %s11236_s19 }
 0x21b   :  { %10164 = vrot.lane.b32.xlu0 %v16898_v7, %s11237_s4 }
 0x21d   :  { %10169 = vrot.lane.b32.xlu1 %v16899_v29, %s11237_s4 }
 0x21f   :  { %10174 = vrot.lane.b32.xlu0 %v11708_v34, %s11237_s4 }
 0x221   :  { %10179 = vrot.lane.b32.xlu1 %v16888_v53, %s11237_s4 }
 0x223   :  { %10184 = vrot.lane.b32.xlu0 %v16890_v49, %s11237_s4 }
 0x225   :  { %10189 = vrot.lane.b32.xlu1 %v16891_v6, %s11237_s4 }
 0x227   :  { %10194 = vrot.lane.b32.xlu0 %v16900_v57, %s11237_s4 }
 0x229   :  { %10199 = vrot.lane.b32.xlu1 %v16901_v8, %s11237_s4 }
 0x22b   :  { %10204 = vrot.lane.b32.xlu0 %v16904_v39, %s11237_s4 }
 0x22c   :  { %v9925_v10 = vpop.permute.xlu0 %9924 }
 0x22d   :  { %10209 = vrot.lane.b32.xlu1 %v11834_v58, %s11237_s4  ;;  %v9927_v37 = vunpack.i.h.bf16 %v9925_v10  ;;  %v9926_v16 = vunpack.i.l.bf16 %v9925_v10  ;;  %v9935_v12 = vpop.permute.xlu1 %9934 }
 0x22e   :  { %v9937_v59 = vunpack.i.h.bf16 %v9935_v12  ;;  %v9936_v25 = vunpack.i.l.bf16 %v9935_v12 }
 0x22f   :  { %10214 = vrot.lane.b32.xlu0 %v11836_v11, %s11237_s4 }
 0x230   :  { %v9930_v31 = vpop.permute.xlu0 %9929  ;;  %v1058_v62 = vsel %vm1041_vm3, %v9926_v16, %v9936_v25  ;;  %v1059_v35 = vsel %vm1041_vm3, %v9927_v37, %v9937_v59 }
 0x231   :  { %10219 = vrot.lane.b32.xlu1 %v11838_v2, %s11237_s4  ;;  %v9932_v27 = vunpack.i.h.bf16 %v9930_v31  ;;  %v9931_v56 = vunpack.i.l.bf16 %v9930_v31  ;;  %v9940_v20 = vpop.permute.xlu1 %9939  ;;  %v8869_v10 = vpack.c.bf16 %v1059_v35, %v1058_v62 }
 0x232   :  { %v9942_v60 = vunpack.i.h.bf16 %v9940_v20  ;;  %v9941_v40 = vunpack.i.l.bf16 %v9940_v20 }
 0x233   :  { %10224 = vrot.lane.b32.xlu0 %v11886_v32, %s11237_s4  ;;  %v1050_v12 = vsel %vm1041_vm3, %v9936_v25, %v9931_v56  ;;  %v1051_v5 = vsel %vm1041_vm3, %v9937_v59, %v9932_v27  ;;  %8870 = vmatprep.subr.bf16.mxu1 %v8869_v10 }
 0x234   :  { %v1066_v31 = vsel %vm1041_vm3, %v9941_v40, %v9926_v16  ;;  %v1067_v62 = vsel %vm1041_vm3, %v9942_v60, %v9927_v37  ;;  %v9945_v20 = vpop.permute.xlu0 %9944  ;;  %v1042_v35 = vsel %vm1041_vm3, %v9931_v56, %v9941_v40  ;;  %v1043_v25 = vsel %vm1041_vm3, %v9932_v27, %v9942_v60 }
 0x235   :  { %10239 = vrot.lane.b32.xlu1 %v11896_v17, %s11237_s4  ;;  %v9947_v38 = vunpack.i.h.bf16 %v9945_v20  ;;  %v9946_v61 = vunpack.i.l.bf16 %v9945_v20  ;;  %v9955_v59 = vpop.permute.xlu1 %9954  ;;  %v8871_v10 = vpack.c.bf16 %v1067_v62, %v1066_v31  ;;  %v8885_v3 = vpack.c.bf16 %v1043_v25, %v1042_v35 }
 0x236   :  { %v9957_v48 = vunpack.i.h.bf16 %v9955_v59  ;;  %v9956_v63 = vunpack.i.l.bf16 %v9955_v59  ;;  %v8887_v16 = vpack.c.bf16 %v1051_v5, %v1050_v12 }
 0x237   :  { %10229 = vrot.lane.b32.xlu0 %v11888_v33, %s11237_s4  ;;  %8872 = vmatpush1.bf16.msra.mxu1 %v8871_v10 }
 0x238   :  { %8886 = vmatprep.subr.bf16.mxu0 %v8885_v3  ;;  %v9950_v56 = vpop.permute.xlu0 %9949  ;;  %v1060_v60 = vsel %vm1041_vm3, %v9946_v61, %v9956_v63  ;;  %v1061_v37 = vsel %vm1041_vm3, %v9947_v38, %v9957_v48 }
 0x239   :  { %10244 = vrot.lane.b32.xlu1 %v11898_v13, %s11237_s4  ;;  %8888 = vmatpush1.bf16.msra.mxu0 %v8887_v16  ;;  %v9952_v27 = vunpack.i.h.bf16 %v9950_v56  ;;  %v9951_v40 = vunpack.i.l.bf16 %v9950_v56  ;;  %v9960_v31 = vpop.permute.xlu1 %9959  ;;  %v8873_v62 = vpack.c.bf16 %v1061_v37, %v1060_v60 }
 0x23a   :  { %v9962_v20 = vunpack.i.h.bf16 %v9960_v31  ;;  %v9961_v35 = vunpack.i.l.bf16 %v9960_v31 }
 0x23b   :  { %10234 = vrot.lane.b32.xlu0 %v11905_v21, %s11238_s20  ;;  %v1052_v3 = vsel %vm1041_vm3, %v9956_v63, %v9951_v40  ;;  %v1053_v5 = vsel %vm1041_vm3, %v9957_v48, %v9952_v27  ;;  %8874 = vmatprep.subr.bf16.mxu1 %v8873_v62 }
 0x23c   :  { %v1068_v12 = vsel %vm1041_vm3, %v9961_v35, %v9946_v61  ;;  %v1069_v25 = vsel %vm1041_vm3, %v9962_v20, %v9947_v38  ;;  %v1044_v10 = vsel %vm1041_vm3, %v9951_v40, %v9961_v35  ;;  %v1045_v63 = vsel %vm1041_vm3, %v9952_v27, %v9962_v20 }
 0x23d   :  { %10249 = vrot.lane.b32.xlu1 %v11908_v0, %s11238_s20  ;;  %v9965_v59 = vpop.permute.xlu0 %9964  ;;  %v8875_v60 = vpack.c.bf16 %v1069_v25, %v1068_v12  ;;  %v8889_v37 = vpack.c.bf16 %v1045_v63, %v1044_v10  ;;  %v8891_v38 = vpack.c.bf16 %v1053_v5, %v1052_v3 }
 0x23e   :  { %v9967_v16 = vunpack.i.h.bf16 %v9965_v59  ;;  %v9966_v56 = vunpack.i.l.bf16 %v9965_v59  ;;  %v9975_v48 = vpop.permute.xlu1 %9974 }
 0x23f   :  { %v9977_v31 = vunpack.i.h.bf16 %v9975_v48  ;;  %v9976_v61 = vunpack.i.l.bf16 %v9975_v48  ;;  %10254 = vrot.lane.b32.xlu0 %v11915_v26, %s11238_s20  ;;  %8876 = vmatpush1.bf16.msra.mxu1 %v8875_v60 }
 0x240   :  { %8890 = vmatprep.subr.bf16.mxu0 %v8889_v37 }
 0x241   :  { %10259 = vrot.lane.b32.xlu1 %v11918_v52, %s11238_s20  ;;  %v9970_v40 = vpop.permute.xlu0 %9969  ;;  %8892 = vmatpush1.bf16.msra.mxu0 %v8891_v38  ;;  %v1062_v27 = vsel %vm1041_vm3, %v9966_v56, %v9976_v61  ;;  %v1063_v62 = vsel %vm1041_vm3, %v9967_v16, %v9977_v31 }
 0x242   :  { %v9972_v20 = vunpack.i.h.bf16 %v9970_v40  ;;  %v9971_v35 = vunpack.i.l.bf16 %v9970_v40  ;;  %v9980_v12 = vpop.permute.xlu1 %9979  ;;  %v8877_v25 = vpack.c.bf16 %v1063_v62, %v1062_v27 }
 0x243   :  { %v9982_v59 = vunpack.i.h.bf16 %v9980_v12  ;;  %v9981_v10 = vunpack.i.l.bf16 %v9980_v12  ;;  %10264 = vrot.lane.b32.xlu0 %v11926_v14, %s11238_s20 }
 0x244   :  { %v1054_v3 = vsel %vm1041_vm3, %v9976_v61, %v9971_v35  ;;  %v1055_v5 = vsel %vm1041_vm3, %v9977_v31, %v9972_v20  ;;  %8878 = vmatprep.subr.bf16.mxu1 %v8877_v25 }
 0x245   :  { %v1070_v63 = vsel %vm1041_vm3, %v9981_v10, %v9966_v56  ;;  %v1071_v48 = vsel %vm1041_vm3, %v9982_v59, %v9967_v16  ;;  %10269 = vrot.lane.b32.xlu1 %v11936_v50, %s11238_s20  ;;  %v9985_v60 = vpop.permute.xlu0 %9984  ;;  %v1046_v37 = vsel %vm1041_vm3, %v9971_v35, %v9981_v10  ;;  %v1047_v61 = vsel %vm1041_vm3, %v9972_v20, %v9982_v59 }
 0x246   :  { %v9987_v38 = vunpack.i.h.bf16 %v9985_v60  ;;  %v9986_v40 = vunpack.i.l.bf16 %v9985_v60  ;;  %v8879_v27 = vpack.c.bf16 %v1071_v48, %v1070_v63  ;;  %v8893_v62 = vpack.c.bf16 %v1047_v61, %v1046_v37 }
 0x247   :  { %v10000_v31 = vpop.permute.xlu1 %9999  ;;  %10274 = vrot.lane.b32.xlu0 %v11944_v55, %s11238_s20  ;;  %v8895_v16 = vpack.c.bf16 %v1055_v5, %v1054_v3 }
 0x248   :  { %v10002_v12 = vunpack.i.h.bf16 %v10000_v31  ;;  %v10001_v56 = vunpack.i.l.bf16 %v10000_v31  ;;  %8880 = vmatpush1.bf16.msra.mxu1 %v8879_v27  ;;  %8894 = vmatprep.subr.bf16.mxu0 %v8893_v62 }
 0x249   :  { %10279 = vrot.lane.b32.xlu1 %v11952_v43, %s11238_s20  ;;  %v9990_v35 = vpop.permute.xlu0 %9989  ;;  %8896 = vmatpush1.bf16.msra.mxu0 %v8895_v16 }
 0x24a   :  { %v1064_v20 = vsel %vm1041_vm3, %v9986_v40, %v10001_v56  ;;  %v1065_v25 = vsel %vm1041_vm3, %v9987_v38, %v10002_v12  ;;  %v9992_v59 = vunpack.i.h.bf16 %v9990_v35  ;;  %v9991_v10 = vunpack.i.l.bf16 %v9990_v35 }
 0x24b   :  { %v10005_v63 = vpop.permute.xlu1 %10004  ;;  %v8881_v48 = vpack.c.bf16 %v1065_v25, %v1064_v20  ;;  %10284 = vrot.lane.b32.xlu0 %v11954_v54, %s11238_s20 }
 0x24c   :  { %v10007_v60 = vunpack.i.h.bf16 %v10005_v63  ;;  %v10006_v37 = vunpack.i.l.bf16 %v10005_v63  ;;  %v1056_v3 = vsel %vm1041_vm3, %v10001_v56, %v9991_v10  ;;  %v1057_v5 = vsel %vm1041_vm3, %v10002_v12, %v9992_v59 }
 0x24d   :  { %8882 = vmatprep.subr.bf16.mxu1 %v8881_v48  ;;  %10289 = vrot.lane.b32.xlu1 %v11962_v18, %s11238_s20  ;;  %v9995_v27 = vpop.permute.xlu0 %9994 }
 0x24e   :  { %v1072_v61 = vsel %vm1041_vm3, %v10006_v37, %v9986_v40  ;;  %v1073_v31 = vsel %vm1041_vm3, %v10007_v60, %v9987_v38  ;;  %v1048_v62 = vsel %vm1041_vm3, %v9991_v10, %v10006_v37  ;;  %v1049_v56 = vsel %vm1041_vm3, %v9992_v59, %v10007_v60  ;;  %v1074_v10 = vld [vmem:[%s16663_s7 + $0x40] sm:$0xff] }
 0x24f   :  { %v9997_v16 = vunpack.i.h.bf16 %v9995_v27  ;;  %v9996_v35 = vunpack.i.l.bf16 %v9995_v27  ;;  %v10010_v12 = vpop.permute.xlu1 %10009  ;;  %v8883_v20 = vpack.c.bf16 %v1073_v31, %v1072_v61  ;;  %v8897_v25 = vpack.c.bf16 %v1049_v56, %v1048_v62  ;;  %10294 = vrot.lane.b32.xlu0 %v11972_v22, %s11238_s20 }
 0x250   :  { %v10012_v63 = vunpack.i.h.bf16 %v10010_v12  ;;  %v10011_v40 = vunpack.i.l.bf16 %v10010_v12  ;;  %v8899_v38 = vpack.c.bf16 %v1057_v5, %v1056_v3  ;;  %v1075_v12 = vld [vmem:[%s16663_s7 + $0x48] sm:$0xff] }
 0x251   :  { %8884 = vmatpush1.bf16.msra.mxu1 %v8883_v20  ;;  %8898 = vmatprep.subr.bf16.mxu0 %v8897_v25  ;;  %v10015_v59 = vpop.permute.xlu0 %10014 }
 0x252   :  { %10299 = vrot.lane.b32.xlu1 %v11980_v4, %s11238_s20  ;;  %8900 = vmatpush1.bf16.msra.mxu0 %v8899_v38  ;;  %v953_v48 = vsel %vm936_vm4, %v9996_v35, %v10011_v40  ;;  %v954_v60 = vsel %vm936_vm4, %v9997_v16, %v10012_v63  ;;  %v10017_v37 = vunpack.i.h.bf16 %v10015_v59  ;;  %v10016_v3 = vunpack.i.l.bf16 %v10015_v59 }
 0x253   :  { %v10020_v5 = vpop.permute.xlu1 %10019  ;;  %v8901_v61 = vpack.c.bf16 %v954_v60, %v953_v48  ;;  %10304 = vrot.lane.b32.xlu0 %v11982_v28, %s11238_s20  ;;  %v16905_v38 = vmov 0.0  }
 0x254   :  { %v10022_v31 = vunpack.i.h.bf16 %v10020_v5  ;;  %v10021_v27 = vunpack.i.l.bf16 %v10020_v5  ;;  %8486 = vmatmul.mubr.msk.f32.vlgmr.msra.gmra.mrb[18].mxu1 %vm1082_vm5, %v1074_v10  ;;  %v946_v62 = vsel %vm936_vm4, %v10012_v63, %v10017_v37  ;;  %v945_v56 = vsel %vm936_vm4, %v10011_v40, %v10016_v3 }
 0x255   :  { %8494 = vmatmul.mubr.msk.f32.vlgmr.msra.gmra.mrb[20].mxu0 %vm1082_vm5, %v1074_v10  ;;  %8902 = vmatprep.subr.bf16.mxu1 %v8901_v61  ;;  %v10025_v63 = vpop.permute.xlu0 %10024 }
 0x256   :  { %v961_v20 = vsel %vm936_vm4, %v10021_v27, %v9996_v35  ;;  %v962_v25 = vsel %vm936_vm4, %v10022_v31, %v9997_v16  ;;  %10319 = vrot.lane.b32.xlu1 %v11988_v15, %s11238_s20  ;;  %1177 = vmatprep.mubr.f32.mxu1 %v16905_v38  ;;  %v937_v40 = vsel %vm936_vm4, %v10016_v3, %v10021_v27  ;;  %v10027_v10 = vunpack.i.h.bf16 %v10025_v63  ;;  %v1076_v27 = vld [vmem:[%s16663_s7 + $0x50] sm:$0xff] }
 0x257   :  { %v10026_v59 = vunpack.i.l.bf16 %v10025_v63  ;;  %v10030_v48 = vpop.permute.xlu1 %10029  ;;  %1290 = vmatprep.mubr.f32.mxu0 %v16905_v38  ;;  %v8903_v60 = vpack.c.bf16 %v962_v25, %v961_v20  ;;  %v938_v35 = vsel %vm936_vm4, %v10017_v37, %v10022_v31  ;;  %10309 = vrot.lane.b32.xlu0 %v11994_v24, %s11238_s20  ;;  %v8919_v3 = vpack.c.bf16 %v946_v62, %v945_v56 }
 0x258   :  { %v10032_v5 = vunpack.i.h.bf16 %v10030_v48  ;;  %v10031_v16 = vunpack.i.l.bf16 %v10030_v48  ;;  %8487 = vmatmul.mubr.msk.f32.gmra.mrb[20].mxu1 %vm1082_vm5, %v1075_v12  ;;  %v8917_v61 = vpack.c.bf16 %v938_v35, %v937_v40  ;;  %v16906_v35 = vld [vmem:[#allocation21_spill] sm:$0xff] }
 0x259   :  { %8495 = vmatmul.mubr.msk.f32.gmra.mrb[22].mxu0 %vm1082_vm5, %v1075_v12  ;;  %8904 = vmatpush1.bf16.msra.mxu1 %v8903_v60  ;;  %v10035_v37 = vpop.permute.xlu0 %10034 }
 0x25a   :  { %8918 = vmatprep.subr.bf16.mxu0 %v8917_v61  ;;  %10324 = vrot.lane.b32.xlu1 %v11998_v44, %s11238_s20  ;;  %v955_v31 = vsel %vm936_vm4, %v10026_v59, %v10031_v16  ;;  %v956_v20 = vsel %vm936_vm4, %v10027_v10, %v10032_v5  ;;  %v10037_v25 = vunpack.i.h.bf16 %v10035_v37  ;;  %v10036_v63 = vunpack.i.l.bf16 %v10035_v37  ;;  %v1077_v61 = vld [vmem:[%s16663_s7 + $0x58] sm:$0xff] }
 0x25b   :  { %8920 = vmatpush1.bf16.msra.mxu0 %v8919_v3  ;;  %1183 = vmatprep.mubr.f32.mxu1 %v16905_v38  ;;  %v10040_v62 = vpop.permute.xlu1 %10039  ;;  %v8905_v56 = vpack.c.bf16 %v956_v20, %v955_v31  ;;  %v16908_v44 = vld [vmem:[#allocation22_spill] sm:$0xff] }
 0x25c   :  { %v10042_v12 = vunpack.i.h.bf16 %v10040_v62  ;;  %v10041_v40 = vunpack.i.l.bf16 %v10040_v62  ;;  %8488 = vmatmul.mubr.msk.f32.gmra.mrb[22].mxu1 %vm1082_vm5, %v1076_v27  ;;  %1296 = vmatprep.mubr.f32.mxu0 %v16905_v38  ;;  %v948_v48 = vsel %vm936_vm4, %v10032_v5, %v10037_v25  ;;  %v947_v60 = vsel %vm936_vm4, %v10031_v16, %v10036_v63  ;;  %v16907_v5 = vld [vmem:[#allocation23_spill] sm:$0xff] }
 0x25d   :  { %10314 = vrot.lane.b32.xlu0 %v16906_v35, %s11239_s27  ;;  %8496 = vmatmul.mubr.msk.f32.gmra.mrb[24].mxu0 %vm1082_vm5, %v1076_v27  ;;  %v10045_v16 = vpop.permute.xlu0 %10044 }
 0x25e   :  { %v963_v3 = vsel %vm936_vm4, %v10041_v40, %v10026_v59  ;;  %v964_v37 = vsel %vm936_vm4, %v10042_v12, %v10027_v10  ;;  %8906 = vmatprep.subr.bf16.mxu1 %v8905_v56  ;;  %10329 = vrot.lane.b32.xlu1 %v16907_v5, %s11239_s27  ;;  %v939_v31 = vsel %vm936_vm4, %v10036_v63, %v10041_v40  ;;  %v10047_v20 = vunpack.i.h.bf16 %v10045_v16 }
 0x25f   :  { %v10046_v27 = vunpack.i.l.bf16 %v10045_v16  ;;  %1189 = vmatprep.mubr.f32.mxu1 %v16905_v38  ;;  %v10050_v62 = vpop.permute.xlu1 %10049  ;;  %1302 = vmatprep.mubr.f32.mxu0 %v16905_v38  ;;  %v8907_v35 = vpack.c.bf16 %v964_v37, %v963_v3  ;;  %v940_v59 = vsel %vm936_vm4, %v10037_v25, %v10042_v12  ;;  %v8923_v63 = vpack.c.bf16 %v948_v48, %v947_v60  ;;  %v1078_v3 = vld [vmem:[%s16663_s7 + $0x60] sm:$0xff]  ;;  %v16909_v37 = vld [vmem:[#allocation24_spill] sm:$0xff] }
 0x260   :  { %v10052_v10 = vunpack.i.h.bf16 %v10050_v62  ;;  %v10051_v56 = vunpack.i.l.bf16 %v10050_v62  ;;  %8489 = vmatmul.mubr.msk.f32.gmra.mrb[24].mxu1 %vm1082_vm5, %v1077_v61  ;;  %v8921_v5 = vpack.c.bf16 %v940_v59, %v939_v31  ;;  %v16910_v59 = vld [vmem:[#allocation32_spill] sm:$0xff] }
 0x261   :  { %10334 = vrot.lane.b32.xlu0 %v16908_v44, %s11239_s27  ;;  %8497 = vmatmul.mubr.msk.f32.gmra.mrb[26].mxu0 %vm1082_vm5, %v1077_v61  ;;  %v10055_v40 = vpop.permute.xlu0 %10054 }
 0x262   :  { %8908 = vmatpush1.bf16.msra.mxu1 %v8907_v35  ;;  %8922 = vmatprep.subr.bf16.mxu0 %v8921_v5  ;;  %v957_v25 = vsel %vm936_vm4, %v10046_v27, %v10051_v56  ;;  %v958_v12 = vsel %vm936_vm4, %v10047_v20, %v10052_v10  ;;  %v10057_v44 = vunpack.i.h.bf16 %v10055_v40  ;;  %v10056_v16 = vunpack.i.l.bf16 %v10055_v40 }
 0x263   :  { %10339 = vrot.lane.b32.xlu1 %v16909_v37, %s11239_s27  ;;  %8924 = vmatpush1.bf16.msra.mxu0 %v8923_v63  ;;  %v10060_v48 = vpop.permute.xlu1 %10059  ;;  %v8909_v60 = vpack.c.bf16 %v958_v12, %v957_v25  ;;  %v16911_v25 = vld [vmem:[#allocation34_spill] sm:$0xff] }
 0x264   :  { %1195 = vmatprep.mubr.f32.mxu1 %v16905_v38  ;;  %v10062_v61 = vunpack.i.h.bf16 %v10060_v48  ;;  %v10061_v31 = vunpack.i.l.bf16 %v10060_v48  ;;  %1308 = vmatprep.mubr.f32.mxu0 %v16905_v38  ;;  %v950_v62 = vsel %vm936_vm4, %v10052_v10, %v10057_v44  ;;  %v949_v35 = vsel %vm936_vm4, %v10051_v56, %v10056_v16  ;;  %v1079_v10 = vld [vmem:[%s16663_s7 + $0x68] sm:$0xff] }
 0x265   :  { %8490 = vmatmul.mubr.msk.f32.gmra.mrb[26].mxu1 %vm1082_vm5, %v1078_v3  ;;  %10344 = vrot.lane.b32.xlu0 %v16910_v59, %s11239_s27  ;;  %v10065_v40 = vpop.permute.xlu0 %10064 }
 0x266   :  { %v965_v5 = vsel %vm936_vm4, %v10061_v31, %v10046_v27  ;;  %v966_v63 = vsel %vm936_vm4, %v10062_v61, %v10047_v20  ;;  %8498 = vmatmul.mubr.msk.f32.gmra.mrb[28].mxu0 %vm1082_vm5, %v1078_v3  ;;  %8910 = vmatprep.subr.bf16.mxu1 %v8909_v60  ;;  %v941_v56 = vsel %vm936_vm4, %v10056_v16, %v10061_v31  ;;  %v10067_v12 = vunpack.i.h.bf16 %v10065_v40  ;;  %v16912_v16 = vld [vmem:[#allocation33_spill] sm:$0xff] }
 0x267   :  { %10349 = vrot.lane.b32.xlu1 %v16911_v25, %s11239_s27  ;;  %v10066_v37 = vunpack.i.l.bf16 %v10065_v40  ;;  %1201 = vmatprep.mubr.f32.mxu1 %v16905_v38  ;;  %v10080_v27 = vpop.permute.xlu1 %10079  ;;  %v8911_v20 = vpack.c.bf16 %v966_v63, %v965_v5  ;;  %v942_v3 = vsel %vm936_vm4, %v10057_v44, %v10062_v61  ;;  %v8927_v40 = vpack.c.bf16 %v950_v62, %v949_v35  ;;  %v1080_v5 = vld [vmem:[%s16663_s7 + $0x70] sm:$0xff]  ;;  %v16913_v63 = vld [vmem:[#allocation35_spill] sm:$0xff] }
 0x268   :  { %v10082_v48 = vunpack.i.h.bf16 %v10080_v27  ;;  %v10081_v60 = vunpack.i.l.bf16 %v10080_v27  ;;  %1314 = vmatprep.mubr.f32.mxu0 %v16905_v38  ;;  %v8925_v59 = vpack.c.bf16 %v942_v3, %v941_v56 }
 0x269   :  { %8491 = vmatmul.mubr.msk.f32.gmra.mrb[28].mxu1 %vm1082_vm5, %v1079_v10  ;;  %10354 = vrot.lane.b32.xlu0 %v16912_v16, %s11239_s27  ;;  %v10070_v31 = vpop.permute.xlu0 %10069 }
 0x26a   :  { %8499 = vmatmul.mubr.msk.f32.gmra.mrb[30].mxu0 %vm1082_vm5, %v1079_v10  ;;  %8912 = vmatpush1.bf16.msra.mxu1 %v8911_v20  ;;  %v959_v44 = vsel %vm936_vm4, %v10066_v37, %v10081_v60  ;;  %v960_v61 = vsel %vm936_vm4, %v10067_v12, %v10082_v48  ;;  %v10072_v56 = vunpack.i.h.bf16 %v10070_v31  ;;  %v10071_v25 = vunpack.i.l.bf16 %v10070_v31  ;;  %v16914_v31 = vld [vmem:[#allocation48_spill] sm:$0xff] }
 0x26b   :  { %8926 = vmatprep.subr.bf16.mxu0 %v8925_v59  ;;  %10359 = vrot.lane.b32.xlu1 %v16913_v63, %s11239_s27  ;;  %v10085_v10 = vpop.permute.xlu1 %10084  ;;  %v8913_v27 = vpack.c.bf16 %v960_v61, %v959_v44  ;;  %v16915_v44 = vld [vmem:[#allocation50_spill] sm:$0xff] }
 0x26c   :  { %8928 = vmatpush1.bf16.msra.mxu0 %v8927_v40  ;;  %1207 = vmatprep.mubr.f32.mxu1 %v16905_v38  ;;  %v10087_v62 = vunpack.i.h.bf16 %v10085_v10  ;;  %v10086_v35 = vunpack.i.l.bf16 %v10085_v10  ;;  %v952_v20 = vsel %vm936_vm4, %v10082_v48, %v10072_v56  ;;  %v951_v3 = vsel %vm936_vm4, %v10081_v60, %v10071_v25  ;;  %v1081_v60 = vld [vmem:[%s16663_s7 + $0x78] sm:$0xff] }
 0x26d   :  { %8492 = vmatmul.mubr.msk.f32.gmra.mrb[30].mxu1 %vm1082_vm5, %v1080_v5  ;;  %1320 = vmatprep.mubr.f32.mxu0 %v16905_v38  ;;  %v10075_v48 = vpop.permute.xlu0 %10074 }
 0x26e   :  { %v967_v59 = vsel %vm936_vm4, %v10086_v35, %v10066_v37  ;;  %v968_v16 = vsel %vm936_vm4, %v10087_v62, %v10067_v12  ;;  %10364 = vrot.lane.b32.xlu0 %v16914_v31, %s11239_s27  ;;  %8500 = vmatmul.mubr.msk.f32.gmra.mrb[32].mxu0 %vm1082_vm5, %v1080_v5  ;;  %v943_v40 = vsel %vm936_vm4, %v10071_v25, %v10086_v35  ;;  %v10077_v37 = vunpack.i.h.bf16 %v10075_v48  ;;  %v16916_v25 = vld [vmem:[#allocation49_spill] sm:$0xff] }
 0x26f   :  { %8914 = vmatprep.subr.bf16.mxu1 %v8913_v27  ;;  %10369 = vrot.lane.b32.xlu1 %v16915_v44, %s11239_s27  ;;  %v10076_v61 = vunpack.i.l.bf16 %v10075_v48  ;;  %v10090_v12 = vpop.permute.xlu1 %10089  ;;  %v8915_v63 = vpack.c.bf16 %v968_v16, %v967_v59  ;;  %v944_v10 = vsel %vm936_vm4, %v10072_v56, %v10087_v62  ;;  %v8931_v27 = vpack.c.bf16 %v952_v20, %v951_v3 }
 0x270   :  { %1213 = vmatprep.mubr.f32.mxu1 %v16905_v38  ;;  %v10092_v5 = vunpack.i.h.bf16 %v10090_v12  ;;  %v10091_v31 = vunpack.i.l.bf16 %v10090_v12  ;;  %1326 = vmatprep.mubr.f32.mxu0 %v16905_v38  ;;  %v8929_v24 = vpack.c.bf16 %v944_v10, %v943_v40  ;;  %v969_v40 = vld [vmem:[%s16663_s7] sm:$0xff] }
 0x271   :  { %8493 = vmatmul.mubr.msk.f32.gmra.mrb[32].mxu1 %vm1082_vm5, %v1081_v60  ;;  %v10095_v35 = vpop.permute.xlu0 %10094 }
 0x272   :  { %10374 = vrot.lane.b32.xlu0 %v16916_v25, %s11239_s27  ;;  %8501 = vmatmul.mubr.msk.f32.gmra.mrb[34].mxu0 %vm1082_vm5, %v1081_v60  ;;  %v1664_v59 = vsel %vm1647_vm6, %v10076_v61, %v10091_v31  ;;  %v1665_v56 = vsel %vm1647_vm6, %v10077_v37, %v10092_v5  ;;  %v10097_v62 = vunpack.i.h.bf16 %v10095_v35  ;;  %v10096_v16 = vunpack.i.l.bf16 %v10095_v35  ;;  %v16917_v60 = vld [vmem:[#allocation51_spill] sm:$0xff]  ;;  %v16918_v25 = vld [vmem:[#allocation61_spill] sm:$0xff] }
 0x273   :  { %8916 = vmatpush1.bf16.msra.mxu1 %v8915_v63  ;;  %8930 = vmatprep.subr.bf16.mxu0 %v8929_v24  ;;  %v10100_v48 = vpop.permute.xlu1 %10099  ;;  %v8933_v44 = vpack.c.bf16 %v1665_v56, %v1664_v59 }
 0x274   :  { %10379 = vrot.lane.b32.xlu1 %v16917_v60, %s11239_s27  ;;  %8932 = vmatpush1.bf16.msra.mxu0 %v8931_v27  ;;  %v10102_v20 = vunpack.i.h.bf16 %v10100_v48  ;;  %v10101_v3 = vunpack.i.l.bf16 %v10100_v48  ;;  %v1657_v12 = vsel %vm1647_vm6, %v10092_v5, %v10097_v62  ;;  %v1656_v24 = vsel %vm1647_vm6, %v10091_v31, %v10096_v16  ;;  %v16919_v48 = vld [vmem:[#allocation63_spill] sm:$0xff] }
 0x275   :  { %1421 = vmatprep.mubr.f32.mxu1 %v16905_v38  ;;  %1534 = vmatprep.mubr.f32.mxu0 %v16905_v38  ;;  %v10105_v27 = vpop.permute.xlu0 %10104 }
 0x276   :  { %v1672_v63 = vsel %vm1647_vm6, %v10101_v3, %v10076_v61  ;;  %v1673_v10 = vsel %vm1647_vm6, %v10102_v20, %v10077_v37  ;;  %8502 = vmatmul.mubr.msk.f32.vlgmr.msra.gmra.mrb[18].mxu1 %vm1082_vm5, %v969_v40  ;;  %10384 = vrot.lane.b32.xlu0 %v16918_v25, %s11239_s27  ;;  %v1648_v5 = vsel %vm1647_vm6, %v10096_v16, %v10101_v3  ;;  %v10107_v31 = vunpack.i.h.bf16 %v10105_v27  ;;  %v970_v61 = vld [vmem:[%s16663_s7 + $0x8] sm:$0xff] }
 0x277   :  { %8510 = vmatmul.mubr.msk.f32.vlgmr.msra.gmra.mrb[20].mxu0 %vm1082_vm5, %v969_v40  ;;  %8934 = vmatprep.subr.bf16.mxu1 %v8933_v44  ;;  %v10106_v35 = vunpack.i.l.bf16 %v10105_v27  ;;  %v10110_v59 = vpop.permute.xlu1 %10109  ;;  %v8935_v37 = vpack.c.bf16 %v1673_v10, %v1672_v63  ;;  %v1649_v56 = vsel %vm1647_vm6, %v10097_v62, %v10102_v20  ;;  %v16920_v44 = vld [vmem:[#allocation62_spill] sm:$0xff]  ;;  %v8951_v63 = vpack.c.bf16 %v1657_v12, %v1656_v24 }
 0x278   :  { %10389 = vrot.lane.b32.xlu1 %v16919_v48, %s11239_s27  ;;  %1427 = vmatprep.mubr.f32.mxu1 %v16905_v38  ;;  %v10112_v16 = vunpack.i.h.bf16 %v10110_v59  ;;  %v10111_v60 = vunpack.i.l.bf16 %v10110_v59  ;;  %v8949_v40 = vpack.c.bf16 %v1649_v56, %v1648_v5  ;;  %v971_v5 = vld [vmem:[%s16663_s7 + $0x10] sm:$0xff] }
 0x279   :  { %1540 = vmatprep.mubr.f32.mxu0 %v16905_v38  ;;  %8936 = vmatpush1.bf16.msra.mxu1 %v8935_v37  ;;  %v10115_v3 = vpop.permute.xlu0 %10114  ;;  %v16921_v37 = vld [vmem:[#allocation64_spill] sm:$0xff] }
 0x27a   :  { %8503 = vmatmul.mubr.msk.f32.gmra.mrb[20].mxu1 %vm1082_vm5, %v970_v61  ;;  %10394 = vrot.lane.b32.xlu0 %v16920_v44, %s11239_s27  ;;  %v1666_v62 = vsel %vm1647_vm6, %v10106_v35, %v10111_v60  ;;  %v1667_v20 = vsel %vm1647_vm6, %v10107_v31, %v10112_v16  ;;  %v10117_v10 = vunpack.i.h.bf16 %v10115_v3  ;;  %v10116_v25 = vunpack.i.l.bf16 %v10115_v3 }
 0x27b   :  { %8511 = vmatmul.mubr.msk.f32.gmra.mrb[22].mxu0 %vm1082_vm5, %v970_v61  ;;  %8950 = vmatprep.subr.bf16.mxu0 %v8949_v40  ;;  %v10120_v27 = vpop.permute.xlu1 %10119  ;;  %v8937_v59 = vpack.c.bf16 %v1667_v20, %v1666_v62 }
 0x27c   :  { %10399 = vrot.lane.b32.xlu1 %v16921_v37, %s11239_s27  ;;  %8952 = vmatpush1.bf16.msra.mxu0 %v8951_v63  ;;  %v10122_v12 = vunpack.i.h.bf16 %v10120_v27  ;;  %v10121_v24 = vunpack.i.l.bf16 %v10120_v27  ;;  %v1659_v56 = vsel %vm1647_vm6, %v10112_v16, %v10117_v10  ;;  %v1658_v61 = vsel %vm1647_vm6, %v10111_v60, %v10116_v25 }
 0x27d   :  { %1433 = vmatprep.mubr.f32.mxu1 %v16905_v38  ;;  %1546 = vmatprep.mubr.f32.mxu0 %v16905_v38  ;;  %v10125_v16 = vpop.permute.xlu0 %10124 }
 0x27e   :  { %v1674_v48 = vsel %vm1647_vm6, %v10121_v24, %v10106_v35  ;;  %v1675_v40 = vsel %vm1647_vm6, %v10122_v12, %v10107_v31  ;;  %8504 = vmatmul.mubr.msk.f32.gmra.mrb[22].mxu1 %vm1082_vm5, %v971_v5  ;;  %10404 = vrot.lane.b32.xlu0 %v16898_v7, %s11240_s25  ;;  %v1650_v60 = vsel %vm1647_vm6, %v10116_v25, %v10121_v24  ;;  %v10127_v44 = vunpack.i.h.bf16 %v10125_v16  ;;  %v972_v31 = vld [vmem:[%s16663_s7 + $0x18] sm:$0xff]  ;;  %v973_v24 = vld [vmem:[%s16663_s7 + $0x20] sm:$0xff] }
 0x27f   :  { %8512 = vmatmul.mubr.msk.f32.gmra.mrb[24].mxu0 %vm1082_vm5, %v971_v5  ;;  %8938 = vmatprep.subr.bf16.mxu1 %v8937_v59  ;;  %v10126_v3 = vunpack.i.l.bf16 %v10125_v16  ;;  %v10130_v63 = vpop.permute.xlu1 %10129  ;;  %v8939_v35 = vpack.c.bf16 %v1675_v40, %v1674_v48  ;;  %v1651_v62 = vsel %vm1647_vm6, %v10117_v10, %v10122_v12  ;;  %v8955_v5 = vpack.c.bf16 %v1659_v56, %v1658_v61 }
 0x280   :  { %10409 = vrot.lane.b32.xlu1 %v16899_v29, %s11240_s25  ;;  %1439 = vmatprep.mubr.f32.mxu1 %v16905_v38  ;;  %v10132_v7 = vunpack.i.h.bf16 %v10130_v63  ;;  %v10131_v20 = vunpack.i.l.bf16 %v10130_v63  ;;  %v8953_v25 = vpack.c.bf16 %v1651_v62, %v1650_v60 }
 0x281   :  { %1552 = vmatprep.mubr.f32.mxu0 %v16905_v38  ;;  %8940 = vmatpush1.bf16.msra.mxu1 %v8939_v35  ;;  %v10135_v27 = vpop.permute.xlu0 %10134 }
 0x282   :  { %8505 = vmatmul.mubr.msk.f32.gmra.mrb[24].mxu1 %vm1082_vm5, %v972_v31  ;;  %10414 = vrot.lane.b32.xlu0 %v11708_v34, %s11240_s25  ;;  %v1668_v10 = vsel %vm1647_vm6, %v10126_v3, %v10131_v20  ;;  %v1669_v29 = vsel %vm1647_vm6, %v10127_v44, %v10132_v7  ;;  %v10137_v59 = vunpack.i.h.bf16 %v10135_v27  ;;  %v10136_v37 = vunpack.i.l.bf16 %v10135_v27 }
 0x283   :  { %8513 = vmatmul.mubr.msk.f32.gmra.mrb[26].mxu0 %vm1082_vm5, %v972_v31  ;;  %8954 = vmatprep.subr.bf16.mxu0 %v8953_v25  ;;  %v10140_v12 = vpop.permute.xlu1 %10139  ;;  %v8941_v48 = vpack.c.bf16 %v1669_v29, %v1668_v10 }
 0x284   :  { %10419 = vrot.lane.b32.xlu1 %v16888_v53, %s11240_s25  ;;  %8956 = vmatpush1.bf16.msra.mxu0 %v8955_v5  ;;  %v10142_v34 = vunpack.i.h.bf16 %v10140_v12  ;;  %v10141_v56 = vunpack.i.l.bf16 %v10140_v12  ;;  %v1661_v61 = vsel %vm1647_vm6, %v10132_v7, %v10137_v59  ;;  %v1660_v40 = vsel %vm1647_vm6, %v10131_v20, %v10136_v37  ;;  %v975_v12 = vld [vmem:[%s16663_s7 + $0x30] sm:$0xff] }
 0x285   :  { %1445 = vmatprep.mubr.f32.mxu1 %v16905_v38  ;;  %1558 = vmatprep.mubr.f32.mxu0 %v16905_v38  ;;  %v10145_v53 = vpop.permute.xlu0 %10144  ;;  %v8959_v5 = vpack.c.bf16 %v1661_v61, %v1660_v40 }
 0x286   :  { %v1676_v16 = vsel %vm1647_vm6, %v10141_v56, %v10126_v3  ;;  %v1677_v60 = vsel %vm1647_vm6, %v10142_v34, %v10127_v44  ;;  %8506 = vmatmul.mubr.msk.f32.gmra.mrb[26].mxu1 %vm1082_vm5, %v973_v24  ;;  %10424 = vrot.lane.b32.xlu0 %v16890_v49, %s11240_s25  ;;  %v1652_v63 = vsel %vm1647_vm6, %v10136_v37, %v10141_v56  ;;  %v10147_v31 = vunpack.i.h.bf16 %v10145_v53  ;;  %v974_v3 = vld [vmem:[%s16663_s7 + $0x28] sm:$0xff] }
 0x287   :  { %8514 = vmatmul.mubr.msk.f32.gmra.mrb[28].mxu0 %vm1082_vm5, %v973_v24  ;;  %8942 = vmatprep.subr.bf16.mxu1 %v8941_v48  ;;  %v10146_v35 = vunpack.i.l.bf16 %v10145_v53  ;;  %v10155_v62 = vpop.permute.xlu1 %10154  ;;  %v8943_v44 = vpack.c.bf16 %v1677_v60, %v1676_v16  ;;  %v1653_v7 = vsel %vm1647_vm6, %v10137_v59, %v10142_v34  ;;  %v976_v53 = vld [vmem:[%s16663_s7 + $0x38] sm:$0xff] }
 0x288   :  { %10429 = vrot.lane.b32.xlu1 %v16891_v6, %s11240_s25  ;;  %1451 = vmatprep.mubr.f32.mxu1 %v16905_v38  ;;  %v10157_v49 = vunpack.i.h.bf16 %v10155_v62  ;;  %v10156_v20 = vunpack.i.l.bf16 %v10155_v62  ;;  %v8957_v25 = vpack.c.bf16 %v1653_v7, %v1652_v63 }
 0x289   :  { %1564 = vmatprep.mubr.f32.mxu0 %v16905_v38  ;;  %8944 = vmatpush1.bf16.msra.mxu1 %v8943_v44  ;;  %v10150_v27 = vpop.permute.xlu0 %10149  ;;  %v16922_v44 = vpack.c.bf16 %v11656_v45, %v16894_v23  ;;  %v16925_v45 = vpack.c.bf16 %v11644_v41, %v16896_v30  ;;  %v16927_v23 = vld [vmem:[#allocation27_spill] sm:$0xff]  ;;  %v16929_v30 = vpack.c.bf16 %v11724_v36, %v11696_v9  ;;  %v16933_v36 = vld [vmem:[#allocation26_spill] sm:$0xff] }
 0x28a   :  { %8507 = vmatmul.mubr.msk.f32.gmra.mrb[28].mxu1 %vm1082_vm5, %v974_v3  ;;  %10434 = vrot.lane.b32.xlu0 %v16900_v57, %s11240_s25  ;;  %v1670_v10 = vsel %vm1647_vm6, %v10146_v35, %v10156_v20  ;;  %v1671_v6 = vsel %vm1647_vm6, %v10147_v31, %v10157_v49  ;;  %v10152_v29 = vunpack.i.h.bf16 %v10150_v27  ;;  %v10151_v59 = vunpack.i.l.bf16 %v10150_v27  ;;  %v16932_v9 = vld [vmem:[#allocation31_spill] sm:$0xff]  ;;  %v16935_v27 = vld [vmem:[#allocation46_spill] sm:$0xff] }
 0x28b   :  { %8515 = vmatmul.mubr.msk.f32.gmra.mrb[30].mxu0 %vm1082_vm5, %v974_v3  ;;  %8958 = vmatprep.subr.bf16.mxu0 %v8957_v25  ;;  %v10160_v37 = vpop.permute.xlu1 %10159  ;;  %v8945_v24 = vpack.c.bf16 %v1671_v6, %v1670_v10 }
 0x28c   :  { %10439 = vrot.lane.b32.xlu1 %v16901_v8, %s11240_s25  ;;  %8960 = vmatpush1.bf16.msra.mxu0 %v8959_v5  ;;  %v10162_v57 = vunpack.i.h.bf16 %v10160_v37  ;;  %v10161_v48 = vunpack.i.l.bf16 %v10160_v37  ;;  %v1663_v34 = vsel %vm1647_vm6, %v10157_v49, %v10152_v29  ;;  %v1662_v16 = vsel %vm1647_vm6, %v10156_v20, %v10151_v59  ;;  %v16938_v37 = vld [vmem:[#allocation47_spill] sm:$0xff] }
 0x28d   :  { %1457 = vmatprep.mubr.f32.mxu1 %v16905_v38  ;;  %1570 = vmatprep.mubr.f32.mxu0 %v16905_v38  ;;  %v12496_v8 = vpop.permute.xlu0 %10164  ;;  %v8963_v62 = vpack.c.bf16 %v1663_v34, %v1662_v16  ;;  %v16928_v20 = vpack.c.bf16 %v11722_v51, %v16927_v23 }
 0x28e   :  { %v1678_v56 = vsel %vm1647_vm6, %v10161_v48, %v10146_v35  ;;  %v1679_v61 = vsel %vm1647_vm6, %v10162_v57, %v10147_v31  ;;  %8508 = vmatmul.mubr.msk.f32.gmra.mrb[30].mxu1 %vm1082_vm5, %v975_v12  ;;  %10444 = vrot.lane.b32.xlu0 %v16904_v39, %s11240_s25  ;;  %v1654_v40 = vsel %vm1647_vm6, %v10151_v59, %v10161_v48  ;;  %v10167_v10 = vunpack.i.h.bf16 %v12496_v8 }
 0x28f   :  { %8516 = vmatmul.mubr.msk.f32.gmra.mrb[32].mxu0 %vm1082_vm5, %v975_v12  ;;  %8946 = vmatprep.subr.bf16.mxu1 %v8945_v24  ;;  %v12503_v60 = vpop.permute.xlu1 %10169  ;;  %v8947_v63 = vpack.c.bf16 %v1679_v61, %v1678_v56  ;;  %v1655_v39 = vsel %vm1647_vm6, %v10152_v29, %v10162_v57  ;;  %v10166_v6 = vunpack.i.l.bf16 %v12496_v8  ;;  %v16939_v12 = vld [vmem:[#allocation39_spill] sm:$0xff] }
 0x290   :  { %10449 = vrot.lane.b32.xlu1 %v11834_v58, %s11240_s25  ;;  %1463 = vmatprep.mubr.f32.mxu1 %v16905_v38  ;;  %v8961_v31 = vpack.c.bf16 %v1655_v39, %v1654_v40  ;;  %v1680_v58 = vld [vmem:[%s16663_s7 + $0x80] sm:$0xff]  ;;  %v10172_v29 = vunpack.i.h.bf16 %v12503_v60  ;;  %v10171_v59 = vunpack.i.l.bf16 %v12503_v60  ;;  %v16940_v24 = vpack.c.bf16 %v16938_v37, %v16939_v12  ;;  %v16942_v40 = vld [vmem:[#allocation36_spill] sm:$0xff]  ;;  %v1687_v60 = vld [vmem:[%s16663_s7 + $0xb8] sm:$0xff] }
 0x291   :  { %1576 = vmatprep.mubr.f32.mxu0 %v16905_v38  ;;  %8948 = vmatpush1.bf16.msra.mxu1 %v8947_v63  ;;  %v12517_v35 = vpop.permute.xlu0 %10174  ;;  %v16945_v63 = vld [vmem:[#allocation37_spill] sm:$0xff] }
 0x292   :  { %8509 = vmatmul.mubr.msk.f32.gmra.mrb[32].mxu1 %vm1082_vm5, %v976_v53  ;;  %10454 = vrot.lane.b32.xlu0 %v11836_v11, %s11240_s25  ;;  %v16923_v11 = vld [vmem:[#allocation18_spill] sm:$0xff]  ;;  %v10177_v57 = vunpack.i.h.bf16 %v12517_v35  ;;  %v10176_v48 = vunpack.i.l.bf16 %v12517_v35 }
 0x293   :  { %8517 = vmatmul.mubr.msk.f32.gmra.mrb[34].mxu0 %vm1082_vm5, %v976_v53  ;;  %8962 = vmatprep.subr.bf16.mxu0 %v8961_v31  ;;  %v12520_v3 = vpop.permute.xlu1 %10179  ;;  %v16924_v7 = vpack.c.bf16 %v11658_v46, %v16923_v11  ;;  %v16926_v46 = vpack.c.bf16 %v11646_v42, %v16897_v19  ;;  %v16930_v42 = vld [vmem:[#allocation25_spill] sm:$0xff]  ;;  %v16934_v19 = vpack.c.bf16 %v16932_v9, %v16933_v36  ;;  %v1683_v31 = vld [vmem:[%s16663_s7 + $0x98] sm:$0xff] }
 0x294   :  { %10459 = vrot.lane.b32.xlu1 %v11838_v2, %s11240_s25  ;;  %8964 = vmatpush1.bf16.msra.mxu0 %v8963_v62  ;;  %v16931_v51 = vpack.c.bf16 %v11712_v47, %v16930_v42  ;;  %v10182_v34 = vunpack.i.h.bf16 %v12520_v3  ;;  %v10181_v56 = vunpack.i.l.bf16 %v12520_v3  ;;  %v16944_v53 = vld [vmem:[#allocation45_spill] sm:$0xff]  ;;  %v16947_v62 = vld [vmem:[#allocation59_spill] sm:$0xff]  ;;  %v2084_v11 = vsel %vm2066_vm7, %v10167_v10, %v10172_v29  ;;  %v16956_v36 = vld [vmem:[#allocation58_spill] sm:$0xff] }
 0x295   :  { %8966 = vmatprep.subr.bf16.mxu1 %v16922_v44  ;;  %1776 = vmatprep.mubr.f32.mxu1 %v16905_v38  ;;  %v12535_v49 = vpop.permute.xlu0 %10184  ;;  %v16946_v39 = vpack.c.bf16 %v16944_v53, %v16945_v63  ;;  %v2083_v44 = vsel %vm2066_vm7, %v10166_v6, %v10171_v59  ;;  %v16953_v42 = vld [vmem:[#allocation57_spill] sm:$0xff] }
 0x296   :  { %8982 = vmatprep.subr.bf16.mxu0 %v16924_v7  ;;  %1889 = vmatprep.mubr.f32.mxu0 %v16905_v38  ;;  %v16950_v7 = vld [vmem:[#allocation60_spill] sm:$0xff]  ;;  %v2068_v23 = vsel %vm2066_vm7, %v10177_v57, %v10182_v34 }
 0x297   :  { %10464 = vrot.lane.b32.xlu0 %v11886_v32, %s11240_s25  ;;  %8518 = vmatmul.mubr.msk.f32.vlgmr.msra.gmra.mrb[18].mxu1 %vm1082_vm5, %v1680_v58  ;;  %v12540_v2 = vpop.permute.xlu1 %10189  ;;  %v1681_v32 = vld [vmem:[%s16663_s7 + $0x88] sm:$0xff] }
 0x298   :  { %10479 = vrot.lane.b32.xlu1 %v11896_v17, %s11240_s25  ;;  %8526 = vmatmul.mubr.msk.f32.vlgmr.msra.gmra.mrb[20].mxu0 %vm1082_vm5, %v1680_v58 }
 0x299   :  { %8968 = vmatpush1.bf16.msra.mxu1 %v16925_v45  ;;  %8984 = vmatpush1.bf16.msra.mxu0 %v16926_v46  ;;  %v12558_v17 = vpop.permute.xlu0 %10194  ;;  %v16951_v45 = vld [vmem:[#allocation55_spill] sm:$0xff] }
 0x29a   :  { %8970 = vmatprep.subr.bf16.mxu1 %v16928_v20  ;;  %1782 = vmatprep.mubr.f32.mxu1 %v16905_v38  ;;  %v16952_v46 = vpack.c.bf16 %v16950_v7, %v16951_v45  ;;  %v10196_v8 = vunpack.i.l.bf16 %v12558_v17 }
 0x29b   :  { %8986 = vmatprep.subr.bf16.mxu0 %v16929_v30  ;;  %10469 = vrot.lane.b32.xlu0 %v11888_v33, %s11240_s25  ;;  %v12565_v41 = vpop.permute.xlu1 %10199  ;;  %v1682_v33 = vld [vmem:[%s16663_s7 + $0x90] sm:$0xff] }
 0x29c   :  { %8519 = vmatmul.mubr.msk.f32.gmra.mrb[20].mxu1 %vm1082_vm5, %v1681_v32  ;;  %1895 = vmatprep.mubr.f32.mxu0 %v16905_v38  ;;  %v10202_v3 = vunpack.i.h.bf16 %v12565_v41 }
 0x29d   :  { %10484 = vrot.lane.b32.xlu1 %v11898_v13, %s11240_s25  ;;  %8527 = vmatmul.mubr.msk.f32.gmra.mrb[22].mxu0 %vm1082_vm5, %v1681_v32  ;;  %v12581_v25 = vpop.permute.xlu0 %10204  ;;  %v16936_v13 = vld [vmem:[#allocation38_spill] sm:$0xff]  ;;  %v2067_v32 = vsel %vm2066_vm7, %v10176_v48, %v10181_v56 }
 0x29e   :  { %8972 = vmatpush1.bf16.msra.mxu1 %v16931_v51  ;;  %8988 = vmatpush1.bf16.msra.mxu0 %v16934_v19  ;;  %v16937_v5 = vpack.c.bf16 %v16935_v27, %v16936_v13  ;;  %v16954_v51 = vld [vmem:[#allocation52_spill] sm:$0xff]  ;;  %v16957_v19 = vld [vmem:[#allocation53_spill] sm:$0xff]  ;;  %v9013_v27 = vpack.c.bf16 %v2068_v23, %v2067_v32  ;;  %v1684_v13 = vld [vmem:[%s16663_s7 + $0xa0] sm:$0xff] }
 0x29f   :  { %1788 = vmatprep.mubr.f32.mxu1 %v16905_v38  ;;  %v12588_v47 = vpop.permute.xlu1 %10209  ;;  %8990 = vmatprep.subr.bf16.mxu0 %v16940_v24  ;;  %v16955_v9 = vpack.c.bf16 %v16953_v42, %v16954_v51  ;;  %v10186_v24 = vunpack.i.l.bf16 %v12535_v49 }
 0x2a0   :  { %8974 = vmatprep.subr.bf16.mxu1 %v16937_v5  ;;  %10474 = vrot.lane.b32.xlu0 %v11905_v21, %s11241_s24  ;;  %v16941_v21 = vld [vmem:[#allocation44_spill] sm:$0xff] }
 0x2a1   :  { %8520 = vmatmul.mubr.msk.f32.gmra.mrb[22].mxu1 %vm1082_vm5, %v1682_v33  ;;  %1901 = vmatprep.mubr.f32.mxu0 %v16905_v38  ;;  %v12608_v61 = vpop.permute.xlu0 %10214  ;;  %v16943_v16 = vpack.c.bf16 %v16941_v21, %v16942_v40  ;;  %v1685_v5 = vld [vmem:[%s16663_s7 + $0xa8] sm:$0xff]  ;;  %v10192_v21 = vunpack.i.h.bf16 %v12540_v2 }
 0x2a2   :  { %10489 = vrot.lane.b32.xlu1 %v11908_v0, %s11241_s24  ;;  %8528 = vmatmul.mubr.msk.f32.gmra.mrb[24].mxu0 %vm1082_vm5, %v1682_v33  ;;  %v16948_v0 = vld [vmem:[#allocation54_spill] sm:$0xff]  ;;  %v16958_v33 = vpack.c.bf16 %v16956_v36, %v16957_v19  ;;  %v10216_v7 = vunpack.i.l.bf16 %v12608_v61 }
 0x2a3   :  { %8976 = vmatpush1.bf16.msra.mxu1 %v16943_v16  ;;  %8992 = vmatpush1.bf16.msra.mxu0 %v16946_v39  ;;  %v12619_v35 = vpop.permute.xlu1 %10219  ;;  %v16949_v58 = vpack.c.bf16 %v16947_v62, %v16948_v0  ;;  %v2076_v16 = vsel %vm2066_vm7, %v10172_v29, %v10177_v57 }
 0x2a4   :  { %1794 = vmatprep.mubr.f32.mxu1 %v16905_v38  ;;  %8994 = vmatprep.subr.bf16.mxu0 %v16952_v46  ;;  %v10221_v0 = vunpack.i.l.bf16 %v12619_v35  ;;  %v10222_v45 = vunpack.i.h.bf16 %v12619_v35 }
 0x2a5   :  { %8978 = vmatprep.subr.bf16.mxu1 %v16949_v58  ;;  %10494 = vrot.lane.b32.xlu0 %v11915_v26, %s11241_s24  ;;  %v12650_v20 = vpop.permute.xlu0 %10224  ;;  %v8997_v26 = vpack.c.bf16 %v2084_v11, %v2083_v44  ;;  %v10217_v11 = vunpack.i.h.bf16 %v12608_v61 }
 0x2a6   :  { %8521 = vmatmul.mubr.msk.f32.gmra.mrb[24].mxu1 %vm1082_vm5, %v1683_v31  ;;  %1907 = vmatprep.mubr.f32.mxu0 %v16905_v38  ;;  %v10227_v61 = vunpack.i.h.bf16 %v12650_v20  ;;  %v10226_v35 = vunpack.i.l.bf16 %v12650_v20 }
 0x2a7   :  { %10499 = vrot.lane.b32.xlu1 %v11918_v52, %s11241_s24  ;;  %8529 = vmatmul.mubr.msk.f32.gmra.mrb[26].mxu0 %vm1082_vm5, %v1683_v31  ;;  %v12655_v30 = vpop.permute.xlu1 %10239 }
 0x2a8   :  { %8980 = vmatpush1.bf16.msra.mxu1 %v16955_v9  ;;  %8996 = vmatpush1.bf16.msra.mxu0 %v16958_v33  ;;  %v10242_v42 = vunpack.i.h.bf16 %v12655_v30  ;;  %v10241_v51 = vunpack.i.l.bf16 %v12655_v30  ;;  %v2108_v9 = vld [vmem:[%s16663_s7 + $0x108] sm:$0xff] }
 0x2a9   :  { %8998 = vmatprep.subr.bf16.mxu1 %v8997_v26  ;;  %1800 = vmatprep.mubr.f32.mxu1 %v16905_v38  ;;  %v12669_v52 = vpop.permute.xlu0 %10229 }
 0x2aa   :  { %9014 = vmatprep.subr.bf16.mxu0 %v9013_v27  ;;  %10504 = vrot.lane.b32.xlu0 %v11926_v14, %s11241_s24  ;;  %v16959_v27 = vld [vmem:[#allocation65_spill] sm:$0xff] }
 0x2ab   :  { %8522 = vmatmul.mubr.msk.f32.gmra.mrb[26].mxu1 %vm1082_vm5, %v1684_v13  ;;  %1913 = vmatprep.mubr.f32.mxu0 %v16905_v38  ;;  %v12679_v37 = vpop.permute.xlu1 %10244 }
 0x2ac   :  { %10509 = vrot.lane.b32.xlu1 %v11936_v50, %s11241_s24  ;;  %8530 = vmatmul.mubr.msk.f32.gmra.mrb[28].mxu0 %vm1082_vm5, %v1684_v13  ;;  %v1686_v50 = vld [vmem:[%s16663_s7 + $0xb0] sm:$0xff]  ;;  %v2071_v13 = vsel %vm2066_vm7, %v10216_v7, %v10221_v0 }
 0x2ad   :  { %1806 = vmatprep.mubr.f32.mxu1 %v16905_v38  ;;  %1919 = vmatprep.mubr.f32.mxu0 %v16905_v38  ;;  %v12685_v14 = vpop.permute.xlu0 %10234 }
 0x2ae   :  { %10514 = vrot.lane.b32.xlu0 %v11944_v55, %s11241_s24  ;;  %v10187_v55 = vunpack.i.h.bf16 %v12535_v49  ;;  %v2075_v49 = vsel %vm2066_vm7, %v10171_v59, %v10176_v48  ;;  %v10201_v59 = vunpack.i.l.bf16 %v12565_v41  ;;  %v10207_v41 = vunpack.i.h.bf16 %v12581_v25 }
 0x2af   :  { %8523 = vmatmul.mubr.msk.f32.gmra.mrb[28].mxu1 %vm1082_vm5, %v1685_v5  ;;  %v12694_v12 = vpop.permute.xlu1 %10249  ;;  %v9015_v53 = vpack.c.bf16 %v2076_v16, %v2075_v49  ;;  %v16960_v16 = vld [vmem:[#allocation30_spill] sm:$0xff] }
 0x2b0   :  { %10519 = vrot.lane.b32.xlu1 %v11952_v43, %s11241_s24  ;;  %8531 = vmatmul.mubr.msk.f32.gmra.mrb[30].mxu0 %vm1082_vm5, %v1685_v5  ;;  %v10191_v43 = vunpack.i.l.bf16 %v12540_v2  ;;  %v2091_v2 = vsel %vm2066_vm7, %v10181_v56, %v10166_v6  ;;  %v10197_v6 = vunpack.i.h.bf16 %v12558_v17  ;;  %v2086_v17 = vsel %vm2066_vm7, %v10187_v55, %v10192_v21 }
 0x2b1   :  { %1812 = vmatprep.mubr.f32.mxu1 %v16905_v38  ;;  %1925 = vmatprep.mubr.f32.mxu0 %v16905_v38  ;;  %v12704_v40 = vpop.permute.xlu0 %10254  ;;  %v2069_v39 = vsel %vm2066_vm7, %v10196_v8, %v10201_v59  ;;  %v2093_v31 = vsel %vm2066_vm7, %v10201_v59, %v10186_v24  ;;  %v2094_v62 = vsel %vm2066_vm7, %v10202_v3, %v10187_v55  ;;  %v10231_v55 = vunpack.i.l.bf16 %v12669_v52 }
 0x2b2   :  { %10524 = vrot.lane.b32.xlu0 %v11954_v54, %s11241_s24  ;;  %v2092_v54 = vsel %vm2066_vm7, %v10182_v34, %v10167_v10  ;;  %v10211_v10 = vunpack.i.l.bf16 %v12588_v47  ;;  %v2085_v57 = vsel %vm2066_vm7, %v10186_v24, %v10191_v43  ;;  %v10212_v34 = vunpack.i.h.bf16 %v12588_v47 }
 0x2b3   :  { %8524 = vmatmul.mubr.msk.f32.gmra.mrb[30].mxu1 %vm1082_vm5, %v1686_v50  ;;  %v12731_v29 = vpop.permute.xlu1 %10259  ;;  %v8999_v56 = vpack.c.bf16 %v2092_v54, %v2091_v2  ;;  %v2077_v32 = vsel %vm2066_vm7, %v10191_v43, %v10196_v8  ;;  %v9003_v36 = vpack.c.bf16 %v2094_v62, %v2093_v31  ;;  %v2096_v33 = vsel %vm2066_vm7, %v10222_v45, %v10207_v41  ;;  %v150_v2 = vld [vmem:[%s16664_s8 + $0x40] sm:$0xff] }
 0x2b4   :  { %10529 = vrot.lane.b32.xlu1 %v11962_v18, %s11241_s24  ;;  %8532 = vmatmul.mubr.msk.f32.gmra.mrb[32].mxu0 %vm1082_vm5, %v1686_v50  ;;  %v10206_v18 = vunpack.i.l.bf16 %v12581_v25  ;;  %v9001_v25 = vpack.c.bf16 %v2086_v17, %v2085_v57  ;;  %v2088_v46 = vsel %vm2066_vm7, %v10207_v41, %v10212_v34  ;;  %v2072_v5 = vsel %vm2066_vm7, %v10217_v11, %v10222_v45  ;;  %v151_v17 = vld [vmem:[%s16664_s8 + $0x48] sm:$0xff]  ;;  %v2110_v45 = vld [vmem:[%s16663_s7 + $0x118] sm:$0xff] }
 0x2b5   :  { %1818 = vmatprep.mubr.f32.mxu1 %v16905_v38  ;;  %1931 = vmatprep.mubr.f32.mxu0 %v16905_v38  ;;  %v12747_v48 = vpop.permute.xlu0 %10264  ;;  %v10232_v50 = vunpack.i.h.bf16 %v12669_v52  ;;  %v10247_v24 = vunpack.i.h.bf16 %v12679_v37  ;;  %v2089_v52 = vsel %vm2066_vm7, %v10226_v35, %v10241_v51  ;;  %v2080_v54 = vsel %vm2066_vm7, %v10212_v34, %v10217_v11 }
 0x2b6   :  { %10534 = vrot.lane.b32.xlu0 %v11972_v22, %s11241_s24  ;;  %v2107_v22 = vld [vmem:[%s16663_s7 + $0x100] sm:$0xff]  ;;  %v2087_v58 = vsel %vm2066_vm7, %v10206_v18, %v10211_v10  ;;  %v10257_v59 = vunpack.i.h.bf16 %v12704_v40  ;;  %v10237_v31 = vunpack.i.h.bf16 %v12685_v14  ;;  %v10236_v11 = vunpack.i.l.bf16 %v12685_v14 }
 0x2b7   :  { %8525 = vmatmul.mubr.msk.f32.gmra.mrb[32].mxu1 %vm1082_vm5, %v1687_v60  ;;  %v12758_v63 = vpop.permute.xlu1 %10269  ;;  %v9005_v19 = vpack.c.bf16 %v2088_v46, %v2087_v58  ;;  %v2074_v41 = vsel %vm2066_vm7, %v10232_v50, %v10247_v24 }
 0x2b8   :  { %10539 = vrot.lane.b32.xlu1 %v11980_v4, %s11241_s24  ;;  %8533 = vmatmul.mubr.msk.f32.gmra.mrb[34].mxu0 %vm1082_vm5, %v1687_v60  ;;  %v2070_v4 = vsel %vm2066_vm7, %v10197_v6, %v10202_v3  ;;  %v9021_v60 = vpack.c.bf16 %v2072_v5, %v2071_v13  ;;  %v2079_v3 = vsel %vm2066_vm7, %v10211_v10, %v10216_v7  ;;  %v155_v5 = vld [vmem:[%s16664_s8 + $0x68] sm:$0xff] }
 0x2b9   :  { %2203 = vmatprep.mubr.f32.mxu1 %v16905_v38  ;;  %2316 = vmatprep.mubr.f32.mxu0 %v16905_v38  ;;  %v12777_v44 = vpop.permute.xlu0 %10274  ;;  %v9017_v23 = vpack.c.bf16 %v2070_v4, %v2069_v39  ;;  %v2098_v4 = vsel %vm2066_vm7, %v10247_v24, %v10227_v61  ;;  %v9023_v62 = vpack.c.bf16 %v2080_v54, %v2079_v3  ;;  %v2112_v24 = vld [vmem:[%s16663_s7 + $0x128] sm:$0xff]  ;;  %v10267_v3 = vunpack.i.h.bf16 %v12747_v48 }
 0x2ba   :  { %10544 = vrot.lane.b32.xlu0 %v11982_v28, %s11241_s24  ;;  %v2078_v28 = vsel %vm2066_vm7, %v10192_v21, %v10197_v6  ;;  %v10246_v21 = vunpack.i.l.bf16 %v12679_v37  ;;  %v2090_v37 = vsel %vm2066_vm7, %v10227_v61, %v10242_v42  ;;  %v2109_v6 = vld [vmem:[%s16663_s7 + $0x110] sm:$0xff]  ;;  %v153_v61 = vld [vmem:[%s16664_s8 + $0x58] sm:$0xff]  ;;  %v10277_v14 = vunpack.i.h.bf16 %v12777_v44 }
 0x2bb   :  { %8534 = vmatmul.mubr.msk.f32.vlgmr.msra.gmra.mrb[34].mxu1 %vm1082_vm5, %v2107_v22  ;;  %v12791_v26 = vpop.permute.xlu1 %10279  ;;  %v9019_v49 = vpack.c.bf16 %v2078_v28, %v2077_v32  ;;  %v9009_v47 = vpack.c.bf16 %v2090_v37, %v2089_v52  ;;  %v2082_v32 = vsel %vm2066_vm7, %v10242_v42, %v10232_v50  ;;  %v156_v50 = vld [vmem:[%s16664_s8 + $0x70] sm:$0xff]  ;;  %v174_v37 = vld [vmem:[%s16664_s8 + $0x100] sm:$0xf] }
 0x2bc   :  { %9000 = vmatpush1.bf16.msra.mxu1 %v8999_v56  ;;  %10554 = vrot.lane.b32.xlu1 %v11988_v15, %s11241_s24  ;;  %v2095_v15 = vsel %vm2066_vm7, %v10221_v0, %v10206_v18  ;;  %v10256_v18 = vunpack.i.l.bf16 %v12704_v40  ;;  %v2073_v10 = vsel %vm2066_vm7, %v10231_v55, %v10246_v21  ;;  %v10251_v56 = vunpack.i.l.bf16 %v12694_v12  ;;  %v152_v0 = vld [vmem:[%s16664_s8 + $0x50] sm:$0xff] }
 0x2bd   :  { %8542 = vmatmul.mubr.msk.f32.vlgmr.msra.gmra.mrb[36].mxu0 %vm1082_vm5, %v2107_v22  ;;  %9002 = vmatprep.subr.bf16.mxu1 %v9001_v25  ;;  %v12804_v20 = vpop.permute.xlu0 %10284  ;;  %v9007_v57 = vpack.c.bf16 %v2096_v33, %v2095_v15  ;;  %v10252_v22 = vunpack.i.h.bf16 %v12694_v12  ;;  %v10261_v25 = vunpack.i.l.bf16 %v12731_v29  ;;  %v2097_v39 = vsel %vm2066_vm7, %v10246_v21, %v10226_v35  ;;  %v2113_v52 = vld [vmem:[%s16663_s7 + $0x130] sm:$0xff]  ;;  %v158_v12 = vld [vmem:[%s16664_s8 + $0x80] sm:$0xff] }
 0x2be   :  { %9016 = vmatpush1.bf16.msra.mxu0 %v9015_v53  ;;  %2209 = vmatprep.mubr.f32.mxu1 %v16905_v38  ;;  %v10262_v53 = vunpack.i.h.bf16 %v12731_v29  ;;  %v9025_v7 = vpack.c.bf16 %v2074_v41, %v2073_v10  ;;  %v2688_v46 = vsel %vm2679_vm8, %v10251_v56, %v10256_v18  ;;  %v10276_v41 = vunpack.i.l.bf16 %v12777_v44 }
 0x2bf   :  { %9018 = vmatprep.subr.bf16.mxu0 %v9017_v23  ;;  %10549 = vrot.lane.b32.xlu0 %v16959_v27, %s11241_s24  ;;  %v12820_v43 = vpop.permute.xlu1 %10289  ;;  %v2689_v28 = vsel %vm2679_vm8, %v10252_v22, %v10257_v59  ;;  %v2081_v23 = vsel %vm2066_vm7, %v10241_v51, %v10231_v55  ;;  %v2704_v30 = vsel %vm2679_vm8, %v10261_v25, %v10236_v11  ;;  %v2111_v27 = vld [vmem:[%s16663_s7 + $0x120] sm:$0xff]  ;;  %v10281_v44 = vunpack.i.l.bf16 %v12791_v26 }
 0x2c0   :  { %8535 = vmatmul.mubr.msk.f32.gmra.mrb[36].mxu1 %vm1082_vm5, %v2108_v9  ;;  %2322 = vmatprep.mubr.f32.mxu0 %v16905_v38  ;;  %v2705_v42 = vsel %vm2679_vm8, %v10262_v53, %v10237_v31  ;;  %v9029_v51 = vpack.c.bf16 %v2689_v28, %v2688_v46  ;;  %v161_v46 = vld [vmem:[%s16664_s8 + $0x98] sm:$0xff] }
 0x2c1   :  { %9004 = vmatpush1.bf16.msra.mxu1 %v9003_v36  ;;  %10559 = vrot.lane.b32.xlu1 %v16960_v16, %s11241_s24  ;;  %v12841_v8 = vpop.permute.xlu0 %10294  ;;  %v9027_v36 = vpack.c.bf16 %v2082_v32, %v2081_v23  ;;  %v9045_v33 = vpack.c.bf16 %v2705_v42, %v2704_v30  ;;  %v157_v16 = vld [vmem:[%s16664_s8 + $0x78] sm:$0xff] }
 0x2c2   :  { %8543 = vmatmul.mubr.msk.f32.gmra.mrb[38].mxu0 %vm1082_vm5, %v2108_v9  ;;  %9006 = vmatprep.subr.bf16.mxu1 %v9005_v19  ;;  %v9011_v9 = vpack.c.bf16 %v2098_v4, %v2097_v39  ;;  %v154_v19 = vld [vmem:[%s16664_s8 + $0x60] sm:$0xff]  ;;  %v2680_v4 = vsel %vm2679_vm8, %v10256_v18, %v10261_v25  ;;  %v160_v18 = vld [vmem:[%s16664_s8 + $0x90] sm:$0xff]  ;;  %v10297_v40 = vunpack.i.h.bf16 %v12841_v8 }
 0x2c3   :  { %9020 = vmatpush1.bf16.msra.mxu0 %v9019_v49  ;;  %2215 = vmatprep.mubr.f32.mxu1 %v16905_v38  ;;  %v176_v49 = vld [vmem:[%s16664_s8 + $0x110] sm:$0xf] }
 0x2c4   :  { %9022 = vmatprep.subr.bf16.mxu0 %v9021_v60  ;;  %4197 = vperm.xlu0 %9921, %v150_v2   ;;  %v12858_v34 = vpop.permute.xlu1 %10299  ;;  %v2696_v60 = vsel %vm2679_vm8, %v10236_v11, %v10251_v56  ;;  %v10282_v56 = vunpack.i.h.bf16 %v12791_v26  ;;  %v10287_v11 = vunpack.i.h.bf16 %v12804_v20 }
 0x2c5   :  { %8536 = vmatmul.mubr.msk.f32.gmra.mrb[38].mxu1 %vm1082_vm5, %v2109_v6  ;;  %2328 = vmatprep.mubr.f32.mxu0 %v16905_v38  ;;  %v12874_v58 = vpop.permute.xlu0 %10304  ;;  %v10302_v32 = vunpack.i.h.bf16 %v12858_v34  ;;  %v10301_v23 = vunpack.i.l.bf16 %v12858_v34 }
 0x2c6   :  { %9008 = vmatpush1.bf16.msra.mxu1 %v9007_v57  ;;  %4202 = vperm.xlu1 %9922, %v151_v17   ;;  %v10266_v57 = vunpack.i.l.bf16 %v12747_v48  ;;  %v10272_v17 = vunpack.i.h.bf16 %v12758_v63  ;;  %v2114_v48 = vld [vmem:[%s16663_s7 + $0x138] sm:$0xff]  ;;  %v2683_v34 = vsel %vm2679_vm8, %v10277_v14, %v10282_v56 }
 0x2c7   :  { %8544 = vmatmul.mubr.msk.f32.gmra.mrb[40].mxu0 %vm1082_vm5, %v2109_v6  ;;  %9010 = vmatprep.subr.bf16.mxu1 %v9009_v47  ;;  %v2697_v6 = vsel %vm2679_vm8, %v10237_v31, %v10252_v22  ;;  %v10271_v47 = vunpack.i.l.bf16 %v12758_v63  ;;  %v159_v63 = vld [vmem:[%s16664_s8 + $0x88] sm:$0xff]  ;;  %v2681_v31 = vsel %vm2679_vm8, %v10257_v59, %v10262_v53  ;;  %v10296_v59 = vunpack.i.l.bf16 %v12841_v8  ;;  %v2099_v53 = vld [vmem:[%s16663_s7 + $0xc0] sm:$0xff] }
 0x2c8   :  { %9024 = vmatpush1.bf16.msra.mxu0 %v9023_v62  ;;  %2221 = vmatprep.mubr.f32.mxu1 %v16905_v38  ;;  %v12905_v35 = vpop.permute.xlu1 %10319  ;;  %v9031_v39 = vpack.c.bf16 %v2697_v6, %v2696_v60  ;;  %v13022_v26 = vsel %vm2679_vm8, %v10267_v3, %v10272_v17  ;;  %v10291_v8 = vunpack.i.l.bf16 %v12820_v43  ;;  %v9047_v30 = vpack.c.bf16 %v2681_v31, %v2680_v4 }
 0x2c9   :  { %9026 = vmatprep.subr.bf16.mxu0 %v9025_v7  ;;  %4207 = vperm.xlu0 %9921, %v152_v0   ;;  %v12919_v15 = vpop.permute.xlu0 %10309  ;;  %v13018_v62 = vsel %vm2679_vm8, %v10266_v57, %v10271_v47  ;;  %v2690_v25 = vsel %vm2679_vm8, %v10271_v47, %v10276_v41  ;;  %v2691_v0 = vsel %vm2679_vm8, %v10272_v17, %v10277_v14  ;;  %v10286_v7 = vunpack.i.l.bf16 %v12804_v20 }
 0x2ca   :  { %8537 = vmatmul.mubr.msk.f32.gmra.mrb[40].mxu1 %vm1082_vm5, %v2110_v45  ;;  %2334 = vmatprep.mubr.f32.mxu0 %v16905_v38  ;;  %v2706_v20 = vsel %vm2679_vm8, %v10281_v44, %v10266_v57  ;;  %v9035_v42 = vpack.c.bf16 %v13022_v26, %v13018_v62  ;;  %v2709_v6 = vsel %vm2679_vm8, %v10302_v32, %v10287_v11 }
 0x2cb   :  { %9012 = vmatpush1.bf16.msra.mxu1 %v9011_v9  ;;  %4212 = vperm.xlu1 %9922, %v153_v61   ;;  %v2682_v61 = vsel %vm2679_vm8, %v10276_v41, %v10281_v44  ;;  %v9033_v9 = vpack.c.bf16 %v2691_v0, %v2690_v25  ;;  %v2708_v60 = vsel %vm2679_vm8, %v10301_v23, %v10286_v7  ;;  %v10322_v41 = vunpack.i.h.bf16 %v12905_v35 }
 0x2cc   :  { %8545 = vmatmul.mubr.msk.f32.gmra.mrb[42].mxu0 %vm1082_vm5, %v2110_v45  ;;  %9030 = vmatprep.subr.bf16.mxu1 %v9029_v51  ;;  %v12928_v13 = vpop.permute.xlu1 %10324  ;;  %v10292_v45 = vunpack.i.h.bf16 %v12820_v43  ;;  %v2707_v43 = vsel %vm2679_vm8, %v10282_v56, %v10267_v3  ;;  %v162_v51 = vld [vmem:[%s16664_s8 + $0xa0] sm:$0xff]  ;;  %v9051_v47 = vpack.c.bf16 %v2683_v34, %v2682_v61  ;;  %v2685_v14 = vsel %vm2679_vm8, %v10297_v40, %v10302_v32  ;;  %v2102_v61 = vld [vmem:[%s16663_s7 + $0xd8] sm:$0xff] }
 0x2cd   :  { %9028 = vmatpush1.bf16.msra.mxu0 %v9027_v36  ;;  %2227 = vmatprep.mubr.f32.mxu1 %v16905_v38  ;;  %v2692_v36 = vsel %vm2679_vm8, %v10291_v8, %v10296_v59  ;;  %v10327_v3 = vunpack.i.h.bf16 %v12928_v13  ;;  %v10326_v57 = vunpack.i.l.bf16 %v12928_v13  ;;  %v10307_v13 = vunpack.i.h.bf16 %v12874_v58 }
 0x2ce   :  { %9046 = vmatprep.subr.bf16.mxu0 %v9045_v33  ;;  %4217 = vperm.xlu0 %9921, %v154_v19   ;;  %v2693_v19 = vsel %vm2679_vm8, %v10292_v45, %v10297_v40  ;;  %v10306_v56 = vunpack.i.l.bf16 %v12874_v58  ;;  %v9053_v44 = vpack.c.bf16 %v2709_v6, %v2708_v60  ;;  %v2101_v58 = vld [vmem:[%s16663_s7 + $0xd0] sm:$0xff]  ;;  %v165_v40 = vld [vmem:[%s16664_s8 + $0xb8] sm:$0xff]  ;;  %v2104_v60 = vld [vmem:[%s16663_s7 + $0xe8] sm:$0xff] }
 0x2cf   :  { %8538 = vmatmul.mubr.msk.f32.gmra.mrb[42].mxu1 %vm1082_vm5, %v2111_v27  ;;  %2340 = vmatprep.mubr.f32.mxu0 %v16905_v38  ;;  %v12939_v55 = vpop.permute.xlu0 %10314  ;;  %v9037_v17 = vpack.c.bf16 %v2693_v19, %v2692_v36  ;;  %v2711_v25 = vsel %vm2679_vm8, %v10327_v3, %v10307_v13  ;;  %v2703_v32 = vsel %vm2679_vm8, %v10307_v13, %v10322_v41 }
 0x2d0   :  { %4222 = vperm.xlu1 %9922, %v155_v5   ;;  %8546 = vmatmul.mubr.msk.f32.gmra.mrb[44].mxu0 %vm1082_vm5, %v2111_v27  ;;  %v12945_v21 = vpop.permute.xlu1 %10329  ;;  %v13075_v27 = vsel %vm2679_vm8, %v10286_v7, %v10291_v8  ;;  %v2701_v5 = vsel %vm2679_vm8, %v10287_v11, %v10292_v45 }
 0x2d1   :  { %2233 = vmatprep.mubr.f32.mxu1 %v16905_v38  ;;  %2346 = vmatprep.mubr.f32.mxu0 %v16905_v38  ;;  %v9039_v4 = vpack.c.bf16 %v2701_v5, %v13075_v27  ;;  %v10332_v0 = vunpack.i.h.bf16 %v12945_v21  ;;  %v10331_v11 = vunpack.i.l.bf16 %v12945_v21 }
 0x2d2   :  { %4227 = vperm.xlu0 %9921, %v156_v50   ;;  %v9049_v50 = vpack.c.bf16 %v2707_v43, %v2706_v20  ;;  %v10317_v20 = vunpack.i.h.bf16 %v12939_v55  ;;  %v10316_v43 = vunpack.i.l.bf16 %v12939_v55 }
 0x2d3   :  { %8539 = vmatmul.mubr.msk.f32.gmra.mrb[44].mxu1 %vm1082_vm5, %v2112_v24  ;;  %v12956_v2 = vpop.permute.xlu0 %10334 }
 0x2d4   :  { %4232 = vperm.xlu1 %9922, %v157_v16   ;;  %8547 = vmatmul.mubr.msk.f32.gmra.mrb[46].mxu0 %vm1082_vm5, %v2112_v24  ;;  %v2100_v24 = vld [vmem:[%s16663_s7 + $0xc8] sm:$0xff]  ;;  %v10336_v31 = vunpack.i.l.bf16 %v12956_v2 }
 0x2d5   :  { %2239 = vmatprep.mubr.f32.mxu1 %v16905_v38  ;;  %2352 = vmatprep.mubr.f32.mxu0 %v16905_v38  ;;  %v12967_v54 = vpop.permute.xlu1 %10339 }
 0x2d6   :  { %323 = vperm.xlu0 %9921, %v176_v49   ;;  %v10312_v49 = vunpack.i.h.bf16 %v12919_v15  ;;  %v10342_v7 = vunpack.i.h.bf16 %v12967_v54  ;;  %v10341_v45 = vunpack.i.l.bf16 %v12967_v54 }
 0x2d7   :  { %8540 = vmatmul.mubr.msk.f32.gmra.mrb[46].mxu1 %vm1082_vm5, %v2113_v52  ;;  %v12987_v10 = vpop.permute.xlu0 %10344 }
 0x2d8   :  { %4301 = vperm.xlu1 %9922, %v174_v37   ;;  %8548 = vmatmul.mubr.msk.f32.gmra.mrb[48].mxu0 %vm1082_vm5, %v2113_v52  ;;  %v10311_v52 = vunpack.i.l.bf16 %v12919_v15  ;;  %v163_v37 = vld [vmem:[%s16664_s8 + $0xa8] sm:$0xff]  ;;  %v2695_v26 = vsel %vm2679_vm8, %v10322_v41, %v10312_v49  ;;  %v2687_v34 = vsel %vm2679_vm8, %v10312_v49, %v10327_v3  ;;  %v3228_v19 = vsel %vm3203_vm9, %v10341_v45, %v10316_v43 }
 0x2d9   :  { %2245 = vmatprep.mubr.f32.mxu1 %v16905_v38  ;;  %2358 = vmatprep.mubr.f32.mxu0 %v16905_v38  ;;  %v13000_v22 = vpop.permute.xlu1 %10349  ;;  %v3229_v15 = vsel %vm3203_vm9, %v10342_v7, %v10317_v20  ;;  %v3204_v21 = vsel %vm3203_vm9, %v10336_v31, %v10341_v45 }
 0x2da   :  { %4469 = vperm.xlu0 %9921, %v158_v12   ;;  %v2684_v12 = vsel %vm2679_vm8, %v10296_v59, %v10301_v23  ;;  %v10351_v41 = vunpack.i.l.bf16 %v13000_v22 }
 0x2db   :  { %8541 = vmatmul.mubr.msk.f32.gmra.mrb[48].mxu1 %vm1082_vm5, %v2114_v48  ;;  %v13028_v29 = vpop.permute.xlu0 %10354  ;;  %v9055_v59 = vpack.c.bf16 %v2685_v14, %v2684_v12  ;;  %v10346_v12 = vunpack.i.l.bf16 %v12987_v10  ;;  %v10352_v14 = vunpack.i.h.bf16 %v13000_v22  ;;  %v3221_v22 = vsel %vm3203_vm9, %v10317_v20, %v10332_v0 }
 0x2dc   :  { %4474 = vperm.xlu1 %9922, %v159_v63   ;;  %8549 = vmatmul.mubr.msk.f32.gmra.mrb[50].mxu0 %vm1082_vm5, %v2114_v48  ;;  %v10321_v48 = vunpack.i.l.bf16 %v12905_v35  ;;  %v10337_v35 = vunpack.i.h.bf16 %v12956_v2  ;;  %v10357_v13 = vunpack.i.h.bf16 %v13028_v29 }
 0x2dd   :  { %2453 = vmatprep.mubr.f32.mxu1 %v16905_v38  ;;  %2566 = vmatprep.mubr.f32.mxu0 %v16905_v38  ;;  %v13049_v28 = vpop.permute.xlu1 %10359 }
 0x2de   :  { %4479 = vperm.xlu0 %9921, %v160_v18   ;;  %v2694_v62 = vsel %vm2679_vm8, %v10321_v48, %v10311_v52  ;;  %v3213_v55 = vsel %vm3203_vm9, %v10332_v0, %v10337_v35 }
 0x2df   :  { %8550 = vmatmul.mubr.msk.f32.vlgmr.msra.gmra.mrb[34].mxu1 %vm1082_vm5, %v2099_v53  ;;  %v9041_v23 = vpack.c.bf16 %v2695_v26, %v2694_v62 }
 0x2e0   :  { %9032 = vmatpush1.bf16.msra.mxu1 %v9031_v39  ;;  %4484 = vperm.xlu1 %9922, %v161_v46   ;;  %v13071_v33 = vpop.permute.xlu0 %10364  ;;  %v164_v39 = vld [vmem:[%s16664_s8 + $0xb0] sm:$0xff]  ;;  %v2702_v46 = vsel %vm2679_vm8, %v10306_v56, %v10321_v48 }
 0x2e1   :  { %8558 = vmatmul.mubr.msk.f32.vlgmr.msra.gmra.mrb[36].mxu0 %vm1082_vm5, %v2099_v53  ;;  %9034 = vmatprep.subr.bf16.mxu1 %v9033_v9  ;;  %v13083_v16 = vpop.permute.xlu1 %10369  ;;  %v2710_v53 = vsel %vm2679_vm8, %v10326_v57, %v10306_v56  ;;  %v3212_v9 = vsel %vm3203_vm9, %v10331_v11, %v10336_v31  ;;  %v9043_v36 = vpack.c.bf16 %v2703_v32, %v2702_v46  ;;  %v10356_v56 = vunpack.i.l.bf16 %v13028_v29  ;;  %v2106_v29 = vld [vmem:[%s16663_s7 + $0xf8] sm:$0xff] }
 0x2e2   :  { %9048 = vmatpush1.bf16.msra.mxu0 %v9047_v30  ;;  %2459 = vmatprep.mubr.f32.mxu1 %v16905_v38  ;;  %v9061_v5 = vpack.c.bf16 %v3213_v55, %v3212_v9  ;;  %v10367_v26 = vunpack.i.h.bf16 %v13071_v33  ;;  %v10366_v31 = vunpack.i.l.bf16 %v13071_v33  ;;  %v10372_v54 = vunpack.i.h.bf16 %v13083_v16 }
 0x2e3   :  { %9050 = vmatprep.subr.bf16.mxu0 %v9049_v50  ;;  %4489 = vperm.xlu0 %9921, %v162_v51   ;;  %v9057_v51 = vpack.c.bf16 %v2711_v25, %v2710_v53  ;;  %v10371_v2 = vunpack.i.l.bf16 %v13083_v16  ;;  %v3214_v53 = vsel %vm3203_vm9, %v10351_v41, %v10356_v56  ;;  %v3215_v33 = vsel %vm3203_vm9, %v10352_v14, %v10357_v13 }
 0x2e4   :  { %8551 = vmatmul.mubr.msk.f32.gmra.mrb[36].mxu1 %vm1082_vm5, %v2100_v24  ;;  %2572 = vmatprep.mubr.f32.mxu0 %v16905_v38  ;;  %v13105_v63 = vpop.permute.xlu0 %10374  ;;  %v9065_v9 = vpack.c.bf16 %v3215_v33, %v3214_v53 }
 0x2e5   :  { %9036 = vmatpush1.bf16.msra.mxu1 %v9035_v42  ;;  %4494 = vperm.xlu1 %9922, %v163_v37   ;;  %v2686_v42 = vsel %vm2679_vm8, %v10311_v52, %v10326_v57  ;;  %v9077_v52 = vpack.c.bf16 %v3229_v15, %v3228_v19  ;;  %v2105_v57 = vld [vmem:[%s16663_s7 + $0xf0] sm:$0xff] }
 0x2e6   :  { %8559 = vmatmul.mubr.msk.f32.gmra.mrb[38].mxu0 %vm1082_vm5, %v2100_v24  ;;  %9038 = vmatprep.subr.bf16.mxu1 %v9037_v17  ;;  %v13125_v18 = vpop.permute.xlu1 %10379  ;;  %v9059_v50 = vpack.c.bf16 %v2687_v34, %v2686_v42  ;;  %v2103_v24 = vld [vmem:[%s16663_s7 + $0xe0] sm:$0xff] }
 0x2e7   :  { %9052 = vmatpush1.bf16.msra.mxu0 %v9051_v47  ;;  %2465 = vmatprep.mubr.f32.mxu1 %v16905_v38  ;;  %v10347_v47 = vunpack.i.h.bf16 %v12987_v10  ;;  %v3220_v10 = vsel %vm3203_vm9, %v10316_v43, %v10331_v11  ;;  %v10382_v0 = vunpack.i.h.bf16 %v13125_v18  ;;  %v2712_v11 = vld [vmem:[%s16663_s7 + $0x140] sm:$0xff] }
 0x2e8   :  { %9054 = vmatprep.subr.bf16.mxu0 %v9053_v44  ;;  %4499 = vperm.xlu0 %9921, %v164_v39   ;;  %v13139_v8 = vpop.permute.xlu0 %10384  ;;  %v10362_v44 = vunpack.i.h.bf16 %v13049_v28  ;;  %v10361_v39 = vunpack.i.l.bf16 %v13049_v28  ;;  %v3205_v28 = vsel %vm3203_vm9, %v10337_v35, %v10342_v7  ;;  %v9063_v45 = vpack.c.bf16 %v3221_v22, %v3220_v10 }
 0x2e9   :  { %8552 = vmatmul.mubr.msk.f32.gmra.mrb[38].mxu1 %vm1082_vm5, %v2101_v58  ;;  %2578 = vmatprep.mubr.f32.mxu0 %v16905_v38  ;;  %v13260_v62 = vsel %vm3203_vm9, %v10347_v47, %v10352_v14  ;;  %v9079_v46 = vpack.c.bf16 %v3205_v28, %v3204_v21 }
 0x2ea   :  { %9040 = vmatpush1.bf16.msra.mxu1 %v9039_v4  ;;  %4504 = vperm.xlu1 %9922, %v165_v40   ;;  %v13165_v30 = vpop.permute.xlu1 %10389  ;;  %v10377_v40 = vunpack.i.h.bf16 %v13105_v63  ;;  %v13279_v25 = vsel %vm3203_vm9, %v10356_v56, %v10361_v39  ;;  %v13283_v16 = vsel %vm3203_vm9, %v10357_v13, %v10362_v44  ;;  %v3230_v20 = vsel %vm3203_vm9, %v10361_v39, %v10346_v12 }
 0x2eb   :  { %8560 = vmatmul.mubr.msk.f32.gmra.mrb[40].mxu0 %vm1082_vm5, %v2101_v58  ;;  %9042 = vmatprep.subr.bf16.mxu1 %v9041_v23  ;;  %v13256_v58 = vsel %vm3203_vm9, %v10346_v12, %v10351_v41  ;;  %v13298_v23 = vsel %vm3203_vm9, %v10366_v31, %v10371_v2  ;;  %v3231_v43 = vsel %vm3203_vm9, %v10362_v44, %v10347_v47  ;;  %v10391_v47 = vunpack.i.l.bf16 %v13165_v30  ;;  %v2714_v44 = vld [vmem:[%s16663_s7 + $0x150] sm:$0xff] }
 0x2ec   :  { %9056 = vmatpush1.bf16.msra.mxu0 %v9055_v59  ;;  %2471 = vmatprep.mubr.f32.mxu1 %v16905_v38  ;;  %v13183_v27 = vpop.permute.xlu0 %10394  ;;  %v10376_v59 = vunpack.i.l.bf16 %v13105_v63  ;;  %v10381_v63 = vunpack.i.l.bf16 %v13125_v18  ;;  %v9067_v32 = vpack.c.bf16 %v13260_v62, %v13256_v58  ;;  %v13302_v18 = vsel %vm3203_vm9, %v10367_v26, %v10372_v54 }
 0x2ed   :  { %9058 = vmatprep.subr.bf16.mxu0 %v9057_v51  ;;  %8553 = vmatmul.mubr.msk.f32.gmra.mrb[40].mxu1 %vm1082_vm5, %v2102_v61  ;;  %v3217_v42 = vsel %vm3203_vm9, %v10372_v54, %v10377_v40  ;;  %v9083_v34 = vpack.c.bf16 %v13283_v16, %v13279_v25  ;;  %v10397_v19 = vunpack.i.h.bf16 %v13183_v27  ;;  %v10396_v15 = vunpack.i.l.bf16 %v13183_v27  ;;  %v2715_v16 = vld [vmem:[%s16663_s7 + $0x158] sm:$0xff] }
 0x2ee   :  { %2584 = vmatprep.mubr.f32.mxu0 %v16905_v38  ;;  %9044 = vmatpush1.bf16.msra.mxu1 %v9043_v36  ;;  %v13190_v49 = vpop.permute.xlu1 %10399  ;;  %v3216_v55 = vsel %vm3203_vm9, %v10371_v2, %v10376_v59  ;;  %v13320_v51 = vsel %vm3203_vm9, %v10376_v59, %v10381_v63  ;;  %v13324_v36 = vsel %vm3203_vm9, %v10377_v40, %v10382_v0  ;;  %v10387_v41 = vunpack.i.h.bf16 %v13139_v8 }
 0x2ef   :  { %8561 = vmatmul.mubr.msk.f32.gmra.mrb[42].mxu0 %vm1082_vm5, %v2102_v61  ;;  %9062 = vmatprep.subr.bf16.mxu1 %v9061_v5  ;;  %v2713_v5 = vld [vmem:[%s16663_s7 + $0x148] sm:$0xff]  ;;  %v9071_v27 = vpack.c.bf16 %v13302_v18, %v13298_v23  ;;  %v3232_v12 = vsel %vm3203_vm9, %v10381_v63, %v10366_v31  ;;  %v10386_v13 = vunpack.i.l.bf16 %v13139_v8  ;;  %v9069_v56 = vpack.c.bf16 %v3217_v42, %v3216_v55 }
 0x2f0   :  { %9060 = vmatpush1.bf16.msra.mxu0 %v9059_v50  ;;  %2477 = vmatprep.mubr.f32.mxu1 %v16905_v38  ;;  %v13194_v37 = vpop.permute.xlu0 %10404  ;;  %v3218_v8 = vsel %vm3203_vm9, %v10391_v47, %v10396_v15 }
 0x2f1   :  { %9078 = vmatprep.subr.bf16.mxu0 %v9077_v52  ;;  %8554 = vmatmul.mubr.msk.f32.gmra.mrb[42].mxu1 %vm1082_vm5, %v2103_v24  ;;  %v10401_v52 = vunpack.i.l.bf16 %v13190_v49  ;;  %v3226_v2 = vsel %vm3203_vm9, %v10386_v13, %v10391_v47  ;;  %v10407_v33 = vunpack.i.h.bf16 %v13194_v37  ;;  %v10406_v25 = vunpack.i.l.bf16 %v13194_v37 }
 0x2f2   :  { %2590 = vmatprep.mubr.f32.mxu0 %v16905_v38  ;;  %2483 = vmatprep.mubr.f32.mxu1 %v16905_v38  ;;  %v13202_v6 = vpop.permute.xlu1 %10409 }
 0x2f3   :  { %8562 = vmatmul.mubr.msk.f32.gmra.mrb[44].mxu0 %vm1082_vm5, %v2103_v24  ;;  %v10402_v24 = vunpack.i.h.bf16 %v13190_v49  ;;  %v3233_v49 = vsel %vm3203_vm9, %v10382_v0, %v10367_v26  ;;  %v3234_v28 = vsel %vm3203_vm9, %v10401_v52, %v10386_v13  ;;  %v10412_v62 = vunpack.i.h.bf16 %v13202_v6 }
 0x2f4   :  { %2596 = vmatprep.mubr.f32.mxu0 %v16905_v38  ;;  %v13206_v3 = vpop.permute.xlu0 %10414  ;;  %v9085_v21 = vpack.c.bf16 %v3233_v49, %v3232_v12  ;;  %v10411_v26 = vunpack.i.l.bf16 %v13202_v6  ;;  %v3210_v63 = vsel %vm3203_vm9, %v10396_v15, %v10401_v52 }
 0x2f5   :  { %8555 = vmatmul.mubr.msk.f32.gmra.mrb[44].mxu1 %vm1082_vm5, %v2104_v60  ;;  %v10417_v10 = vunpack.i.h.bf16 %v13206_v3  ;;  %v10416_v22 = vunpack.i.l.bf16 %v13206_v3  ;;  %v3235_v58 = vsel %vm3203_vm9, %v10402_v24, %v10387_v41 }
 0x2f6   :  { %2489 = vmatprep.mubr.f32.mxu1 %v16905_v38  ;;  %v13213_v17 = vpop.permute.xlu1 %10419 }
 0x2f7   :  { %8563 = vmatmul.mubr.msk.f32.gmra.mrb[46].mxu0 %vm1082_vm5, %v2104_v60  ;;  %v9081_v60 = vpack.c.bf16 %v3231_v43, %v3230_v20  ;;  %v10422_v31 = vunpack.i.h.bf16 %v13213_v17  ;;  %v10421_v54 = vunpack.i.l.bf16 %v13213_v17  ;;  %v3107_v0 = vsel %vm3098_vm10, %v10411_v26, %v10416_v22 }
 0x2f8   :  { %2602 = vmatprep.mubr.f32.mxu0 %v16905_v38  ;;  %v13221_v48 = vpop.permute.xlu0 %10424  ;;  %v3108_v37 = vsel %vm3098_vm10, %v10412_v62, %v10417_v10 }
 0x2f9   :  { %8556 = vmatmul.mubr.msk.f32.gmra.mrb[46].mxu1 %vm1082_vm5, %v2105_v57  ;;  %v3123_v23 = vsel %vm3098_vm10, %v10421_v54, %v10406_v25  ;;  %v3124_v18 = vsel %vm3098_vm10, %v10422_v31, %v10407_v33  ;;  %v9093_v20 = vpack.c.bf16 %v3108_v37, %v3107_v0  ;;  %v10427_v15 = vunpack.i.h.bf16 %v13221_v48 }
 0x2fa   :  { %2495 = vmatprep.mubr.f32.mxu1 %v16905_v38  ;;  %v13240_v4 = vpop.permute.xlu1 %10429  ;;  %v9109_v55 = vpack.c.bf16 %v3124_v18, %v3123_v23  ;;  %v3099_v6 = vsel %vm3098_vm10, %v10416_v22, %v10421_v54 }
 0x2fb   :  { %8564 = vmatmul.mubr.msk.f32.gmra.mrb[48].mxu0 %vm1082_vm5, %v2105_v57  ;;  %v10392_v57 = vunpack.i.h.bf16 %v13165_v30  ;;  %v9087_v30 = vpack.c.bf16 %v13324_v36, %v13320_v51  ;;  %v2717_v51 = vld [vmem:[%s16663_s7 + $0x168] sm:$0xff]  ;;  %v10431_v52 = vunpack.i.l.bf16 %v13240_v4 }
 0x2fc   :  { %2608 = vmatprep.mubr.f32.mxu0 %v16905_v38  ;;  %v13268_v35 = vpop.permute.xlu0 %10434 }
 0x2fd   :  { %8557 = vmatmul.mubr.msk.f32.gmra.mrb[48].mxu1 %vm1082_vm5, %v2106_v29  ;;  %v3219_v39 = vsel %vm3203_vm9, %v10392_v57, %v10397_v19  ;;  %v3227_v40 = vsel %vm3203_vm9, %v10387_v41, %v10392_v57  ;;  %v10436_v57 = vunpack.i.l.bf16 %v13268_v35 }
 0x2fe   :  { %2808 = vmatprep.mubr.f32.mxu1 %v16905_v38  ;;  %v13291_v7 = vpop.permute.xlu1 %10439  ;;  %v9073_v59 = vpack.c.bf16 %v3219_v39, %v3218_v8 }
 0x2ff   :  { %8565 = vmatmul.mubr.msk.f32.gmra.mrb[50].mxu0 %vm1082_vm5, %v2106_v29  ;;  %v10442_v47 = vunpack.i.h.bf16 %v13291_v7  ;;  %v10441_v12 = vunpack.i.l.bf16 %v13291_v7  ;;  %v3100_v7 = vsel %vm3098_vm10, %v10417_v10, %v10422_v31  ;;  %v3109_v8 = vsel %vm3098_vm10, %v10431_v52, %v10436_v57 }
 0x300   :  { %2921 = vmatprep.mubr.f32.mxu0 %v16905_v38  ;;  %v13309_v61 = vpop.permute.xlu0 %10444 }
 0x301   :  { %8566 = vmatmul.mubr.msk.f32.vlgmr.msra.gmra.mrb[34].mxu1 %vm1082_vm5, %v2712_v11  ;;  %v10446_v17 = vunpack.i.l.bf16 %v13309_v61  ;;  %v13506_v39 = vsel %vm3098_vm10, %v10436_v57, %v10441_v12 }
 0x302   :  { %9064 = vmatpush1.bf16.msra.mxu1 %v9063_v45  ;;  %2814 = vmatprep.mubr.f32.mxu1 %v16905_v38  ;;  %v13332_v50 = vpop.permute.xlu1 %10449  ;;  %v9089_v45 = vpack.c.bf16 %v3235_v58, %v3234_v28  ;;  %v3236_v28 = vld [vmem:[%s16663_s7 + $0x1c0] sm:$0xff] }
 0x303   :  { %8574 = vmatmul.mubr.msk.f32.vlgmr.msra.gmra.mrb[36].mxu0 %vm1082_vm5, %v2712_v11  ;;  %9066 = vmatprep.subr.bf16.mxu1 %v9065_v9  ;;  %v3211_v11 = vsel %vm3203_vm9, %v10397_v19, %v10402_v24  ;;  %v2716_v9 = vld [vmem:[%s16663_s7 + $0x160] sm:$0xff]  ;;  %v2718_v19 = vld [vmem:[%s16663_s7 + $0x170] sm:$0xff]  ;;  %v10432_v24 = vunpack.i.h.bf16 %v13240_v4  ;;  %v3116_v4 = vsel %vm3098_vm10, %v10407_v33, %v10412_v62  ;;  %v10452_v3 = vunpack.i.h.bf16 %v13332_v50 }
 0x304   :  { %9080 = vmatpush1.bf16.msra.mxu0 %v9079_v46  ;;  %2927 = vmatprep.mubr.f32.mxu0 %v16905_v38  ;;  %v13346_v14 = vpop.permute.xlu0 %10454  ;;  %v9091_v43 = vpack.c.bf16 %v3211_v11, %v3210_v63  ;;  %v9111_v62 = vpack.c.bf16 %v3100_v7, %v3099_v6 }
 0x305   :  { %9082 = vmatprep.subr.bf16.mxu0 %v9081_v60  ;;  %8567 = vmatmul.mubr.msk.f32.gmra.mrb[36].mxu1 %vm1082_vm5, %v2713_v5  ;;  %v13485_v41 = vsel %vm3098_vm10, %v10427_v15, %v10432_v24  ;;  %v10457_v10 = vunpack.i.h.bf16 %v13346_v14  ;;  %v10456_v22 = vunpack.i.l.bf16 %v13346_v14 }
 0x306   :  { %9068 = vmatpush1.bf16.msra.mxu1 %v9067_v32  ;;  %2820 = vmatprep.mubr.f32.mxu1 %v16905_v38  ;;  %v13363_v29 = vpop.permute.xlu1 %10459  ;;  %v9075_v32 = vpack.c.bf16 %v3227_v40, %v3226_v2  ;;  %v3126_v2 = vsel %vm3098_vm10, %v10442_v47, %v10427_v15 }
 0x307   :  { %8575 = vmatmul.mubr.msk.f32.gmra.mrb[38].mxu0 %vm1082_vm5, %v2713_v5  ;;  %9070 = vmatprep.subr.bf16.mxu1 %v9069_v56  ;;  %v10426_v5 = vunpack.i.l.bf16 %v13221_v48  ;;  %v3115_v48 = vsel %vm3098_vm10, %v10406_v25, %v10411_v26  ;;  %v10447_v56 = vunpack.i.h.bf16 %v13309_v61  ;;  %v10462_v14 = vunpack.i.h.bf16 %v13363_v29 }
 0x308   :  { %9084 = vmatpush1.bf16.msra.mxu0 %v9083_v34  ;;  %2933 = vmatprep.mubr.f32.mxu0 %v16905_v38  ;;  %v9095_v58 = vpack.c.bf16 %v3116_v4, %v3115_v48  ;;  %v3112_v25 = vsel %vm3098_vm10, %v10452_v3, %v10457_v10 }
 0x309   :  { %9086 = vmatprep.subr.bf16.mxu0 %v9085_v21  ;;  %8568 = vmatmul.mubr.msk.f32.gmra.mrb[38].mxu1 %vm1082_vm5, %v2714_v44  ;;  %v13381_v53 = vpop.permute.xlu0 %10464  ;;  %v13481_v49 = vsel %vm3098_vm10, %v10426_v5, %v10431_v52  ;;  %v10461_v21 = vunpack.i.l.bf16 %v13363_v29  ;;  %v13527_v29 = vsel %vm3098_vm10, %v10447_v56, %v10452_v3  ;;  %v3125_v54 = vsel %vm3098_vm10, %v10441_v12, %v10426_v5  ;;  %v3238_v52 = vld [vmem:[%s16663_s7 + $0x1d0] sm:$0xff] }
 0x30a   :  { %9072 = vmatpush1.bf16.msra.mxu1 %v9071_v27  ;;  %2826 = vmatprep.mubr.f32.mxu1 %v16905_v38  ;;  %v13406_v46 = vpop.permute.xlu1 %10479  ;;  %v10437_v27 = vunpack.i.h.bf16 %v13268_v35  ;;  %v2719_v35 = vld [vmem:[%s16663_s7 + $0x178] sm:$0xff]  ;;  %v9099_v26 = vpack.c.bf16 %v13485_v41, %v13481_v49  ;;  %v13549_v37 = vsel %vm3098_vm10, %v10457_v10, %v10462_v14  ;;  %v9113_v18 = vpack.c.bf16 %v3126_v2, %v3125_v54 }
 0x30b   :  { %8576 = vmatmul.mubr.msk.f32.gmra.mrb[40].mxu0 %vm1082_vm5, %v2714_v44  ;;  %9074 = vmatprep.subr.bf16.mxu1 %v9073_v59  ;;  %v13545_v0 = vsel %vm3098_vm10, %v10456_v22, %v10461_v21 }
 0x30c   :  { %9088 = vmatpush1.bf16.msra.mxu0 %v9087_v30  ;;  %2939 = vmatprep.mubr.f32.mxu0 %v16905_v38  ;;  %v10451_v30 = vunpack.i.l.bf16 %v13332_v50  ;;  %v3110_v61 = vsel %vm3098_vm10, %v10432_v24, %v10437_v27  ;;  %v13510_v50 = vsel %vm3098_vm10, %v10437_v27, %v10442_v47 }
 0x30d   :  { %9090 = vmatprep.subr.bf16.mxu0 %v9089_v45  ;;  %8569 = vmatmul.mubr.msk.f32.gmra.mrb[40].mxu1 %vm1082_vm5, %v2715_v16  ;;  %v13423_v42 = vpop.permute.xlu0 %10469  ;;  %v9097_v40 = vpack.c.bf16 %v3110_v61, %v3109_v8  ;;  %v3237_v45 = vld [vmem:[%s16663_s7 + $0x1c8] sm:$0xff] }
 0x30e   :  { %9076 = vmatpush1.bf16.msra.mxu1 %v9075_v32  ;;  %2832 = vmatprep.mubr.f32.mxu1 %v16905_v38  ;;  %v13523_v31 = vsel %vm3098_vm10, %v10446_v17, %v10451_v30  ;;  %v3111_v33 = vsel %vm3098_vm10, %v10451_v30, %v10456_v22  ;;  %v10472_v63 = vunpack.i.h.bf16 %v13423_v42  ;;  %v10471_v11 = vunpack.i.l.bf16 %v13423_v42  ;;  %v3239_v30 = vld [vmem:[%s16663_s7 + $0x1d8] sm:$0xff] }
 0x30f   :  { %8577 = vmatmul.mubr.msk.f32.gmra.mrb[42].mxu0 %vm1082_vm5, %v2715_v16  ;;  %9094 = vmatprep.subr.bf16.mxu1 %v9093_v20  ;;  %v13427_v34 = vpop.permute.xlu1 %10484  ;;  %v9115_v16 = vpack.c.bf16 %v13510_v50, %v13506_v39  ;;  %v3127_v42 = vsel %vm3098_vm10, %v10461_v21, %v10446_v17  ;;  %v9101_v15 = vpack.c.bf16 %v3112_v25, %v3111_v33 }
 0x310   :  { %9092 = vmatpush1.bf16.msra.mxu0 %v9091_v43  ;;  %2945 = vmatprep.mubr.f32.mxu0 %v16905_v38  ;;  %v10487_v32 = vunpack.i.h.bf16 %v13427_v34  ;;  %v10486_v23 = vunpack.i.l.bf16 %v13427_v34  ;;  %v9103_v43 = vpack.c.bf16 %v13527_v29, %v13523_v31  ;;  %v3128_v34 = vsel %vm3098_vm10, %v10462_v14, %v10447_v56  ;;  %v3241_v29 = vld [vmem:[%s16663_s7 + $0x1e8] sm:$0xff] }
 0x311   :  { %9110 = vmatprep.subr.bf16.mxu0 %v9109_v55  ;;  %8570 = vmatmul.mubr.msk.f32.gmra.mrb[42].mxu1 %vm1082_vm5, %v2716_v9  ;;  %v10481_v55 = vunpack.i.l.bf16 %v13406_v46  ;;  %v9117_v48 = vpack.c.bf16 %v3128_v34, %v3127_v42 }
 0x312   :  { %2838 = vmatprep.mubr.f32.mxu1 %v16905_v38  ;;  %v13436_v36 = vpop.permute.xlu0 %10474  ;;  %v3106_v8 = vsel %vm3098_vm10, %v10472_v63, %v10487_v32 }
 0x313   :  { %8578 = vmatmul.mubr.msk.f32.gmra.mrb[44].mxu0 %vm1082_vm5, %v2716_v9  ;;  %v10482_v9 = vunpack.i.h.bf16 %v13406_v46  ;;  %v9119_v46 = vpack.c.bf16 %v13549_v37, %v13545_v0  ;;  %v10477_v17 = vunpack.i.h.bf16 %v13436_v36  ;;  %v10476_v3 = vunpack.i.l.bf16 %v13436_v36 }
 0x314   :  { %2951 = vmatprep.mubr.f32.mxu0 %v16905_v38  ;;  %v13447_v60 = vpop.permute.xlu1 %10489  ;;  %v3105_v36 = vsel %vm3098_vm10, %v10471_v11, %v10486_v23 }
 0x315   :  { %8571 = vmatmul.mubr.msk.f32.gmra.mrb[44].mxu1 %vm1082_vm5, %v2717_v51  ;;  %v3114_v27 = vsel %vm3098_vm10, %v10482_v9, %v10472_v63  ;;  %v10492_v12 = vunpack.i.h.bf16 %v13447_v60 }
 0x316   :  { %2844 = vmatprep.mubr.f32.mxu1 %v16905_v38 }
 0x317   :  { %8579 = vmatmul.mubr.msk.f32.gmra.mrb[46].mxu0 %vm1082_vm5, %v2717_v51  ;;  %v13488_v13 = vpop.permute.xlu0 %10494  ;;  %v10467_v51 = vunpack.i.h.bf16 %v13381_v53  ;;  %v3826_v25 = vsel %vm3808_vm11, %v10477_v17, %v10492_v12 }
 0x318   :  { %2957 = vmatprep.mubr.f32.mxu0 %v16905_v38  ;;  %v10497_v5 = vunpack.i.h.bf16 %v13488_v13  ;;  %v10496_v24 = vunpack.i.l.bf16 %v13488_v13 }
 0x319   :  { %8572 = vmatmul.mubr.msk.f32.gmra.mrb[46].mxu1 %vm1082_vm5, %v2718_v19  ;;  %v13498_v44 = vpop.permute.xlu1 %10499  ;;  %v3130_v47 = vsel %vm3098_vm10, %v10487_v32, %v10467_v51  ;;  %v3122_v41 = vsel %vm3098_vm10, %v10467_v51, %v10482_v9 }
 0x31a   :  { %2850 = vmatprep.mubr.f32.mxu1 %v16905_v38  ;;  %v10502_v6 = vunpack.i.h.bf16 %v13498_v44  ;;  %v10501_v7 = vunpack.i.l.bf16 %v13498_v44  ;;  %v3818_v22 = vsel %vm3808_vm11, %v10492_v12, %v10497_v5 }
 0x31b   :  { %8580 = vmatmul.mubr.msk.f32.gmra.mrb[48].mxu0 %vm1082_vm5, %v2718_v19  ;;  %v10466_v19 = vunpack.i.l.bf16 %v13381_v53  ;;  %v3113_v53 = vsel %vm3098_vm10, %v10481_v55, %v10471_v11 }
 0x31c   :  { %2963 = vmatprep.mubr.f32.mxu0 %v16905_v38  ;;  %v13535_v59 = vpop.permute.xlu0 %10504  ;;  %v3833_v50 = vsel %vm3808_vm11, %v10501_v7, %v10476_v3  ;;  %v3834_v14 = vsel %vm3808_vm11, %v10502_v6, %v10477_v17  ;;  %v3810_v9 = vsel %vm3808_vm11, %v10497_v5, %v10502_v6  ;;  %v3132_v17 = vld [vmem:[%s16663_s7 + $0x188] sm:$0xff] }
 0x31d   :  { %8573 = vmatmul.mubr.msk.f32.gmra.mrb[48].mxu1 %vm1082_vm5, %v2719_v35  ;;  %v3129_v4 = vsel %vm3098_vm10, %v10486_v23, %v10466_v19  ;;  %v3121_v49 = vsel %vm3098_vm10, %v10466_v19, %v10481_v55  ;;  %v9141_v31 = vpack.c.bf16 %v3834_v14, %v3833_v50  ;;  %v10506_v0 = vunpack.i.l.bf16 %v13535_v59 }
 0x31e   :  { %3332 = vmatprep.mubr.f32.mxu1 %v16905_v38  ;;  %v13560_v20 = vpop.permute.xlu1 %10509  ;;  %v9121_v61 = vpack.c.bf16 %v3130_v47, %v3129_v4  ;;  %v9107_v39 = vpack.c.bf16 %v3122_v41, %v3121_v49 }
 0x31f   :  { %8581 = vmatmul.mubr.msk.f32.gmra.mrb[50].mxu0 %vm1082_vm5, %v2719_v35  ;;  %v10491_v35 = vunpack.i.l.bf16 %v13447_v60  ;;  %v9105_v60 = vpack.c.bf16 %v3114_v27, %v3113_v53  ;;  %v10512_v37 = vunpack.i.h.bf16 %v13560_v20  ;;  %v10511_v63 = vunpack.i.l.bf16 %v13560_v20 }
 0x320   :  { %3445 = vmatprep.mubr.f32.mxu0 %v16905_v38  ;;  %v13587_v57 = vpop.permute.xlu0 %10514  ;;  %v3809_v20 = vsel %vm3808_vm11, %v10496_v24, %v10501_v7 }
 0x321   :  { %8582 = vmatmul.mubr.msk.f32.vlgmr.msra.gmra.mrb[50].mxu1 %vm1082_vm5, %v3236_v28  ;;  %v3817_v10 = vsel %vm3808_vm11, %v10491_v35, %v10496_v24  ;;  %v3825_v33 = vsel %vm3808_vm11, %v10476_v3, %v10491_v35  ;;  %v10517_v11 = vunpack.i.h.bf16 %v13587_v57  ;;  %v3827_v42 = vsel %vm3808_vm11, %v10506_v0, %v10511_v63 }
 0x322   :  { %9096 = vmatpush1.bf16.msra.mxu1 %v9095_v58  ;;  %3338 = vmatprep.mubr.f32.mxu1 %v16905_v38  ;;  %v13603_v56 = vpop.permute.xlu1 %10519  ;;  %v9123_v58 = vpack.c.bf16 %v3106_v8, %v3105_v36  ;;  %v9127_v55 = vpack.c.bf16 %v3826_v25, %v3825_v33  ;;  %v9143_v47 = vpack.c.bf16 %v3810_v9, %v3809_v20  ;;  %v3135_v20 = vld [vmem:[%s16663_s7 + $0x1a0] sm:$0xff]  ;;  %v3136_v9 = vld [vmem:[%s16663_s7 + $0x1a8] sm:$0xff] }
 0x323   :  { %8590 = vmatmul.mubr.msk.f32.vlgmr.msra.gmra.mrb[52].mxu0 %vm1082_vm5, %v3236_v28  ;;  %9098 = vmatprep.subr.bf16.mxu1 %v9097_v40  ;;  %v9125_v28 = vpack.c.bf16 %v3818_v22, %v3817_v10  ;;  %v3242_v40 = vld [vmem:[%s16663_s7 + $0x1f0] sm:$0xff]  ;;  %v10522_v23 = vunpack.i.h.bf16 %v13603_v56  ;;  %v3820_v13 = vsel %vm3808_vm11, %v10512_v37, %v10517_v11 }
 0x324   :  { %9112 = vmatpush1.bf16.msra.mxu0 %v9111_v62  ;;  %3451 = vmatprep.mubr.f32.mxu0 %v16905_v38  ;;  %v13634_v21 = vpop.permute.xlu0 %10524  ;;  %v3240_v62 = vld [vmem:[%s16663_s7 + $0x1e0] sm:$0xff] }
 0x325   :  { %9114 = vmatprep.subr.bf16.mxu0 %v9113_v18  ;;  %8583 = vmatmul.mubr.msk.f32.gmra.mrb[52].mxu1 %vm1082_vm5, %v3237_v45  ;;  %v10521_v18 = vunpack.i.l.bf16 %v13603_v56  ;;  %v10526_v24 = vunpack.i.l.bf16 %v13634_v21  ;;  %v3812_v6 = vsel %vm3808_vm11, %v10517_v11, %v10522_v23  ;;  %v10527_v7 = vunpack.i.h.bf16 %v13634_v21 }
 0x326   :  { %9100 = vmatpush1.bf16.msra.mxu1 %v9099_v26  ;;  %3344 = vmatprep.mubr.f32.mxu1 %v16905_v38  ;;  %v13641_v26 = vpop.permute.xlu1 %10529 }
 0x327   :  { %8591 = vmatmul.mubr.msk.f32.gmra.mrb[54].mxu0 %vm1082_vm5, %v3237_v45  ;;  %9102 = vmatprep.subr.bf16.mxu1 %v9101_v15  ;;  %v10516_v45 = vunpack.i.l.bf16 %v13587_v57  ;;  %v3131_v15 = vld [vmem:[%s16663_s7 + $0x180] sm:$0xff] }
 0x328   :  { %9116 = vmatpush1.bf16.msra.mxu0 %v9115_v16  ;;  %3457 = vmatprep.mubr.f32.mxu0 %v16905_v38  ;;  %v13650_v54 = vpop.permute.xlu0 %10534  ;;  %v10507_v16 = vunpack.i.h.bf16 %v13535_v59  ;;  %v3243_v59 = vld [vmem:[%s16663_s7 + $0x1f8] sm:$0xff] }
 0x329   :  { %9118 = vmatprep.subr.bf16.mxu0 %v9117_v48  ;;  %8584 = vmatmul.mubr.msk.f32.gmra.mrb[54].mxu1 %vm1082_vm5, %v3238_v52  ;;  %v3819_v51 = vsel %vm3808_vm11, %v10511_v63, %v10516_v45  ;;  %v10537_v44 = vunpack.i.h.bf16 %v13650_v54  ;;  %v10536_v19 = vunpack.i.l.bf16 %v13650_v54  ;;  %v10532_v48 = vunpack.i.h.bf16 %v13641_v26 }
 0x32a   :  { %9104 = vmatpush1.bf16.msra.mxu1 %v9103_v43  ;;  %3350 = vmatprep.mubr.f32.mxu1 %v16905_v38  ;;  %v13654_v2 = vpop.permute.xlu1 %10539  ;;  %v3828_v34 = vsel %vm3808_vm11, %v10507_v16, %v10512_v37  ;;  %v3836_v5 = vsel %vm3808_vm11, %v10522_v23, %v10507_v16  ;;  %v9129_v4 = vpack.c.bf16 %v3820_v13, %v3819_v51  ;;  %v3842_v51 = vld [vmem:[%s16663_s7 + $0x208] sm:$0xff]  ;;  %v3843_v13 = vld [vmem:[%s16663_s7 + $0x210] sm:$0xff] }
 0x32b   :  { %8592 = vmatmul.mubr.msk.f32.gmra.mrb[56].mxu0 %vm1082_vm5, %v3238_v52  ;;  %9106 = vmatprep.subr.bf16.mxu1 %v9105_v60  ;;  %v10531_v52 = vunpack.i.l.bf16 %v13641_v26  ;;  %v10542_v53 = vunpack.i.h.bf16 %v13654_v2  ;;  %v10541_v27 = vunpack.i.l.bf16 %v13654_v2  ;;  %v9131_v12 = vpack.c.bf16 %v3828_v34, %v3827_v42  ;;  %v3133_v26 = vld [vmem:[%s16663_s7 + $0x190] sm:$0xff]  ;;  %v3138_v42 = vld [vmem:[%s16663_s7 + $0x1b8] sm:$0xff]  ;;  %v3841_v34 = vld [vmem:[%s16663_s7 + $0x200] sm:$0xff] }
 0x32c   :  { %9120 = vmatpush1.bf16.msra.mxu0 %v9119_v46  ;;  %3463 = vmatprep.mubr.f32.mxu0 %v16905_v38  ;;  %v13673_v32 = vpop.permute.xlu0 %10544  ;;  %v3835_v46 = vsel %vm3808_vm11, %v10521_v18, %v10506_v0  ;;  %v3811_v35 = vsel %vm3808_vm11, %v10516_v45, %v10521_v18  ;;  %v3830_v14 = vsel %vm3808_vm11, %v10527_v7, %v10532_v48  ;;  %v3134_v45 = vld [vmem:[%s16663_s7 + $0x198] sm:$0xff] }
 0x32d   :  { %9122 = vmatprep.subr.bf16.mxu0 %v9121_v61  ;;  %8585 = vmatmul.mubr.msk.f32.gmra.mrb[56].mxu1 %vm1082_vm5, %v3239_v30  ;;  %v9145_v41 = vpack.c.bf16 %v3836_v5, %v3835_v46  ;;  %v3821_v3 = vsel %vm3808_vm11, %v10531_v52, %v10536_v19  ;;  %v3829_v10 = vsel %vm3808_vm11, %v10526_v24, %v10531_v52  ;;  %v10547_v21 = vunpack.i.h.bf16 %v13673_v32 }
 0x32e   :  { %9108 = vmatpush1.bf16.msra.mxu1 %v9107_v39  ;;  %3356 = vmatprep.mubr.f32.mxu1 %v16905_v38  ;;  %v13682_v43 = vpop.permute.xlu1 %10554  ;;  %v3837_v22 = vsel %vm3808_vm11, %v10541_v27, %v10526_v24  ;;  %v3838_v36 = vsel %vm3808_vm11, %v10542_v53, %v10527_v7  ;;  %v3813_v54 = vsel %vm3808_vm11, %v10536_v19, %v10541_v27  ;;  %v3845_v24 = vld [vmem:[%s16663_s7 + $0x220] sm:$0xff] }
 0x32f   :  { %8593 = vmatmul.mubr.msk.f32.gmra.mrb[58].mxu0 %vm1082_vm5, %v3239_v30  ;;  %9126 = vmatprep.subr.bf16.mxu1 %v9125_v28  ;;  %v3822_v30 = vsel %vm3808_vm11, %v10532_v48, %v10537_v44  ;;  %v10557_v8 = vunpack.i.h.bf16 %v13682_v43  ;;  %v10556_v61 = vunpack.i.l.bf16 %v13682_v43  ;;  %v10546_v28 = vunpack.i.l.bf16 %v13673_v32  ;;  %v3846_v48 = vld [vmem:[%s16663_s7 + $0x228] sm:$0xff] }
 0x330   :  { %9124 = vmatpush1.bf16.msra.mxu0 %v9123_v58  ;;  %3469 = vmatprep.mubr.f32.mxu0 %v16905_v38  ;;  %v9133_v58 = vpack.c.bf16 %v3822_v30, %v3821_v3  ;;  %v3814_v2 = vsel %vm3808_vm11, %v10537_v44, %v10542_v53  ;;  %v9135_v33 = vpack.c.bf16 %v3830_v14, %v3829_v10  ;;  %v3844_v44 = vld [vmem:[%s16663_s7 + $0x218] sm:$0xff] }
 0x331   :  { %9142 = vmatprep.subr.bf16.mxu0 %v9141_v31  ;;  %8586 = vmatmul.mubr.msk.f32.gmra.mrb[58].mxu1 %vm1082_vm5, %v3240_v62  ;;  %v13721_v57 = vpop.permute.xlu0 %10549  ;;  %v3831_v0 = vsel %vm3808_vm11, %v10546_v28, %v10556_v61  ;;  %v3832_v37 = vsel %vm3808_vm11, %v10547_v21, %v10557_v8  ;;  %v9151_v11 = vpack.c.bf16 %v3814_v2, %v3813_v54  ;;  %v16963_v2 = vld [vmem:[#allocation7_spill] sm:$0xff] }
 0x332   :  { %3362 = vmatprep.mubr.f32.mxu1 %v16905_v38  ;;  %v10552_v56 = vunpack.i.h.bf16 %v13721_v57  ;;  %v10551_v60 = vunpack.i.l.bf16 %v13721_v57 }
 0x333   :  { %8594 = vmatmul.mubr.msk.f32.gmra.mrb[60].mxu0 %vm1082_vm5, %v3240_v62  ;;  %v10560_v49 = vpop.permute.xlu1 %10559  ;;  %v9147_v62 = vpack.c.bf16 %v3812_v6, %v3811_v35  ;;  %v3847_v35 = vld [vmem:[%s16663_s7 + $0x230] sm:$0xff] }
 0x334   :  { %3475 = vmatprep.mubr.f32.mxu0 %v16905_v38  ;;  %v10562_v39 = vunpack.i.h.bf16 %v10560_v49  ;;  %v10561_v50 = vunpack.i.l.bf16 %v10560_v49  ;;  %v3823_v31 = vsel %vm3808_vm11, %v10556_v61, %v10551_v60  ;;  %v3848_v49 = vld [vmem:[%s16663_s7 + $0x238] sm:$0xff] }
 0x335   :  { %8587 = vmatmul.mubr.msk.f32.gmra.mrb[60].mxu1 %vm1082_vm5, %v3241_v29 }
 0x336   :  { %3368 = vmatprep.mubr.f32.mxu1 %v16905_v38  ;;  %v3839_v25 = vsel %vm3808_vm11, %v10561_v50, %v10546_v28  ;;  %v3840_v16 = vsel %vm3808_vm11, %v10562_v39, %v10547_v21  ;;  %v3815_v32 = vsel %vm3808_vm11, %v10551_v60, %v10561_v50  ;;  %v3816_v23 = vsel %vm3808_vm11, %v10552_v56, %v10562_v39 }
 0x337   :  { %8595 = vmatmul.mubr.msk.f32.gmra.mrb[62].mxu0 %vm1082_vm5, %v3241_v29  ;;  %v3824_v29 = vsel %vm3808_vm11, %v10557_v8, %v10552_v56  ;;  %v9153_v18 = vpack.c.bf16 %v3840_v16, %v3839_v25  ;;  %v9155_v43 = vpack.c.bf16 %v3816_v23, %v3815_v32  ;;  %v16967_v16 = vld [vmem:[#allocation8_spill] sm:$0xff] }
 0x338   :  { %3481 = vmatprep.mubr.f32.mxu0 %v16905_v38  ;;  %v9137_v63 = vpack.c.bf16 %v3824_v29, %v3823_v31  ;;  %v8462_v31 = vld [vmem:[%s16659_s3 + $0x2] ss:$4 sm:$0xf]  ;;  %v16961_v29 = vld [vmem:[#allocation5_spill] sm:$0xff] }
 0x339   :  { %8588 = vmatmul.mubr.msk.f32.gmra.mrb[62].mxu1 %vm1082_vm5, %v3242_v40  ;;  %v13942_v54 = vrot.slane %v8462_v31, %v16961_v29 }
 0x33a   :  { %3374 = vmatprep.mubr.f32.mxu1 %v16905_v38 }
 0x33b   :  { %8596 = vmatmul.mubr.msk.f32.gmra.mrb[64].mxu0 %vm1082_vm5, %v3242_v40  ;;  %v9149_v40 = vpack.c.bf16 %v3838_v36, %v3837_v22  ;;  %16962 = vst [vmem:[#allocation41_spill] sm:$0xff] %v13942_v54 }
 0x33c   :  { %3487 = vmatprep.mubr.f32.mxu0 %v16905_v38 }
 0x33d   :  { %8589 = vmatmul.mubr.msk.f32.gmra.mrb[64].mxu1 %vm1082_vm5, %v3243_v59 }
 0x33e   :  { %3582 = vmatprep.mubr.f32.mxu1 %v16905_v38 }
 0x33f   :  { %8597 = vmatmul.mubr.msk.f32.gmra.mrb[66].mxu0 %vm1082_vm5, %v3243_v59  ;;  %v9139_v59 = vpack.c.bf16 %v3832_v37, %v3831_v0  ;;  %v13951_v0 = vrot.slane %v8462_v31, %v16967_v16 }
 0x340   :  { %3695 = vmatprep.mubr.f32.mxu0 %v16905_v38 }
 0x341   :  { %8598 = vmatmul.mubr.msk.f32.vlgmr.msra.gmra.mrb[50].mxu1 %vm1082_vm5, %v3131_v15  ;;  %16968 = vst [vmem:[#allocation14_spill] sm:$0xff] %v13951_v0 }
 0x342   :  { %9128 = vmatpush1.bf16.msra.mxu1 %v9127_v55  ;;  %3588 = vmatprep.mubr.f32.mxu1 %v16905_v38  ;;  %v3137_v55 = vld [vmem:[%s16663_s7 + $0x1b0] sm:$0xff] }
 0x343   :  { %8606 = vmatmul.mubr.msk.f32.vlgmr.msra.gmra.mrb[52].mxu0 %vm1082_vm5, %v3131_v15  ;;  %9130 = vmatprep.subr.bf16.mxu1 %v9129_v4 }
 0x344   :  { %9144 = vmatpush1.bf16.msra.mxu0 %v9143_v47  ;;  %3701 = vmatprep.mubr.f32.mxu0 %v16905_v38 }
 0x345   :  { %9146 = vmatprep.subr.bf16.mxu0 %v9145_v41  ;;  %8599 = vmatmul.mubr.msk.f32.gmra.mrb[52].mxu1 %vm1082_vm5, %v3132_v17 }
 0x346   :  { %9132 = vmatpush1.bf16.msra.mxu1 %v9131_v12  ;;  %3594 = vmatprep.mubr.f32.mxu1 %v16905_v38 }
 0x347   :  { %8607 = vmatmul.mubr.msk.f32.gmra.mrb[54].mxu0 %vm1082_vm5, %v3132_v17  ;;  %9134 = vmatprep.subr.bf16.mxu1 %v9133_v58 }
 0x348   :  { %9148 = vmatpush1.bf16.msra.mxu0 %v9147_v62  ;;  %3707 = vmatprep.mubr.f32.mxu0 %v16905_v38 }
 0x349   :  { %9150 = vmatprep.subr.bf16.mxu0 %v9149_v40  ;;  %8600 = vmatmul.mubr.msk.f32.gmra.mrb[54].mxu1 %vm1082_vm5, %v3133_v26  ;;  %v13945_v40 = vrot.slane %v8462_v31, %v16963_v2 }
 0x34a   :  { %9136 = vmatpush1.bf16.msra.mxu1 %v9135_v33  ;;  %3600 = vmatprep.mubr.f32.mxu1 %v16905_v38  ;;  %v16965_v33 = vld [vmem:[#allocation6_spill] sm:$0xff] }
 0x34b   :  { %8608 = vmatmul.mubr.msk.f32.gmra.mrb[56].mxu0 %vm1082_vm5, %v3133_v26  ;;  %9138 = vmatprep.subr.bf16.mxu1 %v9137_v63  ;;  %16964 = vst [vmem:[#allocation17_spill] sm:$0xff] %v13945_v40  ;;  %v13948_v25 = vrot.slane %v8462_v31, %v16965_v33 }
 0x34c   :  { %9152 = vmatpush1.bf16.msra.mxu0 %v9151_v11  ;;  %3713 = vmatprep.mubr.f32.mxu0 %v16905_v38 }
 0x34d   :  { %9154 = vmatprep.subr.bf16.mxu0 %v9153_v18  ;;  %8601 = vmatmul.mubr.msk.f32.gmra.mrb[56].mxu1 %vm1082_vm5, %v3134_v45  ;;  %16966 = vst [vmem:[#allocation13_spill] sm:$0xff] %v13948_v25 }
 0x34e   :  { %9140 = vmatpush1.bf16.msra.mxu1 %v9139_v59  ;;  %3606 = vmatprep.mubr.f32.mxu1 %v16905_v38 }
 0x34f   :  { %8609 = vmatmul.mubr.msk.f32.gmra.mrb[58].mxu0 %vm1082_vm5, %v3134_v45 }
 0x350   :  { %9156 = vmatpush1.bf16.msra.mxu0 %v9155_v43  ;;  %3719 = vmatprep.mubr.f32.mxu0 %v16905_v38 }
 0x351   :  { %8602 = vmatmul.mubr.msk.f32.gmra.mrb[58].mxu1 %vm1082_vm5, %v3135_v20 }
 0x352   :  { %3612 = vmatprep.mubr.f32.mxu1 %v16905_v38 }
 0x353   :  { %8610 = vmatmul.mubr.msk.f32.gmra.mrb[60].mxu0 %vm1082_vm5, %v3135_v20 }
 0x354   :  { %3725 = vmatprep.mubr.f32.mxu0 %v16905_v38 }
 0x355   :  { %8603 = vmatmul.mubr.msk.f32.gmra.mrb[60].mxu1 %vm1082_vm5, %v3136_v9 }
 0x356   :  { %3618 = vmatprep.mubr.f32.mxu1 %v16905_v38 }
 0x357   :  { %8611 = vmatmul.mubr.msk.f32.gmra.mrb[62].mxu0 %vm1082_vm5, %v3136_v9 }
 0x358   :  { %3731 = vmatprep.mubr.f32.mxu0 %v16905_v38 }
 0x359   :  { %8604 = vmatmul.mubr.msk.f32.gmra.mrb[62].mxu1 %vm1082_vm5, %v3137_v55 }
 0x35a   :  { %3624 = vmatprep.mubr.f32.mxu1 %v16905_v38 }
 0x35b   :  { %8612 = vmatmul.mubr.msk.f32.gmra.mrb[64].mxu0 %vm1082_vm5, %v3137_v55 }
 0x35c   :  { %3737 = vmatprep.mubr.f32.mxu0 %v16905_v38 }
 0x35d   :  { %8605 = vmatmul.mubr.msk.f32.gmra.mrb[64].mxu1 %vm1082_vm5, %v3138_v42 }
 0x35e   :  { %3937 = vmatprep.mubr.f32.mxu1 %v16905_v38 }
 0x35f   :  { %8613 = vmatmul.mubr.msk.f32.gmra.mrb[66].mxu0 %vm1082_vm5, %v3138_v42 }
 0x360   :  { %4050 = vmatprep.mubr.f32.mxu0 %v16905_v38 }
 0x361   :  { %8614 = vmatmul.mubr.msk.f32.vlgmr.msra.gmra.mrb[50].mxu1 %vm1082_vm5, %v3841_v34 }
 0x362   :  { %3943 = vmatprep.mubr.f32.mxu1 %v16905_v38 }
 0x363   :  { %8622 = vmatmul.mubr.msk.f32.vlgmr.msra.gmra.mrb[52].mxu0 %vm1082_vm5, %v3841_v34 }
 0x364   :  { %4056 = vmatprep.mubr.f32.mxu0 %v16905_v38 }
 0x365   :  { %8615 = vmatmul.mubr.msk.f32.gmra.mrb[52].mxu1 %vm1082_vm5, %v3842_v51 }
 0x366   :  { %3949 = vmatprep.mubr.f32.mxu1 %v16905_v38 }
 0x367   :  { %8623 = vmatmul.mubr.msk.f32.gmra.mrb[54].mxu0 %vm1082_vm5, %v3842_v51 }
 0x368   :  { %4062 = vmatprep.mubr.f32.mxu0 %v16905_v38 }
 0x369   :  { %8616 = vmatmul.mubr.msk.f32.gmra.mrb[54].mxu1 %vm1082_vm5, %v3843_v13 }
 0x36a   :  { %3955 = vmatprep.mubr.f32.mxu1 %v16905_v38  ;;  %v13844_v19 = vpop.f32.mrb[18].mxu1 }
 0x36b   :  { %8624 = vmatmul.mubr.msk.f32.gmra.mrb[56].mxu0 %vm1082_vm5, %v3843_v13  ;;  %v1780_v15 = vpop.f32.mrb[19].mxu1  ;;  %v13847_v46 = vpop.f32.mrb[20].mxu0  ;;  %v1970_v37 = vmul.f32 %v13844_v19, %v13942_v54 }
 0x36c   :  { %4068 = vmatprep.mubr.f32.mxu0 %v16905_v38  ;;  %v13850_v5 = vpop.f32.mrb[21].mxu0  ;;  %v1971_v63 = vmul.f32 %v1780_v15, %v13945_v40  ;;  %v1972_v45 = vmul.f32 %v13847_v46, %v13948_v25 }
 0x36d   :  { %8617 = vmatmul.mubr.msk.f32.gmra.mrb[56].mxu1 %vm1082_vm5, %v3844_v44  ;;  %v1973_v18 = vmul.f32 %v13850_v5, %v13951_v0 }
 0x36e   :  { %3961 = vmatprep.mubr.f32.mxu1 %v16905_v38 }
 0x36f   :  { %8625 = vmatmul.mubr.msk.f32.gmra.mrb[58].mxu0 %vm1082_vm5, %v3844_v44  ;;  %v1784_v52 = vpop.f32.mrb[20].mxu1 }
 0x370   :  { %4074 = vmatprep.mubr.f32.mxu0 %v16905_v38  ;;  %v13859_v53 = vpop.f32.mrb[21].mxu1  ;;  %v13861_v27 = vpop.f32.mrb[22].mxu0  ;;  %v1974_v20 = vmul.f32 %v1784_v52, %v13942_v54 }
 0x371   :  { %8618 = vmatmul.mubr.msk.f32.gmra.mrb[58].mxu1 %vm1082_vm5, %v3845_v24  ;;  %v13864_v57 = vpop.f32.mrb[23].mxu0  ;;  %v1975_v42 = vmul.f32 %v13859_v53, %v13945_v40  ;;  %v1976_v13 = vmul.f32 %v13861_v27, %v13948_v25 }
 0x372   :  { %3967 = vmatprep.mubr.f32.mxu1 %v16905_v38  ;;  %v1977_v15 = vmul.f32 %v13864_v57, %v13951_v0 }
 0x373   :  { %8626 = vmatmul.mubr.msk.f32.gmra.mrb[60].mxu0 %vm1082_vm5, %v3845_v24 }
 0x374   :  { %4080 = vmatprep.mubr.f32.mxu0 %v16905_v38  ;;  %v13872_v4 = vpop.f32.mrb[22].mxu1 }
 0x375   :  { %8619 = vmatmul.mubr.msk.f32.gmra.mrb[60].mxu1 %vm1082_vm5, %v3846_v48  ;;  %v13875_v47 = vpop.f32.mrb[23].mxu1  ;;  %v13877_v12 = vpop.f32.mrb[24].mxu0  ;;  %v1978_v24 = vmul.f32 %v13872_v4, %v13942_v54 }
 0x376   :  { %3973 = vmatprep.mubr.f32.mxu1 %v16905_v38  ;;  %v13883_v6 = vpop.f32.mrb[25].mxu0 }
 0x377   :  { %8627 = vmatmul.mubr.msk.f32.gmra.mrb[62].mxu0 %vm1082_vm5, %v3846_v48  ;;  %v1979_v48 = vmul.f32 %v13875_v47, %v13945_v40 }
 0x378   :  { %4086 = vmatprep.mubr.f32.mxu0 %v16905_v38 }
 0x379   :  { %8620 = vmatmul.mubr.msk.f32.gmra.mrb[62].mxu1 %vm1082_vm5, %v3847_v35  ;;  %v13888_v7 = vpop.f32.mrb[24].mxu1 }
 0x37a   :  { %3979 = vmatprep.mubr.f32.mxu1 %v16905_v38  ;;  %v13894_v41 = vpop.f32.mrb[25].mxu1  ;;  %v13896_v56 = vpop.f32.mrb[26].mxu0 }
 0x37b   :  { %8628 = vmatmul.mubr.msk.f32.gmra.mrb[64].mxu0 %vm1082_vm5, %v3847_v35  ;;  %v13899_v60 = vpop.f32.mrb[27].mxu0 }
 0x37c   :  { %4092 = vmatprep.mubr.f32.mxu0 %v16905_v38 }
 0x37d   :  { %8621 = vmatmul.mubr.msk.f32.gmra.mrb[64].mxu1 %vm1082_vm5, %v3848_v49 }
 0x37e   :  { %v13903_v17 = vpop.f32.mrb[26].mxu1  ;;  %4371 = vmatprep.mubr.f32.mxu1 %v16905_v38 }
 0x37f   :  { %8629 = vmatmul.mubr.msk.f32.gmra.mrb[66].mxu0 %vm1082_vm5, %v3848_v49  ;;  %v13907_v3 = vpop.f32.mrb[27].mxu1  ;;  %v13909_v30 = vpop.f32.mrb[28].mxu0  ;;  %v1980_v49 = vmul.f32 %v13877_v12, %v13948_v25 }
 0x380   :  { %v13911_v10 = vpop.f32.mrb[29].mxu0  ;;  %4442 = vmatprep.mubr.f32.mxu0 %v16905_v38 }
 0x382   :  { %v13914_v22 = vpop.f32.mrb[28].mxu1 }
 0x383   :  { %v13916_v36 = vpop.f32.mrb[29].mxu1  ;;  %v13918_v8 = vpop.f32.mrb[30].mxu0 }
 0x384   :  { %v13920_v61 = vpop.f32.mrb[31].mxu0 }
 0x386   :  { %v13922_v39 = vpop.f32.mrb[30].mxu1 }
 0x387   :  { %v13924_v50 = vpop.f32.mrb[31].mxu1  ;;  %v13926_v14 = vpop.f32.mrb[32].mxu0 }
 0x388   :  { %v13928_v21 = vpop.f32.mrb[33].mxu0 }
 0x38a   :  { %v13930_v28 = vpop.f32.mrb[32].mxu1 }
 0x38b   :  { %v13932_v58 = vpop.f32.mrb[33].mxu1  ;;  %v13934_v62 = vpop.f32.mrb[34].mxu0 }
 0x38c   :  { %v13936_v26 = vpop.f32.mrb[35].mxu0 }
 0x3d4   :  { %v2810_v11 = vpop.f32.mrb[34].mxu1 }
 0x3d5   :  { %v13958_v32 = vadd.f32 %v2810_v11, %v1970_v37  ;;  %v2812_v23 = vpop.f32.mrb[35].mxu1  ;;  %v1981_v37 = vmul.f32 %v13883_v6, %v13951_v0  ;;  %v1982_v11 = vmul.f32 %v13888_v7, %v13942_v54 }
 0x3d6   :  { %v13962_v59 = vadd.f32 %v2812_v23, %v1971_v63  ;;  %v2923_v43 = vpop.f32.mrb[36].mxu0  ;;  %v1983_v23 = vmul.f32 %v13894_v41, %v13945_v40 }
 0x3d7   :  { %v13965_v9 = vadd.f32 %v2923_v43, %v1972_v45  ;;  %v2925_v55 = vpop.f32.mrb[37].mxu0  ;;  %v1984_v43 = vmul.f32 %v13896_v56, %v13948_v25 }
 0x3d8   :  { %v13969_v34 = vadd.f32 %v2925_v55, %v1973_v18  ;;  %v2816_v51 = vpop.f32.mrb[36].mxu1  ;;  %v1985_v55 = vmul.f32 %v13899_v60, %v13951_v0 }
 0x3d9   :  { %v13973_v44 = vadd.f32 %v2816_v51, %v1974_v20  ;;  %v2818_v19 = vpop.f32.mrb[37].mxu1  ;;  %v1986_v51 = vmul.f32 %v13903_v17, %v13942_v54 }
 0x3da   :  { %v13977_v46 = vadd.f32 %v2818_v19, %v1975_v42  ;;  %v2929_v5 = vpop.f32.mrb[38].mxu0  ;;  %v1987_v19 = vmul.f32 %v13907_v3, %v13945_v40 }
 0x3db   :  { %v13981_v52 = vadd.f32 %v2929_v5, %v1976_v13  ;;  %v2931_v53 = vpop.f32.mrb[39].mxu0  ;;  %v1988_v5 = vmul.f32 %v13909_v30, %v13948_v25 }
 0x3dc   :  { %v13985_v35 = vadd.f32 %v2931_v53, %v1977_v15  ;;  %v2822_v27 = vpop.f32.mrb[38].mxu1  ;;  %v1989_v53 = vmul.f32 %v13911_v10, %v13951_v0 }
 0x3dd   :  { %v13989_v31 = vadd.f32 %v2822_v27, %v1978_v24  ;;  %v2824_v57 = vpop.f32.mrb[39].mxu1  ;;  %v1990_v27 = vmul.f32 %v13914_v22, %v13942_v54 }
 0x3de   :  { %v13993_v63 = vadd.f32 %v2824_v57, %v1979_v48  ;;  %v2935_v4 = vpop.f32.mrb[40].mxu0  ;;  %v1991_v57 = vmul.f32 %v13916_v36, %v13945_v40 }
 0x3df   :  { %v13997_v45 = vadd.f32 %v2935_v4, %v1980_v49  ;;  %v2937_v47 = vpop.f32.mrb[41].mxu0  ;;  %v1992_v4 = vmul.f32 %v13918_v8, %v13948_v25 }
 0x3e0   :  { %v14001_v18 = vadd.f32 %v2937_v47, %v1981_v37  ;;  %v2828_v12 = vpop.f32.mrb[40].mxu1  ;;  %v1993_v47 = vmul.f32 %v13920_v61, %v13951_v0 }
 0x3e1   :  { %v14005_v20 = vadd.f32 %v2828_v12, %v1982_v11  ;;  %v2830_v6 = vpop.f32.mrb[41].mxu1  ;;  %v1994_v12 = vmul.f32 %v13922_v39, %v13942_v54 }
 0x3e2   :  { %v14009_v42 = vadd.f32 %v2830_v6, %v1983_v23  ;;  %v2941_v7 = vpop.f32.mrb[42].mxu0  ;;  %v1995_v6 = vmul.f32 %v13924_v50, %v13945_v40 }
 0x3e3   :  { %v14013_v13 = vadd.f32 %v2941_v7, %v1984_v43  ;;  %v2943_v41 = vpop.f32.mrb[43].mxu0  ;;  %v1996_v7 = vmul.f32 %v13926_v14, %v13948_v25 }
 0x3e4   :  { %v14017_v15 = vadd.f32 %v2943_v41, %v1985_v55  ;;  %v2834_v56 = vpop.f32.mrb[42].mxu1  ;;  %v1997_v41 = vmul.f32 %v13928_v21, %v13951_v0 }
 0x3e5   :  { %v14021_v24 = vadd.f32 %v2834_v56, %v1986_v51  ;;  %v2836_v60 = vpop.f32.mrb[43].mxu1  ;;  %v1998_v56 = vmul.f32 %v13930_v28, %v13942_v54 }
 0x3e6   :  { %v14025_v48 = vadd.f32 %v2836_v60, %v1987_v19  ;;  %v2947_v17 = vpop.f32.mrb[44].mxu0  ;;  %v1999_v60 = vmul.f32 %v13932_v58, %v13945_v40  ;;  %v8463_v58 = vld [vmem:[%s16659_s3 + $0x3] ss:$4 sm:$0xf] }
 0x3e7   :  { %v14029_v49 = vadd.f32 %v2947_v17, %v1988_v5  ;;  %v2949_v3 = vpop.f32.mrb[45].mxu0  ;;  %v2000_v17 = vmul.f32 %v13934_v62, %v13948_v25  ;;  %v14083_v62 = vrot.slane %v8463_v58, %v16961_v29 }
 0x3e8   :  { %v14033_v37 = vadd.f32 %v2949_v3, %v1989_v53  ;;  %v2840_v30 = vpop.f32.mrb[44].mxu1  ;;  %v2001_v3 = vmul.f32 %v13936_v26, %v13951_v0  ;;  %v14089_v26 = vrot.slane %v8463_v58, %v16965_v33 }
 0x3e9   :  { %v14037_v11 = vadd.f32 %v2840_v30, %v1990_v27  ;;  %v2842_v10 = vpop.f32.mrb[45].mxu1  ;;  %16969 = vst [vmem:[#allocation28_spill] sm:$0xff] %v14083_v62 }
 0x3ea   :  { %v14041_v23 = vadd.f32 %v2842_v10, %v1991_v57  ;;  %v2953_v22 = vpop.f32.mrb[46].mxu0  ;;  %16971 = vst [vmem:[#allocation42_spill] sm:$0xff] %v14089_v26 }
 0x3eb   :  { %v14045_v43 = vadd.f32 %v2953_v22, %v1992_v4  ;;  %v2955_v36 = vpop.f32.mrb[47].mxu0 }
 0x3ec   :  { %v14049_v55 = vadd.f32 %v2955_v36, %v1993_v47  ;;  %v2846_v8 = vpop.f32.mrb[46].mxu1  ;;  %v14086_v47 = vrot.slane %v8463_v58, %v16963_v2  ;;  %v4198_v2 = vpop.permute.xlu0 %4197 }
 0x3ed   :  { %v14053_v51 = vadd.f32 %v2846_v8, %v1994_v12  ;;  %v2848_v61 = vpop.f32.mrb[47].mxu1  ;;  %v14092_v12 = vrot.slane %v8463_v58, %v16967_v16 }
 0x3ee   :  { %v14057_v19 = vadd.f32 %v2848_v61, %v1995_v6  ;;  %v2959_v39 = vpop.f32.mrb[48].mxu0  ;;  %16970 = vst [vmem:[#allocation29_spill] sm:$0xff] %v14086_v47 }
 0x3ef   :  { %v14061_v5 = vadd.f32 %v2959_v39, %v1996_v7  ;;  %v2961_v50 = vpop.f32.mrb[49].mxu0  ;;  %16972 = vst [vmem:[#allocation43_spill] sm:$0xff] %v14092_v12 }
 0x3f0   :  { %v14065_v53 = vadd.f32 %v2961_v50, %v1997_v41  ;;  %v2852_v14 = vpop.f32.mrb[48].mxu1 }
 0x3f1   :  { %v14069_v27 = vadd.f32 %v2852_v14, %v1998_v56  ;;  %v2854_v21 = vpop.f32.mrb[49].mxu1 }
 0x3f2   :  { %v14073_v57 = vadd.f32 %v2854_v21, %v1999_v60  ;;  %v2965_v28 = vpop.f32.mrb[50].mxu0 }
 0x3f3   :  { %v14075_v30 = vadd.f32 %v2965_v28, %v2000_v17  ;;  %v2967_v4 = vpop.f32.mrb[51].mxu0 }
 0x3f4   :  { %v14077_v10 = vadd.f32 %v2967_v4, %v2001_v3 }
 0x434   :  { %v3939_v22 = vpop.f32.mrb[50].mxu1 }
 0x435   :  { %v4131_v36 = vmul.f32 %v3939_v22, %v14083_v62  ;;  %v3941_v6 = vpop.f32.mrb[51].mxu1 }
 0x436   :  { %v4132_v8 = vmul.f32 %v3941_v6, %v14086_v47  ;;  %v4052_v7 = vpop.f32.mrb[52].mxu0 }
 0x437   :  { %v4163_v61 = vadd.f32 %v4131_v36, %v13958_v32  ;;  %v4133_v29 = vmul.f32 %v4052_v7, %v14089_v26  ;;  %v4054_v41 = vpop.f32.mrb[53].mxu0 }
 0x438   :  { %v4164_v39 = vadd.f32 %v4132_v8, %v13962_v59  ;;  %v4134_v33 = vmul.f32 %v4054_v41, %v14092_v12  ;;  %v3945_v56 = vpop.f32.mrb[52].mxu1  ;;  %v4203_v59 = vpop.permute.xlu1 %4202 }
 0x439   :  { %v4235_v50 = vadd.f32 %v4198_v2, %v4163_v61  ;;  %v4165_v16 = vadd.f32 %v4133_v29, %v13965_v9  ;;  %v4135_v60 = vmul.f32 %v3945_v56, %v14083_v62  ;;  %v3947_v14 = vpop.f32.mrb[53].mxu1 }
 0x43a   :  { %v4166_v17 = vadd.f32 %v4134_v33, %v13969_v34  ;;  %v4136_v21 = vmul.f32 %v3947_v14, %v14086_v47  ;;  %v4058_v32 = vpop.f32.mrb[54].mxu0  ;;  %v4236_v58 = vadd.f32 %v4198_v2, %v4164_v39 }
 0x43b   :  { %v4167_v3 = vadd.f32 %v4135_v60, %v13973_v44  ;;  %v4137_v28 = vmul.f32 %v4058_v32, %v14089_v26  ;;  %v4060_v4 = vpop.f32.mrb[55].mxu0  ;;  %v4237_v22 = vadd.f32 %v4198_v2, %v4165_v16  ;;  %v4267_v8 = vmax.f32 %v4235_v50, 0.0 }
 0x43c   :  { %v4168_v36 = vadd.f32 %v4136_v21, %v13977_v46  ;;  %v4138_v9 = vmul.f32 %v4060_v4, %v14092_v12  ;;  %v3951_v6 = vpop.f32.mrb[54].mxu1  ;;  %v4238_v41 = vadd.f32 %v4198_v2, %v4166_v17  ;;  %v4208_v21 = vpop.permute.xlu0 %4207 }
 0x43d   :  { %v4239_v7 = vadd.f32 %v4203_v59, %v4167_v3  ;;  %v4169_v34 = vadd.f32 %v4137_v28, %v13981_v52  ;;  %v4139_v61 = vmul.f32 %v3951_v6, %v14083_v62  ;;  %v3953_v29 = vpop.f32.mrb[55].mxu1  ;;  %v4269_v32 = vmax.f32 %v4237_v22, 0.0 }
 0x43e   :  { %v4240_v44 = vadd.f32 %v4203_v59, %v4168_v36  ;;  %v4170_v33 = vadd.f32 %v4138_v9, %v13985_v35  ;;  %v4140_v56 = vmul.f32 %v3953_v29, %v14086_v47  ;;  %v4064_v39 = vpop.f32.mrb[56].mxu0  ;;  %v4268_v6 = vmax.f32 %v4236_v58, 0.0 }
 0x43f   :  { %v4271_v16 = vmax.f32 %v4239_v7, 0.0  ;;  %v4241_v60 = vadd.f32 %v4203_v59, %v4169_v34  ;;  %v4171_v46 = vadd.f32 %v4139_v61, %v13989_v31  ;;  %v4141_v14 = vmul.f32 %v4064_v39, %v14089_v26  ;;  %v4066_v50 = vpop.f32.mrb[57].mxu0 }
 0x440   :  { %v4242_v52 = vadd.f32 %v4203_v59, %v4170_v33  ;;  %v4172_v3 = vadd.f32 %v4140_v56, %v13993_v63  ;;  %v4142_v2 = vmul.f32 %v4066_v50, %v14092_v12  ;;  %v3957_v17 = vpop.f32.mrb[56].mxu1  ;;  %v4272_v7 = vmax.f32 %v4240_v44, 0.0  ;;  %v4213_v44 = vpop.permute.xlu1 %4212 }
 0x441   :  { %v9159_v28 = vpack.c.bf16 %v4271_v16, %v4267_v8  ;;  %v4273_v35 = vmax.f32 %v4241_v60, 0.0  ;;  %v4243_v4 = vadd.f32 %v4208_v21, %v4171_v46  ;;  %v4173_v36 = vadd.f32 %v4141_v14, %v13997_v45  ;;  %v3959_v9 = vpop.f32.mrb[57].mxu1 }
 0x442   :  { %v4174_v31 = vadd.f32 %v4142_v2, %v14001_v18  ;;  %v4143_v34 = vmul.f32 %v3957_v17, %v14083_v62  ;;  %v4070_v61 = vpop.f32.mrb[58].mxu0  ;;  %v4270_v22 = vmax.f32 %v4238_v41, 0.0  ;;  %v4274_v29 = vmax.f32 %v4242_v52, 0.0 }
 0x443   :  { %v9175_v59 = vpack.c.bf16 %v4273_v35, %v4269_v32  ;;  %v4144_v63 = vmul.f32 %v3959_v9, %v14086_v47  ;;  %v4072_v33 = vpop.f32.mrb[59].mxu0  ;;  %v4275_v56 = vmax.f32 %v4243_v4, 0.0  ;;  %v14120_v8 = vadd.f32 %v4208_v21, %v4172_v3  ;;  %v4218_v4 = vpop.permute.xlu0 %4217 }
 0x444   :  { %v4175_v39 = vadd.f32 %v4143_v34, %v14005_v20  ;;  %v4145_v45 = vmul.f32 %v4070_v61, %v14089_v26  ;;  %v3963_v58 = vpop.f32.mrb[58].mxu1  ;;  %v4245_v16 = vadd.f32 %v4208_v21, %v4173_v36  ;;  %v4146_v60 = vmul.f32 %v4072_v33, %v14092_v12 }
 0x445   :  { %v4176_v18 = vadd.f32 %v4144_v63, %v14009_v42  ;;  %v4147_v41 = vmul.f32 %v3963_v58, %v14083_v62  ;;  %v3965_v46 = vpop.f32.mrb[59].mxu1  ;;  %v14127_v14 = vadd.f32 %v4208_v21, %v4174_v31  ;;  %v9157_v52 = vpack.c.bf16 %v4272_v7, %v4268_v6 }
 0x446   :  { %v4247_v50 = vadd.f32 %v4213_v44, %v4175_v39  ;;  %v4177_v32 = vadd.f32 %v4145_v45, %v14013_v13  ;;  %v4076_v3 = vpop.f32.mrb[60].mxu0  ;;  %v4178_v2 = vadd.f32 %v4146_v60, %v14017_v15  ;;  %v4148_v35 = vmul.f32 %v3965_v46, %v14086_v47 }
 0x447   :  { %v4248_v20 = vadd.f32 %v4213_v44, %v4176_v18  ;;  %v4179_v17 = vadd.f32 %v4147_v41, %v14021_v24  ;;  %v4078_v42 = vpop.f32.mrb[61].mxu0  ;;  %9158 = vmatprep.subr.bf16.mxu1 %v9157_v52  ;;  %v4149_v21 = vmul.f32 %v4076_v3, %v14089_v26  ;;  %v9173_v31 = vpack.c.bf16 %v4274_v29, %v4270_v22 }
 0x448   :  { %v4279_v36 = vmax.f32 %v4247_v50, 0.0  ;;  %v4249_v9 = vadd.f32 %v4213_v44, %v4177_v32  ;;  %v3969_v34 = vpop.f32.mrb[60].mxu1  ;;  %v4277_v61 = vmax.f32 %v4245_v16, 0.0  ;;  %v4250_v13 = vadd.f32 %v4213_v44, %v4178_v2  ;;  %9160 = vmatpush1.bf16.msra.mxu1 %v9159_v28  ;;  %v4223_v50 = vpop.permute.xlu1 %4222 }
 0x449   :  { %v4251_v6 = vadd.f32 %v4218_v4, %v4179_v17  ;;  %v4180_v7 = vadd.f32 %v4148_v35, %v14025_v48  ;;  %v3971_v15 = vpop.f32.mrb[61].mxu1  ;;  %v4181_v33 = vadd.f32 %v4149_v21, %v14029_v49  ;;  %9174 = vmatprep.subr.bf16.mxu0 %v9173_v31  ;;  %v4150_v39 = vmul.f32 %v4078_v42, %v14092_v12 }
 0x44a   :  { %v9163_v63 = vpack.c.bf16 %v4279_v36, %v4275_v56  ;;  %v4281_v24 = vmax.f32 %v4249_v9, 0.0  ;;  %v4082_v45 = vpop.f32.mrb[62].mxu0  ;;  %v4276_v58 = vmax.f32 %v14120_v8, 0.0  ;;  %v4278_v22 = vmax.f32 %v14127_v14, 0.0  ;;  %9176 = vmatpush1.bf16.msra.mxu0 %v9175_v59 }
 0x44b   :  { %v4280_v29 = vmax.f32 %v4248_v20, 0.0  ;;  %v4151_v44 = vmul.f32 %v3969_v34, %v14083_v62  ;;  %v4084_v16 = vpop.f32.mrb[63].mxu0  ;;  %v4282_v28 = vmax.f32 %v4250_v13, 0.0  ;;  %v4182_v56 = vadd.f32 %v4150_v39, %v14033_v37 }
 0x44c   :  { %v9179_v48 = vpack.c.bf16 %v4281_v24, %v4277_v61  ;;  %v4152_v18 = vmul.f32 %v3971_v15, %v14086_v47  ;;  %v3975_v49 = vpop.f32.mrb[62].mxu1  ;;  %v4283_v60 = vmax.f32 %v4251_v6, 0.0  ;;  %v4153_v46 = vmul.f32 %v4082_v45, %v14089_v26 }
 0x44d   :  { %v4183_v41 = vadd.f32 %v4151_v44, %v14037_v11  ;;  %v4154_v8 = vmul.f32 %v4084_v16, %v14092_v12  ;;  %v3977_v14 = vpop.f32.mrb[63].mxu1  ;;  %v4252_v59 = vadd.f32 %v4218_v4, %v4180_v7  ;;  %v4253_v32 = vadd.f32 %v4218_v4, %v4181_v33 }
 0x44e   :  { %v4184_v52 = vadd.f32 %v4152_v18, %v14041_v23  ;;  %v4155_v3 = vmul.f32 %v3975_v49, %v14083_v62  ;;  %v4088_v20 = vpop.f32.mrb[64].mxu0  ;;  %v4185_v2 = vadd.f32 %v4153_v46, %v14045_v43  ;;  %v9161_v35 = vpack.c.bf16 %v4280_v29, %v4276_v58  ;;  %v4228_v58 = vpop.permute.xlu0 %4227 }
 0x44f   :  { %v4255_v37 = vadd.f32 %v4223_v50, %v4183_v41  ;;  %v4186_v17 = vadd.f32 %v4154_v8, %v14049_v55  ;;  %v4090_v11 = vpop.f32.mrb[65].mxu0  ;;  %v4254_v42 = vadd.f32 %v4218_v4, %v4182_v56  ;;  %v4156_v21 = vmul.f32 %v3977_v14, %v14086_v47  ;;  %v4233_v41 = vpop.permute.xlu1 %4232 }
 0x450   :  { %v4256_v36 = vadd.f32 %v4223_v50, %v4184_v52  ;;  %v4187_v9 = vadd.f32 %v4155_v3, %v14053_v51  ;;  %v3981_v31 = vpop.f32.mrb[64].mxu1  ;;  %v4257_v61 = vadd.f32 %v4223_v50, %v4185_v2  ;;  %9162 = vmatprep.subr.bf16.mxu1 %v9161_v35  ;;  %v4157_v13 = vmul.f32 %v4088_v20, %v14089_v26 }
 0x451   :  { %v4287_v34 = vmax.f32 %v4255_v37, 0.0  ;;  %v4258_v23 = vadd.f32 %v4223_v50, %v4186_v17  ;;  %v3983_v6 = vpop.f32.mrb[65].mxu1  ;;  %v4284_v7 = vmax.f32 %v4252_v59, 0.0  ;;  %v4285_v43 = vmax.f32 %v4253_v32, 0.0  ;;  %9164 = vmatpush1.bf16.msra.mxu1 %v9163_v63 }
 0x452   :  { %v4188_v55 = vadd.f32 %v4156_v21, %v14057_v19  ;;  %v9177_v15 = vpack.c.bf16 %v4282_v28, %v4278_v22  ;;  %v4094_v4 = vpop.f32.mrb[66].mxu0  ;;  %v4288_v33 = vmax.f32 %v4256_v36, 0.0  ;;  %v4289_v51 = vmax.f32 %v4257_v61, 0.0  ;;  %v140_v21 = vld [vmem:[%s16662_s6] sm:$0xf] }
 0x453   :  { %v9167_v24 = vpack.c.bf16 %v4287_v34, %v4283_v60  ;;  %v4189_v39 = vadd.f32 %v4157_v13, %v14061_v5  ;;  %v4096_v45 = vpop.f32.mrb[67].mxu0  ;;  %v4286_v29 = vmax.f32 %v4254_v42, 0.0  ;;  %v4290_v44 = vmax.f32 %v4258_v23, 0.0  ;;  %v4302_v34 = vpop.permute.xlu1 %4301  ;;  %v11205_v61 = vld [vmem:[%s16657_s1] sm:$0xff]  ;;  %v11206_v13 = vld [vmem:[%s16657_s1 + $0x8] sm:$0xff] }
 0x454   :  { %9178 = vmatprep.subr.bf16.mxu0 %v9177_v15  ;;  %v4158_v16 = vmul.f32 %v4090_v11, %v14092_v12  ;;  %v4159_v56 = vmul.f32 %v3981_v31, %v14083_v62  ;;  %v9183_v18 = vpack.c.bf16 %v4289_v51, %v4285_v43  ;;  %v4259_v49 = vadd.f32 %v4228_v58, %v4187_v9  ;;  %v324_v31 = vpop.permute.xlu0 %323 }
 0x455   :  { %9180 = vmatpush1.bf16.msra.mxu0 %v9179_v48  ;;  %v4160_v19 = vmul.f32 %v3983_v6, %v14086_v47  ;;  %v4161_v63 = vmul.f32 %v4094_v4, %v14089_v26  ;;  %v4260_v22 = vadd.f32 %v4228_v58, %v4188_v55  ;;  %v4162_v60 = vmul.f32 %v4096_v45, %v14092_v12 }
 0x456   :  { %v4190_v28 = vadd.f32 %v4158_v16, %v14065_v53  ;;  %v4191_v5 = vadd.f32 %v4159_v56, %v14069_v27  ;;  %v4261_v46 = vadd.f32 %v4228_v58, %v4189_v39  ;;  %v9165_v50 = vpack.c.bf16 %v4288_v33, %v4284_v7 }
 0x457   :  { %v4192_v8 = vadd.f32 %v4160_v19, %v14073_v57  ;;  %v4193_v14 = vadd.f32 %v4161_v63, %v14075_v30  ;;  %v4194_v32 = vadd.f32 %v4162_v60, %v14077_v10  ;;  %v9181_v52 = vpack.c.bf16 %v4290_v44, %v4286_v29  ;;  %v132_v63 = vld [vmem:[%s16661_s5 + $0x40] sm:$0xff]  ;;  %v135_v60 = vld [vmem:[%s16661_s5 + $0x58] sm:$0xff] }
 0x458   :  { %v4262_v59 = vadd.f32 %v4228_v58, %v4190_v28  ;;  %v4263_v48 = vadd.f32 %v4233_v41, %v4191_v5  ;;  %9166 = vmatprep.subr.bf16.mxu1 %v9165_v50  ;;  %v4291_v53 = vmax.f32 %v4259_v49, 0.0  ;;  %v4292_v2 = vmax.f32 %v4260_v22, 0.0  ;;  %v133_v28 = vld [vmem:[%s16661_s5 + $0x48] sm:$0xff]  ;;  %v134_v5 = vld [vmem:[%s16661_s5 + $0x50] sm:$0xff]  ;;  %v4470_v50 = vpop.permute.xlu0 %4469 }
 0x459   :  { %v4264_v3 = vadd.f32 %v4233_v41, %v4192_v8  ;;  %v4265_v20 = vadd.f32 %v4233_v41, %v4193_v14  ;;  %v4266_v27 = vadd.f32 %v4233_v41, %v4194_v32  ;;  %9168 = vmatpush1.bf16.msra.mxu1 %v9167_v24  ;;  %9182 = vmatprep.subr.bf16.mxu0 %v9181_v52  ;;  %v4293_v17 = vmax.f32 %v4261_v46, 0.0  ;;  %v136_v41 = vld [vmem:[%s16661_s5 + $0x60] sm:$0xff]  ;;  %v137_v46 = vld [vmem:[%s16661_s5 + $0x68] sm:$0xff]  ;;  %v138_v8 = vld [vmem:[%s16661_s5 + $0x70] sm:$0xff] }
 0x45a   :  { %v4295_v37 = vmax.f32 %v4263_v48, 0.0  ;;  %9184 = vmatpush1.bf16.msra.mxu0 %v9183_v18  ;;  %v4294_v30 = vmax.f32 %v4262_v59, 0.0  ;;  %v9509_v23 = vadd.f32 %v11205_v61, %v324_v31  ;;  %v9515_v6 = vadd.f32 %v11206_v13, %v324_v31  ;;  %v139_v14 = vld [vmem:[%s16661_s5 + $0x78] sm:$0xff] }
 0x45b   :  { %v4296_v35 = vmax.f32 %v4264_v3, 0.0  ;;  %v4297_v57 = vmax.f32 %v4265_v20, 0.0  ;;  %v4298_v42 = vmax.f32 %v4266_v27, 0.0  ;;  %v4451_v43 = vcombine.high %v11205_v61, %v11205_v61 }
 0x45c   :  { %v9171_v11 = vpack.c.bf16 %v4295_v37, %v4291_v53  ;;  %v9512_v55 = vadd.f32 %v4302_v34, %v324_v31  ;;  %v9510_v15 = vadd.f32 %v9509_v23, %v4302_v34  ;;  %v4452_v33 = vcombine.high %v11206_v13, %v11206_v13  ;;  %v16983_v13 = vld [vmem:[#allocation11_spill] sm:$0xff] }
 0x45d   :  { %v9187_v36 = vpack.c.bf16 %v4297_v57, %v4293_v17  ;;  %v9169_v9 = vpack.c.bf16 %v4296_v35, %v4292_v2  ;;  %v9185_v10 = vpack.c.bf16 %v4298_v42, %v4294_v30  ;;  %v9516_v39 = vadd.f32 %v9515_v6, %v4302_v34  ;;  %v4475_v2 = vpop.permute.xlu1 %4474 }
 0x45f   :  { %9170 = vmatprep.subr.bf16.mxu1 %v9169_v9  ;;  %9186 = vmatprep.subr.bf16.mxu0 %v9185_v10  ;;  %v16981_v9 = vld [vmem:[#allocation9_spill] sm:$0xff] }
 0x460   :  { %9172 = vmatpush1.bf16.msra.mxu1 %v9171_v11  ;;  %9188 = vmatpush1.bf16.msra.mxu0 %v9187_v36 }
 0x463   :  { %8630 = vmatmul.mubr.msk.f32.vlgmr.msra.gmra.mrb[0].mxu1 %vm1082_vm5, %v140_v21  ;;  %8631 = vmatmul.mubr.msk.f32.vlgmr.msra.gmra.mrb[2].mxu0 %vm1082_vm5, %v140_v21  ;;  %v16982_v21 = vld [vmem:[#allocation15_spill] sm:$0xff] }
 0x464   :  { %4607 = vmatprep.mubr.f32.mxu1 %v16905_v38  ;;  %4720 = vmatprep.mubr.f32.mxu0 %v16905_v38 }
 0x536   :  { %v4373_v7 = vpop.f32.mrb[0].mxu1  ;;  %v4444_v24 = vpop.f32.mrb[2].mxu0 }
 0x537   :  { %v4375_v4 = vpop.f32.mrb[1].mxu1  ;;  %v4446_v45 = vpop.f32.mrb[3].mxu0  ;;  %v14177_v58 = vadd.f32 %v9510_v15, %v4373_v7  ;;  %v14181_v16 = vadd.f32 %v9516_v39, %v4444_v24  ;;  %v16984_v7 = vld [vmem:[#allocation10_spill] sm:$0xff] }
 0x538   :  { %v9513_v51 = vadd.f32 %v9512_v55, %v4375_v4  ;;  %v9519_v29 = vadd.f32 %v9512_v55, %v4446_v45  ;;  %v16985_v4 = vld [vmem:[#allocation12_spill] sm:$0xff]  ;;  %v4480_v39 = vpop.permute.xlu0 %4479 }
 0x539   :  { %16973 = vst [vmem:[#allocation56_spill] sm:$0xff] %v14177_v58  ;;  %16975 = vst [vmem:[#allocation23_spill] sm:$0xff] %v14181_v16  ;;  %v4463_v49 = vmax.f32 %v14177_v58, 0.0  ;;  %v4465_v22 = vmax.f32 %v14181_v16, 0.0 }
 0x53a   :  { %v14179_v44 = vadd.f32 %v9513_v51, %v4451_v43  ;;  %v14183_v56 = vadd.f32 %v9519_v29, %v4452_v33  ;;  %v16986_v33 = vld [vmem:[#allocation16_spill] sm:$0xff] }
 0x53c   :  { %16974 = vst [vmem:[#allocation21_spill] sm:$0xff] %v14179_v44  ;;  %16976 = vst [vmem:[#allocation22_spill] sm:$0xff] %v14183_v56  ;;  %v4464_v18 = vmax.f32 %v14179_v44, 0.0  ;;  %v4466_v19 = vmax.f32 %v14183_v56, 0.0 }
 0x53e   :  { %8632 = vmatprep.subr.msk.mxu1 %vm183_vm0, %v4464_v18  ;;  %8642 = vmatprep.subr.msk.mxu0 %vm183_vm0, %v4466_v19 }
 0x53f   :  { %8633 = vmatpush1.msk.msra.mxu1 %vm183_vm0, %v4463_v49  ;;  %8643 = vmatpush1.msk.msra.mxu0 %vm183_vm0, %v4465_v22  ;;  %v16987_v49 = vld [vmem:[#allocation19_spill] sm:$0xff] }
 0x540   :  { %8634 = vmatmul.mubr.msk.f32.vlgmr.msra.gmra.mrb[66].mxu1 %vm179_vm1, %v132_v63  ;;  %8644 = vmatmul.mubr.msk.f32.vlgmr.msra.gmra.mrb[68].mxu0 %vm179_vm1, %v132_v63  ;;  %v16988_v63 = vld [vmem:[#allocation20_spill] sm:$0xff] }
 0x541   :  { %4613 = vmatprep.mubr.f32.mxu1 %v16905_v38  ;;  %4726 = vmatprep.mubr.f32.mxu0 %v16905_v38 }
 0x544   :  { %8635 = vmatmul.mubr.msk.f32.gmra.mrb[68].mxu1 %vm179_vm1, %v133_v28  ;;  %8645 = vmatmul.mubr.msk.f32.gmra.mrb[70].mxu0 %vm179_vm1, %v133_v28 }
 0x545   :  { %4619 = vmatprep.mubr.f32.mxu1 %v16905_v38  ;;  %4732 = vmatprep.mubr.f32.mxu0 %v16905_v38 }
 0x548   :  { %8636 = vmatmul.mubr.msk.f32.gmra.mrb[70].mxu1 %vm179_vm1, %v134_v5  ;;  %8646 = vmatmul.mubr.msk.f32.gmra.mrb[72].mxu0 %vm179_vm1, %v134_v5 }
 0x549   :  { %4625 = vmatprep.mubr.f32.mxu1 %v16905_v38  ;;  %4738 = vmatprep.mubr.f32.mxu0 %v16905_v38 }
 0x54c   :  { %8637 = vmatmul.mubr.msk.f32.gmra.mrb[72].mxu1 %vm179_vm1, %v135_v60  ;;  %8647 = vmatmul.mubr.msk.f32.gmra.mrb[74].mxu0 %vm179_vm1, %v135_v60 }
 0x54d   :  { %4631 = vmatprep.mubr.f32.mxu1 %v16905_v38  ;;  %4744 = vmatprep.mubr.f32.mxu0 %v16905_v38 }
 0x550   :  { %8638 = vmatmul.mubr.msk.f32.gmra.mrb[74].mxu1 %vm179_vm1, %v136_v41  ;;  %8648 = vmatmul.mubr.msk.f32.gmra.mrb[76].mxu0 %vm179_vm1, %v136_v41 }
 0x551   :  { %4637 = vmatprep.mubr.f32.mxu1 %v16905_v38  ;;  %4750 = vmatprep.mubr.f32.mxu0 %v16905_v38 }
 0x554   :  { %8639 = vmatmul.mubr.msk.f32.gmra.mrb[76].mxu1 %vm179_vm1, %v137_v46  ;;  %8649 = vmatmul.mubr.msk.f32.gmra.mrb[78].mxu0 %vm179_vm1, %v137_v46 }
 0x555   :  { %4643 = vmatprep.mubr.f32.mxu1 %v16905_v38  ;;  %4756 = vmatprep.mubr.f32.mxu0 %v16905_v38 }
 0x558   :  { %8640 = vmatmul.mubr.msk.f32.gmra.mrb[78].mxu1 %vm179_vm1, %v138_v8  ;;  %8650 = vmatmul.mubr.msk.f32.gmra.mrb[80].mxu0 %vm179_vm1, %v138_v8 }
 0x559   :  { %4649 = vmatprep.mubr.f32.mxu1 %v16905_v38  ;;  %4762 = vmatprep.mubr.f32.mxu0 %v16905_v38 }
 0x55c   :  { %8641 = vmatmul.mubr.msk.f32.gmra.mrb[80].mxu1 %vm179_vm1, %v139_v14  ;;  %8651 = vmatmul.mubr.msk.f32.gmra.mrb[82].mxu0 %vm179_vm1, %v139_v14 }
 0x55d   :  { %5161 = vmatprep.mubr.f32.mxu1 %v16905_v38  ;;  %5274 = vmatprep.mubr.f32.mxu0 %v16905_v38 }
 0x613   :  { %v4609_v59 = vpop.f32.mrb[66].mxu1  ;;  %v4722_v52 = vpop.f32.mrb[68].mxu0 }
 0x614   :  { %v4610_v48 = vadd.f32 %v4609_v59, %v4470_v50  ;;  %v4611_v32 = vpop.f32.mrb[67].mxu1  ;;  %v4723_v20 = vadd.f32 %v4722_v52, %v4470_v50  ;;  %v4724_v53 = vpop.f32.mrb[69].mxu0 }
 0x615   :  { %v4612_v3 = vadd.f32 %v4611_v32, %v4470_v50  ;;  %v4725_v27 = vadd.f32 %v4724_v53, %v4470_v50 }
 0x616   :  { %v14249_v37 = vmax.f32 %v4610_v48, 0.0  ;;  %v14253_v35 = vmax.f32 %v4723_v20, 0.0 }
 0x617   :  { %v14251_v17 = vmax.f32 %v4612_v3, 0.0  ;;  %v4615_v57 = vpop.f32.mrb[68].mxu1  ;;  %v14255_v30 = vmax.f32 %v4725_v27, 0.0  ;;  %v4728_v36 = vpop.f32.mrb[70].mxu0 }
 0x618   :  { %16977 = vst [vmem:[#allocation24_spill] sm:$0xff] %v14249_v37  ;;  %16979 = vst [vmem:[#allocation34_spill] sm:$0xff] %v14253_v35  ;;  %v4616_v11 = vadd.f32 %v4615_v57, %v4475_v2  ;;  %v4617_v42 = vpop.f32.mrb[69].mxu1  ;;  %v4801_v10 = vmul.f32 %v14249_v37, %v16981_v9  ;;  %v14261_v31 = vmul.f32 %v14249_v37, %v16982_v21  ;;  %v4730_v23 = vpop.f32.mrb[71].mxu0 }
 0x619   :  { %16978 = vst [vmem:[#allocation32_spill] sm:$0xff] %v14251_v17  ;;  %16980 = vst [vmem:[#allocation33_spill] sm:$0xff] %v14255_v30  ;;  %v4618_v34 = vadd.f32 %v4617_v42, %v4475_v2  ;;  %v4729_v61 = vadd.f32 %v4728_v36, %v4475_v2  ;;  %v4802_v6 = vmul.f32 %v14251_v17, %v16983_v13  ;;  %v4485_v27 = vpop.permute.xlu1 %4484 }
 0x61a   :  { %v4803_v43 = vmul.f32 %v14253_v35, %v16984_v7  ;;  %v14267_v55 = vmax.f32 %v4616_v11, 0.0  ;;  %v4731_v15 = vadd.f32 %v4730_v23, %v4475_v2  ;;  %v4804_v24 = vmul.f32 %v14255_v30, %v16985_v4 }
 0x61b   :  { %v14273_v51 = vmul.f32 %v14251_v17, %v16986_v33  ;;  %v14275_v45 = vmax.f32 %v4618_v34, 0.0  ;;  %v14277_v29 = vmax.f32 %v4729_v61, 0.0  ;;  %v4621_v18 = vpop.f32.mrb[70].mxu1  ;;  %v14281_v19 = vmul.f32 %v14253_v35, %v16987_v49  ;;  %v4734_v41 = vpop.f32.mrb[72].mxu0 }
 0x61c   :  { %v14285_v22 = vmul.f32 %v14255_v30, %v16988_v63  ;;  %v14287_v28 = vmax.f32 %v4731_v15, 0.0  ;;  %v4622_v5 = vadd.f32 %v4621_v18, %v4480_v39  ;;  %v4623_v60 = vpop.f32.mrb[71].mxu1  ;;  %v14291_v46 = vpack.i.bf16 %v14267_v55, %v14249_v37  ;;  %v4736_v59 = vpop.f32.mrb[73].mxu0 }
 0x61d   :  { %v4805_v8 = vmul.f32 %v14267_v55, %v16981_v9  ;;  %v4624_v14 = vadd.f32 %v4623_v60, %v4480_v39  ;;  %v4735_v50 = vadd.f32 %v4734_v41, %v4480_v39  ;;  %v14297_v48 = vpack.i.bf16 %v14275_v45, %v14251_v17 }
 0x61e   :  { %16989 = vst [vmem:[#allocation35_spill] sm:$0xff] %v14291_v46  ;;  %v14301_v32 = vpack.i.bf16 %v14277_v29, %v14253_v35  ;;  %v14303_v52 = vmax.f32 %v4622_v5, 0.0  ;;  %v4737_v3 = vadd.f32 %v4736_v59, %v4480_v39  ;;  %10564 = vrot.lane.b32.xlu0 %v14291_v46, %s11234_s17  ;;  %v14309_v20 = vpack.i.bf16 %v14287_v28, %v14255_v30 }
 0x61f   :  { %16990 = vst [vmem:[#allocation48_spill] sm:$0xff] %v14297_v48  ;;  %v14311_v53 = vpack.i.bf16 %v4805_v8, %v4801_v10  ;;  %v14313_v2 = vmax.f32 %v4624_v14, 0.0  ;;  %v14315_v57 = vmax.f32 %v4735_v50, 0.0  ;;  %v4627_v11 = vpop.f32.mrb[72].mxu1  ;;  %10574 = vrot.lane.b32.xlu1 %v14297_v48, %s11234_s17  ;;  %v4806_v42 = vmul.f32 %v14275_v45, %v16983_v13  ;;  %v4740_v23 = vpop.f32.mrb[74].mxu0 }
 0x620   :  { %16991 = vst [vmem:[#allocation50_spill] sm:$0xff] %v14301_v32  ;;  %16992 = vst [vmem:[#allocation49_spill] sm:$0xff] %v14303_v52  ;;  %v4807_v36 = vmul.f32 %v14277_v29, %v16984_v7  ;;  %v14323_v34 = vmax.f32 %v4737_v3, 0.0  ;;  %v4628_v61 = vadd.f32 %v4627_v11, %v4485_v27  ;;  %v4629_v10 = vpop.f32.mrb[73].mxu1  ;;  %v4808_v15 = vmul.f32 %v14287_v28, %v16985_v4  ;;  %v4742_v60 = vpop.f32.mrb[75].mxu0 }
 0x621   :  { %16993 = vst [vmem:[#allocation51_spill] sm:$0xff] %v14309_v20  ;;  %16994 = vst [vmem:[#allocation61_spill] sm:$0xff] %v14311_v53  ;;  %v4809_v39 = vmul.f32 %v14303_v52, %v16981_v9  ;;  %v4630_v18 = vadd.f32 %v4629_v10, %v4485_v27  ;;  %v4741_v5 = vadd.f32 %v4740_v23, %v4485_v27  ;;  %v4490_v11 = vpop.permute.xlu0 %4489 }
 0x622   :  { %16995 = vst [vmem:[#allocation63_spill] sm:$0xff] %v14315_v57  ;;  %v14329_v41 = vpack.i.bf16 %v4806_v42, %v4802_v6  ;;  %v14331_v8 = vpack.i.bf16 %v4807_v36, %v4803_v43  ;;  %v14333_v14 = vmax.f32 %v4628_v61, 0.0  ;;  %v4743_v50 = vadd.f32 %v4742_v60, %v4485_v27  ;;  %10569 = vrot.lane.b32.xlu0 %v14301_v32, %s11234_s17 }
 0x623   :  { %v14337_v59 = vpack.i.bf16 %v4808_v15, %v4804_v24  ;;  %v4810_v3 = vmul.f32 %v14313_v2, %v16983_v13  ;;  %v14341_v56 = vmax.f32 %v4630_v18, 0.0  ;;  %v14343_v10 = vmax.f32 %v4741_v5, 0.0  ;;  %v4633_v6 = vpop.f32.mrb[74].mxu1  ;;  %10579 = vrot.lane.b32.xlu1 %v14309_v20, %s11234_s17  ;;  %v4746_v61 = vpop.f32.mrb[76].mxu0 }
 0x624   :  { %16996 = vst [vmem:[#allocation62_spill] sm:$0xff] %v14329_v41  ;;  %v4811_v43 = vmul.f32 %v14315_v57, %v16984_v7  ;;  %v4812_v27 = vmul.f32 %v14323_v34, %v16985_v4  ;;  %v14351_v24 = vmax.f32 %v4743_v50, 0.0  ;;  %v4634_v42 = vadd.f32 %v4633_v6, %v4490_v11  ;;  %v4635_v36 = vpop.f32.mrb[75].mxu1  ;;  %v4748_v60 = vpop.f32.mrb[77].mxu0 }
 0x625   :  { %16997 = vst [vmem:[#allocation64_spill] sm:$0xff] %v14343_v10  ;;  %v14355_v23 = vpack.i.bf16 %v14333_v14, %v14303_v52  ;;  %v4813_v15 = vmul.f32 %v14333_v14, %v16981_v9  ;;  %v4636_v18 = vadd.f32 %v4635_v36, %v4490_v11  ;;  %v4747_v5 = vadd.f32 %v4746_v61, %v4490_v11  ;;  %v4495_v61 = vpop.permute.xlu1 %4494  ;;  %v4500_v32 = vpop.permute.xlu0 %4499 }
 0x626   :  { %v14361_v44 = vpack.i.bf16 %v14341_v56, %v14313_v2  ;;  %v14365_v50 = vpack.i.bf16 %v14343_v10, %v14315_v57  ;;  %v14367_v6 = vmax.f32 %v4634_v42, 0.0  ;;  %v4749_v16 = vadd.f32 %v4748_v60, %v4490_v11 }
 0x627   :  { %16998 = vst [vmem:[#allocation18_spill] sm:$0xff] %v14355_v23  ;;  %10584 = vrot.lane.b32.xlu0 %v14355_v23, %s11234_s17  ;;  %v14373_v58 = vpack.i.bf16 %v14351_v24, %v14323_v34  ;;  %v14375_v36 = vpack.i.bf16 %v4813_v15, %v4809_v39  ;;  %v14377_v12 = vmax.f32 %v4636_v18, 0.0  ;;  %v14379_v26 = vmax.f32 %v4747_v5, 0.0  ;;  %v4639_v47 = vpop.f32.mrb[76].mxu1  ;;  %v4752_v15 = vpop.f32.mrb[78].mxu0 }
 0x628   :  { %16999 = vst [vmem:[#allocation27_spill] sm:$0xff] %v14361_v44  ;;  %17000 = vst [vmem:[#allocation25_spill] sm:$0xff] %v14365_v50  ;;  %10594 = vrot.lane.b32.xlu1 %v14361_v44, %s11234_s17  ;;  %v4814_v11 = vmul.f32 %v14341_v56, %v16983_v13  ;;  %v4815_v42 = vmul.f32 %v14343_v10, %v16984_v7  ;;  %v14387_v60 = vmax.f32 %v4749_v16, 0.0  ;;  %v4641_v39 = vpop.f32.mrb[77].mxu1  ;;  %v4754_v40 = vpop.f32.mrb[79].mxu0 }
 0x629   :  { %17001 = vst [vmem:[#allocation31_spill] sm:$0xff] %v14367_v6  ;;  %17002 = vst [vmem:[#allocation26_spill] sm:$0xff] %v14373_v58  ;;  %v4640_v62 = vadd.f32 %v4639_v47, %v4495_v61  ;;  %v4816_v18 = vmul.f32 %v14351_v24, %v16985_v4  ;;  %v4817_v5 = vmul.f32 %v14367_v6, %v16981_v9 }
 0x62a   :  { %17003 = vst [vmem:[#allocation46_spill] sm:$0xff] %v14377_v12  ;;  %17004 = vst [vmem:[#allocation38_spill] sm:$0xff] %v14379_v26  ;;  %v4642_v0 = vadd.f32 %v4641_v39, %v4495_v61  ;;  %v4753_v25 = vadd.f32 %v4752_v15, %v4495_v61  ;;  %v14393_v54 = vpack.i.bf16 %v4814_v11, %v4810_v3 }
 0x62b   :  { %17005 = vst [vmem:[#allocation47_spill] sm:$0xff] %v14387_v60  ;;  %v14395_v44 = vpack.i.bf16 %v4815_v42, %v4811_v43  ;;  %v14397_v23 = vmax.f32 %v4640_v62, 0.0  ;;  %v4755_v16 = vadd.f32 %v4754_v40, %v4495_v61  ;;  %10589 = vrot.lane.b32.xlu0 %v14365_v50, %s11234_s17  ;;  %v14401_v47 = vpack.i.bf16 %v4816_v18, %v4812_v27  ;;  %v4645_v3 = vpop.f32.mrb[78].mxu1  ;;  %v4758_v11 = vpop.f32.mrb[80].mxu0 }
 0x62c   :  { %17006 = vst [vmem:[#allocation39_spill] sm:$0xff] %v14393_v54  ;;  %v4818_v20 = vmul.f32 %v14377_v12, %v16983_v13  ;;  %v14405_v48 = vmax.f32 %v4642_v0, 0.0  ;;  %v14407_v39 = vmax.f32 %v4753_v25, 0.0  ;;  %10599 = vrot.lane.b32.xlu1 %v14373_v58, %s11234_s17  ;;  %v4819_v40 = vmul.f32 %v14379_v26, %v16984_v7  ;;  %v4647_v61 = vpop.f32.mrb[79].mxu1  ;;  %v4760_v18 = vpop.f32.mrb[81].mxu0 }
 0x62d   :  { %17007 = vst [vmem:[#allocation44_spill] sm:$0xff] %v14395_v44  ;;  %17008 = vst [vmem:[#allocation36_spill] sm:$0xff] %v14397_v23  ;;  %v4820_v62 = vmul.f32 %v14387_v60, %v16985_v4  ;;  %v14415_v43 = vmax.f32 %v4755_v16, 0.0  ;;  %v4646_v27 = vadd.f32 %v4645_v3, %v4500_v32  ;;  %v14419_v0 = vpack.i.bf16 %v14397_v23, %v14367_v6 }
 0x62e   :  { %17009 = vst [vmem:[#allocation45_spill] sm:$0xff] %v14401_v47  ;;  %17010 = vst [vmem:[#allocation37_spill] sm:$0xff] %v14405_v48  ;;  %v4821_v25 = vmul.f32 %v14397_v23, %v16981_v9  ;;  %v4648_v42 = vadd.f32 %v4647_v61, %v4500_v32  ;;  %v4759_v15 = vadd.f32 %v4758_v11, %v4500_v32  ;;  %v4505_v11 = vpop.permute.xlu1 %4504 }
 0x62f   :  { %17011 = vst [vmem:[#allocation59_spill] sm:$0xff] %v14407_v39  ;;  %17012 = vst [vmem:[#allocation54_spill] sm:$0xff] %v14415_v43  ;;  %v14425_v58 = vpack.i.bf16 %v14405_v48, %v14377_v12  ;;  %v14429_v16 = vpack.i.bf16 %v14407_v39, %v14379_v26  ;;  %v14431_v3 = vmax.f32 %v4646_v27, 0.0  ;;  %v4761_v50 = vadd.f32 %v4760_v18, %v4500_v32  ;;  %v4651_v35 = vpop.f32.mrb[80].mxu1 }
 0x630   :  { %17013 = vst [vmem:[#allocation60_spill] sm:$0xff] %v14419_v0  ;;  %10604 = vrot.lane.b32.xlu0 %v14419_v0, %s11234_s17  ;;  %v14437_v46 = vpack.i.bf16 %v14415_v43, %v14387_v60  ;;  %v14439_v61 = vpack.i.bf16 %v4821_v25, %v4817_v5  ;;  %v14441_v38 = vmax.f32 %v4648_v42, 0.0  ;;  %v14443_v1 = vmax.f32 %v4759_v15, 0.0  ;;  %v4653_v5 = vpop.f32.mrb[81].mxu1  ;;  %v4764_v25 = vpop.f32.mrb[82].mxu0 }
 0x631   :  { %17014 = vst [vmem:[#allocation55_spill] sm:$0xff] %v14425_v58  ;;  %17015 = vst [vmem:[#allocation57_spill] sm:$0xff] %v14429_v16  ;;  %10614 = vrot.lane.b32.xlu1 %v14425_v58, %s11234_s17  ;;  %v4822_v32 = vmul.f32 %v14405_v48, %v16983_v13  ;;  %v4823_v27 = vmul.f32 %v14407_v39, %v16984_v7  ;;  %v14451_v18 = vmax.f32 %v4761_v50, 0.0  ;;  %v4766_v58 = vpop.f32.mrb[83].mxu0 }
 0x632   :  { %17016 = vst [vmem:[#allocation52_spill] sm:$0xff] %v14431_v3  ;;  %17017 = vst [vmem:[#allocation58_spill] sm:$0xff] %v14437_v46  ;;  %v4652_v0 = vadd.f32 %v4651_v35, %v4505_v11  ;;  %v4824_v42 = vmul.f32 %v14415_v43, %v16985_v4  ;;  %v4825_v15 = vmul.f32 %v14431_v3, %v16981_v9 }
 0x633   :  { %17018 = vst [vmem:[#allocation53_spill] sm:$0xff] %v14439_v61  ;;  %17019 = vst [vmem:[#allocation65_spill] sm:$0xff] %v14441_v38  ;;  %v4654_v37 = vadd.f32 %v4653_v5, %v4505_v11  ;;  %v4765_v30 = vadd.f32 %v4764_v25, %v4505_v11  ;;  %v14457_v17 = vpack.i.bf16 %v4822_v32, %v4818_v20 }
 0x634   :  { %17020 = vst [vmem:[#allocation30_spill] sm:$0xff] %v14443_v1  ;;  %17021 = vst [vmem:[#allocation5_spill] sm:$0xff] %v14451_v18  ;;  %v14459_v61 = vpack.i.bf16 %v4823_v27, %v4819_v40  ;;  %v14461_v47 = vmax.f32 %v4652_v0, 0.0  ;;  %v4767_v50 = vadd.f32 %v4766_v58, %v4505_v11  ;;  %10609 = vrot.lane.b32.xlu0 %v14429_v16, %s11234_s17 }
 0x635   :  { %v14465_v35 = vpack.i.bf16 %v4824_v42, %v4820_v62  ;;  %v4826_v44 = vmul.f32 %v14441_v38, %v16983_v13  ;;  %v14469_v54 = vmax.f32 %v4654_v37, 0.0  ;;  %v14471_v5 = vmax.f32 %v4765_v30, 0.0  ;;  %10619 = vrot.lane.b32.xlu1 %v14437_v46, %s11234_s17 }
 0x636   :  { %17022 = vst [vmem:[#allocation7_spill] sm:$0xff] %v14461_v47  ;;  %v4827_v20 = vmul.f32 %v14443_v1, %v16984_v7  ;;  %v4828_v58 = vmul.f32 %v14451_v18, %v16985_v4  ;;  %v14479_v40 = vmax.f32 %v4767_v50, 0.0  ;;  %v14483_v62 = vpack.i.bf16 %v14461_v47, %v14431_v3 }
 0x637   :  { %17023 = vst [vmem:[#allocation6_spill] sm:$0xff] %v14469_v54  ;;  %17024 = vst [vmem:[#allocation8_spill] sm:$0xff] %v14471_v5  ;;  %v4829_v37 = vmul.f32 %v14461_v47, %v16981_v9  ;;  %v4837_v30 = vmul.f32 %v14267_v55, %v16982_v21  ;;  %v14491_v0 = vpack.i.bf16 %v14469_v54, %v14441_v38 }
 0x638   :  { %17025 = vst [vmem:[#allocation9_spill] sm:$0xff] %v14479_v40  ;;  %17026 = vst [vmem:[#allocation15_spill] sm:$0xff] %v14483_v62  ;;  %v14495_v11 = vpack.i.bf16 %v14471_v5, %v14443_v1  ;;  %v4830_v32 = vmul.f32 %v14469_v54, %v16983_v13  ;;  %v4831_v27 = vmul.f32 %v14471_v5, %v16984_v7  ;;  %10624 = vrot.lane.b32.xlu0 %v14483_v62, %s11234_s17 }
 0x639   :  { %17027 = vst [vmem:[#allocation11_spill] sm:$0xff] %v14491_v0  ;;  %v14505_v9 = vpack.i.bf16 %v14479_v40, %v14451_v18  ;;  %v14507_v25 = vpack.i.bf16 %v4829_v37, %v4825_v15  ;;  %v4832_v42 = vmul.f32 %v14479_v40, %v16985_v4  ;;  %v14512_v50 = vpack.i.bf16 %v4837_v30, %v14261_v31 }
 0x63a   :  { %17028 = vst [vmem:[#allocation10_spill] sm:$0xff] %v14495_v11  ;;  %10639 = vrot.lane.b32.xlu1 %v14491_v0, %s11234_s17  ;;  %v14516_v13 = vpack.i.bf16 %v4830_v32, %v4826_v44  ;;  %v14518_v7 = vpack.i.bf16 %v4831_v27, %v4827_v20  ;;  %v4838_v62 = vmul.f32 %v14275_v45, %v16986_v33 }
 0x63b   :  { %17029 = vst [vmem:[#allocation12_spill] sm:$0xff] %v14505_v9  ;;  %v4839_v15 = vmul.f32 %v14277_v29, %v16987_v49  ;;  %v14524_v37 = vpack.i.bf16 %v4832_v42, %v4828_v58  ;;  %v4840_v4 = vmul.f32 %v14287_v28, %v16988_v63  ;;  %v4841_v31 = vmul.f32 %v14303_v52, %v16982_v21 }
 0x63c   :  { %v4845_v44 = vmul.f32 %v14333_v14, %v16982_v21  ;;  %v14533_v20 = vpack.i.bf16 %v4838_v62, %v14273_v51  ;;  %v4842_v32 = vmul.f32 %v14313_v2, %v16986_v33  ;;  %v4846_v58 = vmul.f32 %v14341_v56, %v16986_v33  ;;  %10629 = vrot.lane.b32.xlu0 %v14495_v11, %s11234_s17 }
 0x63d   :  { %v14536_v30 = vpack.i.bf16 %v4839_v15, %v14281_v19  ;;  %v14545_v27 = vpack.i.bf16 %v4840_v4, %v14285_v22  ;;  %v4843_v51 = vmul.f32 %v14315_v57, %v16987_v49  ;;  %v4847_v19 = vmul.f32 %v14343_v10, %v16987_v49 }
 0x63e   :  { %v14547_v42 = vpack.i.bf16 %v4845_v44, %v4841_v31  ;;  %10644 = vrot.lane.b32.xlu1 %v14505_v9, %s11234_s17  ;;  %v14555_v62 = vpack.i.bf16 %v4846_v58, %v4842_v32  ;;  %v4844_v15 = vmul.f32 %v14323_v34, %v16988_v63  ;;  %v4848_v22 = vmul.f32 %v14351_v24, %v16988_v63  ;;  %s11242_s17 = smov [#allocation2]  }
 0x63f   :  { %v4849_v4 = vmul.f32 %v14367_v6, %v16982_v21  ;;  %v14563_v31 = vpack.i.bf16 %v4847_v19, %v4843_v51  ;;  %v4853_v44 = vmul.f32 %v14397_v23, %v16982_v21  ;;  %v4850_v11 = vmul.f32 %v14377_v12, %v16986_v33 }
 0x640   :  { %v4854_v32 = vmul.f32 %v14405_v48, %v16986_v33  ;;  %v14571_v58 = vpack.i.bf16 %v4848_v22, %v4844_v15  ;;  %v4851_v9 = vmul.f32 %v14379_v26, %v16987_v49  ;;  %v4855_v0 = vmul.f32 %v14407_v39, %v16987_v49  ;;  %10634 = vrot.lane.b32.xlu0 %v14311_v53, %s11235_s18 }
 0x641   :  { %v4852_v51 = vmul.f32 %v14387_v60, %v16988_v63  ;;  %v14581_v19 = vpack.i.bf16 %v4853_v44, %v4849_v4  ;;  %v4856_v15 = vmul.f32 %v14415_v43, %v16988_v63  ;;  %v4857_v22 = vmul.f32 %v14431_v3, %v16982_v21 }
 0x642   :  { %17030 = vst [vmem:[#allocation16_spill] sm:$0xff] %v14571_v58  ;;  %v14583_v46 = vpack.i.bf16 %v4854_v32, %v4850_v11  ;;  %10649 = vrot.lane.b32.xlu1 %v14329_v41, %s11235_s18  ;;  %v14591_v16 = vpack.i.bf16 %v4855_v0, %v4851_v9  ;;  %v4861_v58 = vmul.f32 %v14461_v47, %v16982_v21 }
 0x643   :  { %v4858_v4 = vmul.f32 %v14441_v38, %v16986_v33  ;;  %v4862_v11 = vmul.f32 %v14469_v54, %v16986_v33  ;;  %v14599_v44 = vpack.i.bf16 %v4856_v15, %v4852_v51  ;;  %v4859_v32 = vmul.f32 %v14443_v1, %v16987_v49  ;;  %v17044_v15 = vld [vmem:[#allocation45_spill] sm:$0xff] }
 0x644   :  { %v4863_v53 = vmul.f32 %v14471_v5, %v16987_v49  ;;  %v4860_v0 = vmul.f32 %v14451_v18, %v16988_v63  ;;  %v14607_v9 = vpack.i.bf16 %v4861_v58, %v4857_v22  ;;  %v4864_v41 = vmul.f32 %v14479_v40, %v16988_v63  ;;  %10654 = vrot.lane.b32.xlu0 %v14331_v8, %s11235_s18  ;;  %v17033_v49 = vld [vmem:[#allocation39_spill] sm:$0xff]  ;;  %v17034_v58 = vld [vmem:[#allocation44_spill] sm:$0xff]  ;;  %v17035_v63 = vld [vmem:[#allocation45_spill] sm:$0xff] }
 0x645   :  { %v14609_v21 = vpack.i.bf16 %v4862_v11, %v4858_v4  ;;  %v17039_v11 = vld [vmem:[#allocation24_spill] sm:$0xff]  ;;  %v17043_v22 = vld [vmem:[#allocation62_spill] sm:$0xff]  ;;  %v7121_v40 = vld [vmem:[%s16663_s7 + $0x3e0] sm:$0xff] }
 0x646   :  { %v14615_v33 = vpack.i.bf16 %v4863_v53, %v4859_v32  ;;  %10659 = vrot.lane.b32.xlu1 %v14337_v59, %s11235_s18  ;;  %v14619_v51 = vpack.i.bf16 %v4864_v41, %v4860_v0  ;;  %v17036_v53 = vld [vmem:[#allocation53_spill] sm:$0xff]  ;;  %v17037_v41 = vld [vmem:[#allocation32_spill] sm:$0xff] }
 0x647   :  { %17031 = vst [vmem:[#allocation19_spill] sm:$0xff] %v14609_v21  ;;  %v17042_v32 = vld [vmem:[#allocation61_spill] sm:$0xff] }
 0x648   :  { %17032 = vst [vmem:[#allocation20_spill] sm:$0xff] %v14619_v51  ;;  %10664 = vrot.lane.b32.xlu0 %v14375_v36, %s11235_s18 }
 0x64a   :  { %10669 = vrot.lane.b32.xlu1 %v17033_v49, %s11235_s18 }
 0x64c   :  { %10674 = vrot.lane.b32.xlu0 %v17034_v58, %s11235_s18 }
 0x64e   :  { %10679 = vrot.lane.b32.xlu1 %v17035_v63, %s11235_s18  ;;  %v17045_v63 = vld [vmem:[#allocation53_spill] sm:$0xff] }
 0x650   :  { %10684 = vrot.lane.b32.xlu0 %v17036_v53, %s11235_s18  ;;  %v17041_v53 = vld [vmem:[#allocation16_spill] sm:$0xff] }
 0x652   :  { %10689 = vrot.lane.b32.xlu1 %v14457_v17, %s11235_s18 }
 0x654   :  { %10694 = vrot.lane.b32.xlu0 %v14459_v61, %s11235_s18 }
 0x656   :  { %10699 = vrot.lane.b32.xlu1 %v14465_v35, %s11235_s18 }
 0x658   :  { %10704 = vrot.lane.b32.xlu0 %v14507_v25, %s11235_s18 }
 0x65a   :  { %10719 = vrot.lane.b32.xlu1 %v14516_v13, %s11235_s18 }
 0x65c   :  { %10709 = vrot.lane.b32.xlu0 %v14518_v7, %s11235_s18 }
 0x65e   :  { %10724 = vrot.lane.b32.xlu1 %v14524_v37, %s11235_s18 }
 0x660   :  { %10714 = vrot.lane.b32.xlu0 %v14512_v50, %s11236_s19 }
 0x662   :  { %10729 = vrot.lane.b32.xlu1 %v14533_v20, %s11236_s19 }
 0x664   :  { %10734 = vrot.lane.b32.xlu0 %v14536_v30, %s11236_s19 }
 0x666   :  { %10739 = vrot.lane.b32.xlu1 %v14545_v27, %s11236_s19 }
 0x668   :  { %10744 = vrot.lane.b32.xlu0 %v14547_v42, %s11236_s19 }
 0x66a   :  { %10749 = vrot.lane.b32.xlu1 %v14555_v62, %s11236_s19 }
 0x66c   :  { %10754 = vrot.lane.b32.xlu0 %v14563_v31, %s11236_s19 }
 0x66e   :  { %10759 = vrot.lane.b32.xlu1 %v17041_v53, %s11236_s19 }
 0x670   :  { %10764 = vrot.lane.b32.xlu0 %v14581_v19, %s11236_s19 }
 0x672   :  { %10769 = vrot.lane.b32.xlu1 %v14583_v46, %s11236_s19 }
 0x674   :  { %10774 = vrot.lane.b32.xlu0 %v14591_v16, %s11236_s19 }
 0x676   :  { %10779 = vrot.lane.b32.xlu1 %v14599_v44, %s11236_s19 }
 0x678   :  { %10784 = vrot.lane.b32.xlu0 %v14607_v9, %s11236_s19 }
 0x67a   :  { %10794 = vrot.lane.b32.xlu1 %v14609_v21, %s11236_s19 }
 0x67c   :  { %10789 = vrot.lane.b32.xlu0 %v14615_v33, %s11236_s19 }
 0x67e   :  { %10799 = vrot.lane.b32.xlu1 %v14619_v51, %s11236_s19 }
 0x680   :  { %10804 = vrot.lane.b32.xlu0 %v17042_v32, %s11237_s4 }
 0x682   :  { %10809 = vrot.lane.b32.xlu1 %v17043_v22, %s11237_s4 }
 0x684   :  { %10814 = vrot.lane.b32.xlu0 %v14331_v8, %s11237_s4 }
 0x686   :  { %10819 = vrot.lane.b32.xlu1 %v14337_v59, %s11237_s4 }
 0x688   :  { %10824 = vrot.lane.b32.xlu0 %v14375_v36, %s11237_s4 }
 0x68a   :  { %10829 = vrot.lane.b32.xlu1 %v17033_v49, %s11237_s4 }
 0x68c   :  { %10834 = vrot.lane.b32.xlu0 %v17034_v58, %s11237_s4 }
 0x68e   :  { %10839 = vrot.lane.b32.xlu1 %v17044_v15, %s11237_s4 }
 0x690   :  { %10844 = vrot.lane.b32.xlu0 %v17045_v63, %s11237_s4  ;;  %v10565_v0 = vpop.permute.xlu0 %10564 }
 0x691   :  { %v10567_v4 = vunpack.i.h.bf16 %v10565_v0  ;;  %v10566_v1 = vunpack.i.l.bf16 %v10565_v0  ;;  %v10575_v5 = vpop.permute.xlu1 %10574 }
 0x692   :  { %10849 = vrot.lane.b32.xlu1 %v14457_v17, %s11237_s4  ;;  %v10577_v3 = vunpack.i.h.bf16 %v10575_v5  ;;  %v10576_v47 = vunpack.i.l.bf16 %v10575_v5 }
 0x694   :  { %10854 = vrot.lane.b32.xlu0 %v14459_v61, %s11237_s4  ;;  %v10570_v18 = vpop.permute.xlu0 %10569  ;;  %v5049_v26 = vsel %vm1041_vm3, %v10566_v1, %v10576_v47  ;;  %v5050_v39 = vsel %vm1041_vm3, %v10567_v4, %v10577_v3 }
 0x695   :  { %v10572_v38 = vunpack.i.h.bf16 %v10570_v18  ;;  %v10571_v54 = vunpack.i.l.bf16 %v10570_v18  ;;  %v10580_v6 = vpop.permute.xlu1 %10579  ;;  %v9189_v0 = vpack.c.bf16 %v5050_v39, %v5049_v26 }
 0x696   :  { %10859 = vrot.lane.b32.xlu1 %v14465_v35, %s11237_s4  ;;  %v10582_v23 = vunpack.i.h.bf16 %v10580_v6  ;;  %v10581_v60 = vunpack.i.l.bf16 %v10580_v6 }
 0x697   :  { %v5042_v5 = vsel %vm1041_vm3, %v10577_v3, %v10572_v38  ;;  %v5041_v43 = vsel %vm1041_vm3, %v10576_v47, %v10571_v54  ;;  %9190 = vmatprep.subr.bf16.mxu1 %v9189_v0 }
 0x698   :  { %10864 = vrot.lane.b32.xlu0 %v14507_v25, %s11237_s4  ;;  %v5057_v18 = vsel %vm1041_vm3, %v10581_v60, %v10566_v1  ;;  %v5058_v26 = vsel %vm1041_vm3, %v10582_v23, %v10567_v4  ;;  %v5033_v39 = vsel %vm1041_vm3, %v10571_v54, %v10581_v60  ;;  %v5034_v3 = vsel %vm1041_vm3, %v10572_v38, %v10582_v23 }
 0x699   :  { %v10585_v6 = vpop.permute.xlu0 %10584  ;;  %v9191_v12 = vpack.c.bf16 %v5058_v26, %v5057_v18  ;;  %v9205_v48 = vpack.c.bf16 %v5034_v3, %v5033_v39  ;;  %v9207_v1 = vpack.c.bf16 %v5042_v5, %v5041_v43 }
 0x69a   :  { %10879 = vrot.lane.b32.xlu1 %v14516_v13, %s11237_s4  ;;  %v10587_v57 = vunpack.i.h.bf16 %v10585_v6  ;;  %v10586_v10 = vunpack.i.l.bf16 %v10585_v6  ;;  %v10595_v47 = vpop.permute.xlu1 %10594 }
 0x69b   :  { %v10597_v52 = vunpack.i.h.bf16 %v10595_v47  ;;  %v10596_v0 = vunpack.i.l.bf16 %v10595_v47  ;;  %9192 = vmatpush1.bf16.msra.mxu1 %v9191_v12  ;;  %9206 = vmatprep.subr.bf16.mxu0 %v9205_v48 }
 0x69c   :  { %10869 = vrot.lane.b32.xlu0 %v14518_v7, %s11237_s4  ;;  %9208 = vmatpush1.bf16.msra.mxu0 %v9207_v1 }
 0x69d   :  { %v10590_v54 = vpop.permute.xlu0 %10589  ;;  %v5051_v38 = vsel %vm1041_vm3, %v10586_v10, %v10596_v0  ;;  %v5052_v23 = vsel %vm1041_vm3, %v10587_v57, %v10597_v52 }
 0x69e   :  { %10884 = vrot.lane.b32.xlu1 %v14524_v37, %s11237_s4  ;;  %v10592_v60 = vunpack.i.h.bf16 %v10590_v54  ;;  %v10591_v4 = vunpack.i.l.bf16 %v10590_v54  ;;  %v10600_v18 = vpop.permute.xlu1 %10599  ;;  %v9193_v26 = vpack.c.bf16 %v5052_v23, %v5051_v38 }
 0x69f   :  { %v10602_v6 = vunpack.i.h.bf16 %v10600_v18  ;;  %v10601_v39 = vunpack.i.l.bf16 %v10600_v18 }
 0x6a0   :  { %10874 = vrot.lane.b32.xlu0 %v14512_v50, %s11238_s20  ;;  %v5044_v12 = vsel %vm1041_vm3, %v10597_v52, %v10592_v60  ;;  %v5043_v48 = vsel %vm1041_vm3, %v10596_v0, %v10591_v4  ;;  %9194 = vmatprep.subr.bf16.mxu1 %v9193_v26 }
 0x6a1   :  { %v5059_v43 = vsel %vm1041_vm3, %v10601_v39, %v10586_v10  ;;  %v5060_v5 = vsel %vm1041_vm3, %v10602_v6, %v10587_v57  ;;  %v5035_v47 = vsel %vm1041_vm3, %v10591_v4, %v10601_v39  ;;  %v5036_v52 = vsel %vm1041_vm3, %v10592_v60, %v10602_v6 }
 0x6a2   :  { %10889 = vrot.lane.b32.xlu1 %v14533_v20, %s11238_s20  ;;  %v10605_v3 = vpop.permute.xlu0 %10604  ;;  %v9195_v38 = vpack.c.bf16 %v5060_v5, %v5059_v43  ;;  %v9209_v23 = vpack.c.bf16 %v5036_v52, %v5035_v47  ;;  %v9211_v57 = vpack.c.bf16 %v5044_v12, %v5043_v48 }
 0x6a3   :  { %v10607_v1 = vunpack.i.h.bf16 %v10605_v3  ;;  %v10606_v54 = vunpack.i.l.bf16 %v10605_v3  ;;  %v10615_v0 = vpop.permute.xlu1 %10614 }
 0x6a4   :  { %v10617_v18 = vunpack.i.h.bf16 %v10615_v0  ;;  %v10616_v26 = vunpack.i.l.bf16 %v10615_v0  ;;  %10894 = vrot.lane.b32.xlu0 %v14536_v30, %s11238_s20  ;;  %9196 = vmatpush1.bf16.msra.mxu1 %v9195_v38 }
 0x6a5   :  { %9210 = vmatprep.subr.bf16.mxu0 %v9209_v23 }
 0x6a6   :  { %10899 = vrot.lane.b32.xlu1 %v14545_v27, %s11238_s20  ;;  %v10610_v10 = vpop.permute.xlu0 %10609  ;;  %v5053_v60 = vsel %vm1041_vm3, %v10606_v54, %v10616_v26  ;;  %v5054_v4 = vsel %vm1041_vm3, %v10607_v1, %v10617_v18  ;;  %9212 = vmatpush1.bf16.msra.mxu0 %v9211_v57 }
 0x6a7   :  { %v10612_v6 = vunpack.i.h.bf16 %v10610_v10  ;;  %v10611_v39 = vunpack.i.l.bf16 %v10610_v10  ;;  %v10620_v43 = vpop.permute.xlu1 %10619  ;;  %v9197_v5 = vpack.c.bf16 %v5054_v4, %v5053_v60 }
 0x6a8   :  { %v10622_v3 = vunpack.i.h.bf16 %v10620_v43  ;;  %v10621_v47 = vunpack.i.l.bf16 %v10620_v43  ;;  %10904 = vrot.lane.b32.xlu0 %v14547_v42, %s11238_s20 }
 0x6a9   :  { %v5046_v12 = vsel %vm1041_vm3, %v10617_v18, %v10612_v6  ;;  %v5045_v48 = vsel %vm1041_vm3, %v10616_v26, %v10611_v39  ;;  %9198 = vmatprep.subr.bf16.mxu1 %v9197_v5 }
 0x6aa   :  { %10909 = vrot.lane.b32.xlu1 %v14555_v62, %s11238_s20  ;;  %v5061_v52 = vsel %vm1041_vm3, %v10621_v47, %v10606_v54  ;;  %v5062_v0 = vsel %vm1041_vm3, %v10622_v3, %v10607_v1  ;;  %v10625_v38 = vpop.permute.xlu0 %10624  ;;  %v5037_v23 = vsel %vm1041_vm3, %v10611_v39, %v10621_v47  ;;  %v5038_v18 = vsel %vm1041_vm3, %v10612_v6, %v10622_v3 }
 0x6ab   :  { %v10627_v57 = vunpack.i.h.bf16 %v10625_v38  ;;  %v10626_v10 = vunpack.i.l.bf16 %v10625_v38  ;;  %v9199_v60 = vpack.c.bf16 %v5062_v0, %v5061_v52  ;;  %v9213_v4 = vpack.c.bf16 %v5038_v18, %v5037_v23 }
 0x6ac   :  { %v10640_v26 = vpop.permute.xlu1 %10639  ;;  %10914 = vrot.lane.b32.xlu0 %v14563_v31, %s11238_s20  ;;  %v9215_v1 = vpack.c.bf16 %v5046_v12, %v5045_v48 }
 0x6ad   :  { %v10642_v43 = vunpack.i.h.bf16 %v10640_v26  ;;  %v10641_v5 = vunpack.i.l.bf16 %v10640_v26  ;;  %9200 = vmatpush1.bf16.msra.mxu1 %v9199_v60  ;;  %9214 = vmatprep.subr.bf16.mxu0 %v9213_v4 }
 0x6ae   :  { %10919 = vrot.lane.b32.xlu1 %v17041_v53, %s11238_s20  ;;  %v10630_v54 = vpop.permute.xlu0 %10629  ;;  %9216 = vmatpush1.bf16.msra.mxu0 %v9215_v1 }
 0x6af   :  { %v5055_v6 = vsel %vm1041_vm3, %v10626_v10, %v10641_v5  ;;  %v5056_v39 = vsel %vm1041_vm3, %v10627_v57, %v10642_v43  ;;  %v10632_v3 = vunpack.i.h.bf16 %v10630_v54  ;;  %v10631_v47 = vunpack.i.l.bf16 %v10630_v54 }
 0x6b0   :  { %v10645_v52 = vpop.permute.xlu1 %10644  ;;  %v9201_v0 = vpack.c.bf16 %v5056_v39, %v5055_v6  ;;  %10924 = vrot.lane.b32.xlu0 %v14581_v19, %s11238_s20 }
 0x6b1   :  { %v10647_v38 = vunpack.i.h.bf16 %v10645_v52  ;;  %v10646_v23 = vunpack.i.l.bf16 %v10645_v52  ;;  %v5048_v12 = vsel %vm1041_vm3, %v10642_v43, %v10632_v3  ;;  %v5047_v48 = vsel %vm1041_vm3, %v10641_v5, %v10631_v47 }
 0x6b2   :  { %10929 = vrot.lane.b32.xlu1 %v14583_v46, %s11238_s20  ;;  %9202 = vmatprep.subr.bf16.mxu1 %v9201_v0  ;;  %v10635_v60 = vpop.permute.xlu0 %10634 }
 0x6b3   :  { %v5063_v18 = vsel %vm1041_vm3, %v10646_v23, %v10626_v10  ;;  %v5064_v26 = vsel %vm1041_vm3, %v10647_v38, %v10627_v57  ;;  %v5039_v4 = vsel %vm1041_vm3, %v10631_v47, %v10646_v23  ;;  %v5040_v43 = vsel %vm1041_vm3, %v10632_v3, %v10647_v38  ;;  %v5065_v10 = vld [vmem:[%s16663_s7 + $0x280] sm:$0xff] }
 0x6b4   :  { %v10637_v1 = vunpack.i.h.bf16 %v10635_v60  ;;  %v10636_v54 = vunpack.i.l.bf16 %v10635_v60  ;;  %v10650_v5 = vpop.permute.xlu1 %10649  ;;  %v9203_v6 = vpack.c.bf16 %v5064_v26, %v5063_v18  ;;  %v9217_v39 = vpack.c.bf16 %v5040_v43, %v5039_v4  ;;  %10934 = vrot.lane.b32.xlu0 %v14591_v16, %s11238_s20 }
 0x6b5   :  { %v10652_v52 = vunpack.i.h.bf16 %v10650_v5  ;;  %v10651_v0 = vunpack.i.l.bf16 %v10650_v5  ;;  %v9219_v57 = vpack.c.bf16 %v5048_v12, %v5047_v48  ;;  %v5066_v5 = vld [vmem:[%s16663_s7 + $0x288] sm:$0xff] }
 0x6b6   :  { %10939 = vrot.lane.b32.xlu1 %v14599_v44, %s11238_s20  ;;  %9204 = vmatpush1.bf16.msra.mxu1 %v9203_v6  ;;  %v10655_v3 = vpop.permute.xlu0 %10654 }
 0x6b7   :  { %9218 = vmatprep.subr.bf16.mxu0 %v9217_v39  ;;  %v4945_v47 = vsel %vm936_vm4, %v10636_v54, %v10651_v0  ;;  %v4946_v38 = vsel %vm936_vm4, %v10637_v1, %v10652_v52  ;;  %v10657_v23 = vunpack.i.h.bf16 %v10655_v3  ;;  %v10656_v18 = vunpack.i.l.bf16 %v10655_v3 }
 0x6b8   :  { %9220 = vmatpush1.bf16.msra.mxu0 %v9219_v57  ;;  %v10660_v26 = vpop.permute.xlu1 %10659  ;;  %v9221_v60 = vpack.c.bf16 %v4946_v38, %v4945_v47  ;;  %10944 = vrot.lane.b32.xlu0 %v14607_v9, %s11238_s20  ;;  %v17047_v57 = vmov 0.0  }
 0x6b9   :  { %v10662_v4 = vunpack.i.h.bf16 %v10660_v26  ;;  %v10661_v43 = vunpack.i.l.bf16 %v10660_v26  ;;  %8652 = vmatmul.mubr.msk.f32.vlgmr.msra.gmra.mrb[82].mxu1 %vm1082_vm5, %v5065_v10  ;;  %v4938_v12 = vsel %vm936_vm4, %v10652_v52, %v10657_v23  ;;  %v4937_v48 = vsel %vm936_vm4, %v10651_v0, %v10656_v18 }
 0x6ba   :  { %10959 = vrot.lane.b32.xlu1 %v14609_v21, %s11238_s20  ;;  %9222 = vmatprep.subr.bf16.mxu1 %v9221_v60  ;;  %v10665_v52 = vpop.permute.xlu0 %10664 }
 0x6bb   :  { %v4953_v6 = vsel %vm936_vm4, %v10661_v43, %v10636_v54  ;;  %v4954_v39 = vsel %vm936_vm4, %v10662_v4, %v10637_v1  ;;  %8660 = vmatmul.mubr.msk.f32.vlgmr.msra.gmra.mrb[84].mxu0 %vm1082_vm5, %v5065_v10  ;;  %5167 = vmatprep.mubr.f32.mxu1 %v17047_v57  ;;  %v4929_v0 = vsel %vm936_vm4, %v10656_v18, %v10661_v43  ;;  %v10667_v3 = vunpack.i.h.bf16 %v10665_v52  ;;  %v5067_v18 = vld [vmem:[%s16663_s7 + $0x290] sm:$0xff] }
 0x6bc   :  { %v10666_v47 = vunpack.i.l.bf16 %v10665_v52  ;;  %v10670_v38 = vpop.permute.xlu1 %10669  ;;  %5280 = vmatprep.mubr.f32.mxu0 %v17047_v57  ;;  %v9223_v26 = vpack.c.bf16 %v4954_v39, %v4953_v6  ;;  %v4930_v54 = vsel %vm936_vm4, %v10657_v23, %v10662_v4  ;;  %10949 = vrot.lane.b32.xlu0 %v14615_v33, %s11238_s20  ;;  %v9239_v10 = vpack.c.bf16 %v4938_v12, %v4937_v48 }
 0x6bd   :  { %v10672_v60 = vunpack.i.h.bf16 %v10670_v38  ;;  %v10671_v21 = vunpack.i.l.bf16 %v10670_v38  ;;  %8653 = vmatmul.mubr.msk.f32.gmra.mrb[84].mxu1 %vm1082_vm5, %v5066_v5  ;;  %v9237_v1 = vpack.c.bf16 %v4930_v54, %v4929_v0  ;;  %v17049_v54 = vld [vmem:[#allocation48_spill] sm:$0xff] }
 0x6be   :  { %10964 = vrot.lane.b32.xlu1 %v14619_v51, %s11238_s20  ;;  %9224 = vmatpush1.bf16.msra.mxu1 %v9223_v26  ;;  %v10675_v23 = vpop.permute.xlu0 %10674  ;;  %v17048_v26 = vld [vmem:[#allocation35_spill] sm:$0xff] }
 0x6bf   :  { %8661 = vmatmul.mubr.msk.f32.gmra.mrb[86].mxu0 %vm1082_vm5, %v5066_v5  ;;  %9238 = vmatprep.subr.bf16.mxu0 %v9237_v1  ;;  %v4947_v4 = vsel %vm936_vm4, %v10666_v47, %v10671_v21  ;;  %v4948_v43 = vsel %vm936_vm4, %v10667_v3, %v10672_v60  ;;  %v10677_v6 = vunpack.i.h.bf16 %v10675_v23  ;;  %v10676_v39 = vunpack.i.l.bf16 %v10675_v23  ;;  %v5068_v1 = vld [vmem:[%s16663_s7 + $0x298] sm:$0xff] }
 0x6c0   :  { %9240 = vmatpush1.bf16.msra.mxu0 %v9239_v10  ;;  %v10680_v52 = vpop.permute.xlu1 %10679  ;;  %5173 = vmatprep.mubr.f32.mxu1 %v17047_v57  ;;  %v9225_v12 = vpack.c.bf16 %v4948_v43, %v4947_v4 }
 0x6c1   :  { %v10682_v48 = vunpack.i.h.bf16 %v10680_v52  ;;  %v10681_v0 = vunpack.i.l.bf16 %v10680_v52  ;;  %8654 = vmatmul.mubr.msk.f32.gmra.mrb[86].mxu1 %vm1082_vm5, %v5067_v18  ;;  %5286 = vmatprep.mubr.f32.mxu0 %v17047_v57  ;;  %v4940_v5 = vsel %vm936_vm4, %v10672_v60, %v10677_v6  ;;  %v4939_v38 = vsel %vm936_vm4, %v10671_v21, %v10676_v39 }
 0x6c2   :  { %10954 = vrot.lane.b32.xlu0 %v17048_v26, %s11239_s27  ;;  %10969 = vrot.lane.b32.xlu1 %v17049_v54, %s11239_s27  ;;  %v10685_v21 = vpop.permute.xlu0 %10684 }
 0x6c3   :  { %v4955_v10 = vsel %vm936_vm4, %v10681_v0, %v10666_v47  ;;  %v4956_v23 = vsel %vm936_vm4, %v10682_v48, %v10667_v3  ;;  %8662 = vmatmul.mubr.msk.f32.gmra.mrb[88].mxu0 %vm1082_vm5, %v5067_v18  ;;  %9226 = vmatprep.subr.bf16.mxu1 %v9225_v12  ;;  %v4931_v60 = vsel %vm936_vm4, %v10676_v39, %v10681_v0  ;;  %v10687_v4 = vunpack.i.h.bf16 %v10685_v21  ;;  %v17050_v12 = vld [vmem:[#allocation50_spill] sm:$0xff]  ;;  %v17051_v39 = vld [vmem:[#allocation51_spill] sm:$0xff] }
 0x6c4   :  { %v10686_v43 = vunpack.i.l.bf16 %v10685_v21  ;;  %v10690_v52 = vpop.permute.xlu1 %10689  ;;  %5179 = vmatprep.mubr.f32.mxu1 %v17047_v57  ;;  %5292 = vmatprep.mubr.f32.mxu0 %v17047_v57  ;;  %v9227_v26 = vpack.c.bf16 %v4956_v23, %v4955_v10  ;;  %v4932_v47 = vsel %vm936_vm4, %v10677_v6, %v10682_v48  ;;  %v5069_v0 = vld [vmem:[%s16663_s7 + $0x2a0] sm:$0xff]  ;;  %v9243_v6 = vpack.c.bf16 %v4940_v5, %v4939_v38 }
 0x6c5   :  { %v10692_v54 = vunpack.i.h.bf16 %v10690_v52  ;;  %v10691_v3 = vunpack.i.l.bf16 %v10690_v52  ;;  %8655 = vmatmul.mubr.msk.f32.gmra.mrb[88].mxu1 %vm1082_vm5, %v5068_v1  ;;  %v9241_v18 = vpack.c.bf16 %v4932_v47, %v4931_v60 }
 0x6c6   :  { %10974 = vrot.lane.b32.xlu0 %v17050_v12, %s11239_s27  ;;  %10979 = vrot.lane.b32.xlu1 %v17051_v39, %s11239_s27  ;;  %v10695_v10 = vpop.permute.xlu0 %10694 }
 0x6c7   :  { %8663 = vmatmul.mubr.msk.f32.gmra.mrb[90].mxu0 %vm1082_vm5, %v5068_v1  ;;  %9228 = vmatpush1.bf16.msra.mxu1 %v9227_v26  ;;  %v4949_v48 = vsel %vm936_vm4, %v10686_v43, %v10691_v3  ;;  %v4950_v23 = vsel %vm936_vm4, %v10687_v4, %v10692_v54  ;;  %v10697_v21 = vunpack.i.h.bf16 %v10695_v10  ;;  %v10696_v60 = vunpack.i.l.bf16 %v10695_v10  ;;  %v17052_v1 = vld [vmem:[#allocation18_spill] sm:$0xff]  ;;  %v5070_v26 = vld [vmem:[%s16663_s7 + $0x2a8] sm:$0xff] }
 0x6c8   :  { %9242 = vmatprep.subr.bf16.mxu0 %v9241_v18  ;;  %v10700_v52 = vpop.permute.xlu1 %10699  ;;  %5185 = vmatprep.mubr.f32.mxu1 %v17047_v57  ;;  %v9229_v47 = vpack.c.bf16 %v4950_v23, %v4949_v48 }
 0x6c9   :  { %9244 = vmatpush1.bf16.msra.mxu0 %v9243_v6  ;;  %v10702_v12 = vunpack.i.h.bf16 %v10700_v52  ;;  %v10701_v39 = vunpack.i.l.bf16 %v10700_v52  ;;  %8656 = vmatmul.mubr.msk.f32.gmra.mrb[90].mxu1 %vm1082_vm5, %v5069_v0  ;;  %v4942_v5 = vsel %vm936_vm4, %v10692_v54, %v10697_v21  ;;  %v4941_v38 = vsel %vm936_vm4, %v10691_v3, %v10696_v60  ;;  %v17053_v54 = vld [vmem:[#allocation27_spill] sm:$0xff] }
 0x6ca   :  { %5298 = vmatprep.mubr.f32.mxu0 %v17047_v57  ;;  %10984 = vrot.lane.b32.xlu0 %v17052_v1, %s11239_s27  ;;  %v10705_v3 = vpop.permute.xlu0 %10704 }
 0x6cb   :  { %v4957_v18 = vsel %vm936_vm4, %v10701_v39, %v10686_v43  ;;  %v4958_v10 = vsel %vm936_vm4, %v10702_v12, %v10687_v4  ;;  %10989 = vrot.lane.b32.xlu1 %v17053_v54, %s11239_s27  ;;  %8664 = vmatmul.mubr.msk.f32.gmra.mrb[92].mxu0 %vm1082_vm5, %v5069_v0  ;;  %v4933_v6 = vsel %vm936_vm4, %v10696_v60, %v10701_v39  ;;  %v10707_v48 = vunpack.i.h.bf16 %v10705_v3  ;;  %v17054_v54 = vld [vmem:[#allocation25_spill] sm:$0xff] }
 0x6cc   :  { %9230 = vmatprep.subr.bf16.mxu1 %v9229_v47  ;;  %v10706_v23 = vunpack.i.l.bf16 %v10705_v3  ;;  %v10720_v52 = vpop.permute.xlu1 %10719  ;;  %5191 = vmatprep.mubr.f32.mxu1 %v17047_v57  ;;  %v9231_v1 = vpack.c.bf16 %v4958_v10, %v4957_v18  ;;  %v4934_v43 = vsel %vm936_vm4, %v10697_v21, %v10702_v12  ;;  %v5071_v60 = vld [vmem:[%s16663_s7 + $0x2b0] sm:$0xff]  ;;  %v17055_v47 = vld [vmem:[#allocation26_spill] sm:$0xff]  ;;  %v9247_v12 = vpack.c.bf16 %v4942_v5, %v4941_v38 }
 0x6cd   :  { %v10722_v4 = vunpack.i.h.bf16 %v10720_v52  ;;  %v10721_v51 = vunpack.i.l.bf16 %v10720_v52  ;;  %8657 = vmatmul.mubr.msk.f32.gmra.mrb[92].mxu1 %vm1082_vm5, %v5070_v26  ;;  %5304 = vmatprep.mubr.f32.mxu0 %v17047_v57  ;;  %v9245_v0 = vpack.c.bf16 %v4934_v43, %v4933_v6 }
 0x6ce   :  { %10994 = vrot.lane.b32.xlu0 %v17054_v54, %s11239_s27  ;;  %9232 = vmatpush1.bf16.msra.mxu1 %v9231_v1  ;;  %v10710_v21 = vpop.permute.xlu0 %10709 }
 0x6cf   :  { %10999 = vrot.lane.b32.xlu1 %v17055_v47, %s11239_s27  ;;  %8665 = vmatmul.mubr.msk.f32.gmra.mrb[94].mxu0 %vm1082_vm5, %v5070_v26  ;;  %v4951_v39 = vsel %vm936_vm4, %v10706_v23, %v10721_v51  ;;  %v4952_v18 = vsel %vm936_vm4, %v10707_v48, %v10722_v4  ;;  %v10712_v10 = vunpack.i.h.bf16 %v10710_v21  ;;  %v10711_v3 = vunpack.i.l.bf16 %v10710_v21  ;;  %v17056_v26 = vld [vmem:[#allocation60_spill] sm:$0xff] }
 0x6d0   :  { %9246 = vmatprep.subr.bf16.mxu0 %v9245_v0  ;;  %v10725_v6 = vpop.permute.xlu1 %10724  ;;  %5197 = vmatprep.mubr.f32.mxu1 %v17047_v57  ;;  %v9233_v52 = vpack.c.bf16 %v4952_v18, %v4951_v39  ;;  %v5072_v0 = vld [vmem:[%s16663_s7 + $0x2b8] sm:$0xff] }
 0x6d1   :  { %9248 = vmatpush1.bf16.msra.mxu0 %v9247_v12  ;;  %v10727_v1 = vunpack.i.h.bf16 %v10725_v6  ;;  %v10726_v43 = vunpack.i.l.bf16 %v10725_v6  ;;  %8658 = vmatmul.mubr.msk.f32.gmra.mrb[94].mxu1 %vm1082_vm5, %v5071_v60  ;;  %v4944_v5 = vsel %vm936_vm4, %v10722_v4, %v10712_v10  ;;  %v4943_v38 = vsel %vm936_vm4, %v10721_v51, %v10711_v3  ;;  %v17057_v4 = vld [vmem:[#allocation55_spill] sm:$0xff] }
 0x6d2   :  { %5310 = vmatprep.mubr.f32.mxu0 %v17047_v57  ;;  %11004 = vrot.lane.b32.xlu0 %v17056_v26, %s11239_s27  ;;  %v10715_v51 = vpop.permute.xlu0 %10714 }
 0x6d3   :  { %v4959_v54 = vsel %vm936_vm4, %v10726_v43, %v10706_v23  ;;  %v4960_v47 = vsel %vm936_vm4, %v10727_v1, %v10707_v48  ;;  %11009 = vrot.lane.b32.xlu1 %v17057_v4, %s11239_s27  ;;  %8666 = vmatmul.mubr.msk.f32.gmra.mrb[96].mxu0 %vm1082_vm5, %v5071_v60  ;;  %v4935_v21 = vsel %vm936_vm4, %v10711_v3, %v10726_v43  ;;  %v10717_v12 = vunpack.i.h.bf16 %v10715_v51  ;;  %v17058_v4 = vld [vmem:[#allocation57_spill] sm:$0xff]  ;;  %v17059_v3 = vld [vmem:[#allocation58_spill] sm:$0xff] }
 0x6d4   :  { %9234 = vmatprep.subr.bf16.mxu1 %v9233_v52  ;;  %v10716_v39 = vunpack.i.l.bf16 %v10715_v51  ;;  %v10730_v18 = vpop.permute.xlu1 %10729  ;;  %5203 = vmatprep.mubr.f32.mxu1 %v17047_v57  ;;  %v9235_v6 = vpack.c.bf16 %v4960_v47, %v4959_v54  ;;  %v4936_v23 = vsel %vm936_vm4, %v10712_v10, %v10727_v1  ;;  %v9251_v43 = vpack.c.bf16 %v4944_v5, %v4943_v38  ;;  %v4961_v10 = vld [vmem:[%s16663_s7 + $0x240] sm:$0xff] }
 0x6d5   :  { %v10732_v48 = vunpack.i.h.bf16 %v10730_v18  ;;  %v10731_v26 = vunpack.i.l.bf16 %v10730_v18  ;;  %8659 = vmatmul.mubr.msk.f32.gmra.mrb[96].mxu1 %vm1082_vm5, %v5072_v0  ;;  %5316 = vmatprep.mubr.f32.mxu0 %v17047_v57  ;;  %v9249_v60 = vpack.c.bf16 %v4936_v23, %v4935_v21  ;;  %v17060_v23 = vld [vmem:[#allocation15_spill] sm:$0xff] }
 0x6d6   :  { %11014 = vrot.lane.b32.xlu0 %v17058_v4, %s11239_s27  ;;  %9236 = vmatpush1.bf16.msra.mxu1 %v9235_v6  ;;  %v10735_v52 = vpop.permute.xlu0 %10734 }
 0x6d7   :  { %11019 = vrot.lane.b32.xlu1 %v17059_v3, %s11239_s27  ;;  %8667 = vmatmul.mubr.msk.f32.gmra.mrb[98].mxu0 %vm1082_vm5, %v5072_v0  ;;  %v5653_v1 = vsel %vm1647_vm6, %v10716_v39, %v10731_v26  ;;  %v5654_v54 = vsel %vm1647_vm6, %v10717_v12, %v10732_v48  ;;  %v10737_v47 = vunpack.i.h.bf16 %v10735_v52  ;;  %v10736_v51 = vunpack.i.l.bf16 %v10735_v52  ;;  %v17061_v3 = vld [vmem:[#allocation11_spill] sm:$0xff] }
 0x6d8   :  { %9250 = vmatprep.subr.bf16.mxu0 %v9249_v60  ;;  %v10740_v21 = vpop.permute.xlu1 %10739  ;;  %5411 = vmatprep.mubr.f32.mxu1 %v17047_v57  ;;  %v9253_v18 = vpack.c.bf16 %v5654_v54, %v5653_v1 }
 0x6d9   :  { %9252 = vmatpush1.bf16.msra.mxu0 %v9251_v43  ;;  %v10742_v0 = vunpack.i.h.bf16 %v10740_v21  ;;  %v10741_v5 = vunpack.i.l.bf16 %v10740_v21  ;;  %5524 = vmatprep.mubr.f32.mxu0 %v17047_v57  ;;  %v5646_v38 = vsel %vm1647_vm6, %v10732_v48, %v10737_v47  ;;  %v5645_v6 = vsel %vm1647_vm6, %v10731_v26, %v10736_v51  ;;  %v4962_v48 = vld [vmem:[%s16663_s7 + $0x248] sm:$0xff] }
 0x6da   :  { %11024 = vrot.lane.b32.xlu0 %v17060_v23, %s11239_s27  ;;  %8668 = vmatmul.mubr.msk.f32.vlgmr.msra.gmra.mrb[82].mxu1 %vm1082_vm5, %v4961_v10  ;;  %v10745_v52 = vpop.permute.xlu0 %10744 }
 0x6db   :  { %v5661_v60 = vsel %vm1647_vm6, %v10741_v5, %v10716_v39  ;;  %v5662_v4 = vsel %vm1647_vm6, %v10742_v0, %v10717_v12  ;;  %11029 = vrot.lane.b32.xlu1 %v17061_v3, %s11239_s27  ;;  %9254 = vmatprep.subr.bf16.mxu1 %v9253_v18  ;;  %v5637_v26 = vsel %vm1647_vm6, %v10736_v51, %v10741_v5  ;;  %v10747_v43 = vunpack.i.h.bf16 %v10745_v52  ;;  %v17062_v3 = vld [vmem:[#allocation10_spill] sm:$0xff] }
 0x6dc   :  { %8676 = vmatmul.mubr.msk.f32.vlgmr.msra.gmra.mrb[84].mxu0 %vm1082_vm5, %v4961_v10  ;;  %v10746_v1 = vunpack.i.l.bf16 %v10745_v52  ;;  %v10750_v39 = vpop.permute.xlu1 %10749  ;;  %5417 = vmatprep.mubr.f32.mxu1 %v17047_v57  ;;  %v9255_v12 = vpack.c.bf16 %v5662_v4, %v5661_v60  ;;  %v5638_v54 = vsel %vm1647_vm6, %v10737_v47, %v10742_v0  ;;  %v17063_v10 = vld [vmem:[#allocation12_spill] sm:$0xff]  ;;  %v9271_v5 = vpack.c.bf16 %v5646_v38, %v5645_v6  ;;  %v4963_v47 = vld [vmem:[%s16663_s7 + $0x250] sm:$0xff] }
 0x6dd   :  { %v10752_v21 = vunpack.i.h.bf16 %v10750_v39  ;;  %v10751_v18 = vunpack.i.l.bf16 %v10750_v39  ;;  %5530 = vmatprep.mubr.f32.mxu0 %v17047_v57  ;;  %v9269_v23 = vpack.c.bf16 %v5638_v54, %v5637_v26 }
 0x6de   :  { %11034 = vrot.lane.b32.xlu0 %v17062_v3, %s11239_s27  ;;  %8669 = vmatmul.mubr.msk.f32.gmra.mrb[84].mxu1 %vm1082_vm5, %v4962_v48  ;;  %v10755_v51 = vpop.permute.xlu0 %10754 }
 0x6df   :  { %11039 = vrot.lane.b32.xlu1 %v17063_v10, %s11239_s27  ;;  %9256 = vmatpush1.bf16.msra.mxu1 %v9255_v12  ;;  %v5655_v0 = vsel %vm1647_vm6, %v10746_v1, %v10751_v18  ;;  %v5656_v60 = vsel %vm1647_vm6, %v10747_v43, %v10752_v21  ;;  %v10757_v4 = vunpack.i.h.bf16 %v10755_v51  ;;  %v10756_v52 = vunpack.i.l.bf16 %v10755_v51 }
 0x6e0   :  { %8677 = vmatmul.mubr.msk.f32.gmra.mrb[86].mxu0 %vm1082_vm5, %v4962_v48  ;;  %9270 = vmatprep.subr.bf16.mxu0 %v9269_v23  ;;  %v10760_v26 = vpop.permute.xlu1 %10759  ;;  %v9257_v39 = vpack.c.bf16 %v5656_v60, %v5655_v0 }
 0x6e1   :  { %9272 = vmatpush1.bf16.msra.mxu0 %v9271_v5  ;;  %v10762_v12 = vunpack.i.h.bf16 %v10760_v26  ;;  %v10761_v38 = vunpack.i.l.bf16 %v10760_v26  ;;  %5423 = vmatprep.mubr.f32.mxu1 %v17047_v57  ;;  %v5648_v6 = vsel %vm1647_vm6, %v10752_v21, %v10757_v4  ;;  %v5647_v54 = vsel %vm1647_vm6, %v10751_v18, %v10756_v52  ;;  %v4964_v18 = vld [vmem:[%s16663_s7 + $0x258] sm:$0xff] }
 0x6e2   :  { %11044 = vrot.lane.b32.xlu0 %v17042_v32, %s11240_s25  ;;  %8670 = vmatmul.mubr.msk.f32.gmra.mrb[86].mxu1 %vm1082_vm5, %v4963_v47  ;;  %v10765_v21 = vpop.permute.xlu0 %10764  ;;  %v9275_v60 = vpack.c.bf16 %v5648_v6, %v5647_v54 }
 0x6e3   :  { %v5663_v48 = vsel %vm1647_vm6, %v10761_v38, %v10746_v1  ;;  %v5664_v23 = vsel %vm1647_vm6, %v10762_v12, %v10747_v43  ;;  %5536 = vmatprep.mubr.f32.mxu0 %v17047_v57  ;;  %11049 = vrot.lane.b32.xlu1 %v17043_v22, %s11240_s25  ;;  %v5639_v32 = vsel %vm1647_vm6, %v10756_v52, %v10761_v38  ;;  %v10767_v1 = vunpack.i.h.bf16 %v10765_v21 }
 0x6e4   :  { %v9259_v3 = vpack.c.bf16 %v5664_v23, %v5663_v48  ;;  %8678 = vmatmul.mubr.msk.f32.gmra.mrb[88].mxu0 %vm1082_vm5, %v4963_v47  ;;  %9258 = vmatprep.subr.bf16.mxu1 %v9257_v39  ;;  %v10766_v10 = vunpack.i.l.bf16 %v10765_v21  ;;  %v10770_v43 = vpop.permute.xlu1 %10769  ;;  %v5640_v51 = vsel %vm1647_vm6, %v10757_v4, %v10762_v12  ;;  %v4965_v4 = vld [vmem:[%s16663_s7 + $0x260] sm:$0xff] }
 0x6e5   :  { %v10772_v5 = vunpack.i.h.bf16 %v10770_v43  ;;  %v10771_v22 = vunpack.i.l.bf16 %v10770_v43  ;;  %5429 = vmatprep.mubr.f32.mxu1 %v17047_v57  ;;  %5542 = vmatprep.mubr.f32.mxu0 %v17047_v57  ;;  %v9273_v0 = vpack.c.bf16 %v5640_v51, %v5639_v32 }
 0x6e6   :  { %11054 = vrot.lane.b32.xlu0 %v14331_v8, %s11240_s25  ;;  %8671 = vmatmul.mubr.msk.f32.gmra.mrb[88].mxu1 %vm1082_vm5, %v4964_v18  ;;  %v10775_v47 = vpop.permute.xlu0 %10774 }
 0x6e7   :  { %11059 = vrot.lane.b32.xlu1 %v14337_v59, %s11240_s25  ;;  %9260 = vmatpush1.bf16.msra.mxu1 %v9259_v3  ;;  %v5657_v52 = vsel %vm1647_vm6, %v10766_v10, %v10771_v22  ;;  %v5658_v26 = vsel %vm1647_vm6, %v10767_v1, %v10772_v5  ;;  %v10777_v8 = vunpack.i.h.bf16 %v10775_v47  ;;  %v10776_v39 = vunpack.i.l.bf16 %v10775_v47 }
 0x6e8   :  { %8679 = vmatmul.mubr.msk.f32.gmra.mrb[90].mxu0 %vm1082_vm5, %v4964_v18  ;;  %9274 = vmatprep.subr.bf16.mxu0 %v9273_v0  ;;  %v10780_v12 = vpop.permute.xlu1 %10779  ;;  %v9261_v59 = vpack.c.bf16 %v5658_v26, %v5657_v52 }
 0x6e9   :  { %9276 = vmatpush1.bf16.msra.mxu0 %v9275_v60  ;;  %v10782_v38 = vunpack.i.h.bf16 %v10780_v12  ;;  %v10781_v6 = vunpack.i.l.bf16 %v10780_v12  ;;  %5435 = vmatprep.mubr.f32.mxu1 %v17047_v57  ;;  %v5650_v54 = vsel %vm1647_vm6, %v10772_v5, %v10777_v8  ;;  %v5649_v48 = vsel %vm1647_vm6, %v10771_v22, %v10776_v39  ;;  %v4967_v60 = vld [vmem:[%s16663_s7 + $0x270] sm:$0xff] }
 0x6ea   :  { %11064 = vrot.lane.b32.xlu0 %v14375_v36, %s11240_s25  ;;  %8672 = vmatmul.mubr.msk.f32.gmra.mrb[90].mxu1 %vm1082_vm5, %v4965_v4  ;;  %v10785_v18 = vpop.permute.xlu0 %10784  ;;  %v4966_v36 = vld [vmem:[%s16663_s7 + $0x268] sm:$0xff]  ;;  %v9279_v0 = vpack.c.bf16 %v5650_v54, %v5649_v48 }
 0x6eb   :  { %v5665_v23 = vsel %vm1647_vm6, %v10781_v6, %v10766_v10  ;;  %v5666_v21 = vsel %vm1647_vm6, %v10782_v38, %v10767_v1  ;;  %5548 = vmatprep.mubr.f32.mxu0 %v17047_v57  ;;  %11069 = vrot.lane.b32.xlu1 %v17033_v49, %s11240_s25  ;;  %v10787_v3 = vunpack.i.h.bf16 %v10785_v18  ;;  %v10786_v43 = vunpack.i.l.bf16 %v10785_v18 }
 0x6ec   :  { %v9263_v32 = vpack.c.bf16 %v5666_v21, %v5665_v23  ;;  %8680 = vmatmul.mubr.msk.f32.gmra.mrb[92].mxu0 %vm1082_vm5, %v4965_v4  ;;  %9262 = vmatprep.subr.bf16.mxu1 %v9261_v59  ;;  %v10795_v10 = vpop.permute.xlu1 %10794  ;;  %v5641_v1 = vsel %vm1647_vm6, %v10776_v39, %v10781_v6  ;;  %v5642_v49 = vsel %vm1647_vm6, %v10777_v8, %v10782_v38 }
 0x6ed   :  { %v10797_v51 = vunpack.i.h.bf16 %v10795_v10  ;;  %v10796_v5 = vunpack.i.l.bf16 %v10795_v10  ;;  %5441 = vmatprep.mubr.f32.mxu1 %v17047_v57  ;;  %5554 = vmatprep.mubr.f32.mxu0 %v17047_v57  ;;  %v9277_v22 = vpack.c.bf16 %v5642_v49, %v5641_v1  ;;  %v5669_v10 = vld [vmem:[%s16663_s7 + $0x2c0] sm:$0xff] }
 0x6ee   :  { %11074 = vrot.lane.b32.xlu0 %v17034_v58, %s11240_s25  ;;  %8673 = vmatmul.mubr.msk.f32.gmra.mrb[92].mxu1 %vm1082_vm5, %v4966_v36  ;;  %v10790_v47 = vpop.permute.xlu0 %10789 }
 0x6ef   :  { %11079 = vrot.lane.b32.xlu1 %v17044_v15, %s11240_s25  ;;  %9264 = vmatpush1.bf16.msra.mxu1 %v9263_v32  ;;  %v5659_v4 = vsel %vm1647_vm6, %v10786_v43, %v10796_v5  ;;  %v5660_v52 = vsel %vm1647_vm6, %v10787_v3, %v10797_v51  ;;  %v10792_v58 = vunpack.i.h.bf16 %v10790_v47  ;;  %v10791_v26 = vunpack.i.l.bf16 %v10790_v47 }
 0x6f0   :  { %8681 = vmatmul.mubr.msk.f32.gmra.mrb[94].mxu0 %vm1082_vm5, %v4966_v36  ;;  %9278 = vmatprep.subr.bf16.mxu0 %v9277_v22  ;;  %v10800_v8 = vpop.permute.xlu1 %10799  ;;  %v9265_v39 = vpack.c.bf16 %v5660_v52, %v5659_v4  ;;  %v17077_v22 = vld [vmem:[#allocation64_spill] sm:$0xff] }
 0x6f1   :  { %9280 = vmatpush1.bf16.msra.mxu0 %v9279_v0  ;;  %v10802_v15 = vunpack.i.h.bf16 %v10800_v8  ;;  %v10801_v12 = vunpack.i.l.bf16 %v10800_v8  ;;  %5447 = vmatprep.mubr.f32.mxu1 %v17047_v57  ;;  %v5652_v59 = vsel %vm1647_vm6, %v10797_v51, %v10792_v58  ;;  %v5651_v48 = vsel %vm1647_vm6, %v10796_v5, %v10791_v26  ;;  %v17069_v5 = vld [vmem:[#allocation34_spill] sm:$0xff]  ;;  %v17078_v0 = vld [vmem:[#allocation63_spill] sm:$0xff] }
 0x6f2   :  { %11084 = vrot.lane.b32.xlu0 %v17045_v63, %s11240_s25  ;;  %8674 = vmatmul.mubr.msk.f32.gmra.mrb[94].mxu1 %vm1082_vm5, %v4967_v60  ;;  %v15113_v54 = vpop.permute.xlu0 %10804  ;;  %v4968_v63 = vld [vmem:[%s16663_s7 + $0x278] sm:$0xff]  ;;  %v9283_v32 = vpack.c.bf16 %v5652_v59, %v5651_v48  ;;  %v17070_v49 = vpack.c.bf16 %v14277_v29, %v17069_v5  ;;  %v17079_v47 = vpack.c.bf16 %v17077_v22, %v17078_v0  ;;  %v17098_v22 = vld [vmem:[#allocation8_spill] sm:$0xff] }
 0x6f3   :  { %v5667_v38 = vsel %vm1647_vm6, %v10801_v12, %v10786_v43  ;;  %v5668_v6 = vsel %vm1647_vm6, %v10802_v15, %v10787_v3  ;;  %5560 = vmatprep.mubr.f32.mxu0 %v17047_v57  ;;  %11089 = vrot.lane.b32.xlu1 %v14457_v17, %s11240_s25  ;;  %v5643_v18 = vsel %vm1647_vm6, %v10791_v26, %v10801_v12  ;;  %v10806_v4 = vunpack.i.l.bf16 %v15113_v54  ;;  %v17081_v26 = vld [vmem:[#allocation47_spill] sm:$0xff]  ;;  %v17099_v0 = vld [vmem:[#allocation30_spill] sm:$0xff] }
 0x6f4   :  { %v9267_v23 = vpack.c.bf16 %v5668_v6, %v5667_v38  ;;  %8682 = vmatmul.mubr.msk.f32.gmra.mrb[96].mxu0 %vm1082_vm5, %v4967_v60  ;;  %9266 = vmatprep.subr.bf16.mxu1 %v9265_v39  ;;  %v15121_v21 = vpop.permute.xlu1 %10809  ;;  %v5644_v17 = vsel %vm1647_vm6, %v10792_v58, %v10802_v15  ;;  %v17080_v58 = vld [vmem:[#allocation54_spill] sm:$0xff]  ;;  %v17083_v6 = vld [vmem:[#allocation36_spill] sm:$0xff] }
 0x6f5   :  { %5453 = vmatprep.mubr.f32.mxu1 %v17047_v57  ;;  %5566 = vmatprep.mubr.f32.mxu0 %v17047_v57  ;;  %v9281_v36 = vpack.c.bf16 %v5644_v17, %v5643_v18  ;;  %v10811_v52 = vunpack.i.l.bf16 %v15121_v21  ;;  %v17082_v8 = vpack.c.bf16 %v17080_v58, %v17081_v26  ;;  %v17087_v17 = vld [vmem:[#allocation65_spill] sm:$0xff]  ;;  %v5674_v58 = vld [vmem:[%s16663_s7 + $0x2e8] sm:$0xff] }
 0x6f6   :  { %11094 = vrot.lane.b32.xlu0 %v14459_v61, %s11240_s25  ;;  %8675 = vmatmul.mubr.msk.f32.gmra.mrb[96].mxu1 %vm1082_vm5, %v4968_v63  ;;  %v15134_v3 = vpop.permute.xlu0 %10814  ;;  %v17064_v61 = vpack.c.bf16 %v14275_v45, %v17037_v41  ;;  %v17068_v41 = vpack.c.bf16 %v14341_v56, %v14313_v2  ;;  %v17072_v56 = vld [vmem:[#allocation49_spill] sm:$0xff] }
 0x6f7   :  { %11099 = vrot.lane.b32.xlu1 %v14465_v35, %s11240_s25  ;;  %9268 = vmatpush1.bf16.msra.mxu1 %v9267_v23  ;;  %v17065_v35 = vld [vmem:[#allocation33_spill] sm:$0xff]  ;;  %v17073_v29 = vpack.c.bf16 %v14333_v14, %v17072_v56  ;;  %v10812_v14 = vunpack.i.h.bf16 %v15121_v21  ;;  %v10817_v15 = vunpack.i.h.bf16 %v15134_v3  ;;  %v10816_v12 = vunpack.i.l.bf16 %v15134_v3  ;;  %v5672_v23 = vld [vmem:[%s16663_s7 + $0x2d8] sm:$0xff] }
 0x6f8   :  { %8683 = vmatmul.mubr.msk.f32.gmra.mrb[98].mxu0 %vm1082_vm5, %v4968_v63  ;;  %9282 = vmatprep.subr.bf16.mxu0 %v9281_v36  ;;  %v15137_v43 = vpop.permute.xlu1 %10819  ;;  %v17066_v1 = vpack.c.bf16 %v14287_v28, %v17065_v35  ;;  %v17067_v28 = vpack.c.bf16 %v14267_v55, %v17039_v11  ;;  %v5671_v2 = vld [vmem:[%s16663_s7 + $0x2d0] sm:$0xff]  ;;  %v17084_v63 = vld [vmem:[#allocation31_spill] sm:$0xff]  ;;  %v5676_v21 = vld [vmem:[%s16663_s7 + $0x2f8] sm:$0xff] }
 0x6f9   :  { %9284 = vmatpush1.bf16.msra.mxu0 %v9283_v32  ;;  %9286 = vmatprep.subr.bf16.mxu1 %v17064_v61  ;;  %v10822_v59 = vunpack.i.h.bf16 %v15137_v43  ;;  %v10821_v38 = vunpack.i.l.bf16 %v15137_v43  ;;  %v17085_v48 = vpack.c.bf16 %v17083_v6, %v17084_v63  ;;  %v17089_v32 = vld [vmem:[#allocation59_spill] sm:$0xff] }
 0x6fa   :  { %5765 = vmatprep.mubr.f32.mxu1 %v17047_v57  ;;  %9302 = vmatprep.subr.bf16.mxu0 %v17066_v1  ;;  %v15152_v51 = vpop.permute.xlu0 %10824 }
 0x6fb   :  { %11104 = vrot.lane.b32.xlu0 %v14507_v25, %s11240_s25  ;;  %8684 = vmatmul.mubr.msk.f32.vlgmr.msra.gmra.mrb[82].mxu1 %vm1082_vm5, %v5669_v10  ;;  %v5670_v25 = vld [vmem:[%s16663_s7 + $0x2c8] sm:$0xff]  ;;  %v6055_v5 = vsel %vm2066_vm7, %v10816_v12, %v10821_v38  ;;  %v10827_v6 = vunpack.i.h.bf16 %v15152_v51 }
 0x6fc   :  { %5878 = vmatprep.mubr.f32.mxu0 %v17047_v57  ;;  %11119 = vrot.lane.b32.xlu1 %v14516_v13, %s11240_s25  ;;  %v15157_v45 = vpop.permute.xlu1 %10829  ;;  %v17071_v13 = vpack.c.bf16 %v14351_v24, %v14323_v34  ;;  %v17074_v34 = vld [vmem:[#allocation37_spill] sm:$0xff]  ;;  %v17075_v24 = vld [vmem:[#allocation46_spill] sm:$0xff] }
 0x6fd   :  { %8692 = vmatmul.mubr.msk.f32.vlgmr.msra.gmra.mrb[84].mxu0 %vm1082_vm5, %v5669_v10  ;;  %9288 = vmatpush1.bf16.msra.mxu1 %v17067_v28  ;;  %v17090_v10 = vld [vmem:[#allocation38_spill] sm:$0xff]  ;;  %v17092_v28 = vld [vmem:[#allocation9_spill] sm:$0xff]  ;;  %v10832_v63 = vunpack.i.h.bf16 %v15157_v45 }
 0x6fe   :  { %9290 = vmatprep.subr.bf16.mxu1 %v17068_v41  ;;  %9304 = vmatpush1.bf16.msra.mxu0 %v17070_v49  ;;  %v15176_v55 = vpop.permute.xlu0 %10834  ;;  %v17091_v61 = vpack.c.bf16 %v17089_v32, %v17090_v10  ;;  %v6056_v49 = vsel %vm2066_vm7, %v10817_v15, %v10822_v59 }
 0x6ff   :  { %5771 = vmatprep.mubr.f32.mxu1 %v17047_v57  ;;  %9306 = vmatprep.subr.bf16.mxu0 %v17071_v13 }
 0x700   :  { %11109 = vrot.lane.b32.xlu0 %v14518_v7, %s11240_s25  ;;  %8685 = vmatmul.mubr.msk.f32.gmra.mrb[84].mxu1 %vm1082_vm5, %v5670_v25  ;;  %v15181_v11 = vpop.permute.xlu1 %10839  ;;  %v17076_v7 = vpack.c.bf16 %v17074_v34, %v17075_v24  ;;  %v9333_v24 = vpack.c.bf16 %v6056_v49, %v6055_v5 }
 0x701   :  { %5884 = vmatprep.mubr.f32.mxu0 %v17047_v57  ;;  %11124 = vrot.lane.b32.xlu1 %v14524_v37, %s11240_s25  ;;  %v10807_v37 = vunpack.i.h.bf16 %v15113_v54  ;;  %v10836_v54 = vunpack.i.l.bf16 %v15176_v55  ;;  %v10842_v43 = vunpack.i.h.bf16 %v15181_v11 }
 0x702   :  { %8693 = vmatmul.mubr.msk.f32.gmra.mrb[86].mxu0 %vm1082_vm5, %v5670_v25  ;;  %9292 = vmatpush1.bf16.msra.mxu1 %v17073_v29  ;;  %v15199_v60 = vpop.permute.xlu0 %10844  ;;  %v17093_v25 = vld [vmem:[#allocation5_spill] sm:$0xff]  ;;  %v17095_v29 = vld [vmem:[#allocation7_spill] sm:$0xff] }
 0x703   :  { %9294 = vmatprep.subr.bf16.mxu1 %v17076_v7  ;;  %9308 = vmatpush1.bf16.msra.mxu0 %v17079_v47  ;;  %v6072_v35 = vsel %vm2066_vm7, %v10807_v37, %v10812_v14  ;;  %v17094_v41 = vpack.c.bf16 %v17092_v28, %v17093_v25  ;;  %v17100_v47 = vpack.c.bf16 %v17098_v22, %v17099_v0 }
 0x704   :  { %5777 = vmatprep.mubr.f32.mxu1 %v17047_v57  ;;  %9310 = vmatprep.subr.bf16.mxu0 %v17082_v8  ;;  %v15209_v39 = vpop.permute.xlu1 %10849  ;;  %v6082_v32 = vsel %vm2066_vm7, %v10842_v43, %v10827_v6 }
 0x705   :  { %11114 = vrot.lane.b32.xlu0 %v14512_v50, %s11241_s24  ;;  %8686 = vmatmul.mubr.msk.f32.gmra.mrb[86].mxu1 %vm1082_vm5, %v5671_v2  ;;  %v17086_v50 = vld [vmem:[#allocation6_spill] sm:$0xff] }
 0x706   :  { %5890 = vmatprep.mubr.f32.mxu0 %v17047_v57  ;;  %11129 = vrot.lane.b32.xlu1 %v14533_v20, %s11241_s24  ;;  %v15228_v18 = vpop.permute.xlu0 %10854  ;;  %v17088_v36 = vpack.c.bf16 %v17086_v50, %v17087_v17  ;;  %v6071_v20 = vsel %vm2066_vm7, %v10806_v4, %v10811_v52 }
 0x707   :  { %8694 = vmatmul.mubr.msk.f32.gmra.mrb[88].mxu0 %vm1082_vm5, %v5671_v2  ;;  %9296 = vmatpush1.bf16.msra.mxu1 %v17085_v48  ;;  %v9317_v13 = vpack.c.bf16 %v6072_v35, %v6071_v20  ;;  %v17096_v2 = vld [vmem:[#allocation52_spill] sm:$0xff]  ;;  %v10831_v48 = vunpack.i.l.bf16 %v15157_v45  ;;  %v6079_v45 = vsel %vm2066_vm7, %v10821_v38, %v10806_v4  ;;  %v10837_v4 = vunpack.i.h.bf16 %v15176_v55 }
 0x708   :  { %9298 = vmatprep.subr.bf16.mxu1 %v17088_v36  ;;  %9312 = vmatpush1.bf16.msra.mxu0 %v17091_v61  ;;  %v15248_v1 = vpop.permute.xlu1 %10859  ;;  %v17097_v34 = vpack.c.bf16 %v17095_v29, %v17096_v2  ;;  %v10847_v55 = vunpack.i.h.bf16 %v15199_v60  ;;  %v10857_v20 = vunpack.i.h.bf16 %v15228_v18  ;;  %v10856_v35 = vunpack.i.l.bf16 %v15228_v18 }
 0x709   :  { %5783 = vmatprep.mubr.f32.mxu1 %v17047_v57  ;;  %9314 = vmatprep.subr.bf16.mxu0 %v17094_v41  ;;  %v6058_v36 = vsel %vm2066_vm7, %v10837_v4, %v10842_v43  ;;  %v10861_v10 = vunpack.i.l.bf16 %v15248_v1  ;;  %v10862_v28 = vunpack.i.h.bf16 %v15248_v1  ;;  %v6066_v5 = vsel %vm2066_vm7, %v10832_v63, %v10837_v4  ;;  %v17101_v1 = vld [vmem:[#allocation19_spill] sm:$0xff]  ;;  %v6097_v4 = vld [vmem:[%s16663_s7 + $0x350] sm:$0xff] }
 0x70a   :  { %11134 = vrot.lane.b32.xlu0 %v14536_v30, %s11241_s24  ;;  %8687 = vmatmul.mubr.msk.f32.gmra.mrb[88].mxu1 %vm1082_vm5, %v5672_v23  ;;  %v15268_v56 = vpop.permute.xlu0 %10864  ;;  %v5673_v30 = vld [vmem:[%s16663_s7 + $0x2e0] sm:$0xff]  ;;  %v6065_v18 = vsel %vm2066_vm7, %v10831_v48, %v10836_v54 }
 0x70b   :  { %5896 = vmatprep.mubr.f32.mxu0 %v17047_v57  ;;  %11139 = vrot.lane.b32.xlu1 %v14545_v27, %s11241_s24  ;;  %v10866_v29 = vunpack.i.l.bf16 %v15268_v56 }
 0x70c   :  { %8695 = vmatmul.mubr.msk.f32.gmra.mrb[90].mxu0 %vm1082_vm5, %v5672_v23  ;;  %9300 = vmatpush1.bf16.msra.mxu1 %v17097_v34  ;;  %v15277_v7 = vpop.permute.xlu1 %10879 }
 0x70d   :  { %9316 = vmatpush1.bf16.msra.mxu0 %v17100_v47  ;;  %9318 = vmatprep.subr.bf16.mxu1 %v9317_v13  ;;  %v10867_v13 = vunpack.i.h.bf16 %v15268_v56  ;;  %v10882_v2 = vunpack.i.h.bf16 %v15277_v7  ;;  %v10881_v34 = vunpack.i.l.bf16 %v15277_v7  ;;  %v6084_v56 = vsel %vm2066_vm7, %v10862_v28, %v10847_v55 }
 0x70e   :  { %5789 = vmatprep.mubr.f32.mxu1 %v17047_v57  ;;  %9334 = vmatprep.subr.bf16.mxu0 %v9333_v24  ;;  %v15286_v27 = vpop.permute.xlu0 %10869  ;;  %v6096_v24 = vld [vmem:[%s16663_s7 + $0x348] sm:$0xff]  ;;  %v6059_v47 = vsel %vm2066_vm7, %v10856_v35, %v10861_v10 }
 0x70f   :  { %11144 = vrot.lane.b32.xlu0 %v14547_v42, %s11241_s24  ;;  %8688 = vmatmul.mubr.msk.f32.gmra.mrb[90].mxu1 %vm1082_vm5, %v5673_v30 }
 0x710   :  { %5902 = vmatprep.mubr.f32.mxu0 %v17047_v57  ;;  %11149 = vrot.lane.b32.xlu1 %v14555_v62, %s11241_s24  ;;  %v15294_v26 = vpop.permute.xlu1 %10884  ;;  %v5675_v62 = vld [vmem:[%s16663_s7 + $0x2f0] sm:$0xff] }
 0x711   :  { %8696 = vmatmul.mubr.msk.f32.gmra.mrb[92].mxu0 %vm1082_vm5, %v5673_v30  ;;  %5795 = vmatprep.mubr.f32.mxu1 %v17047_v57 }
 0x712   :  { %5908 = vmatprep.mubr.f32.mxu0 %v17047_v57  ;;  %v15302_v42 = vpop.permute.xlu0 %10874 }
 0x713   :  { %11154 = vrot.lane.b32.xlu0 %v14563_v31, %s11241_s24  ;;  %8689 = vmatmul.mubr.msk.f32.gmra.mrb[92].mxu1 %vm1082_vm5, %v5674_v58  ;;  %v10826_v31 = vunpack.i.l.bf16 %v15152_v51  ;;  %v6063_v51 = vsel %vm2066_vm7, %v10811_v52, %v10816_v12  ;;  %v10852_v12 = vunpack.i.h.bf16 %v15209_v39 }
 0x714   :  { %11159 = vrot.lane.b32.xlu1 %v17041_v53, %s11241_s24  ;;  %5801 = vmatprep.mubr.f32.mxu1 %v17047_v57  ;;  %v15310_v8 = vpop.permute.xlu1 %10889  ;;  %v15322_v53 = vsel %vm2066_vm7, %v10812_v14, %v10817_v15  ;;  %v10841_v14 = vunpack.i.l.bf16 %v15181_v11  ;;  %v6074_v15 = vsel %vm2066_vm7, %v10827_v6, %v10832_v63  ;;  %v10872_v6 = vunpack.i.h.bf16 %v15286_v27 }
 0x715   :  { %8697 = vmatmul.mubr.msk.f32.gmra.mrb[94].mxu0 %vm1082_vm5, %v5674_v58  ;;  %v6073_v52 = vsel %vm2066_vm7, %v10826_v31, %v10831_v48  ;;  %v6076_v25 = vsel %vm2066_vm7, %v10847_v55, %v10852_v12  ;;  %v6060_v58 = vsel %vm2066_vm7, %v10857_v20, %v10862_v28  ;;  %v10887_v63 = vunpack.i.h.bf16 %v15294_v26 }
 0x716   :  { %5914 = vmatprep.mubr.f32.mxu0 %v17047_v57  ;;  %v15327_v23 = vpop.permute.xlu0 %10894  ;;  %v6057_v17 = vsel %vm2066_vm7, %v10836_v54, %v10841_v14  ;;  %v10886_v48 = vunpack.i.l.bf16 %v15294_v26  ;;  %v6078_v26 = vsel %vm2066_vm7, %v10867_v13, %v10882_v2 }
 0x717   :  { %11164 = vrot.lane.b32.xlu0 %v14581_v19, %s11241_s24  ;;  %8690 = vmatmul.mubr.msk.f32.gmra.mrb[94].mxu1 %vm1082_vm5, %v5675_v62  ;;  %v6080_v19 = vsel %vm2066_vm7, %v10822_v59, %v10807_v37  ;;  %v10851_v37 = vunpack.i.l.bf16 %v15209_v39  ;;  %v9335_v59 = vpack.c.bf16 %v15322_v53, %v6063_v51  ;;  %v9339_v53 = vpack.c.bf16 %v6066_v5, %v6065_v18  ;;  %v17102_v51 = vld [vmem:[#allocation20_spill] sm:$0xff] }
 0x718   :  { %11169 = vrot.lane.b32.xlu1 %v14583_v46, %s11241_s24  ;;  %5807 = vmatprep.mubr.f32.mxu1 %v17047_v57  ;;  %v15351_v3 = vpop.permute.xlu1 %10899  ;;  %v10846_v46 = vunpack.i.l.bf16 %v15199_v60  ;;  %v6095_v60 = vld [vmem:[%s16663_s7 + $0x340] sm:$0xff]  ;;  %v9319_v50 = vpack.c.bf16 %v6080_v19, %v6079_v45  ;;  %v6068_v19 = vsel %vm2066_vm7, %v10852_v12, %v10857_v20  ;;  %v6062_v55 = vsel %vm2066_vm7, %v10872_v6, %v10887_v63 }
 0x719   :  { %8698 = vmatmul.mubr.msk.f32.gmra.mrb[96].mxu0 %vm1082_vm5, %v5675_v62  ;;  %v166_v45 = vld [vmem:[%s16664_s8 + $0xc0] sm:$0xff]  ;;  %v6067_v54 = vsel %vm2066_vm7, %v10851_v37, %v10856_v35  ;;  %v6098_v35 = vld [vmem:[%s16663_s7 + $0x358] sm:$0xff]  ;;  %v6070_v18 = vsel %vm2066_vm7, %v10882_v2, %v10872_v6  ;;  %v172_v6 = vld [vmem:[%s16664_s8 + $0xf0] sm:$0xff] }
 0x71a   :  { %5920 = vmatprep.mubr.f32.mxu0 %v17047_v57  ;;  %v15370_v11 = vpop.permute.xlu0 %10904  ;;  %v6075_v61 = vsel %vm2066_vm7, %v10846_v46, %v10851_v37  ;;  %v6083_v22 = vsel %vm2066_vm7, %v10861_v10, %v10846_v46  ;;  %v10896_v46 = vunpack.i.l.bf16 %v15327_v23  ;;  %v168_v10 = vld [vmem:[%s16664_s8 + $0xd0] sm:$0xff] }
 0x71b   :  { %11174 = vrot.lane.b32.xlu0 %v14591_v16, %s11241_s24  ;;  %8691 = vmatmul.mubr.msk.f32.gmra.mrb[96].mxu1 %vm1082_vm5, %v5676_v21  ;;  %v9321_v16 = vpack.c.bf16 %v6074_v15, %v6073_v52  ;;  %v9325_v0 = vpack.c.bf16 %v6076_v25, %v6075_v61  ;;  %v9327_v43 = vpack.c.bf16 %v6084_v56, %v6083_v22  ;;  %v167_v52 = vld [vmem:[%s16664_s8 + $0xc8] sm:$0xff]  ;;  %v10876_v61 = vunpack.i.l.bf16 %v15302_v42  ;;  %v6099_v56 = vld [vmem:[%s16663_s7 + $0x360] sm:$0xff] }
 0x71c   :  { %11179 = vrot.lane.b32.xlu1 %v14599_v44, %s11241_s24  ;;  %6191 = vmatprep.mubr.f32.mxu1 %v17047_v57  ;;  %v15379_v38 = vpop.permute.xlu1 %10909  ;;  %v6081_v44 = vsel %vm2066_vm7, %v10841_v14, %v10826_v31  ;;  %v10871_v31 = vunpack.i.l.bf16 %v15286_v27  ;;  %v6077_v27 = vsel %vm2066_vm7, %v10866_v29, %v10881_v34  ;;  %v10897_v14 = vunpack.i.h.bf16 %v15327_v23 }
 0x71d   :  { %8699 = vmatmul.mubr.msk.f32.gmra.mrb[98].mxu0 %vm1082_vm5, %v5676_v21  ;;  %v9323_v30 = vpack.c.bf16 %v6082_v32, %v6081_v44  ;;  %v9341_v21 = vpack.c.bf16 %v6060_v58, %v6059_v47  ;;  %v9329_v39 = vpack.c.bf16 %v6078_v26, %v6077_v27  ;;  %v6086_v44 = vsel %vm2066_vm7, %v10887_v63, %v10867_v13  ;;  %v171_v58 = vld [vmem:[%s16664_s8 + $0xe8] sm:$0xff]  ;;  %v6101_v26 = vld [vmem:[%s16663_s7 + $0x370] sm:$0xff] }
 0x71e   :  { %6304 = vmatprep.mubr.f32.mxu0 %v17047_v57  ;;  %v15406_v41 = vpop.permute.xlu0 %10914  ;;  %v6061_v37 = vsel %vm2066_vm7, %v10871_v31, %v10886_v48  ;;  %v10877_v32 = vunpack.i.h.bf16 %v15302_v42 }
 0x71f   :  { %11184 = vrot.lane.b32.xlu0 %v14607_v9, %s11241_s24  ;;  %8700 = vmatmul.mubr.msk.f32.vlgmr.msra.gmra.mrb[98].mxu1 %vm1082_vm5, %v6095_v60  ;;  %v9337_v9 = vpack.c.bf16 %v6058_v36, %v6057_v17  ;;  %v9343_v17 = vpack.c.bf16 %v6068_v19, %v6067_v54  ;;  %v6085_v36 = vsel %vm2066_vm7, %v10886_v48, %v10866_v29  ;;  %v10916_v27 = vunpack.i.l.bf16 %v15406_v41 }
 0x720   :  { %9320 = vmatpush1.bf16.msra.mxu1 %v9319_v50  ;;  %11194 = vrot.lane.b32.xlu1 %v17101_v1, %s11241_s24  ;;  %v15414_v49 = vpop.permute.xlu1 %10919  ;;  %v10902_v50 = vunpack.i.h.bf16 %v15351_v3  ;;  %v9345_v20 = vpack.c.bf16 %v6062_v55, %v6061_v37  ;;  %v6069_v1 = vsel %vm2066_vm7, %v10881_v34, %v10871_v31  ;;  %v9331_v29 = vpack.c.bf16 %v6086_v44, %v6085_v36  ;;  %v6100_v31 = vld [vmem:[%s16663_s7 + $0x368] sm:$0xff] }
 0x721   :  { %8708 = vmatmul.mubr.msk.f32.vlgmr.msra.gmra.mrb[100].mxu0 %vm1082_vm5, %v6095_v60  ;;  %9322 = vmatprep.subr.bf16.mxu1 %v9321_v16  ;;  %v10891_v60 = vunpack.i.l.bf16 %v15310_v8  ;;  %v10901_v16 = vunpack.i.l.bf16 %v15351_v3  ;;  %v10912_v54 = vunpack.i.h.bf16 %v15379_v38 }
 0x722   :  { %9336 = vmatpush1.bf16.msra.mxu0 %v9335_v59  ;;  %6197 = vmatprep.mubr.f32.mxu1 %v17047_v57  ;;  %v15435_v62 = vpop.permute.xlu0 %10924  ;;  %v10892_v59 = vunpack.i.h.bf16 %v15310_v8  ;;  %v6692_v2 = vsel %vm2679_vm8, %v10902_v50, %v10877_v32  ;;  %v6668_v42 = vsel %vm2679_vm8, %v10897_v14, %v10902_v50  ;;  %v10907_v8 = vunpack.i.h.bf16 %v15370_v11 }
 0x723   :  { %9338 = vmatprep.subr.bf16.mxu0 %v9337_v9  ;;  %11189 = vrot.lane.b32.xlu0 %v14615_v33, %s11241_s24  ;;  %v6675_v28 = vsel %vm2679_vm8, %v10891_v60, %v10896_v46  ;;  %v169_v9 = vld [vmem:[%s16664_s8 + $0xd8] sm:$0xff]  ;;  %v6691_v7 = vsel %vm2679_vm8, %v10901_v16, %v10876_v61 }
 0x724   :  { %8701 = vmatmul.mubr.msk.f32.gmra.mrb[100].mxu1 %vm1082_vm5, %v6096_v24  ;;  %6310 = vmatprep.mubr.f32.mxu0 %v17047_v57  ;;  %v15443_v33 = vpop.permute.xlu1 %10929  ;;  %v6676_v25 = vsel %vm2679_vm8, %v10892_v59, %v10897_v14  ;;  %v10927_v14 = vunpack.i.h.bf16 %v15435_v62 }
 0x725   :  { %9324 = vmatpush1.bf16.msra.mxu1 %v9323_v30  ;;  %11199 = vrot.lane.b32.xlu1 %v17102_v51, %s11241_s24  ;;  %v9349_v34 = vpack.c.bf16 %v6676_v25, %v6675_v28  ;;  %v170_v30 = vld [vmem:[%s16664_s8 + $0xe0] sm:$0xff]  ;;  %v175_v51 = vld [vmem:[%s16664_s8 + $0x108] sm:$0xf]  ;;  %v10932_v55 = vunpack.i.h.bf16 %v15443_v33  ;;  %v10931_v50 = vunpack.i.l.bf16 %v15443_v33  ;;  %v6686_v33 = vsel %vm2679_vm8, %v10907_v8, %v10912_v54 }
 0x726   :  { %8709 = vmatmul.mubr.msk.f32.gmra.mrb[102].mxu0 %vm1082_vm5, %v6096_v24  ;;  %9326 = vmatprep.subr.bf16.mxu1 %v9325_v0  ;;  %v15476_v15 = vpop.permute.xlu0 %10934  ;;  %v9347_v24 = vpack.c.bf16 %v6070_v18, %v6069_v1  ;;  %v9365_v0 = vpack.c.bf16 %v6692_v2, %v6691_v7 }
 0x727   :  { %9340 = vmatpush1.bf16.msra.mxu0 %v9339_v53  ;;  %6203 = vmatprep.mubr.f32.mxu1 %v17047_v57  ;;  %v173_v53 = vld [vmem:[%s16664_s8 + $0xf8] sm:$0xff]  ;;  %s8453_s8 = sshll.u32 %s11242_s17, 4  ;;  %s8454_s8 = int_to_ptr.vmem [resolvable:$true] %s8453_s8 }
 0x728   :  { %9342 = vmatprep.subr.bf16.mxu0 %v9341_v21  ;;  %8181 = vperm.xlu0 %9921, %v166_v45   ;;  %v15482_v12 = vpop.permute.xlu1 %10939  ;;  %v10917_v45 = vunpack.i.h.bf16 %v15406_v41  ;;  %v10911_v41 = vunpack.i.l.bf16 %v15379_v38  ;;  %v6667_v38 = vsel %vm2679_vm8, %v10896_v46, %v10901_v16  ;;  %v6102_v46 = vld [vmem:[%s16663_s7 + $0x378] sm:$0xff]  ;;  %v10937_v16 = vunpack.i.h.bf16 %v15476_v15  ;;  %p11212_p1 = scmp.lt.s32.totalorder %s8454_s8, %s8454_s8 }
 0x729   :  { %8702 = vmatmul.mubr.msk.f32.gmra.mrb[102].mxu1 %vm1082_vm5, %v6097_v4  ;;  %6316 = vmatprep.mubr.f32.mxu0 %v17047_v57 }
 0x72a   :  { %9328 = vmatpush1.bf16.msra.mxu1 %v9327_v43  ;;  %8186 = vperm.xlu1 %9922, %v167_v52   ;;  %v15515_v5 = vpop.permute.xlu0 %10944  ;;  %v10922_v43 = vunpack.i.h.bf16 %v15414_v49  ;;  %v6683_v52 = vsel %vm2679_vm8, %v10876_v61, %v10891_v60  ;;  %v6677_v37 = vsel %vm2679_vm8, %v10911_v41, %v10916_v27  ;;  %v6678_v3 = vsel %vm2679_vm8, %v10912_v54, %v10917_v45 }
 0x72b   :  { %8710 = vmatmul.mubr.msk.f32.gmra.mrb[104].mxu0 %vm1082_vm5, %v6097_v4  ;;  %9330 = vmatprep.subr.bf16.mxu1 %v9329_v39  ;;  %v10921_v4 = vunpack.i.l.bf16 %v15414_v49  ;;  %v6684_v39 = vsel %vm2679_vm8, %v10877_v32, %v10892_v59  ;;  %v10906_v49 = vunpack.i.l.bf16 %v15370_v11  ;;  %v10926_v11 = vunpack.i.l.bf16 %v15435_v62 }
 0x72c   :  { %9344 = vmatpush1.bf16.msra.mxu0 %v9343_v17  ;;  %6209 = vmatprep.mubr.f32.mxu1 %v17047_v57  ;;  %v15529_v13 = vpop.permute.xlu1 %10959  ;;  %v10936_v17 = vunpack.i.l.bf16 %v15476_v15  ;;  %v6694_v36 = vsel %vm2679_vm8, %v10922_v43, %v10907_v8  ;;  %v9351_v44 = vpack.c.bf16 %v6684_v39, %v6683_v52  ;;  %v10942_v62 = vunpack.i.h.bf16 %v15482_v12  ;;  %v6087_v15 = vld [vmem:[%s16663_s7 + $0x300] sm:$0xff] }
 0x72d   :  { %9346 = vmatprep.subr.bf16.mxu0 %v9345_v20  ;;  %8191 = vperm.xlu0 %9921, %v168_v10   ;;  %v6693_v59 = vsel %vm2679_vm8, %v10921_v4, %v10906_v49  ;;  %v10941_v32 = vunpack.i.l.bf16 %v15482_v12  ;;  %v9367_v10 = vpack.c.bf16 %v6668_v42, %v6667_v38  ;;  %v6685_v61 = vsel %vm2679_vm8, %v10906_v49, %v10911_v41 }
 0x72e   :  { %8703 = vmatmul.mubr.msk.f32.gmra.mrb[104].mxu1 %vm1082_vm5, %v6098_v35  ;;  %6322 = vmatprep.mubr.f32.mxu0 %v17047_v57  ;;  %v15548_v22 = vpop.permute.xlu0 %10949  ;;  %v6669_v12 = vsel %vm2679_vm8, %v10916_v27, %v10921_v4  ;;  %v9353_v28 = vpack.c.bf16 %v6678_v3, %v6677_v37  ;;  %v9369_v25 = vpack.c.bf16 %v6694_v36, %v6693_v59  ;;  %v10947_v54 = vunpack.i.h.bf16 %v15515_v5 }
 0x72f   :  { %9332 = vmatpush1.bf16.msra.mxu1 %v9331_v29  ;;  %8196 = vperm.xlu1 %9922, %v169_v9   ;;  %v6687_v1 = vsel %vm2679_vm8, %v10926_v11, %v10931_v50  ;;  %v6688_v9 = vsel %vm2679_vm8, %v10927_v14, %v10932_v55  ;;  %v6679_v29 = vsel %vm2679_vm8, %v10931_v50, %v10936_v17  ;;  %v10962_v41 = vunpack.i.h.bf16 %v15529_v13 }
 0x730   :  { %8711 = vmatmul.mubr.msk.f32.gmra.mrb[106].mxu0 %vm1082_vm5, %v6098_v35  ;;  %9350 = vmatprep.subr.bf16.mxu1 %v9349_v34  ;;  %v15554_v47 = vpop.permute.xlu1 %10964  ;;  %v6670_v35 = vsel %vm2679_vm8, %v10917_v45, %v10922_v43  ;;  %v6680_v7 = vsel %vm2679_vm8, %v10932_v55, %v10937_v16  ;;  %v15680_v2 = vsel %vm2679_vm8, %v10936_v17, %v10941_v32 }
 0x731   :  { %9348 = vmatpush1.bf16.msra.mxu0 %v9347_v24  ;;  %6215 = vmatprep.mubr.f32.mxu1 %v17047_v57  ;;  %v15684_v34 = vsel %vm2679_vm8, %v10937_v16, %v10942_v62  ;;  %v10946_v24 = vunpack.i.l.bf16 %v15515_v5  ;;  %v9371_v45 = vpack.c.bf16 %v6670_v35, %v6669_v12  ;;  %v10967_v27 = vunpack.i.h.bf16 %v15554_v47 }
 0x732   :  { %9366 = vmatprep.subr.bf16.mxu0 %v9365_v0  ;;  %8201 = vperm.xlu0 %9921, %v170_v30   ;;  %v10961_v30 = vunpack.i.l.bf16 %v15529_v13  ;;  %v10952_v0 = vunpack.i.h.bf16 %v15548_v22  ;;  %v9359_v4 = vpack.c.bf16 %v6688_v9, %v6687_v1  ;;  %v9357_v43 = vpack.c.bf16 %v6680_v7, %v6679_v29  ;;  %v6089_v13 = vld [vmem:[%s16663_s7 + $0x310] sm:$0xff]  ;;  %v6091_v9 = vld [vmem:[%s16663_s7 + $0x320] sm:$0xff] }
 0x733   :  { %8704 = vmatmul.mubr.msk.f32.gmra.mrb[106].mxu1 %vm1082_vm5, %v6099_v56  ;;  %6328 = vmatprep.mubr.f32.mxu0 %v17047_v57  ;;  %v9375_v52 = vpack.c.bf16 %v15684_v34, %v15680_v2  ;;  %v6690_v55 = vsel %vm2679_vm8, %v10947_v54, %v10962_v41  ;;  %v6092_v2 = vld [vmem:[%s16663_s7 + $0x328] sm:$0xff] }
 0x734   :  { %8206 = vperm.xlu1 %9922, %v171_v58   ;;  %8712 = vmatmul.mubr.msk.f32.gmra.mrb[108].mxu0 %vm1082_vm5, %v6099_v56  ;;  %v15569_v63 = vpop.permute.xlu0 %10954  ;;  %v15571_v48 = vpop.permute.xlu1 %10969  ;;  %v10951_v56 = vunpack.i.l.bf16 %v15548_v22  ;;  %v6088_v58 = vld [vmem:[%s16663_s7 + $0x308] sm:$0xff]  ;;  %v10966_v22 = vunpack.i.l.bf16 %v15554_v47  ;;  %v6689_v39 = vsel %vm2679_vm8, %v10946_v24, %v10961_v30  ;;  %v6682_v42 = vsel %vm2679_vm8, %v10962_v41, %v10952_v0  ;;  %v6094_v41 = vld [vmem:[%s16663_s7 + $0x338] sm:$0xff] }
 0x735   :  { %6221 = vmatprep.mubr.f32.mxu1 %v17047_v57  ;;  %6334 = vmatprep.mubr.f32.mxu0 %v17047_v57  ;;  %v10972_v50 = vunpack.i.h.bf16 %v15571_v48  ;;  %v10971_v16 = vunpack.i.l.bf16 %v15571_v48  ;;  %v6674_v17 = vsel %vm2679_vm8, %v10952_v0, %v10967_v27  ;;  %v10957_v36 = vunpack.i.h.bf16 %v15569_v63  ;;  %v6090_v48 = vld [vmem:[%s16663_s7 + $0x318] sm:$0xff] }
 0x736   :  { %8211 = vperm.xlu0 %9921, %v172_v6   ;;  %v6695_v6 = vsel %vm2679_vm8, %v10941_v32, %v10926_v11  ;;  %v6681_v49 = vsel %vm2679_vm8, %v10961_v30, %v10951_v56  ;;  %v6697_v3 = vsel %vm2679_vm8, %v10966_v22, %v10946_v24  ;;  %v6673_v59 = vsel %vm2679_vm8, %v10951_v56, %v10966_v22  ;;  %v6093_v56 = vld [vmem:[%s16663_s7 + $0x330] sm:$0xff] }
 0x737   :  { %8705 = vmatmul.mubr.msk.f32.gmra.mrb[108].mxu1 %vm1082_vm5, %v6100_v31  ;;  %v9363_v35 = vpack.c.bf16 %v6690_v55, %v6689_v39  ;;  %v7206_v22 = vsel %vm3203_vm9, %v10957_v36, %v10972_v50 }
 0x738   :  { %8216 = vperm.xlu1 %9922, %v173_v53   ;;  %8713 = vmatmul.mubr.msk.f32.gmra.mrb[110].mxu0 %vm1082_vm5, %v6100_v31  ;;  %v15588_v19 = vpop.permute.xlu0 %10974  ;;  %v15590_v21 = vpop.permute.xlu1 %10979  ;;  %v6696_v31 = vsel %vm2679_vm8, %v10942_v62, %v10927_v14  ;;  %v6698_v14 = vsel %vm2679_vm8, %v10967_v27, %v10947_v54  ;;  %v9361_v62 = vpack.c.bf16 %v6682_v42, %v6681_v49 }
 0x739   :  { %6227 = vmatprep.mubr.f32.mxu1 %v17047_v57  ;;  %6340 = vmatprep.mubr.f32.mxu0 %v17047_v57  ;;  %v9373_v47 = vpack.c.bf16 %v6696_v31, %v6695_v6  ;;  %v10977_v38 = vunpack.i.h.bf16 %v15588_v19  ;;  %v10976_v5 = vunpack.i.l.bf16 %v15588_v19  ;;  %v10981_v37 = vunpack.i.l.bf16 %v15590_v21 }
 0x73a   :  { %8285 = vperm.xlu0 %9921, %v175_v51   ;;  %v9355_v51 = vpack.c.bf16 %v6686_v33, %v6685_v61  ;;  %v9377_v32 = vpack.c.bf16 %v6698_v14, %v6697_v3 }
 0x73b   :  { %8706 = vmatmul.mubr.msk.f32.gmra.mrb[110].mxu1 %vm1082_vm5, %v6101_v26 }
 0x73c   :  { %8714 = vmatmul.mubr.msk.f32.gmra.mrb[112].mxu0 %vm1082_vm5, %v6101_v26  ;;  %6233 = vmatprep.mubr.f32.mxu1 %v17047_v57  ;;  %v15634_v23 = vpop.permute.xlu0 %10984 }
 0x73d   :  { %6346 = vmatprep.mubr.f32.mxu0 %v17047_v57  ;;  %v15642_v60 = vpop.permute.xlu1 %10989  ;;  %v10986_v54 = vunpack.i.l.bf16 %v15634_v23 }
 0x73f   :  { %8707 = vmatmul.mubr.msk.f32.gmra.mrb[112].mxu1 %vm1082_vm5, %v6102_v46 }
 0x740   :  { %8715 = vmatmul.mubr.msk.f32.gmra.mrb[114].mxu0 %vm1082_vm5, %v6102_v46  ;;  %6441 = vmatprep.mubr.f32.mxu1 %v17047_v57  ;;  %v15661_v20 = vpop.permute.xlu0 %10994  ;;  %v10982_v46 = vunpack.i.h.bf16 %v15590_v21 }
 0x741   :  { %6554 = vmatprep.mubr.f32.mxu0 %v17047_v57  ;;  %v15668_v18 = vpop.permute.xlu1 %10999  ;;  %v10997_v30 = vunpack.i.h.bf16 %v15661_v20  ;;  %v10996_v0 = vunpack.i.l.bf16 %v15661_v20  ;;  %v10991_v20 = vunpack.i.l.bf16 %v15642_v60 }
 0x742   :  { %v11001_v6 = vunpack.i.l.bf16 %v15668_v18 }
 0x743   :  { %8716 = vmatmul.mubr.msk.f32.vlgmr.msra.gmra.mrb[98].mxu1 %vm1082_vm5, %v6087_v15  ;;  %v7207_v14 = vsel %vm3203_vm9, %v10986_v54, %v10991_v20 }
 0x744   :  { %9352 = vmatpush1.bf16.msra.mxu1 %v9351_v44  ;;  %8724 = vmatmul.mubr.msk.f32.vlgmr.msra.gmra.mrb[100].mxu0 %vm1082_vm5, %v6087_v15  ;;  %v15699_v53 = vpop.permute.xlu0 %11004  ;;  %v10956_v44 = vunpack.i.l.bf16 %v15569_v63  ;;  %v7198_v63 = vsel %vm3203_vm9, %v10972_v50, %v10977_v38  ;;  %v7214_v15 = vsel %vm3203_vm9, %v10982_v46, %v10957_v36 }
 0x745   :  { %9354 = vmatprep.subr.bf16.mxu1 %v9353_v28  ;;  %9368 = vmatpush1.bf16.msra.mxu0 %v9367_v10  ;;  %v15703_v26 = vpop.permute.xlu1 %11009  ;;  %v7197_v10 = vsel %vm3203_vm9, %v10971_v16, %v10976_v5  ;;  %v9379_v28 = vpack.c.bf16 %v6674_v17, %v6673_v59 }
 0x746   :  { %9370 = vmatprep.subr.bf16.mxu0 %v9369_v25  ;;  %6447 = vmatprep.mubr.f32.mxu1 %v17047_v57  ;;  %v7213_v33 = vsel %vm3203_vm9, %v10981_v37, %v10956_v44  ;;  %v9381_v25 = vpack.c.bf16 %v7198_v63, %v7197_v10  ;;  %v7205_v27 = vsel %vm3203_vm9, %v10956_v44, %v10971_v16  ;;  %v11012_v39 = vunpack.i.h.bf16 %v15703_v26 }
 0x747   :  { %8717 = vmatmul.mubr.msk.f32.gmra.mrb[100].mxu1 %vm1082_vm5, %v6088_v58  ;;  %6560 = vmatprep.mubr.f32.mxu0 %v17047_v57  ;;  %v9397_v1 = vpack.c.bf16 %v7214_v15, %v7213_v33 }
 0x748   :  { %9356 = vmatpush1.bf16.msra.mxu1 %v9355_v51  ;;  %8725 = vmatmul.mubr.msk.f32.gmra.mrb[102].mxu0 %vm1082_vm5, %v6088_v58  ;;  %v15724_v8 = vpop.permute.xlu0 %11014  ;;  %v10992_v51 = vunpack.i.h.bf16 %v15642_v60  ;;  %v7190_v60 = vsel %vm3203_vm9, %v10977_v38, %v10982_v46  ;;  %v9383_v46 = vpack.c.bf16 %v7206_v22, %v7205_v27 }
 0x749   :  { %9358 = vmatprep.subr.bf16.mxu1 %v9357_v43  ;;  %9372 = vmatpush1.bf16.msra.mxu0 %v9371_v45  ;;  %v15732_v11 = vpop.permute.xlu1 %11019  ;;  %v11002_v45 = vunpack.i.h.bf16 %v15668_v18  ;;  %v10987_v18 = vunpack.i.h.bf16 %v15634_v23  ;;  %v7199_v43 = vsel %vm3203_vm9, %v10991_v20, %v10996_v0  ;;  %v11006_v23 = vunpack.i.l.bf16 %v15699_v53 }
 0x74a   :  { %9374 = vmatprep.subr.bf16.mxu0 %v9373_v47  ;;  %6453 = vmatprep.mubr.f32.mxu1 %v17047_v57  ;;  %v7200_v21 = vsel %vm3203_vm9, %v10992_v51, %v10997_v30  ;;  %v7215_v47 = vsel %vm3203_vm9, %v11001_v6, %v10986_v54  ;;  %v11016_v49 = vunpack.i.l.bf16 %v15724_v8 }
 0x74b   :  { %8718 = vmatmul.mubr.msk.f32.gmra.mrb[102].mxu1 %vm1082_vm5, %v6089_v13  ;;  %6566 = vmatprep.mubr.f32.mxu0 %v17047_v57  ;;  %v7216_v42 = vsel %vm3203_vm9, %v11002_v45, %v10987_v18  ;;  %v7192_v59 = vsel %vm3203_vm9, %v10997_v30, %v11002_v45  ;;  %v9385_v50 = vpack.c.bf16 %v7200_v21, %v7199_v43 }
 0x74c   :  { %9360 = vmatpush1.bf16.msra.mxu1 %v9359_v4  ;;  %8726 = vmatmul.mubr.msk.f32.gmra.mrb[104].mxu0 %vm1082_vm5, %v6089_v13  ;;  %v15759_v61 = vpop.permute.xlu0 %11024  ;;  %v7189_v4 = vsel %vm3203_vm9, %v10976_v5, %v10981_v37  ;;  %v11011_v5 = vunpack.i.l.bf16 %v15703_v26  ;;  %v11017_v13 = vunpack.i.h.bf16 %v15724_v8  ;;  %v11021_v37 = vunpack.i.l.bf16 %v15732_v11  ;;  %v6699_v8 = vld [vmem:[%s16663_s7 + $0x380] sm:$0xff] }
 0x74d   :  { %9362 = vmatprep.subr.bf16.mxu1 %v9361_v62  ;;  %9376 = vmatpush1.bf16.msra.mxu0 %v9375_v52  ;;  %v15769_v12 = vpop.permute.xlu1 %11029  ;;  %v11007_v52 = vunpack.i.h.bf16 %v15699_v53  ;;  %v11022_v53 = vunpack.i.h.bf16 %v15732_v11  ;;  %v9399_v3 = vpack.c.bf16 %v7190_v60, %v7189_v4  ;;  %v7208_v26 = vsel %vm3203_vm9, %v10987_v18, %v10992_v51 }
 0x74e   :  { %9378 = vmatprep.subr.bf16.mxu0 %v9377_v32  ;;  %6459 = vmatprep.mubr.f32.mxu1 %v17047_v57  ;;  %v7191_v11 = vsel %vm3203_vm9, %v10996_v0, %v11001_v6  ;;  %v9401_v16 = vpack.c.bf16 %v7216_v42, %v7215_v47  ;;  %v7209_v36 = vsel %vm3203_vm9, %v11006_v23, %v11011_v5  ;;  %v11026_v63 = vunpack.i.l.bf16 %v15759_v61 }
 0x74f   :  { %8719 = vmatmul.mubr.msk.f32.gmra.mrb[104].mxu1 %vm1082_vm5, %v6090_v48  ;;  %6572 = vmatprep.mubr.f32.mxu0 %v17047_v57  ;;  %v7210_v44 = vsel %vm3203_vm9, %v11007_v52, %v11012_v39  ;;  %v7201_v62 = vsel %vm3203_vm9, %v11011_v5, %v11016_v49  ;;  %v7202_v32 = vsel %vm3203_vm9, %v11012_v39, %v11017_v13  ;;  %v11031_v33 = vunpack.i.l.bf16 %v15769_v12 }
 0x750   :  { %9364 = vmatpush1.bf16.msra.mxu1 %v9363_v35  ;;  %8727 = vmatmul.mubr.msk.f32.gmra.mrb[106].mxu0 %vm1082_vm5, %v6090_v48  ;;  %v15778_v29 = vpop.permute.xlu0 %11034  ;;  %v15886_v48 = vsel %vm3203_vm9, %v11016_v49, %v11021_v37  ;;  %v15890_v10 = vsel %vm3203_vm9, %v11017_v13, %v11022_v53  ;;  %v9403_v30 = vpack.c.bf16 %v7192_v59, %v7191_v11  ;;  %v11027_v51 = vunpack.i.h.bf16 %v15759_v61 }
 0x751   :  { %9380 = vmatpush1.bf16.msra.mxu0 %v9379_v28  ;;  %9382 = vmatprep.subr.bf16.mxu1 %v9381_v25  ;;  %v15780_v7 = vpop.permute.xlu1 %11039  ;;  %v11037_v15 = vunpack.i.h.bf16 %v15778_v29  ;;  %v11036_v35 = vunpack.i.l.bf16 %v15778_v29  ;;  %v6700_v28 = vld [vmem:[%s16663_s7 + $0x388] sm:$0xff]  ;;  %v7217_v25 = vsel %vm3203_vm9, %v11021_v37, %v11006_v23  ;;  %v9391_v6 = vpack.c.bf16 %v7210_v44, %v7209_v36  ;;  %v6703_v44 = vld [vmem:[%s16663_s7 + $0x3a0] sm:$0xff] }
 0x752   :  { %9398 = vmatprep.subr.bf16.mxu0 %v9397_v1  ;;  %6465 = vmatprep.mubr.f32.mxu1 %v17047_v57  ;;  %v7218_v1 = vsel %vm3203_vm9, %v11022_v53, %v11007_v52  ;;  %v11042_v0 = vunpack.i.h.bf16 %v15780_v7  ;;  %v11041_v29 = vunpack.i.l.bf16 %v15780_v7  ;;  %v11032_v20 = vunpack.i.h.bf16 %v15769_v12  ;;  %v6701_v12 = vld [vmem:[%s16663_s7 + $0x390] sm:$0xff] }
 0x753   :  { %8720 = vmatmul.mubr.msk.f32.gmra.mrb[106].mxu1 %vm1082_vm5, %v6091_v9  ;;  %6578 = vmatprep.mubr.f32.mxu0 %v17047_v57  ;;  %v9389_v45 = vpack.c.bf16 %v7202_v32, %v7201_v62  ;;  %v9407_v27 = vpack.c.bf16 %v15890_v10, %v15886_v48  ;;  %v7211_v22 = vsel %vm3203_vm9, %v11026_v63, %v11031_v33  ;;  %v6704_v48 = vld [vmem:[%s16663_s7 + $0x3a8] sm:$0xff] }
 0x754   :  { %8728 = vmatmul.mubr.msk.f32.gmra.mrb[108].mxu0 %vm1082_vm5, %v6091_v9  ;;  %6471 = vmatprep.mubr.f32.mxu1 %v17047_v57  ;;  %v15790_v34 = vpop.permute.xlu0 %11044  ;;  %v9405_v7 = vpack.c.bf16 %v7218_v1, %v7217_v25  ;;  %v7203_v54 = vsel %vm3203_vm9, %v11031_v33, %v11036_v35  ;;  %v7204_v60 = vsel %vm3203_vm9, %v11032_v20, %v11037_v15 }
 0x755   :  { %6584 = vmatprep.mubr.f32.mxu0 %v17047_v57  ;;  %v15793_v24 = vpop.permute.xlu1 %11049  ;;  %v7219_v21 = vsel %vm3203_vm9, %v11041_v29, %v11026_v63  ;;  %v7220_v52 = vsel %vm3203_vm9, %v11042_v0, %v11027_v51  ;;  %v7212_v39 = vsel %vm3203_vm9, %v11027_v51, %v11032_v20  ;;  %v7195_v47 = vsel %vm3203_vm9, %v11036_v35, %v11041_v29 }
 0x756   :  { %v11052_v5 = vunpack.i.h.bf16 %v15793_v24  ;;  %v11051_v13 = vunpack.i.l.bf16 %v15793_v24  ;;  %v7196_v49 = vsel %vm3203_vm9, %v11037_v15, %v11042_v0  ;;  %v11047_v42 = vunpack.i.h.bf16 %v15790_v34  ;;  %v6702_v24 = vld [vmem:[%s16663_s7 + $0x398] sm:$0xff]  ;;  %v6705_v15 = vld [vmem:[%s16663_s7 + $0x3b0] sm:$0xff] }
 0x757   :  { %8721 = vmatmul.mubr.msk.f32.gmra.mrb[108].mxu1 %vm1082_vm5, %v6092_v2  ;;  %v9393_v53 = vpack.c.bf16 %v7204_v60, %v7203_v54  ;;  %v9409_v37 = vpack.c.bf16 %v7220_v52, %v7219_v21  ;;  %v9395_v11 = vpack.c.bf16 %v7212_v39, %v7211_v22 }
 0x758   :  { %8729 = vmatmul.mubr.msk.f32.gmra.mrb[110].mxu0 %vm1082_vm5, %v6092_v2  ;;  %6477 = vmatprep.mubr.f32.mxu1 %v17047_v57  ;;  %v15803_v58 = vpop.permute.xlu0 %11054  ;;  %v9387_v2 = vpack.c.bf16 %v7208_v26, %v7207_v14 }
 0x759   :  { %6590 = vmatprep.mubr.f32.mxu0 %v17047_v57  ;;  %v15807_v31 = vpop.permute.xlu1 %11059  ;;  %v11057_v4 = vunpack.i.h.bf16 %v15803_v58  ;;  %v11056_v61 = vunpack.i.l.bf16 %v15803_v58 }
 0x75a   :  { %v11061_v43 = vunpack.i.l.bf16 %v15807_v31 }
 0x75b   :  { %8722 = vmatmul.mubr.msk.f32.gmra.mrb[110].mxu1 %vm1082_vm5, %v6093_v56 }
 0x75c   :  { %8730 = vmatmul.mubr.msk.f32.gmra.mrb[112].mxu0 %vm1082_vm5, %v6093_v56  ;;  %6483 = vmatprep.mubr.f32.mxu1 %v17047_v57  ;;  %v15840_v19 = vpop.permute.xlu0 %11064  ;;  %v7085_v0 = vsel %vm3098_vm10, %v11056_v61, %v11061_v43 }
 0x75d   :  { %6596 = vmatprep.mubr.f32.mxu0 %v17047_v57  ;;  %v15848_v38 = vpop.permute.xlu1 %11069  ;;  %v11066_v29 = vunpack.i.l.bf16 %v15840_v19 }
 0x75e   :  { %v11072_v25 = vunpack.i.h.bf16 %v15848_v38  ;;  %v11071_v1 = vunpack.i.l.bf16 %v15848_v38 }
 0x75f   :  { %8723 = vmatmul.mubr.msk.f32.gmra.mrb[112].mxu1 %vm1082_vm5, %v6094_v41 }
 0x760   :  { %8731 = vmatmul.mubr.msk.f32.gmra.mrb[114].mxu0 %vm1082_vm5, %v6094_v41  ;;  %6795 = vmatprep.mubr.f32.mxu1 %v17047_v57  ;;  %v15867_v55 = vpop.permute.xlu0 %11074  ;;  %v11062_v41 = vunpack.i.h.bf16 %v15807_v31 }
 0x761   :  { %6908 = vmatprep.mubr.f32.mxu0 %v17047_v57  ;;  %v15874_v17 = vpop.permute.xlu1 %11079  ;;  %v11077_v63 = vunpack.i.h.bf16 %v15867_v55  ;;  %v11076_v33 = vunpack.i.l.bf16 %v15867_v55 }
 0x762   :  { %v7110_v26 = vsel %vm3098_vm10, %v11062_v41, %v11047_v42  ;;  %v11082_v55 = vunpack.i.h.bf16 %v15874_v17  ;;  %v7086_v38 = vsel %vm3098_vm10, %v11057_v4, %v11062_v41 }
 0x763   :  { %8732 = vmatmul.mubr.msk.f32.vlgmr.msra.gmra.mrb[98].mxu1 %vm1082_vm5, %v6699_v8  ;;  %v7095_v51 = vsel %vm3098_vm10, %v11071_v1, %v11076_v33  ;;  %v7096_v31 = vsel %vm3098_vm10, %v11072_v25, %v11077_v63  ;;  %v9431_v41 = vpack.c.bf16 %v7086_v38, %v7085_v0 }
 0x764   :  { %9384 = vmatpush1.bf16.msra.mxu1 %v9383_v46  ;;  %8740 = vmatmul.mubr.msk.f32.vlgmr.msra.gmra.mrb[100].mxu0 %vm1082_vm5, %v6699_v8  ;;  %v15905_v9 = vpop.permute.xlu0 %11084  ;;  %v11046_v46 = vunpack.i.l.bf16 %v15790_v34  ;;  %v7094_v34 = vsel %vm3098_vm10, %v11052_v5, %v11057_v4  ;;  %v7088_v52 = vsel %vm3098_vm10, %v11077_v63, %v11082_v55 }
 0x765   :  { %9386 = vmatprep.subr.bf16.mxu1 %v9385_v50  ;;  %9400 = vmatpush1.bf16.msra.mxu0 %v9399_v3  ;;  %v15909_v56 = vpop.permute.xlu1 %11089  ;;  %v7093_v3 = vsel %vm3098_vm10, %v11051_v13, %v11056_v61  ;;  %v9411_v50 = vpack.c.bf16 %v7196_v49, %v7195_v47  ;;  %v11087_v58 = vunpack.i.h.bf16 %v15905_v9  ;;  %v11086_v20 = vunpack.i.l.bf16 %v15905_v9 }
 0x766   :  { %9402 = vmatprep.subr.bf16.mxu0 %v9401_v16  ;;  %6801 = vmatprep.mubr.f32.mxu1 %v17047_v57  ;;  %v7109_v14 = vsel %vm3098_vm10, %v11061_v43, %v11046_v46  ;;  %v9413_v16 = vpack.c.bf16 %v7094_v34, %v7093_v3  ;;  %v11091_v22 = vunpack.i.l.bf16 %v15909_v56 }
 0x767   :  { %8733 = vmatmul.mubr.msk.f32.gmra.mrb[100].mxu1 %vm1082_vm5, %v6700_v28  ;;  %6914 = vmatprep.mubr.f32.mxu0 %v17047_v57  ;;  %v9429_v36 = vpack.c.bf16 %v7110_v26, %v7109_v14  ;;  %v7222_v26 = vld [vmem:[%s16663_s7 + $0x408] sm:$0xff] }
 0x768   :  { %9388 = vmatpush1.bf16.msra.mxu1 %v9387_v2  ;;  %8741 = vmatmul.mubr.msk.f32.gmra.mrb[102].mxu0 %vm1082_vm5, %v6700_v28  ;;  %v15930_v18 = vpop.permute.xlu0 %11094  ;;  %v11081_v28 = vunpack.i.l.bf16 %v15874_v17  ;;  %v7101_v2 = vsel %vm3098_vm10, %v11046_v46, %v11051_v13  ;;  %v11067_v17 = vunpack.i.h.bf16 %v15840_v19  ;;  %v11092_v19 = vunpack.i.h.bf16 %v15909_v56 }
 0x769   :  { %9390 = vmatprep.subr.bf16.mxu1 %v9389_v45  ;;  %9404 = vmatpush1.bf16.msra.mxu0 %v9403_v30  ;;  %v15938_v23 = vpop.permute.xlu1 %11099  ;;  %v7102_v30 = vsel %vm3098_vm10, %v11047_v42, %v11052_v5  ;;  %v11096_v4 = vunpack.i.l.bf16 %v15930_v18  ;;  %v7103_v56 = vsel %vm3098_vm10, %v11066_v29, %v11071_v1  ;;  %v7105_v47 = vsel %vm3098_vm10, %v11086_v20, %v11091_v22 }
 0x76a   :  { %9406 = vmatprep.subr.bf16.mxu0 %v9405_v7  ;;  %6807 = vmatprep.mubr.f32.mxu1 %v17047_v57  ;;  %v11097_v7 = vunpack.i.h.bf16 %v15930_v18  ;;  %v7112_v9 = vsel %vm3098_vm10, %v11082_v55, %v11067_v17  ;;  %v11102_v54 = vunpack.i.h.bf16 %v15938_v23  ;;  %v11101_v60 = vunpack.i.l.bf16 %v15938_v23  ;;  %v7221_v18 = vld [vmem:[%s16663_s7 + $0x400] sm:$0xff] }
 0x76b   :  { %8734 = vmatmul.mubr.msk.f32.gmra.mrb[102].mxu1 %vm1082_vm5, %v6701_v12  ;;  %6920 = vmatprep.mubr.f32.mxu0 %v17047_v57  ;;  %v7104_v43 = vsel %vm3098_vm10, %v11067_v17, %v11072_v25  ;;  %v7087_v21 = vsel %vm3098_vm10, %v11076_v33, %v11081_v28  ;;  %v9417_v23 = vpack.c.bf16 %v7096_v31, %v7095_v51 }
 0x76c   :  { %9392 = vmatpush1.bf16.msra.mxu1 %v9391_v6  ;;  %8742 = vmatmul.mubr.msk.f32.gmra.mrb[104].mxu0 %vm1082_vm5, %v6701_v12  ;;  %v6706_v6 = vld [vmem:[%s16663_s7 + $0x3b8] sm:$0xff]  ;;  %v9415_v12 = vpack.c.bf16 %v7102_v30, %v7101_v2  ;;  %v7106_v5 = vsel %vm3098_vm10, %v11087_v58, %v11092_v19  ;;  %v7097_v13 = vsel %vm3098_vm10, %v11091_v22, %v11096_v4 }
 0x76d   :  { %9394 = vmatprep.subr.bf16.mxu1 %v9393_v53  ;;  %9408 = vmatpush1.bf16.msra.mxu0 %v9407_v27  ;;  %v15973_v8 = vpop.permute.xlu0 %11104  ;;  %v7111_v27 = vsel %vm3098_vm10, %v11081_v28, %v11066_v29  ;;  %v7098_v49 = vsel %vm3098_vm10, %v11092_v19, %v11097_v7  ;;  %v16084_v42 = vsel %vm3098_vm10, %v11096_v4, %v11101_v60 }
 0x76e   :  { %9410 = vmatprep.subr.bf16.mxu0 %v9409_v37  ;;  %6813 = vmatprep.mubr.f32.mxu1 %v17047_v57  ;;  %v15976_v59 = vpop.permute.xlu1 %11119  ;;  %v9433_v39 = vpack.c.bf16 %v7112_v9, %v7111_v27  ;;  %v16088_v46 = vsel %vm3098_vm10, %v11097_v7, %v11102_v54  ;;  %v11106_v53 = vunpack.i.l.bf16 %v15973_v8  ;;  %v11107_v63 = vunpack.i.h.bf16 %v15973_v8  ;;  %v7224_v9 = vld [vmem:[%s16663_s7 + $0x418] sm:$0xff] }
 0x76f   :  { %8735 = vmatmul.mubr.msk.f32.gmra.mrb[104].mxu1 %vm1082_vm5, %v6702_v24  ;;  %6926 = vmatprep.mubr.f32.mxu0 %v17047_v57  ;;  %v11121_v37 = vunpack.i.l.bf16 %v15976_v59  ;;  %v11122_v33 = vunpack.i.h.bf16 %v15976_v59  ;;  %v9439_v28 = vpack.c.bf16 %v16088_v46, %v16084_v42  ;;  %v7223_v59 = vld [vmem:[%s16663_s7 + $0x410] sm:$0xff] }
 0x770   :  { %9396 = vmatpush1.bf16.msra.mxu1 %v9395_v11  ;;  %8743 = vmatmul.mubr.msk.f32.gmra.mrb[106].mxu0 %vm1082_vm5, %v6702_v24  ;;  %v7113_v11 = vsel %vm3098_vm10, %v11101_v60, %v11086_v20 }
 0x771   :  { %9412 = vmatpush1.bf16.msra.mxu0 %v9411_v50  ;;  %9414 = vmatprep.subr.bf16.mxu1 %v9413_v16  ;;  %v7114_v50 = vsel %vm3098_vm10, %v11102_v54, %v11087_v58  ;;  %v9419_v16 = vpack.c.bf16 %v7104_v43, %v7103_v56  ;;  %v7107_v25 = vsel %vm3098_vm10, %v11106_v53, %v11121_v37 }
 0x772   :  { %9430 = vmatprep.subr.bf16.mxu0 %v9429_v36  ;;  %6819 = vmatprep.mubr.f32.mxu1 %v17047_v57  ;;  %v15985_v62 = vpop.permute.xlu0 %11109  ;;  %v9435_v36 = vpack.c.bf16 %v7088_v52, %v7087_v21 }
 0x773   :  { %8736 = vmatmul.mubr.msk.f32.gmra.mrb[106].mxu1 %vm1082_vm5, %v6703_v44  ;;  %6932 = vmatprep.mubr.f32.mxu0 %v17047_v57  ;;  %v15989_v32 = vpop.permute.xlu1 %11124  ;;  %v11112_v3 = vunpack.i.h.bf16 %v15985_v62  ;;  %v11111_v34 = vunpack.i.l.bf16 %v15985_v62 }
 0x774   :  { %8744 = vmatmul.mubr.msk.f32.gmra.mrb[108].mxu0 %vm1082_vm5, %v6703_v44  ;;  %6825 = vmatprep.mubr.f32.mxu1 %v17047_v57  ;;  %v11127_v44 = vunpack.i.h.bf16 %v15989_v32  ;;  %v11126_v62 = vunpack.i.l.bf16 %v15989_v32  ;;  %v9437_v32 = vpack.c.bf16 %v7114_v50, %v7113_v11 }
 0x775   :  { %6938 = vmatprep.mubr.f32.mxu0 %v17047_v57  ;;  %v7099_v55 = vsel %vm3098_vm10, %v11121_v37, %v11111_v34  ;;  %v7100_v2 = vsel %vm3098_vm10, %v11122_v33, %v11112_v3 }
 0x776   :  { %v7115_v38 = vsel %vm3098_vm10, %v11126_v62, %v11106_v53  ;;  %v7116_v17 = vsel %vm3098_vm10, %v11127_v44, %v11107_v63  ;;  %v7091_v51 = vsel %vm3098_vm10, %v11111_v34, %v11126_v62  ;;  %v7092_v19 = vsel %vm3098_vm10, %v11112_v3, %v11127_v44 }
 0x777   :  { %8737 = vmatmul.mubr.msk.f32.gmra.mrb[108].mxu1 %vm1082_vm5, %v6704_v48  ;;  %v15998_v10 = vpop.permute.xlu0 %11114  ;;  %v9425_v7 = vpack.c.bf16 %v7100_v2, %v7099_v55  ;;  %v9441_v4 = vpack.c.bf16 %v7116_v17, %v7115_v38  ;;  %v9443_v56 = vpack.c.bf16 %v7092_v19, %v7091_v51 }
 0x778   :  { %8745 = vmatmul.mubr.msk.f32.gmra.mrb[110].mxu0 %vm1082_vm5, %v6704_v48  ;;  %6831 = vmatprep.mubr.f32.mxu1 %v17047_v57  ;;  %v16007_v35 = vpop.permute.xlu1 %11129  ;;  %v9423_v48 = vpack.c.bf16 %v7106_v5, %v7105_v47  ;;  %v11117_v27 = vunpack.i.h.bf16 %v15998_v10  ;;  %v11116_v22 = vunpack.i.l.bf16 %v15998_v10 }
 0x779   :  { %6944 = vmatprep.mubr.f32.mxu0 %v17047_v57  ;;  %v11132_v31 = vunpack.i.h.bf16 %v16007_v35  ;;  %v11131_v58 = vunpack.i.l.bf16 %v16007_v35 }
 0x77b   :  { %8738 = vmatmul.mubr.msk.f32.gmra.mrb[110].mxu1 %vm1082_vm5, %v6705_v15 }
 0x77c   :  { %8746 = vmatmul.mubr.msk.f32.gmra.mrb[112].mxu0 %vm1082_vm5, %v6705_v15  ;;  %6837 = vmatprep.mubr.f32.mxu1 %v17047_v57  ;;  %v16046_v45 = vpop.permute.xlu0 %11134  ;;  %v9421_v15 = vpack.c.bf16 %v7098_v49, %v7097_v13  ;;  %v7227_v13 = vld [vmem:[%s16663_s7 + $0x430] sm:$0xff] }
 0x77d   :  { %6950 = vmatprep.mubr.f32.mxu0 %v17047_v57  ;;  %v16053_v61 = vpop.permute.xlu1 %11139  ;;  %v11137_v1 = vunpack.i.h.bf16 %v16046_v45  ;;  %v11136_v8 = vunpack.i.l.bf16 %v16046_v45 }
 0x77e   :  { %v11142_v30 = vunpack.i.h.bf16 %v16053_v61  ;;  %v11141_v0 = vunpack.i.l.bf16 %v16053_v61 }
 0x77f   :  { %8739 = vmatmul.mubr.msk.f32.gmra.mrb[112].mxu1 %vm1082_vm5, %v6706_v6  ;;  %v7801_v10 = vsel %vm3808_vm11, %v11131_v58, %v11136_v8 }
 0x780   :  { %8747 = vmatmul.mubr.msk.f32.gmra.mrb[114].mxu0 %vm1082_vm5, %v6706_v6  ;;  %7317 = vmatprep.mubr.f32.mxu1 %v17047_v57  ;;  %v7108_v6 = vsel %vm3098_vm10, %v11107_v63, %v11122_v33  ;;  %v7817_v54 = vsel %vm3808_vm11, %v11141_v0, %v11116_v22  ;;  %v7818_v60 = vsel %vm3808_vm11, %v11142_v30, %v11117_v27 }
 0x781   :  { %7430 = vmatprep.mubr.f32.mxu0 %v17047_v57  ;;  %v16093_v24 = vpop.permute.xlu0 %11144  ;;  %v9461_v52 = vpack.c.bf16 %v7818_v60, %v7817_v54  ;;  %v7794_v44 = vsel %vm3808_vm11, %v11137_v1, %v11142_v30 }
 0x782   :  { %v16098_v14 = vpop.permute.xlu1 %11149  ;;  %v11147_v49 = vunpack.i.h.bf16 %v16093_v24  ;;  %v11146_v42 = vunpack.i.l.bf16 %v16093_v24  ;;  %v7228_v24 = vld [vmem:[%s16663_s7 + $0x438] sm:$0xff] }
 0x783   :  { %8748 = vmatmul.mubr.msk.f32.vlgmr.msra.gmra.mrb[114].mxu1 %vm1082_vm5, %v7221_v18  ;;  %v11152_v46 = vunpack.i.h.bf16 %v16098_v14  ;;  %v11151_v53 = vunpack.i.l.bf16 %v16098_v14  ;;  %v7809_v14 = vsel %vm3808_vm11, %v11116_v22, %v11131_v58  ;;  %v7118_v22 = vld [vmem:[%s16663_s7 + $0x3c8] sm:$0xff] }
 0x784   :  { %9416 = vmatpush1.bf16.msra.mxu1 %v9415_v12  ;;  %8756 = vmatmul.mubr.msk.f32.vlgmr.msra.gmra.mrb[116].mxu0 %vm1082_vm5, %v7221_v18  ;;  %v7802_v12 = vsel %vm3808_vm11, %v11132_v31, %v11137_v1 }
 0x785   :  { %9418 = vmatprep.subr.bf16.mxu1 %v9417_v23  ;;  %9432 = vmatpush1.bf16.msra.mxu0 %v9431_v41  ;;  %v16130_v29 = vpop.permute.xlu0 %11154  ;;  %v9427_v41 = vpack.c.bf16 %v7108_v6, %v7107_v25  ;;  %v9445_v18 = vpack.c.bf16 %v7802_v12, %v7801_v10  ;;  %v7225_v23 = vld [vmem:[%s16663_s7 + $0x420] sm:$0xff]  ;;  %v7811_v35 = vsel %vm3808_vm11, %v11146_v42, %v11151_v53 }
 0x786   :  { %9434 = vmatprep.subr.bf16.mxu0 %v9433_v39  ;;  %7323 = vmatprep.mubr.f32.mxu1 %v17047_v57  ;;  %v16142_v20 = vpop.permute.xlu1 %11159  ;;  %v7226_v39 = vld [vmem:[%s16663_s7 + $0x428] sm:$0xff]  ;;  %v11157_v37 = vunpack.i.h.bf16 %v16130_v29  ;;  %v11156_v3 = vunpack.i.l.bf16 %v16130_v29  ;;  %v7812_v62 = vsel %vm3808_vm11, %v11147_v49, %v11152_v46 }
 0x787   :  { %8749 = vmatmul.mubr.msk.f32.gmra.mrb[116].mxu1 %vm1082_vm5, %v7222_v26  ;;  %7436 = vmatprep.mubr.f32.mxu0 %v17047_v57  ;;  %v11162_v34 = vunpack.i.h.bf16 %v16142_v20  ;;  %v9451_v29 = vpack.c.bf16 %v7812_v62, %v7811_v35  ;;  %v7124_v35 = vld [vmem:[%s16663_s7 + $0x3f8] sm:$0xff]  ;;  %v7825_v62 = vld [vmem:[%s16663_s7 + $0x440] sm:$0xff] }
 0x788   :  { %9420 = vmatpush1.bf16.msra.mxu1 %v9419_v16  ;;  %8757 = vmatmul.mubr.msk.f32.gmra.mrb[118].mxu0 %vm1082_vm5, %v7222_v26  ;;  %v11161_v26 = vunpack.i.l.bf16 %v16142_v20  ;;  %v7810_v16 = vsel %vm3808_vm11, %v11117_v27, %v11132_v31  ;;  %v7804_v63 = vsel %vm3808_vm11, %v11152_v46, %v11157_v37 }
 0x789   :  { %9422 = vmatprep.subr.bf16.mxu1 %v9421_v15  ;;  %9436 = vmatpush1.bf16.msra.mxu0 %v9435_v36  ;;  %v16176_v43 = vpop.permute.xlu0 %11164  ;;  %v7793_v36 = vsel %vm3808_vm11, %v11136_v8, %v11141_v0  ;;  %v7796_v61 = vsel %vm3808_vm11, %v11157_v37, %v11162_v34  ;;  %v7820_v8 = vsel %vm3808_vm11, %v11162_v34, %v11147_v49 }
 0x78a   :  { %9438 = vmatprep.subr.bf16.mxu0 %v9437_v32  ;;  %7329 = vmatprep.mubr.f32.mxu1 %v17047_v57  ;;  %v16180_v21 = vpop.permute.xlu1 %11169  ;;  %v7795_v45 = vsel %vm3808_vm11, %v11156_v3, %v11161_v26  ;;  %v11166_v33 = vunpack.i.l.bf16 %v16176_v43  ;;  %v7117_v32 = vld [vmem:[%s16663_s7 + $0x3c0] sm:$0xff]  ;;  %v7819_v1 = vsel %vm3808_vm11, %v11161_v26, %v11146_v42  ;;  %v9463_v0 = vpack.c.bf16 %v7794_v44, %v7793_v36  ;;  %v7122_v36 = vld [vmem:[%s16663_s7 + $0x3e8] sm:$0xff]  ;;  %v7123_v44 = vld [vmem:[%s16663_s7 + $0x3f0] sm:$0xff] }
 0x78b   :  { %8750 = vmatmul.mubr.msk.f32.gmra.mrb[118].mxu1 %vm1082_vm5, %v7223_v59  ;;  %7442 = vmatprep.mubr.f32.mxu0 %v17047_v57  ;;  %v11171_v15 = vunpack.i.l.bf16 %v16180_v21  ;;  %v11167_v38 = vunpack.i.h.bf16 %v16176_v43  ;;  %v11172_v17 = vunpack.i.h.bf16 %v16180_v21  ;;  %v9467_v51 = vpack.c.bf16 %v7796_v61, %v7795_v45  ;;  %v7828_v45 = vld [vmem:[%s16663_s7 + $0x458] sm:$0xff] }
 0x78c   :  { %9424 = vmatpush1.bf16.msra.mxu1 %v9423_v48  ;;  %8758 = vmatmul.mubr.msk.f32.gmra.mrb[120].mxu0 %vm1082_vm5, %v7223_v59  ;;  %v7803_v48 = vsel %vm3808_vm11, %v11151_v53, %v11156_v3  ;;  %v9447_v59 = vpack.c.bf16 %v7810_v16, %v7809_v14  ;;  %v9465_v20 = vpack.c.bf16 %v7820_v8, %v7819_v1  ;;  %v7830_v1 = vld [vmem:[%s16663_s7 + $0x468] sm:$0xff] }
 0x78d   :  { %9426 = vmatprep.subr.bf16.mxu1 %v9425_v7  ;;  %9440 = vmatpush1.bf16.msra.mxu0 %v9439_v28  ;;  %v16194_v47 = vpop.permute.xlu0 %11174  ;;  %v7813_v31 = vsel %vm3808_vm11, %v11166_v33, %v11171_v15  ;;  %v9449_v58 = vpack.c.bf16 %v7804_v63, %v7803_v48  ;;  %v7814_v60 = vsel %vm3808_vm11, %v11167_v38, %v11172_v17  ;;  %v7826_v48 = vld [vmem:[%s16663_s7 + $0x448] sm:$0xff]  ;;  %v7827_v63 = vld [vmem:[%s16663_s7 + $0x450] sm:$0xff] }
 0x78e   :  { %9442 = vmatprep.subr.bf16.mxu0 %v9441_v4  ;;  %7335 = vmatprep.mubr.f32.mxu1 %v17047_v57  ;;  %v16197_v5 = vpop.permute.xlu1 %11179  ;;  %v11177_v28 = vunpack.i.h.bf16 %v16194_v47  ;;  %v11176_v25 = vunpack.i.l.bf16 %v16194_v47  ;;  %v7119_v47 = vld [vmem:[%s16663_s7 + $0x3d0] sm:$0xff]  ;;  %v9455_v46 = vpack.c.bf16 %v7814_v60, %v7813_v31 }
 0x78f   :  { %8751 = vmatmul.mubr.msk.f32.gmra.mrb[120].mxu1 %vm1082_vm5, %v7224_v9  ;;  %7448 = vmatprep.mubr.f32.mxu0 %v17047_v57  ;;  %v11182_v55 = vunpack.i.h.bf16 %v16197_v5  ;;  %v11181_v2 = vunpack.i.l.bf16 %v16197_v5 }
 0x790   :  { %9428 = vmatpush1.bf16.msra.mxu1 %v9427_v41  ;;  %8759 = vmatmul.mubr.msk.f32.gmra.mrb[122].mxu0 %vm1082_vm5, %v7224_v9  ;;  %v7805_v7 = vsel %vm3808_vm11, %v11171_v15, %v11176_v25  ;;  %v7806_v4 = vsel %vm3808_vm11, %v11172_v17, %v11177_v28  ;;  %v7829_v15 = vld [vmem:[%s16663_s7 + $0x460] sm:$0xff]  ;;  %v7832_v17 = vld [vmem:[%s16663_s7 + $0x478] sm:$0xff] }
 0x791   :  { %9444 = vmatpush1.bf16.msra.mxu0 %v9443_v56  ;;  %9446 = vmatprep.subr.bf16.mxu1 %v9445_v18  ;;  %v16214_v11 = vpop.permute.xlu0 %11184  ;;  %v7821_v12 = vsel %vm3808_vm11, %v11181_v2, %v11166_v33  ;;  %v7822_v54 = vsel %vm3808_vm11, %v11182_v55, %v11167_v38  ;;  %v7797_v41 = vsel %vm3808_vm11, %v11176_v25, %v11181_v2  ;;  %v7831_v2 = vld [vmem:[%s16663_s7 + $0x470] sm:$0xff] }
 0x792   :  { %9462 = vmatprep.subr.bf16.mxu0 %v9461_v52  ;;  %7341 = vmatprep.mubr.f32.mxu1 %v17047_v57  ;;  %v16217_v50 = vpop.permute.xlu1 %11194  ;;  %v7798_v18 = vsel %vm3808_vm11, %v11177_v28, %v11182_v55  ;;  %v11187_v21 = vunpack.i.h.bf16 %v16214_v11  ;;  %v11186_v52 = vunpack.i.l.bf16 %v16214_v11 }
 0x793   :  { %8752 = vmatmul.mubr.msk.f32.gmra.mrb[122].mxu1 %vm1082_vm5, %v7225_v23  ;;  %7454 = vmatprep.mubr.f32.mxu0 %v17047_v57  ;;  %v11197_v56 = vunpack.i.h.bf16 %v16217_v50  ;;  %v11196_v43 = vunpack.i.l.bf16 %v16217_v50  ;;  %v9471_v53 = vpack.c.bf16 %v7798_v18, %v7797_v41 }
 0x794   :  { %8760 = vmatmul.mubr.msk.f32.gmra.mrb[124].mxu0 %vm1082_vm5, %v7225_v23  ;;  %7347 = vmatprep.mubr.f32.mxu1 %v17047_v57  ;;  %v9453_v23 = vpack.c.bf16 %v7806_v4, %v7805_v7 }
 0x795   :  { %7460 = vmatprep.mubr.f32.mxu0 %v17047_v57  ;;  %v11190_v30 = vpop.permute.xlu0 %11189  ;;  %v7815_v37 = vsel %vm3808_vm11, %v11186_v52, %v11196_v43  ;;  %v7816_v3 = vsel %vm3808_vm11, %v11187_v21, %v11197_v56 }
 0x796   :  { %v11192_v19 = vunpack.i.h.bf16 %v11190_v30  ;;  %v11191_v27 = vunpack.i.l.bf16 %v11190_v30  ;;  %v9459_v14 = vpack.c.bf16 %v7816_v3, %v7815_v37 }
 0x797   :  { %8753 = vmatmul.mubr.msk.f32.gmra.mrb[124].mxu1 %vm1082_vm5, %v7226_v39  ;;  %v11200_v6 = vpop.permute.xlu1 %11199 }
 0x798   :  { %8761 = vmatmul.mubr.msk.f32.gmra.mrb[126].mxu0 %vm1082_vm5, %v7226_v39  ;;  %7353 = vmatprep.mubr.f32.mxu1 %v17047_v57  ;;  %v11202_v9 = vunpack.i.h.bf16 %v11200_v6  ;;  %v11201_v10 = vunpack.i.l.bf16 %v11200_v6  ;;  %v9469_v39 = vpack.c.bf16 %v7822_v54, %v7821_v12  ;;  %v7807_v5 = vsel %vm3808_vm11, %v11196_v43, %v11191_v27 }
 0x799   :  { %7466 = vmatprep.mubr.f32.mxu0 %v17047_v57 }
 0x79a   :  { %v7823_v49 = vsel %vm3808_vm11, %v11201_v10, %v11186_v52  ;;  %v7824_v42 = vsel %vm3808_vm11, %v11202_v9, %v11187_v21  ;;  %v7799_v26 = vsel %vm3808_vm11, %v11191_v27, %v11201_v10  ;;  %v7800_v11 = vsel %vm3808_vm11, %v11192_v19, %v11202_v9  ;;  %v17103_v21 = vld [vmem:[#allocation41_spill] sm:$0xff] }
 0x79b   :  { %8754 = vmatmul.mubr.msk.f32.gmra.mrb[126].mxu1 %vm1082_vm5, %v7227_v13  ;;  %v9473_v50 = vpack.c.bf16 %v7824_v42, %v7823_v49  ;;  %v9475_v16 = vpack.c.bf16 %v7800_v11, %v7799_v26  ;;  %v17106_v49 = vld [vmem:[#allocation14_spill] sm:$0xff] }
 0x79c   :  { %8762 = vmatmul.mubr.msk.f32.gmra.mrb[128].mxu0 %vm1082_vm5, %v7227_v13  ;;  %7359 = vmatprep.mubr.f32.mxu1 %v17047_v57  ;;  %v7808_v13 = vsel %vm3808_vm11, %v11197_v56, %v11192_v19 }
 0x79d   :  { %7472 = vmatprep.mubr.f32.mxu0 %v17047_v57  ;;  %v9457_v34 = vpack.c.bf16 %v7808_v13, %v7807_v5 }
 0x79f   :  { %8755 = vmatmul.mubr.msk.f32.gmra.mrb[128].mxu1 %vm1082_vm5, %v7228_v24 }
 0x7a0   :  { %8763 = vmatmul.mubr.msk.f32.gmra.mrb[130].mxu0 %vm1082_vm5, %v7228_v24  ;;  %7567 = vmatprep.mubr.f32.mxu1 %v17047_v57  ;;  %v7120_v24 = vld [vmem:[%s16663_s7 + $0x3d8] sm:$0xff] }
 0x7a1   :  { %7680 = vmatprep.mubr.f32.mxu0 %v17047_v57 }
 0x7a3   :  { %8764 = vmatmul.mubr.msk.f32.vlgmr.msra.gmra.mrb[114].mxu1 %vm1082_vm5, %v7117_v32 }
 0x7a4   :  { %9448 = vmatpush1.bf16.msra.mxu1 %v9447_v59  ;;  %8772 = vmatmul.mubr.msk.f32.vlgmr.msra.gmra.mrb[116].mxu0 %vm1082_vm5, %v7117_v32 }
 0x7a5   :  { %9450 = vmatprep.subr.bf16.mxu1 %v9449_v58  ;;  %9464 = vmatpush1.bf16.msra.mxu0 %v9463_v0 }
 0x7a6   :  { %9466 = vmatprep.subr.bf16.mxu0 %v9465_v20  ;;  %7573 = vmatprep.mubr.f32.mxu1 %v17047_v57 }
 0x7a7   :  { %8765 = vmatmul.mubr.msk.f32.gmra.mrb[116].mxu1 %vm1082_vm5, %v7118_v22  ;;  %7686 = vmatprep.mubr.f32.mxu0 %v17047_v57 }
 0x7a8   :  { %9452 = vmatpush1.bf16.msra.mxu1 %v9451_v29  ;;  %8773 = vmatmul.mubr.msk.f32.gmra.mrb[118].mxu0 %vm1082_vm5, %v7118_v22 }
 0x7a9   :  { %9454 = vmatprep.subr.bf16.mxu1 %v9453_v23  ;;  %9468 = vmatpush1.bf16.msra.mxu0 %v9467_v51  ;;  %v17104_v23 = vld [vmem:[#allocation17_spill] sm:$0xff] }
 0x7aa   :  { %9470 = vmatprep.subr.bf16.mxu0 %v9469_v39  ;;  %7579 = vmatprep.mubr.f32.mxu1 %v17047_v57 }
 0x7ab   :  { %8766 = vmatmul.mubr.msk.f32.gmra.mrb[118].mxu1 %vm1082_vm5, %v7119_v47  ;;  %7692 = vmatprep.mubr.f32.mxu0 %v17047_v57 }
 0x7ac   :  { %9456 = vmatpush1.bf16.msra.mxu1 %v9455_v46  ;;  %8774 = vmatmul.mubr.msk.f32.gmra.mrb[120].mxu0 %vm1082_vm5, %v7119_v47  ;;  %v17105_v47 = vld [vmem:[#allocation13_spill] sm:$0xff] }
 0x7ad   :  { %9458 = vmatprep.subr.bf16.mxu1 %v9457_v34  ;;  %9472 = vmatpush1.bf16.msra.mxu0 %v9471_v53 }
 0x7ae   :  { %9474 = vmatprep.subr.bf16.mxu0 %v9473_v50  ;;  %7585 = vmatprep.mubr.f32.mxu1 %v17047_v57 }
 0x7af   :  { %8767 = vmatmul.mubr.msk.f32.gmra.mrb[120].mxu1 %vm1082_vm5, %v7120_v24  ;;  %7698 = vmatprep.mubr.f32.mxu0 %v17047_v57 }
 0x7b0   :  { %9460 = vmatpush1.bf16.msra.mxu1 %v9459_v14  ;;  %8775 = vmatmul.mubr.msk.f32.gmra.mrb[122].mxu0 %vm1082_vm5, %v7120_v24 }
 0x7b1   :  { %9476 = vmatpush1.bf16.msra.mxu0 %v9475_v16  ;;  %7591 = vmatprep.mubr.f32.mxu1 %v17047_v57 }
 0x7b2   :  { %7704 = vmatprep.mubr.f32.mxu0 %v17047_v57 }
 0x7b3   :  { %8768 = vmatmul.mubr.msk.f32.gmra.mrb[122].mxu1 %vm1082_vm5, %v7121_v40 }
 0x7b4   :  { %8776 = vmatmul.mubr.msk.f32.gmra.mrb[124].mxu0 %vm1082_vm5, %v7121_v40  ;;  %7597 = vmatprep.mubr.f32.mxu1 %v17047_v57 }
 0x7b5   :  { %7710 = vmatprep.mubr.f32.mxu0 %v17047_v57 }
 0x7b7   :  { %8769 = vmatmul.mubr.msk.f32.gmra.mrb[124].mxu1 %vm1082_vm5, %v7122_v36 }
 0x7b8   :  { %8777 = vmatmul.mubr.msk.f32.gmra.mrb[126].mxu0 %vm1082_vm5, %v7122_v36  ;;  %7603 = vmatprep.mubr.f32.mxu1 %v17047_v57 }
 0x7b9   :  { %7716 = vmatprep.mubr.f32.mxu0 %v17047_v57 }
 0x7bb   :  { %8770 = vmatmul.mubr.msk.f32.gmra.mrb[126].mxu1 %vm1082_vm5, %v7123_v44 }
 0x7bc   :  { %8778 = vmatmul.mubr.msk.f32.gmra.mrb[128].mxu0 %vm1082_vm5, %v7123_v44  ;;  %7609 = vmatprep.mubr.f32.mxu1 %v17047_v57 }
 0x7bd   :  { %7722 = vmatprep.mubr.f32.mxu0 %v17047_v57 }
 0x7bf   :  { %8771 = vmatmul.mubr.msk.f32.gmra.mrb[128].mxu1 %vm1082_vm5, %v7124_v35 }
 0x7c0   :  { %8779 = vmatmul.mubr.msk.f32.gmra.mrb[130].mxu0 %vm1082_vm5, %v7124_v35  ;;  %7921 = vmatprep.mubr.f32.mxu1 %v17047_v57 }
 0x7c1   :  { %8034 = vmatprep.mubr.f32.mxu0 %v17047_v57 }
 0x7c3   :  { %8780 = vmatmul.mubr.msk.f32.vlgmr.msra.gmra.mrb[114].mxu1 %vm1082_vm5, %v7825_v62 }
 0x7c4   :  { %8788 = vmatmul.mubr.msk.f32.vlgmr.msra.gmra.mrb[116].mxu0 %vm1082_vm5, %v7825_v62  ;;  %7927 = vmatprep.mubr.f32.mxu1 %v17047_v57 }
 0x7c5   :  { %8040 = vmatprep.mubr.f32.mxu0 %v17047_v57 }
 0x7c7   :  { %8781 = vmatmul.mubr.msk.f32.gmra.mrb[116].mxu1 %vm1082_vm5, %v7826_v48 }
 0x7c8   :  { %8789 = vmatmul.mubr.msk.f32.gmra.mrb[118].mxu0 %vm1082_vm5, %v7826_v48  ;;  %7933 = vmatprep.mubr.f32.mxu1 %v17047_v57 }
 0x7c9   :  { %8046 = vmatprep.mubr.f32.mxu0 %v17047_v57 }
 0x7cb   :  { %8782 = vmatmul.mubr.msk.f32.gmra.mrb[118].mxu1 %vm1082_vm5, %v7827_v63 }
 0x7cc   :  { %8790 = vmatmul.mubr.msk.f32.gmra.mrb[120].mxu0 %vm1082_vm5, %v7827_v63  ;;  %7939 = vmatprep.mubr.f32.mxu1 %v17047_v57 }
 0x7cd   :  { %8052 = vmatprep.mubr.f32.mxu0 %v17047_v57 }
 0x7ce   :  { %v5767_v61 = vpop.f32.mrb[82].mxu1 }
 0x7cf   :  { %8783 = vmatmul.mubr.msk.f32.gmra.mrb[120].mxu1 %vm1082_vm5, %v7828_v45  ;;  %v5769_v33 = vpop.f32.mrb[83].mxu1  ;;  %v5959_v52 = vmul.f32 %v5767_v61, %v17103_v21 }
 0x7d0   :  { %8791 = vmatmul.mubr.msk.f32.gmra.mrb[122].mxu0 %vm1082_vm5, %v7828_v45  ;;  %7945 = vmatprep.mubr.f32.mxu1 %v17047_v57  ;;  %v5880_v28 = vpop.f32.mrb[84].mxu0  ;;  %v5960_v39 = vmul.f32 %v5769_v33, %v17104_v23 }
 0x7d1   :  { %8058 = vmatprep.mubr.f32.mxu0 %v17047_v57  ;;  %v5882_v25 = vpop.f32.mrb[85].mxu0  ;;  %v5961_v5 = vmul.f32 %v5880_v28, %v17105_v47 }
 0x7d2   :  { %v5962_v42 = vmul.f32 %v5882_v25, %v17106_v49 }
 0x7d3   :  { %8784 = vmatmul.mubr.msk.f32.gmra.mrb[122].mxu1 %vm1082_vm5, %v7829_v15  ;;  %v5773_v32 = vpop.f32.mrb[84].mxu1 }
 0x7d4   :  { %8792 = vmatmul.mubr.msk.f32.gmra.mrb[124].mxu0 %vm1082_vm5, %v7829_v15  ;;  %7951 = vmatprep.mubr.f32.mxu1 %v17047_v57  ;;  %v5775_v8 = vpop.f32.mrb[85].mxu1  ;;  %v5963_v11 = vmul.f32 %v5773_v32, %v17103_v21 }
 0x7d5   :  { %8064 = vmatprep.mubr.f32.mxu0 %v17047_v57  ;;  %v5886_v59 = vpop.f32.mrb[86].mxu0  ;;  %v5964_v24 = vmul.f32 %v5775_v8, %v17104_v23 }
 0x7d6   :  { %v5888_v55 = vpop.f32.mrb[87].mxu0  ;;  %v5965_v14 = vmul.f32 %v5886_v59, %v17105_v47 }
 0x7d7   :  { %8785 = vmatmul.mubr.msk.f32.gmra.mrb[124].mxu1 %vm1082_vm5, %v7830_v1  ;;  %v5966_v40 = vmul.f32 %v5888_v55, %v17106_v49 }
 0x7d8   :  { %8793 = vmatmul.mubr.msk.f32.gmra.mrb[126].mxu0 %vm1082_vm5, %v7830_v1  ;;  %7957 = vmatprep.mubr.f32.mxu1 %v17047_v57  ;;  %v5779_v30 = vpop.f32.mrb[86].mxu1 }
 0x7d9   :  { %8070 = vmatprep.mubr.f32.mxu0 %v17047_v57  ;;  %v5781_v0 = vpop.f32.mrb[87].mxu1  ;;  %v5967_v45 = vmul.f32 %v5779_v30, %v17103_v21 }
 0x7da   :  { %v5892_v29 = vpop.f32.mrb[88].mxu0  ;;  %v5968_v33 = vmul.f32 %v5781_v0, %v17104_v23 }
 0x7db   :  { %8786 = vmatmul.mubr.msk.f32.gmra.mrb[126].mxu1 %vm1082_vm5, %v7831_v2  ;;  %v5894_v38 = vpop.f32.mrb[89].mxu0  ;;  %v5969_v15 = vmul.f32 %v5892_v29, %v17105_v47 }
 0x7dc   :  { %8794 = vmatmul.mubr.msk.f32.gmra.mrb[128].mxu0 %vm1082_vm5, %v7831_v2  ;;  %7963 = vmatprep.mubr.f32.mxu1 %v17047_v57  ;;  %v5970_v25 = vmul.f32 %v5894_v38, %v17106_v49 }
 0x7dd   :  { %8076 = vmatprep.mubr.f32.mxu0 %v17047_v57  ;;  %v5785_v6 = vpop.f32.mrb[88].mxu1 }
 0x7de   :  { %v5787_v51 = vpop.f32.mrb[89].mxu1  ;;  %v5971_v30 = vmul.f32 %v5785_v6, %v17103_v21 }
 0x7df   :  { %8787 = vmatmul.mubr.msk.f32.gmra.mrb[128].mxu1 %vm1082_vm5, %v7832_v17  ;;  %v5898_v31 = vpop.f32.mrb[90].mxu0  ;;  %v5972_v0 = vmul.f32 %v5787_v51, %v17104_v23 }
 0x7e0   :  { %8795 = vmatmul.mubr.msk.f32.gmra.mrb[130].mxu0 %vm1082_vm5, %v7832_v17  ;;  %v5900_v58 = vpop.f32.mrb[91].mxu0  ;;  %8355 = vmatprep.mubr.f32.mxu1 %v17047_v57  ;;  %v5973_v29 = vmul.f32 %v5898_v31, %v17105_v47 }
 0x7e1   :  { %8426 = vmatprep.mubr.f32.mxu0 %v17047_v57  ;;  %v5974_v38 = vmul.f32 %v5900_v58, %v17106_v49 }
 0x7e2   :  { %v16421_v20 = vpop.f32.mrb[90].mxu1 }
 0x7e3   :  { %v16423_v19 = vpop.f32.mrb[91].mxu1  ;;  %v5975_v6 = vmul.f32 %v16421_v20, %v17103_v21 }
 0x7e4   :  { %v16425_v27 = vpop.f32.mrb[92].mxu0  ;;  %v5976_v51 = vmul.f32 %v16423_v19, %v17104_v23 }
 0x7e5   :  { %v16427_v22 = vpop.f32.mrb[93].mxu0  ;;  %v5977_v31 = vmul.f32 %v16425_v27, %v17105_v47 }
 0x7e6   :  { %v16429_v7 = vpop.f32.mrb[92].mxu1 }
 0x7e7   :  { %v16431_v4 = vpop.f32.mrb[93].mxu1 }
 0x7e8   :  { %v16433_v9 = vpop.f32.mrb[94].mxu0  ;;  %v5980_v27 = vmul.f32 %v16431_v4, %v17104_v23 }
 0x7e9   :  { %v16435_v10 = vpop.f32.mrb[95].mxu0 }
 0x7ea   :  { %v16437_v12 = vpop.f32.mrb[94].mxu1 }
 0x7eb   :  { %v16439_v54 = vpop.f32.mrb[95].mxu1 }
 0x7ec   :  { %v16441_v57 = vpop.f32.mrb[96].mxu0 }
 0x7ed   :  { %v16443_v60 = vpop.f32.mrb[97].mxu0 }
 0x7ee   :  { %v16445_v41 = vpop.f32.mrb[96].mxu1 }
 0x7ef   :  { %v16447_v56 = vpop.f32.mrb[97].mxu1 }
 0x7f0   :  { %v16449_v43 = vpop.f32.mrb[98].mxu0 }
 0x7f1   :  { %v16451_v18 = vpop.f32.mrb[99].mxu0 }
 0x836   :  { %v6797_v13 = vpop.f32.mrb[98].mxu1 }
 0x837   :  { %v16457_v46 = vadd.f32 %v6797_v13, %v5959_v52  ;;  %v6799_v53 = vpop.f32.mrb[99].mxu1  ;;  %v6910_v37 = vpop.f32.mrb[100].mxu0 }
 0x838   :  { %v16459_v3 = vadd.f32 %v6799_v53, %v5960_v39  ;;  %v16461_v34 = vadd.f32 %v6910_v37, %v5961_v5  ;;  %v6912_v26 = vpop.f32.mrb[101].mxu0 }
 0x839   :  { %v16464_v50 = vadd.f32 %v6912_v26, %v5962_v42 }
 0x83a   :  { %v6803_v16 = vpop.f32.mrb[100].mxu1 }
 0x83b   :  { %v16469_v36 = vadd.f32 %v6803_v16, %v5963_v11  ;;  %v6805_v44 = vpop.f32.mrb[101].mxu1  ;;  %v6916_v35 = vpop.f32.mrb[102].mxu0  ;;  %v5978_v11 = vmul.f32 %v16427_v22, %v17106_v49  ;;  %v5981_v22 = vmul.f32 %v16433_v9, %v17105_v47  ;;  %v5984_v9 = vmul.f32 %v16439_v54, %v17104_v23 }
 0x83c   :  { %v16471_v62 = vadd.f32 %v6805_v44, %v5964_v24  ;;  %v16473_v48 = vadd.f32 %v6916_v35, %v5965_v14  ;;  %v6918_v63 = vpop.f32.mrb[103].mxu0  ;;  %v5979_v35 = vmul.f32 %v16429_v7, %v17103_v21 }
 0x83d   :  { %v16476_v61 = vadd.f32 %v6918_v63, %v5966_v40 }
 0x83e   :  { %v6809_v28 = vpop.f32.mrb[102].mxu1 }
 0x83f   :  { %v16481_v32 = vadd.f32 %v6809_v28, %v5967_v45  ;;  %v6811_v1 = vpop.f32.mrb[103].mxu1  ;;  %v6922_v8 = vpop.f32.mrb[104].mxu0  ;;  %v5982_v45 = vmul.f32 %v16435_v10, %v17106_v49  ;;  %v5985_v10 = vmul.f32 %v16441_v57, %v17105_v47  ;;  %v5988_v57 = vmul.f32 %v16447_v56, %v17104_v23  ;;  %v17107_v56 = vld [vmem:[#allocation28_spill] sm:$0xff] }
 0x840   :  { %v16483_v59 = vadd.f32 %v6811_v1, %v5968_v33  ;;  %v16485_v55 = vadd.f32 %v6922_v8, %v5969_v15  ;;  %v6924_v2 = vpop.f32.mrb[105].mxu0  ;;  %v5983_v8 = vmul.f32 %v16437_v12, %v17103_v21 }
 0x841   :  { %v16488_v17 = vadd.f32 %v6924_v2, %v5970_v25 }
 0x842   :  { %v6815_v52 = vpop.f32.mrb[104].mxu1 }
 0x843   :  { %v16493_v39 = vadd.f32 %v6815_v52, %v5971_v30  ;;  %v6817_v5 = vpop.f32.mrb[105].mxu1  ;;  %v6928_v13 = vpop.f32.mrb[106].mxu0  ;;  %v5986_v30 = vmul.f32 %v16443_v60, %v17106_v49  ;;  %v5989_v60 = vmul.f32 %v16449_v43, %v17105_v47  ;;  %v17108_v47 = vld [vmem:[#allocation29_spill] sm:$0xff] }
 0x844   :  { %v16495_v42 = vadd.f32 %v6817_v5, %v5972_v0  ;;  %v16497_v53 = vadd.f32 %v6928_v13, %v5973_v29  ;;  %v6930_v37 = vpop.f32.mrb[107].mxu0  ;;  %v5987_v13 = vmul.f32 %v16445_v41, %v17103_v21 }
 0x845   :  { %v16501_v26 = vadd.f32 %v6930_v37, %v5974_v38 }
 0x846   :  { %v6821_v58 = vpop.f32.mrb[106].mxu1 }
 0x847   :  { %v16509_v24 = vadd.f32 %v6821_v58, %v5975_v6  ;;  %v6823_v14 = vpop.f32.mrb[107].mxu1  ;;  %v6934_v16 = vpop.f32.mrb[108].mxu0  ;;  %v5990_v6 = vmul.f32 %v16451_v18, %v17106_v49 }
 0x848   :  { %v16511_v40 = vadd.f32 %v6823_v14, %v5976_v51  ;;  %v16513_v44 = vadd.f32 %v6934_v16, %v5977_v31  ;;  %v6936_v20 = vpop.f32.mrb[109].mxu0 }
 0x849   :  { %v16517_v19 = vadd.f32 %v6936_v20, %v5978_v11 }
 0x84a   :  { %v6827_v63 = vpop.f32.mrb[108].mxu1 }
 0x84b   :  { %v16525_v33 = vadd.f32 %v6827_v63, %v5979_v35  ;;  %v6829_v15 = vpop.f32.mrb[109].mxu1  ;;  %v6940_v28 = vpop.f32.mrb[110].mxu0  ;;  %v17110_v63 = vld [vmem:[#allocation43_spill] sm:$0xff] }
 0x84c   :  { %v16527_v25 = vadd.f32 %v6829_v15, %v5980_v27  ;;  %v16529_v1 = vadd.f32 %v6940_v28, %v5981_v22  ;;  %v6942_v7 = vpop.f32.mrb[111].mxu0  ;;  %v17109_v27 = vld [vmem:[#allocation42_spill] sm:$0xff]  ;;  %v8182_v15 = vpop.permute.xlu0 %8181 }
 0x84d   :  { %v16533_v4 = vadd.f32 %v6942_v7, %v5982_v45 }
 0x84e   :  { %v6833_v2 = vpop.f32.mrb[110].mxu1 }
 0x84f   :  { %v16541_v0 = vadd.f32 %v6833_v2, %v5983_v8  ;;  %v6835_v29 = vpop.f32.mrb[111].mxu1  ;;  %v6946_v52 = vpop.f32.mrb[112].mxu0 }
 0x850   :  { %v16543_v38 = vadd.f32 %v6835_v29, %v5984_v9  ;;  %v16545_v5 = vadd.f32 %v6946_v52, %v5985_v10  ;;  %v6948_v12 = vpop.f32.mrb[113].mxu0 }
 0x851   :  { %v16549_v54 = vadd.f32 %v6948_v12, %v5986_v30 }
 0x852   :  { %v6839_v37 = vpop.f32.mrb[112].mxu1 }
 0x853   :  { %v16557_v51 = vadd.f32 %v6839_v37, %v5987_v13  ;;  %v6841_v31 = vpop.f32.mrb[113].mxu1  ;;  %v6952_v58 = vpop.f32.mrb[114].mxu0 }
 0x854   :  { %v16559_v11 = vadd.f32 %v6841_v31, %v5988_v57  ;;  %v16561_v14 = vadd.f32 %v6952_v58, %v5989_v60  ;;  %v6954_v41 = vpop.f32.mrb[115].mxu0  ;;  %v8187_v60 = vpop.permute.xlu1 %8186 }
 0x855   :  { %v16563_v21 = vadd.f32 %v6954_v41, %v5990_v6 }
 0x896   :  { %v7923_v16 = vpop.f32.mrb[114].mxu1 }
 0x897   :  { %v8115_v23 = vmul.f32 %v7923_v16, %v17107_v56  ;;  %v7925_v20 = vpop.f32.mrb[115].mxu1  ;;  %v8036_v43 = vpop.f32.mrb[116].mxu0 }
 0x898   :  { %v8116_v35 = vmul.f32 %v7925_v20, %v17108_v47  ;;  %v8117_v18 = vmul.f32 %v8036_v43, %v17109_v27  ;;  %v8038_v49 = vpop.f32.mrb[117].mxu0 }
 0x899   :  { %v8147_v22 = vadd.f32 %v8115_v23, %v16457_v46  ;;  %v8118_v45 = vmul.f32 %v8038_v49, %v17110_v63 }
 0x89a   :  { %v8148_v28 = vadd.f32 %v8116_v35, %v16459_v3  ;;  %v8149_v7 = vadd.f32 %v8117_v18, %v16461_v34  ;;  %v7929_v8 = vpop.f32.mrb[116].mxu1 }
 0x89b   :  { %v8219_v9 = vadd.f32 %v8182_v15, %v8147_v22  ;;  %v8150_v10 = vadd.f32 %v8118_v45, %v16464_v50  ;;  %v8119_v2 = vmul.f32 %v7929_v8, %v17107_v56  ;;  %v7931_v30 = vpop.f32.mrb[117].mxu1  ;;  %v8042_v29 = vpop.f32.mrb[118].mxu0 }
 0x89c   :  { %v8120_v52 = vmul.f32 %v7931_v30, %v17108_v47  ;;  %v8121_v12 = vmul.f32 %v8042_v29, %v17109_v27  ;;  %v8044_v46 = vpop.f32.mrb[119].mxu0  ;;  %v8220_v13 = vadd.f32 %v8182_v15, %v8148_v28  ;;  %v8221_v37 = vadd.f32 %v8182_v15, %v8149_v7  ;;  %v8192_v28 = vpop.permute.xlu0 %8191 }
 0x89d   :  { %v8151_v57 = vadd.f32 %v8119_v2, %v16469_v36  ;;  %v8122_v3 = vmul.f32 %v8044_v46, %v17110_v63  ;;  %v8251_v34 = vmax.f32 %v8219_v9, 0.0  ;;  %v8222_v58 = vadd.f32 %v8182_v15, %v8150_v10 }
 0x89e   :  { %v8152_v6 = vadd.f32 %v8120_v52, %v16471_v62  ;;  %v8153_v50 = vadd.f32 %v8121_v12, %v16473_v48  ;;  %v7935_v31 = vpop.f32.mrb[118].mxu1  ;;  %v8253_v7 = vmax.f32 %v8221_v37, 0.0  ;;  %v8252_v2 = vmax.f32 %v8220_v13, 0.0  ;;  %v8197_v13 = vpop.permute.xlu1 %8196 }
 0x89f   :  { %v8223_v41 = vadd.f32 %v8187_v60, %v8151_v57  ;;  %v8154_v16 = vadd.f32 %v8122_v3, %v16476_v61  ;;  %v8123_v23 = vmul.f32 %v7935_v31, %v17107_v56  ;;  %v7937_v20 = vpop.f32.mrb[119].mxu1  ;;  %v8048_v43 = vpop.f32.mrb[120].mxu0  ;;  %v8254_v57 = vmax.f32 %v8222_v58, 0.0 }
 0x8a0   :  { %v8224_v35 = vadd.f32 %v8187_v60, %v8152_v6  ;;  %v8225_v36 = vadd.f32 %v8187_v60, %v8153_v50  ;;  %v8124_v18 = vmul.f32 %v7937_v20, %v17108_v47  ;;  %v8125_v49 = vmul.f32 %v8048_v43, %v17109_v27  ;;  %v8050_v22 = vpop.f32.mrb[121].mxu0 }
 0x8a1   :  { %v8255_v45 = vmax.f32 %v8223_v41, 0.0  ;;  %v8226_v62 = vadd.f32 %v8187_v60, %v8154_v16  ;;  %v8155_v48 = vadd.f32 %v8123_v23, %v16481_v32  ;;  %v8126_v15 = vmul.f32 %v8050_v22, %v17110_v63 }
 0x8a2   :  { %v8257_v61 = vmax.f32 %v8225_v36, 0.0  ;;  %v8156_v8 = vadd.f32 %v8124_v18, %v16483_v59  ;;  %v8157_v9 = vadd.f32 %v8125_v49, %v16485_v55  ;;  %v7941_v10 = vpop.f32.mrb[120].mxu1  ;;  %v8256_v3 = vmax.f32 %v8224_v35, 0.0 }
 0x8a3   :  { %v9479_v30 = vpack.c.bf16 %v8255_v45, %v8251_v34  ;;  %v8227_v29 = vadd.f32 %v8192_v28, %v8155_v48  ;;  %v8158_v52 = vadd.f32 %v8126_v15, %v16488_v17  ;;  %v7943_v12 = vpop.f32.mrb[121].mxu1  ;;  %v8054_v46 = vpop.f32.mrb[122].mxu0  ;;  %v8127_v60 = vmul.f32 %v7941_v10, %v17107_v56 }
 0x8a4   :  { %v9495_v32 = vpack.c.bf16 %v8257_v61, %v8253_v7  ;;  %v8056_v6 = vpop.f32.mrb[123].mxu0  ;;  %v8258_v37 = vmax.f32 %v8226_v62, 0.0  ;;  %v16590_v50 = vadd.f32 %v8192_v28, %v8156_v8  ;;  %v8128_v59 = vmul.f32 %v7943_v12, %v17108_v47  ;;  %v8202_v12 = vpop.permute.xlu0 %8201 }
 0x8a5   :  { %v8129_v55 = vmul.f32 %v8054_v46, %v17109_v27  ;;  %v8259_v34 = vmax.f32 %v8227_v29, 0.0  ;;  %v8229_v31 = vadd.f32 %v8192_v28, %v8157_v9  ;;  %v8159_v17 = vadd.f32 %v8127_v60, %v16493_v39 }
 0x8a6   :  { %v8130_v41 = vmul.f32 %v8056_v6, %v17110_v63  ;;  %v7947_v58 = vpop.f32.mrb[122].mxu1  ;;  %v16596_v16 = vadd.f32 %v8192_v28, %v8158_v52  ;;  %v8160_v23 = vadd.f32 %v8128_v59, %v16495_v42  ;;  %v9477_v22 = vpack.c.bf16 %v8256_v3, %v8252_v2 }
 0x8a7   :  { %v8161_v20 = vadd.f32 %v8129_v55, %v16497_v53  ;;  %v8131_v43 = vmul.f32 %v7947_v58, %v17107_v56  ;;  %v7949_v35 = vpop.f32.mrb[123].mxu1  ;;  %v8060_v36 = vpop.f32.mrb[124].mxu0  ;;  %v8231_v18 = vadd.f32 %v8197_v13, %v8159_v17  ;;  %v9493_v61 = vpack.c.bf16 %v8258_v37, %v8254_v57 }
 0x8a8   :  { %v8162_v49 = vadd.f32 %v8130_v41, %v16501_v26  ;;  %v8132_v45 = vmul.f32 %v7949_v35, %v17108_v47  ;;  %v8062_v39 = vpop.f32.mrb[125].mxu0  ;;  %v8232_v62 = vadd.f32 %v8197_v13, %v8160_v23  ;;  %v8133_v28 = vmul.f32 %v8060_v36, %v17109_v27  ;;  %9478 = vmatprep.subr.bf16.mxu1 %v9477_v22 }
 0x8a9   :  { %v8233_v48 = vadd.f32 %v8197_v13, %v8161_v20  ;;  %v8163_v15 = vadd.f32 %v8131_v43, %v16509_v24  ;;  %v8263_v42 = vmax.f32 %v8231_v18, 0.0  ;;  %v8260_v9 = vmax.f32 %v16590_v50, 0.0  ;;  %9480 = vmatpush1.bf16.msra.mxu1 %v9479_v30  ;;  %9494 = vmatprep.subr.bf16.mxu0 %v9493_v61 }
 0x8aa   :  { %v8234_v7 = vadd.f32 %v8197_v13, %v8162_v49  ;;  %v8164_v53 = vadd.f32 %v8132_v45, %v16511_v40  ;;  %v7953_v8 = vpop.f32.mrb[124].mxu1  ;;  %v8261_v26 = vmax.f32 %v8229_v31, 0.0  ;;  %v8165_v2 = vadd.f32 %v8133_v28, %v16513_v44  ;;  %9496 = vmatpush1.bf16.msra.mxu0 %v9495_v32  ;;  %v8207_v32 = vpop.permute.xlu1 %8206 }
 0x8ab   :  { %v8265_v10 = vmax.f32 %v8233_v48, 0.0  ;;  %v7955_v29 = vpop.f32.mrb[125].mxu1  ;;  %v8066_v52 = vpop.f32.mrb[126].mxu0  ;;  %v8262_v24 = vmax.f32 %v16596_v16, 0.0  ;;  %v9483_v46 = vpack.c.bf16 %v8263_v42, %v8259_v34  ;;  %v8264_v3 = vmax.f32 %v8232_v62, 0.0 }
 0x8ac   :  { %v8134_v60 = vmul.f32 %v8062_v39, %v17110_v63  ;;  %v8068_v40 = vpop.f32.mrb[127].mxu0  ;;  %v8266_v6 = vmax.f32 %v8234_v7, 0.0  ;;  %v8235_v37 = vadd.f32 %v8202_v12, %v8163_v15  ;;  %v8135_v50 = vmul.f32 %v7953_v8, %v17107_v56 }
 0x8ad   :  { %v9499_v57 = vpack.c.bf16 %v8265_v10, %v8261_v26  ;;  %v8236_v59 = vadd.f32 %v8202_v12, %v8164_v53  ;;  %v8136_v30 = vmul.f32 %v7955_v29, %v17108_v47  ;;  %v8137_v55 = vmul.f32 %v8066_v52, %v17109_v27 }
 0x8ae   :  { %v8166_v44 = vadd.f32 %v8134_v60, %v16517_v19  ;;  %v7959_v13 = vpop.f32.mrb[126].mxu1  ;;  %v8237_v34 = vadd.f32 %v8202_v12, %v8165_v2  ;;  %v8167_v31 = vadd.f32 %v8135_v50, %v16525_v33  ;;  %v8138_v17 = vmul.f32 %v8068_v40, %v17110_v63 }
 0x8af   :  { %v8139_v41 = vmul.f32 %v7959_v13, %v17107_v56  ;;  %v7961_v58 = vpop.f32.mrb[127].mxu1  ;;  %v8072_v16 = vpop.f32.mrb[128].mxu0  ;;  %v8168_v20 = vadd.f32 %v8136_v30, %v16527_v25  ;;  %v8169_v19 = vadd.f32 %v8137_v55, %v16529_v1  ;;  %v9481_v43 = vpack.c.bf16 %v8264_v3, %v8260_v9 }
 0x8b0   :  { %v8238_v23 = vadd.f32 %v8202_v12, %v8166_v44  ;;  %v8074_v35 = vpop.f32.mrb[129].mxu0  ;;  %v8239_v36 = vadd.f32 %v8207_v32, %v8167_v31  ;;  %v8170_v18 = vadd.f32 %v8138_v17, %v16533_v4  ;;  %v8140_v33 = vmul.f32 %v7961_v58, %v17108_v47  ;;  %v8212_v9 = vpop.permute.xlu0 %8211 }
 0x8b1   :  { %v8171_v49 = vadd.f32 %v8139_v41, %v16541_v0  ;;  %v8267_v22 = vmax.f32 %v8235_v37, 0.0  ;;  %v8240_v45 = vadd.f32 %v8207_v32, %v8168_v20  ;;  %v8241_v39 = vadd.f32 %v8207_v32, %v8169_v19  ;;  %9482 = vmatprep.subr.bf16.mxu1 %v9481_v43 }
 0x8b2   :  { %v8141_v62 = vmul.f32 %v8072_v16, %v17109_v27  ;;  %v7965_v48 = vpop.f32.mrb[128].mxu1  ;;  %v8269_v15 = vmax.f32 %v8237_v34, 0.0  ;;  %v8271_v25 = vmax.f32 %v8239_v36, 0.0  ;;  %v8242_v28 = vadd.f32 %v8207_v32, %v8170_v18  ;;  %9484 = vmatpush1.bf16.msra.mxu1 %v9483_v46 }
 0x8b3   :  { %v8172_v1 = vadd.f32 %v8140_v33, %v16543_v38  ;;  %v7967_v42 = vpop.f32.mrb[129].mxu1  ;;  %v8078_v7 = vpop.f32.mrb[130].mxu0  ;;  %v8272_v4 = vmax.f32 %v8240_v45, 0.0  ;;  %v8273_v53 = vmax.f32 %v8241_v39, 0.0  ;;  %v9497_v61 = vpack.c.bf16 %v8266_v6, %v8262_v24  ;;  %v17111_v45 = vld [vmem:[#allocation56_spill] sm:$0xff] }
 0x8b4   :  { %v8173_v0 = vadd.f32 %v8141_v62, %v16545_v5  ;;  %v8080_v8 = vpop.f32.mrb[131].mxu0  ;;  %v8268_v26 = vmax.f32 %v8236_v59, 0.0  ;;  %v8270_v10 = vmax.f32 %v8238_v23, 0.0  ;;  %v9487_v2 = vpack.c.bf16 %v8271_v25, %v8267_v22  ;;  %v8217_v59 = vpop.permute.xlu1 %8216  ;;  %v141_v23 = vld [vmem:[%s16662_s6 + $0x8] sm:$0xf]  ;;  %v17112_v62 = vld [vmem:[#allocation23_spill] sm:$0xff] }
 0x8b5   :  { %v8274_v29 = vmax.f32 %v8242_v28, 0.0  ;;  %v9503_v52 = vpack.c.bf16 %v8273_v53, %v8269_v15  ;;  %v8243_v12 = vadd.f32 %v8212_v9, %v8171_v49  ;;  %9498 = vmatprep.subr.bf16.mxu0 %v9497_v61  ;;  %v8142_v3 = vmul.f32 %v8074_v35, %v17110_v63  ;;  %v8286_v20 = vpop.permute.xlu0 %8285  ;;  %v17113_v15 = vld [vmem:[#allocation21_spill] sm:$0xff]  ;;  %v17114_v28 = vld [vmem:[#allocation22_spill] sm:$0xff]  ;;  %s11207_s6 = scalar_lea.vmem %s8454_s8, 256 }
 0x8b6   :  { %v8143_v38 = vmul.f32 %v7965_v48, %v17107_v56  ;;  %v8244_v46 = vadd.f32 %v8212_v9, %v8172_v1  ;;  %9500 = vmatpush1.bf16.msra.mxu0 %v9499_v57  ;;  %v8144_v60 = vmul.f32 %v7967_v42, %v17108_v47  ;;  %v8145_v5 = vmul.f32 %v8078_v7, %v17109_v27  ;;  %p11208_p0 = scmp.ne.s32.totalorder %s8454_s8, %s11207_s6  ;;  %p11213_p2 = scmp.lt.s32.totalorder %s11207_s6, %s11207_s6 }
 0x8b7   :  { %v8146_v24 = vmul.f32 %v8080_v8, %v17110_v63  ;;  %v8245_v40 = vadd.f32 %v8212_v9, %v8173_v0  ;;  %v8174_v6 = vadd.f32 %v8142_v3, %v16549_v54  ;;  %v9485_v50 = vpack.c.bf16 %v8272_v4, %v8268_v26 }
 0x8b8   :  { %v8175_v37 = vadd.f32 %v8143_v38, %v16557_v51  ;;  %v8176_v44 = vadd.f32 %v8144_v60, %v16559_v11  ;;  %v8177_v30 = vadd.f32 %v8145_v5, %v16561_v14  ;;  %v9501_v57 = vpack.c.bf16 %v8274_v29, %v8270_v10  ;;  %p11214_p3 = por %p11213_p2, %p11212_p1 }
 0x8b9   :  { %v8178_v56 = vadd.f32 %v8146_v24, %v16563_v21  ;;  %v8246_v55 = vadd.f32 %v8212_v9, %v8174_v6  ;;  %9486 = vmatprep.subr.bf16.mxu1 %v9485_v50  ;;  %v8275_v54 = vmax.f32 %v8243_v12, 0.0  ;;  %v8276_v34 = vmax.f32 %v8244_v46, 0.0 }
 0x8ba   :  { %v8247_v47 = vadd.f32 %v8217_v59, %v8175_v37  ;;  %v8248_v27 = vadd.f32 %v8217_v59, %v8176_v44  ;;  %v8249_v13 = vadd.f32 %v8217_v59, %v8177_v30  ;;  %9488 = vmatpush1.bf16.msra.mxu1 %v9487_v2  ;;  %9502 = vmatprep.subr.bf16.mxu0 %v9501_v57  ;;  %v8277_v51 = vmax.f32 %v8245_v40, 0.0  ;;  %p11215_p4 = pnand %p11214_p3, %p11208_p0 }
 0x8bb   :  { %v8250_v63 = vadd.f32 %v8217_v59, %v8178_v56  ;;  %9504 = vmatpush1.bf16.msra.mxu0 %v9503_v52  ;;  %v8278_v17 = vmax.f32 %v8246_v55, 0.0 }
 0x8bc   :  { %v8279_v31 = vmax.f32 %v8247_v47, 0.0  ;;  %v8280_v11 = vmax.f32 %v8248_v27, 0.0  ;;  %v8281_v41 = vmax.f32 %v8249_v13, 0.0 }
 0x8bd   :  { %v8282_v14 = vmax.f32 %v8250_v63, 0.0 }
 0x8be   :  { %v9491_v58 = vpack.c.bf16 %v8279_v31, %v8275_v54  ;;  %v9507_v21 = vpack.c.bf16 %v8281_v41, %v8277_v51  ;;  %v9489_v16 = vpack.c.bf16 %v8280_v11, %v8276_v34 }
 0x8bf   :  { %v9505_v32 = vpack.c.bf16 %v8282_v14, %v8278_v17 }
 0x8c0   :  { %9490 = vmatprep.subr.bf16.mxu1 %v9489_v16 }
 0x8c1   :  { %9506 = vmatprep.subr.bf16.mxu0 %v9505_v32  ;;  %9492 = vmatpush1.bf16.msra.mxu1 %v9491_v58 }
 0x8c2   :  { %9508 = vmatpush1.bf16.msra.mxu0 %v9507_v21 }
 0x8c4   :  { %8796 = vmatmul.mubr.msk.f32.vlgmr.msra.gmra.mrb[130].mxu1 %vm1082_vm5, %v141_v23 }
 0x8c5   :  { %8797 = vmatmul.mubr.msk.f32.vlgmr.msra.gmra.mrb[132].mxu0 %vm1082_vm5, %v141_v23 }
 0x997   :  { %v8357_v19 = vpop.f32.mrb[130].mxu1 }
 0x998   :  { %v8428_v43 = vpop.f32.mrb[132].mxu0  ;;  %v8358_v35 = vadd.f32 %v8357_v19, %v8286_v20  ;;  %v8359_v36 = vpop.f32.mrb[131].mxu1 }
 0x999   :  { %v8429_v18 = vadd.f32 %v8428_v43, %v8286_v20  ;;  %v8430_v49 = vpop.f32.mrb[133].mxu0  ;;  %v8360_v33 = vadd.f32 %v8359_v36, %v8286_v20 }
 0x99a   :  { %v8431_v22 = vadd.f32 %v8430_v49, %v8286_v20  ;;  %v8433_v39 = vadd.f32 %v17111_v45, %v8358_v35 }
 0x99b   :  { %v8435_v48 = vadd.f32 %v17112_v62, %v8429_v18  ;;  %v8434_v25 = vadd.f32 %v17113_v15, %v8360_v33 }
 0x99c   :  { %v8436_v1 = vadd.f32 %v17114_v28, %v8431_v22 }
 0x99d   :  { %v8441_v42 = vcombine.low %v8433_v39, %v8434_v25 }
 0x99e   :  { %v8442_v7 = vcombine.low %v8435_v48, %v8436_v1 }
 0x99f   :  { %8445 = vst [vmem:[#allocation2] sm:$0xff] %v8441_v42 }
 0x9a0   :  { %8446 = vst [vmem:[#allocation2 + $0x8] sm:$0xff] %v8442_v7 }
 0x9a1   :  { %11218 = shalt.err (!%p11215_p4)
}
 0x9a2   :  { %s11219_s19 = scalar_lea.hbm %s16665_s9, 256 }
 0x9a3   :  { %p11220_p5 = scmp.ne.s32.totalorder %s16665_s9, %s11219_s19  ;;  %p11223_p6 = scmp.lt.u32.totalorder %s11219_s19, %s16665_s9 }
 0x9a5   :  { %p11225_p7 = pnand %p11223_p6, %p11220_p5 }
 0x9a7   :  { %11228 = shalt.err (!%p11225_p7)
}
 0x9a8   :  { %8456 = dma.vmem_to_hbm [thread:$0]  %s8454_s8, 256, %s16665_s9, [#allocation3]  }
 0x9a9   :  { %11229 = dma.done.wait [#allocation3], 256  }
 0x9aa   :  { %11230 = vsyncadd [#allocation3], 4294967040 }
 0x9ab   :  { %8460 = vsyncpa [#allocation3], 1 }

</bundles_post_ra>
